<compile_context>
chip_gen: v7x
topology: tpu7x:2x2x1
jax: 0.10.0
libtpu: 0.0.40
codegen_flags: <defaults>
</compile_context>

<pallas_src>
import math

import jax
import jax.numpy as jnp
from jax.experimental import pallas as pl
from jax.experimental.pallas import tpu as pltpu


def _round_up(x, m):
    return ((x + m - 1) // m) * m


def _birnn_kernel(maxlen_ref, len_ref, x_ref,
                  wih_f_ref, whh_f_ref, b_f_ref,
                  wih_r_ref, whh_r_ref, b_r_ref,
                  out_ref, gxf_ref, gxr_ref):
    T, Bt, Dp = x_ref.shape
    Hp = whh_f_ref.shape[0]
    G = 4 * Hp

    t_max = maxlen_ref[pl.program_id(0)]            # per-tile max length (SMEM)
    lengths = len_ref[...]                          # (Bt, 1) int32

    # Timesteps >= t_max are padding for every row in this tile: cheap zero
    # stores only (no matmuls, no transcendentals).
    zero_row = jnp.zeros((Bt, 2 * Hp), jnp.float32)

    def zero_pad(t, carry):
        out_ref[t] = zero_row
        return carry

    jax.lax.fori_loop(t_max, T, zero_pad, 0)

    # ---- Hoisted input projection: one bf16 MXU matmul per direction over
    # all T timesteps, f32 accumulation, stored as bf16 gate pre-activations.
    x_all = x_ref[...].reshape(T * Bt, Dp)          # bf16
    gxf_ref[...] = (jnp.dot(x_all, wih_f_ref[...],
                            preferred_element_type=jnp.float32)
                    + b_f_ref[...]).astype(jnp.bfloat16).reshape(T, Bt, G)
    gxr_ref[...] = (jnp.dot(x_all, wih_r_ref[...],
                            preferred_element_type=jnp.float32)
                    + b_r_ref[...]).astype(jnp.bfloat16).reshape(T, Bt, G)

    whh_f = whh_f_ref[...]                          # (Hp, 4Hp) bf16
    whh_r = whh_r_ref[...]

    def lstm_update(gates, h, c, valid):
        # PyTorch gate order: i, f, g, o.  Hp is a multiple of 128 so every
        # slice is tile-aligned.
        i = jax.nn.sigmoid(gates[:, 0 * Hp:1 * Hp])
        f = jax.nn.sigmoid(gates[:, 1 * Hp:2 * Hp])
        g = jnp.tanh(gates[:, 2 * Hp:3 * Hp])
        o = jax.nn.sigmoid(gates[:, 3 * Hp:4 * Hp])
        c_new = f * c + i * g
        h_new = o * jnp.tanh(c_new)
        # Freeze state past the true sequence length (packed-seq semantics):
        # single vselect per tensor instead of arithmetic blends.
        h = jnp.where(valid, h_new, h)
        c = jnp.where(valid, c_new, c)
        return h, c

    zeros = jnp.zeros((Bt, Hp), jnp.float32)

    def body(t, carry):
        h_f, c_f, h_r, c_r = carry
        tr = t_max - 1 - t                          # reverse walks the valid span

        # Recurrent matmuls: bf16 operands, f32 accumulation / state.
        gates_f = gxf_ref[t].astype(jnp.float32) + jnp.dot(
            h_f.astype(jnp.bfloat16), whh_f, preferred_element_type=jnp.float32)
        gates_r = gxr_ref[tr].astype(jnp.float32) + jnp.dot(
            h_r.astype(jnp.bfloat16), whh_r, preferred_element_type=jnp.float32)

        valid_f = t < lengths                       # (Bt, 1) bool
        valid_r = tr < lengths

        h_f, c_f = lstm_update(gates_f, h_f, c_f, valid_f)
        h_r, c_r = lstm_update(gates_r, h_r, c_r, valid_r)

        # Lane-dense stores into the fused output block (both offsets are
        # multiples of 128 -> unmasked vst).
        out_ref[t, :, :Hp] = jnp.where(valid_f, h_f, 0.0)
        out_ref[tr, :, Hp:] = jnp.where(valid_r, h_r, 0.0)
        return (h_f, c_f, h_r, c_r)

    # Dynamic trip count = per-tile max length (skips fully padded steps).
    jax.lax.fori_loop(0, t_max, body, (zeros, zeros, zeros, zeros))


def init_params(key, input_size, hidden_size):
    """Deterministic nn.LSTM-style init: U(-1/sqrt(H), 1/sqrt(H))."""
    bound = 1.0 / math.sqrt(hidden_size)
    ks = jax.random.split(key, 8)

    def u(k, shape):
        return jax.random.uniform(k, shape, jnp.float32, -bound, bound)

    H, D = hidden_size, input_size
    return dict(
        wih_f=u(ks[0], (4 * H, D)), whh_f=u(ks[1], (4 * H, H)),
        bih_f=u(ks[2], (4 * H,)),   bhh_f=u(ks[3], (4 * H,)),
        wih_r=u(ks[4], (4 * H, D)), whh_r=u(ks[5], (4 * H, H)),
        bih_r=u(ks[6], (4 * H,)),   bhh_r=u(ks[7], (4 * H,)),
    )


def _pack_w(w, H, Hp, Dp):
    """(4H, Dsrc) PyTorch weight -> (Dp, 4*Hp) with per-gate Hp padding."""
    Dsrc = w.shape[1]
    w4 = w.reshape(4, H, Dsrc)
    out = jnp.zeros((4, Hp, Dp), jnp.float32).at[:, :H, :Dsrc].set(w4)
    return out.transpose(2, 0, 1).reshape(Dp, 4 * Hp)


def _pack_b(b, H, Hp):
    """(4H,) bias -> (1, 4*Hp) with per-gate Hp padding."""
    out = jnp.zeros((4, Hp), jnp.float32).at[:, :H].set(b.reshape(4, H))
    return out.reshape(1, 4 * Hp)


def _tpu_vmem_capacity():
    try:
        return int(pltpu.get_tpu_info().vmem_capacity_bytes)
    except Exception:
        return 64 * 1024 * 1024          # conservative (v7x-sized) fallback


def _vmem_need(T, Bt, Dp, Hp):
    x_buf = 2 * T * Bt * Dp * 2                       # bf16 x tile, dbl-buffered
    out_buf = 2 * T * Bt * 2 * Hp * 4                 # fused f32 out, dbl-buffered
    weights = 2 * (2 * Dp * 4 * Hp * 2                # wih fwd/rev, dbl-buffered
                   + 2 * Hp * 4 * Hp * 2              # whh fwd/rev
                   + 2 * 4 * Hp * 4)                  # biases
    scratch = 2 * T * Bt * 4 * Hp * 2                 # bf16 gate pre-acts (f+r)
    proj_tmp = T * Bt * 4 * Hp * 4                    # live f32 proj result (1 dir)
    live = 4 * Bt * Hp * 4 + 2 * Bt * 4 * Hp * 4      # carries + per-step gates
    return x_buf + out_buf + weights + scratch + proj_tmp + live


def _vmem_limit_bytes(T, Bt, Dp, Hp, vmem_budget):
    need = int(_vmem_need(T, Bt, Dp, Hp) * 1.25)      # slack for compiler temps
    return int(min(max(need, 32 * 1024 * 1024), vmem_budget))


def birnn_forward(params, x, x_mask, *, batch_tile=None):
    B, T, Din = x.shape
    H = params['whh_f'].shape[1]

    Hp = _round_up(H, 128)
    Dp = _round_up(Din, 128)

    vmem_cap = _tpu_vmem_capacity()
    vmem_budget = int(vmem_cap * 0.78)   # ~50 MiB on v7x, ~100 MiB on v5e/v6e

    if batch_tile is None:
        batch_tile = 128                 # never let the tile collapse below 128
        if B >= 512 and int(_vmem_need(T, 256, Dp, Hp) * 1.25) < vmem_budget:
            batch_tile = 256             # fill 256-row MXU (v6e/v7x), >=2 tiles stay
    assert batch_tile % 8 == 0
    Bt = batch_tile
    Bp = _round_up(max(B, Bt), Bt)
    n_tiles = Bp // Bt

    # --- parameter glue: fold biases, pad gate blocks to Hp, cast to bf16 ---
    wih_f_p = _pack_w(params['wih_f'], H, Hp, Dp).astype(jnp.bfloat16)
    wih_r_p = _pack_w(params['wih_r'], H, Hp, Dp).astype(jnp.bfloat16)
    whh_f_p = _pack_w(params['whh_f'], H, Hp, Hp).astype(jnp.bfloat16)
    whh_r_p = _pack_w(params['whh_r'], H, Hp, Hp).astype(jnp.bfloat16)
    b_f = _pack_b(params['bih_f'] + params['bhh_f'], H, Hp)   # (1, 4Hp) f32
    b_r = _pack_b(params['bih_r'] + params['bhh_r'], H, Hp)

    # --- input plumbing: pad batch/feature, go time-major, directly in bf16 ---
    x_tm = jnp.zeros((T, Bp, Dp), jnp.bfloat16).at[:, :B, :Din].set(
        jnp.transpose(x, (1, 0, 2)).astype(jnp.bfloat16))

    lengths = jnp.sum(x_mask.astype(jnp.int32), axis=1)        # (B,)
    len_flat = jnp.zeros((Bp,), jnp.int32).at[:B].set(lengths)
    len_p = len_flat[:, None]                                  # (Bp, 1) int32
    maxlen = jnp.max(len_flat.reshape(n_tiles, Bt), axis=1).astype(jnp.int32)

    out = pl.pallas_call(
        _birnn_kernel,
        out_shape=jax.ShapeDtypeStruct((T, Bp, 2 * Hp), jnp.float32),
        grid_spec=pltpu.PrefetchScalarGridSpec(
            num_scalar_prefetch=1,                              # maxlen -> SMEM
            grid=(n_tiles,),
            in_specs=[
                pl.BlockSpec((Bt, 1), lambda b, ml: (b, 0)),            # lengths
                pl.BlockSpec((T, Bt, Dp), lambda b, ml: (0, b, 0)),     # x (time-major)
                pl.BlockSpec((Dp, 4 * Hp), lambda b, ml: (0, 0)),       # wih fwd
                pl.BlockSpec((Hp, 4 * Hp), lambda b, ml: (0, 0)),       # whh fwd
                pl.BlockSpec((1, 4 * Hp), lambda b, ml: (0, 0)),        # bias fwd
                pl.BlockSpec((Dp, 4 * Hp), lambda b, ml: (0, 0)),       # wih rev
                pl.BlockSpec((Hp, 4 * Hp), lambda b, ml: (0, 0)),       # whh rev
                pl.BlockSpec((1, 4 * Hp), lambda b, ml: (0, 0)),        # bias rev
            ],
            out_specs=pl.BlockSpec((T, Bt, 2 * Hp), lambda b, ml: (0, b, 0)),
            scratch_shapes=[
                pltpu.VMEM((T, Bt, 4 * Hp), jnp.bfloat16),              # gates_x fwd
                pltpu.VMEM((T, Bt, 4 * Hp), jnp.bfloat16),              # gates_x rev
            ],
        ),
        compiler_params=pltpu.CompilerParams(
            dimension_semantics=("parallel",),
            vmem_limit_bytes=_vmem_limit_bytes(T, Bt, Dp, Hp, vmem_budget),
        ),
    )(maxlen, len_p, x_tm, wih_f_p, whh_f_p, b_f, wih_r_p, whh_r_p, b_r)

    # Back to batch-first, strip padding (XLA plumbing; no extra concat when
    # H is already a multiple of 128).
    out = jnp.transpose(out, (1, 0, 2))[:B]
    if Hp == H:
        return out[:, :, :2 * H]
    return jnp.concatenate([out[:, :, :H], out[:, :, Hp:Hp + H]], axis=-1)


def birnn_reference(params, x, x_mask):
    """Pure-JAX f32 reference mirroring pack/BiLSTM/pad semantics."""
    B, T, _ = x.shape
    H = params['whh_f'].shape[1]
    lengths = jnp.sum(x_mask.astype(jnp.int32), axis=1)

    def cell(x_t, h, c, wih, whh, bih, bhh):
        gates = x_t @ wih.T + h @ whh.T + bih + bhh
        i = jax.nn.sigmoid(gates[:, :H])
        f = jax.nn.sigmoid(gates[:, H:2 * H])
        g = jnp.tanh(gates[:, 2 * H:3 * H])
        o = jax.nn.sigmoid(gates[:, 3 * H:])
        c = f * c + i * g
        h = o * jnp.tanh(c)
        return h, c

    h = jnp.zeros((B, H)); c = jnp.zeros((B, H)); outs_f = []
    for t in range(T):
        valid = (t < lengths)[:, None].astype(jnp.float32)
        hn, cn = cell(x[:, t], h, c, params['wih_f'], params['whh_f'],
                      params['bih_f'], params['bhh_f'])
        h = valid * hn + (1 - valid) * h
        c = valid * cn + (1 - valid) * c
        outs_f.append(valid * h)
    out_f = jnp.stack(outs_f, axis=1)

    h = jnp.zeros((B, H)); c = jnp.zeros((B, H)); outs_r = [None] * T
    for t in range(T - 1, -1, -1):
        valid = (t < lengths)[:, None].astype(jnp.float32)
        hn, cn = cell(x[:, t], h, c, params['wih_r'], params['whh_r'],
                      params['bih_r'], params['bhh_r'])
        h = valid * hn + (1 - valid) * h
        c = valid * cn + (1 - valid) * c
        outs_r[t] = valid * h
    out_r = jnp.stack(outs_r, axis=1)
    return jnp.concatenate([out_f, out_r], axis=-1)


if __name__ == "__main__":
    key = jax.random.PRNGKey(0)
    B, T, D_in, H = 2, 8, 32, 32

    k_params, k_x = jax.random.split(key)
    params = init_params(k_params, D_in, H)
    # Pre-round params and x to the bf16 grid so the f32 reference and the
    # bf16-operand kernel see identical values; the remaining tolerance covers
    # the bf16 gate-preactivation scratch, the bf16 cast of h before the
    # recurrent matmul, and summation-order differences (state stays f32).
    params = jax.tree_util.tree_map(
        lambda w: w.astype(jnp.bfloat16).astype(jnp.float32), params)
    x = jax.random.normal(k_x, (B, T, D_in), jnp.float32)
    x = x.astype(jnp.bfloat16).astype(jnp.float32)

    # Prefix-True mask (required by pack_padded_sequence semantics).
    lengths = jnp.array([8, 5], jnp.int32)
    x_mask = jnp.arange(T)[None, :] < lengths[:, None]   # (B, T) bool

    out = birnn_forward(params, x, x_mask)
    out = jax.block_until_ready(out)

    ref = birnn_reference(params, x, x_mask)
    assert out.shape == (B, T, 2 * H), out.shape
    assert bool(jnp.all(jnp.isfinite(out)))
    assert bool(jnp.allclose(out, ref, rtol=2e-2, atol=2e-2)), \
        float(jnp.max(jnp.abs(out - ref)))

    print("KERNEL_OK")
</pallas_src>

<mosaic_0001>
module attributes {stable_mosaic.version = 11 : i64} {
  func.func @_birnn_kernel(%arg0: i32, %arg1: memref<1xi32, #tpu.memory_space<smem>>, %arg2: memref<128x1xi32, #tpu.memory_space<vmem>>, %arg3: memref<8x128x128xbf16, #tpu.memory_space<vmem>>, %arg4: memref<128x512xbf16, #tpu.memory_space<vmem>>, %arg5: memref<128x512xbf16, #tpu.memory_space<vmem>>, %arg6: memref<1x512xf32, #tpu.memory_space<vmem>>, %arg7: memref<128x512xbf16, #tpu.memory_space<vmem>>, %arg8: memref<128x512xbf16, #tpu.memory_space<vmem>>, %arg9: memref<1x512xf32, #tpu.memory_space<vmem>>, %arg10: memref<8x128x256xf32, #tpu.memory_space<vmem>>, %arg11: memref<8x128x512xbf16, #tpu.memory_space<vmem>>, %arg12: memref<8x128x512xbf16, #tpu.memory_space<vmem>>) attributes {dimension_semantics = [#tpu.dimension_semantics<parallel>], iteration_bounds = array<i64: 1>, scalar_prefetch = 1 : i64, scratch_operands = 2 : i64, tpu.core_type = #tpu.core_type<tc>, window_params = [{transform_indices = @transform_0, window_bounds = array<i64: 128, 1>}, {transform_indices = @transform_1, window_bounds = array<i64: 8, 128, 128>}, {pipeline_mode = #tpu.pipeline_mode<synchronous>, transform_indices = @transform_2, window_bounds = array<i64: 128, 512>}, {pipeline_mode = #tpu.pipeline_mode<synchronous>, transform_indices = @transform_3, window_bounds = array<i64: 128, 512>}, {pipeline_mode = #tpu.pipeline_mode<synchronous>, transform_indices = @transform_4, window_bounds = array<i64: 1, 512>}, {pipeline_mode = #tpu.pipeline_mode<synchronous>, transform_indices = @transform_5, window_bounds = array<i64: 128, 512>}, {pipeline_mode = #tpu.pipeline_mode<synchronous>, transform_indices = @transform_6, window_bounds = array<i64: 128, 512>}, {pipeline_mode = #tpu.pipeline_mode<synchronous>, transform_indices = @transform_7, window_bounds = array<i64: 1, 512>}, {transform_indices = @transform_8, window_bounds = array<i64: 8, 128, 256>}]} {
    %0 = arith.index_cast %arg0 : i32 to index
    %1 = memref.load %arg1[%0] : memref<1xi32, #tpu.memory_space<smem>>
    %c0 = arith.constant 0 : index
    %c0_0 = arith.constant 0 : index
    %2 = vector.load %arg2[%c0, %c0_0] : memref<128x1xi32, #tpu.memory_space<vmem>>, vector<128x1xi32>
    %cst = arith.constant 0.000000e+00 : f32
    %3 = vector.broadcast %cst : f32 to vector<128x256xf32>
    %c0_i32 = arith.constant 0 : i32
    %c8_i32 = arith.constant 8 : i32
    %4 = arith.subi %c8_i32, %1 : i32
    %5 = arith.addi %1, %4 : i32
    %c1_i32 = arith.constant 1 : i32
    scf.for %arg13 = %1 to %5 step %c1_i32  : i32 {
      %30 = arith.index_cast %arg13 : i32 to index
      %c0_27 = arith.constant 0 : index
      %c0_28 = arith.constant 0 : index
      %31 = vector.load %arg10[%30, %c0_27, %c0_28] : memref<8x128x256xf32, #tpu.memory_space<vmem>>, vector<1x128x256xf32>
      %32 = vector.shape_cast %31 : vector<1x128x256xf32> to vector<128x256xf32>
      %33 = vector.shape_cast %3 : vector<128x256xf32> to vector<1x128x256xf32>
      tpu.vector_store %arg10[%30, %c0_27, %c0_28], %33 {strides = array<i32>} : memref<8x128x256xf32, #tpu.memory_space<vmem>>, vector<1x128x256xf32>,
    }
    %c0_1 = arith.constant 0 : index
    %c0_2 = arith.constant 0 : index
    %c0_3 = arith.constant 0 : index
    %6 = vector.load %arg3[%c0_1, %c0_2, %c0_3] : memref<8x128x128xbf16, #tpu.memory_space<vmem>>, vector<8x128x128xbf16>
    %7 = vector.shape_cast %6 : vector<8x128x128xbf16> to vector<1024x128xbf16>
    %c0_4 = arith.constant 0 : index
    %c0_5 = arith.constant 0 : index
    %8 = vector.load %arg4[%c0_4, %c0_5] : memref<128x512xbf16, #tpu.memory_space<vmem>>, vector<128x512xbf16>
    %cst_6 = arith.constant dense<0.000000e+00> : vector<1024x512xf32>
    %9 = tpu.matmul %7, %8, %cst_6 {dimension_numbers = #tpu.dot_dimension_numbers<[1], [0], [0], [1], [0, 0, 1, 1], [], []>} : vector<1024x128xbf16>, vector<128x512xbf16>, vector<1024x512xf32> -> vector<1024x512xf32>
    %c0_7 = arith.constant 0 : index
    %c0_8 = arith.constant 0 : index
    %10 = vector.load %arg6[%c0_7, %c0_8] : memref<1x512xf32, #tpu.memory_space<vmem>>, vector<1x512xf32>
    %11 = vector.broadcast %10 : vector<1x512xf32> to vector<1024x512xf32>
    %12 = arith.addf %9, %11 : vector<1024x512xf32>
    %13 = arith.truncf %12 : vector<1024x512xf32> to vector<1024x512xbf16>
    %14 = vector.shape_cast %13 : vector<1024x512xbf16> to vector<8x128x512xbf16>
    %c0_9 = arith.constant 0 : index
    %c0_10 = arith.constant 0 : index
    %c0_11 = arith.constant 0 : index
    %15 = vector.load %arg11[%c0_9, %c0_10, %c0_11] : memref<8x128x512xbf16, #tpu.memory_space<vmem>>, vector<8x128x512xbf16>
    tpu.vector_store %arg11[%c0_9, %c0_10, %c0_11], %14 {strides = array<i32>} : memref<8x128x512xbf16, #tpu.memory_space<vmem>>, vector<8x128x512xbf16>,
    %c0_12 = arith.constant 0 : index
    %c0_13 = arith.constant 0 : index
    %16 = vector.load %arg7[%c0_12, %c0_13] : memref<128x512xbf16, #tpu.memory_space<vmem>>, vector<128x512xbf16>
    %cst_14 = arith.constant dense<0.000000e+00> : vector<1024x512xf32>
    %17 = tpu.matmul %7, %16, %cst_14 {dimension_numbers = #tpu.dot_dimension_numbers<[1], [0], [0], [1], [0, 0, 1, 1], [], []>} : vector<1024x128xbf16>, vector<128x512xbf16>, vector<1024x512xf32> -> vector<1024x512xf32>
    %c0_15 = arith.constant 0 : index
    %c0_16 = arith.constant 0 : index
    %18 = vector.load %arg9[%c0_15, %c0_16] : memref<1x512xf32, #tpu.memory_space<vmem>>, vector<1x512xf32>
    %19 = vector.broadcast %18 : vector<1x512xf32> to vector<1024x512xf32>
    %20 = arith.addf %17, %19 : vector<1024x512xf32>
    %21 = arith.truncf %20 : vector<1024x512xf32> to vector<1024x512xbf16>
    %22 = vector.shape_cast %21 : vector<1024x512xbf16> to vector<8x128x512xbf16>
    %c0_17 = arith.constant 0 : index
    %c0_18 = arith.constant 0 : index
    %c0_19 = arith.constant 0 : index
    %23 = vector.load %arg12[%c0_17, %c0_18, %c0_19] : memref<8x128x512xbf16, #tpu.memory_space<vmem>>, vector<8x128x512xbf16>
    tpu.vector_store %arg12[%c0_17, %c0_18, %c0_19], %22 {strides = array<i32>} : memref<8x128x512xbf16, #tpu.memory_space<vmem>>, vector<8x128x512xbf16>,
    %c0_20 = arith.constant 0 : index
    %c0_21 = arith.constant 0 : index
    %24 = vector.load %arg5[%c0_20, %c0_21] : memref<128x512xbf16, #tpu.memory_space<vmem>>, vector<128x512xbf16>
    %c0_22 = arith.constant 0 : index
    %c0_23 = arith.constant 0 : index
    %25 = vector.load %arg8[%c0_22, %c0_23] : memref<128x512xbf16, #tpu.memory_space<vmem>>, vector<128x512xbf16>
    %cst_24 = arith.constant 0.000000e+00 : f32
    %26 = vector.broadcast %cst_24 : f32 to vector<128x128xf32>
    %c0_i32_25 = arith.constant 0 : i32
    %27 = arith.subi %1, %c0_i32_25 : i32
    %28 = arith.addi %c0_i32_25, %27 : i32
    %c1_i32_26 = arith.constant 1 : i32
    %29:4 = scf.for %arg13 = %c0_i32_25 to %28 step %c1_i32_26 iter_args(%arg14 = %26, %arg15 = %26, %arg16 = %26, %arg17 = %26) -> (vector<128x128xf32>, vector<128x128xf32>, vector<128x128xf32>, vector<128x128xf32>)  : i32 {
      %c1_i32_27 = arith.constant 1 : i32
      %30 = arith.subi %1, %c1_i32_27 : i32
      %31 = arith.subi %30, %arg13 : i32
      %32 = arith.index_cast %arg13 : i32 to index
      %c0_28 = arith.constant 0 : index
      %c0_29 = arith.constant 0 : index
      %33 = vector.load %arg11[%32, %c0_28, %c0_29] : memref<8x128x512xbf16, #tpu.memory_space<vmem>>, vector<1x128x512xbf16>
      %34 = vector.shape_cast %33 : vector<1x128x512xbf16> to vector<128x512xbf16>
      %35 = arith.extf %34 : vector<128x512xbf16> to vector<128x512xf32>
      %36 = arith.truncf %arg14 : vector<128x128xf32> to vector<128x128xbf16>
      %cst_30 = arith.constant dense<0.000000e+00> : vector<128x512xf32>
      %37 = tpu.matmul %36, %24, %cst_30 {dimension_numbers = #tpu.dot_dimension_numbers<[1], [0], [0], [1], [0, 0, 1, 1], [], []>} : vector<128x128xbf16>, vector<128x512xbf16>, vector<128x512xf32> -> vector<128x512xf32>
      %38 = arith.addf %35, %37 : vector<128x512xf32>
      %39 = arith.index_cast %31 : i32 to index
      %c0_31 = arith.constant 0 : index
      %c0_32 = arith.constant 0 : index
      %40 = vector.load %arg12[%39, %c0_31, %c0_32] : memref<8x128x512xbf16, #tpu.memory_space<vmem>>, vector<1x128x512xbf16>
      %41 = vector.shape_cast %40 : vector<1x128x512xbf16> to vector<128x512xbf16>
      %42 = arith.extf %41 : vector<128x512xbf16> to vector<128x512xf32>
      %43 = arith.truncf %arg16 : vector<128x128xf32> to vector<128x128xbf16>
      %cst_33 = arith.constant dense<0.000000e+00> : vector<128x512xf32>
      %44 = tpu.matmul %43, %25, %cst_33 {dimension_numbers = #tpu.dot_dimension_numbers<[1], [0], [0], [1], [0, 0, 1, 1], [], []>} : vector<128x128xbf16>, vector<128x512xbf16>, vector<128x512xf32> -> vector<128x512xf32>
      %45 = arith.addf %42, %44 : vector<128x512xf32>
      %46 = vector.broadcast %arg13 : i32 to vector<128x1xi32>
      %47 = arith.cmpi slt, %46, %2 : vector<128x1xi32>
      %48 = vector.broadcast %31 : i32 to vector<128x1xi32>
      %49 = arith.cmpi slt, %48, %2 : vector<128x1xi32>
      %50 = vector.extract_strided_slice %38 {offsets = [0, 0], sizes = [128, 128], strides = [1, 1]} : vector<128x512xf32> to vector<128x128xf32>
      %51 = arith.negf %50 : vector<128x128xf32>
      %52 = math.exp %51 : vector<128x128xf32>
      %cst_34 = arith.constant 1.000000e+00 : f32
      %53 = vector.broadcast %cst_34 : f32 to vector<128x128xf32>
      %54 = arith.addf %53, %52 : vector<128x128xf32>
      %55 = arith.divf %53, %54 : vector<128x128xf32>
      %56 = vector.extract_strided_slice %38 {offsets = [0, 128], sizes = [128, 128], strides = [1, 1]} : vector<128x512xf32> to vector<128x128xf32>
      %57 = arith.negf %56 : vector<128x128xf32>
      %58 = math.exp %57 : vector<128x128xf32>
      %cst_35 = arith.constant 1.000000e+00 : f32
      %59 = vector.broadcast %cst_35 : f32 to vector<128x128xf32>
      %60 = arith.addf %59, %58 : vector<128x128xf32>
      %61 = arith.divf %59, %60 : vector<128x128xf32>
      %62 = vector.extract_strided_slice %38 {offsets = [0, 256], sizes = [128, 128], strides = [1, 1]} : vector<128x512xf32> to vector<128x128xf32>
      %63 = math.tanh %62 : vector<128x128xf32>
      %64 = vector.extract_strided_slice %38 {offsets = [0, 384], sizes = [128, 128], strides = [1, 1]} : vector<128x512xf32> to vector<128x128xf32>
      %65 = arith.negf %64 : vector<128x128xf32>
      %66 = math.exp %65 : vector<128x128xf32>
      %cst_36 = arith.constant 1.000000e+00 : f32
      %67 = vector.broadcast %cst_36 : f32 to vector<128x128xf32>
      %68 = arith.addf %67, %66 : vector<128x128xf32>
      %69 = arith.divf %67, %68 : vector<128x128xf32>
      %70 = arith.mulf %61, %arg15 : vector<128x128xf32>
      %71 = arith.mulf %55, %63 : vector<128x128xf32>
      %72 = arith.addf %70, %71 : vector<128x128xf32>
      %73 = math.tanh %72 : vector<128x128xf32>
      %74 = arith.mulf %69, %73 : vector<128x128xf32>
      %75 = vector.shape_cast %47 : vector<128x1xi1> to vector<128x1xi1>
      %76 = vector.broadcast %75 : vector<128x1xi1> to vector<128x128xi1>
      %77 = arith.select %76, %74, %arg14 : vector<128x128xi1>, vector<128x128xf32>
      %78 = vector.shape_cast %47 : vector<128x1xi1> to vector<128x1xi1>
      %79 = vector.broadcast %78 : vector<128x1xi1> to vector<128x128xi1>
      %80 = arith.select %79, %72, %arg15 : vector<128x128xi1>, vector<128x128xf32>
      %81 = vector.extract_strided_slice %45 {offsets = [0, 0], sizes = [128, 128], strides = [1, 1]} : vector<128x512xf32> to vector<128x128xf32>
      %82 = arith.negf %81 : vector<128x128xf32>
      %83 = math.exp %82 : vector<128x128xf32>
      %cst_37 = arith.constant 1.000000e+00 : f32
      %84 = vector.broadcast %cst_37 : f32 to vector<128x128xf32>
      %85 = arith.addf %84, %83 : vector<128x128xf32>
      %86 = arith.divf %84, %85 : vector<128x128xf32>
      %87 = vector.extract_strided_slice %45 {offsets = [0, 128], sizes = [128, 128], strides = [1, 1]} : vector<128x512xf32> to vector<128x128xf32>
      %88 = arith.negf %87 : vector<128x128xf32>
      %89 = math.exp %88 : vector<128x128xf32>
      %cst_38 = arith.constant 1.000000e+00 : f32
      %90 = vector.broadcast %cst_38 : f32 to vector<128x128xf32>
      %91 = arith.addf %90, %89 : vector<128x128xf32>
      %92 = arith.divf %90, %91 : vector<128x128xf32>
      %93 = vector.extract_strided_slice %45 {offsets = [0, 256], sizes = [128, 128], strides = [1, 1]} : vector<128x512xf32> to vector<128x128xf32>
      %94 = math.tanh %93 : vector<128x128xf32>
      %95 = vector.extract_strided_slice %45 {offsets = [0, 384], sizes = [128, 128], strides = [1, 1]} : vector<128x512xf32> to vector<128x128xf32>
      %96 = arith.negf %95 : vector<128x128xf32>
      %97 = math.exp %96 : vector<128x128xf32>
      %cst_39 = arith.constant 1.000000e+00 : f32
      %98 = vector.broadcast %cst_39 : f32 to vector<128x128xf32>
      %99 = arith.addf %98, %97 : vector<128x128xf32>
      %100 = arith.divf %98, %99 : vector<128x128xf32>
      %101 = arith.mulf %92, %arg17 : vector<128x128xf32>
      %102 = arith.mulf %86, %94 : vector<128x128xf32>
      %103 = arith.addf %101, %102 : vector<128x128xf32>
      %104 = math.tanh %103 : vector<128x128xf32>
      %105 = arith.mulf %100, %104 : vector<128x128xf32>
      %106 = vector.shape_cast %49 : vector<128x1xi1> to vector<128x1xi1>
      %107 = vector.broadcast %106 : vector<128x1xi1> to vector<128x128xi1>
      %108 = arith.select %107, %105, %arg16 : vector<128x128xi1>, vector<128x128xf32>
      %109 = vector.shape_cast %49 : vector<128x1xi1> to vector<128x1xi1>
      %110 = vector.broadcast %109 : vector<128x1xi1> to vector<128x128xi1>
      %111 = arith.select %110, %103, %arg17 : vector<128x128xi1>, vector<128x128xf32>
      %cst_40 = arith.constant 0.000000e+00 : f32
      %112 = vector.shape_cast %47 : vector<128x1xi1> to vector<128x1xi1>
      %113 = vector.broadcast %112 : vector<128x1xi1> to vector<128x128xi1>
      %114 = vector.broadcast %cst_40 : f32 to vector<128x128xf32>
      %115 = arith.select %113, %77, %114 : vector<128x128xi1>, vector<128x128xf32>
      %116 = arith.index_cast %arg13 : i32 to index
      %c0_41 = arith.constant 0 : index
      %c0_42 = arith.constant 0 : index
      %117 = vector.load %arg10[%116, %c0_41, %c0_42] : memref<8x128x256xf32, #tpu.memory_space<vmem>>, vector<1x128x128xf32>
      %118 = vector.shape_cast %117 : vector<1x128x128xf32> to vector<128x128xf32>
      %119 = vector.shape_cast %115 : vector<128x128xf32> to vector<1x128x128xf32>
      tpu.vector_store %arg10[%116, %c0_41, %c0_42], %119 {strides = array<i32>} : memref<8x128x256xf32, #tpu.memory_space<vmem>>, vector<1x128x128xf32>,
      %cst_43 = arith.constant 0.000000e+00 : f32
      %120 = vector.shape_cast %49 : vector<128x1xi1> to vector<128x1xi1>
      %121 = vector.broadcast %120 : vector<128x1xi1> to vector<128x128xi1>
      %122 = vector.broadcast %cst_43 : f32 to vector<128x128xf32>
      %123 = arith.select %121, %108, %122 : vector<128x128xi1>, vector<128x128xf32>
      %124 = arith.index_cast %31 : i32 to index
      %c0_44 = arith.constant 0 : index
      %c128 = arith.constant 128 : index
      %125 = vector.load %arg10[%124, %c0_44, %c128] : memref<8x128x256xf32, #tpu.memory_space<vmem>>, vector<1x128x128xf32>
      %126 = vector.shape_cast %125 : vector<1x128x128xf32> to vector<128x128xf32>
      %127 = vector.shape_cast %123 : vector<128x128xf32> to vector<1x128x128xf32>
      tpu.vector_store %arg10[%124, %c0_44, %c128], %127 {strides = array<i32>} : memref<8x128x256xf32, #tpu.memory_space<vmem>>, vector<1x128x128xf32>,
      scf.yield %77, %80, %108, %111 : vector<128x128xf32>, vector<128x128xf32>, vector<128x128xf32>, vector<128x128xf32>
    }
    return
  }
  func.func @transform_0(%arg0: i32, %arg1: memref<1xi32, #tpu.memory_space<smem>>) -> (i32, i32) {
    %c0_i32 = arith.constant 0 : i32
    %c0_i32_0 = arith.constant 0 : i32
    return %arg0, %c0_i32 : i32, i32
  }
  func.func @transform_1(%arg0: i32, %arg1: memref<1xi32, #tpu.memory_space<smem>>) -> (i32, i32, i32) {
    %c0_i32 = arith.constant 0 : i32
    %c0_i32_0 = arith.constant 0 : i32
    %c0_i32_1 = arith.constant 0 : i32
    return %c0_i32, %arg0, %c0_i32_0 : i32, i32, i32
  }
  func.func @transform_2(%arg0: i32, %arg1: memref<1xi32, #tpu.memory_space<smem>>) -> (i32, i32) {
    %c0_i32 = arith.constant 0 : i32
    %c0_i32_0 = arith.constant 0 : i32
    %c0_i32_1 = arith.constant 0 : i32
    return %c0_i32, %c0_i32_0 : i32, i32
  }
  func.func @transform_3(%arg0: i32, %arg1: memref<1xi32, #tpu.memory_space<smem>>) -> (i32, i32) {
    %c0_i32 = arith.constant 0 : i32
    %c0_i32_0 = arith.constant 0 : i32
    %c0_i32_1 = arith.constant 0 : i32
    return %c0_i32, %c0_i32_0 : i32, i32
  }
  func.func @transform_4(%arg0: i32, %arg1: memref<1xi32, #tpu.memory_space<smem>>) -> (i32, i32) {
    %c0_i32 = arith.constant 0 : i32
    %c0_i32_0 = arith.constant 0 : i32
    %c0_i32_1 = arith.constant 0 : i32
    return %c0_i32, %c0_i32_0 : i32, i32
  }
  func.func @transform_5(%arg0: i32, %arg1: memref<1xi32, #tpu.memory_space<smem>>) -> (i32, i32) {
    %c0_i32 = arith.constant 0 : i32
    %c0_i32_0 = arith.constant 0 : i32
    %c0_i32_1 = arith.constant 0 : i32
    return %c0_i32, %c0_i32_0 : i32, i32
  }
  func.func @transform_6(%arg0: i32, %arg1: memref<1xi32, #tpu.memory_space<smem>>) -> (i32, i32) {
    %c0_i32 = arith.constant 0 : i32
    %c0_i32_0 = arith.constant 0 : i32
    %c0_i32_1 = arith.constant 0 : i32
    return %c0_i32, %c0_i32_0 : i32, i32
  }
  func.func @transform_7(%arg0: i32, %arg1: memref<1xi32, #tpu.memory_space<smem>>) -> (i32, i32) {
    %c0_i32 = arith.constant 0 : i32
    %c0_i32_0 = arith.constant 0 : i32
    %c0_i32_1 = arith.constant 0 : i32
    return %c0_i32, %c0_i32_0 : i32, i32
  }
  func.func @transform_8(%arg0: i32, %arg1: memref<1xi32, #tpu.memory_space<smem>>) -> (i32, i32, i32) {
    %c0_i32 = arith.constant 0 : i32
    %c0_i32_0 = arith.constant 0 : i32
    %c0_i32_1 = arith.constant 0 : i32
    return %c0_i32, %arg0, %c0_i32_0 : i32, i32, i32
  }
}

</mosaic_0001>

<bundles_post_ra>
// kernel: tpu_custom_call.1
= control target key start
LH: loop header
LB: loop body
LE: loop exit
PB: predicated region body
PF: predicated region fallthrough
CT: control target
= control target key end

     0   :  { %15 = vsyncpa [#allocation7], 0  ;;  %s13497_s0 = inlined_call_operand.<no memory space> [shape: s32[1], index: 0, kind: input, shape index: {}]   ;;  %s13498_s1 = inlined_call_operand.vmem [shape: s32[128,1], index: 1, kind: input, shape index: {}]   ;;  %s13499_s2 = inlined_call_operand.hbm [shape: bf16[8,128,128], index: 2, kind: input, shape index: {}]   ;;  %s13500_s3 = inlined_call_operand.hbm [shape: bf16[128,512], index: 3, kind: input, shape index: {}]   ;;  %s13501_s4 = inlined_call_operand.hbm [shape: bf16[128,512], index: 4, kind: input, shape index: {}]   ;;  %s13502_s5 = inlined_call_operand.vmem [shape: f32[1,512], index: 5, kind: input, shape index: {}]   ;;  %s13503_s6 = inlined_call_operand.hbm [shape: bf16[128,512], index: 6, kind: input, shape index: {}]   ;;  %s13504_s7 = inlined_call_operand.hbm [shape: bf16[128,512], index: 7, kind: input, shape index: {}]   ;;  %s13505_s8 = inlined_call_operand.vmem [shape: f32[1,512], index: 8, kind: input, shape index: {}]   ;;  %s13506_s9 = inlined_call_operand.hbm [shape: f32[8,128,256], index: 9, kind: output, shape index: {}]  }
   0x1   :  { %16 = vsyncpa [#allocation10], 0 }
   0x2   :  { %17 = vsyncpa [#allocation13], 0 }
   0x3   :  { %18 = vsyncpa [#allocation8], 0  ;;  %s9640_s30 = smov [#allocation9]   ;;  %s8972_s13 = scalar_lea.hbm %s13500_s3, 4096 }
   0x4   :  { %s38_s10 = sshll.u32 %s9640_s30, 4  ;;  %p8973_p0 = scmp.ne.s32.totalorder %s13500_s3, %s8972_s13  ;;  %s39_s10 = int_to_ptr.vmem [resolvable:$true] %s38_s10 }
   0x5   :  { %p8976_p1 = scmp.lt.u32.totalorder %s8972_s13, %s13500_s3 }
   0x7   :  { %p8978_p2 = pnand %p8976_p1, %p8973_p0 }
   0x9   :  { %8981 = shalt.err (!%p8978_p2)
}
   0xa   :  { %s8982_s18 = scalar_lea.vmem %s39_s10, 4096  ;;  %p8987_p4 = scmp.lt.s32.totalorder %s39_s10, %s39_s10 }
   0xb   :  { %p8983_p3 = scmp.ne.s32.totalorder %s39_s10, %s8982_s18  ;;  %p8988_p5 = scmp.lt.s32.totalorder %s8982_s18, %s8982_s18 }
   0xd   :  { %p8989_p6 = por %p8988_p5, %p8987_p4 }
   0xf   :  { %p8990_p7 = pnand %p8989_p6, %p8983_p3 }
  0x11   :  { %8993 = shalt.err (!%p8990_p7)
}
  0x12   :  { %s9641_s19 = smov 256   ;;  %s9642_s20 = smov 16  }
  0x13   :  { %44 = dma.hbm_to_vmem [thread:$0]  %s13500_s3, 4096, %s39_s10, [#allocation10], %s9641_s19, %s9641_s19, %s9642_s20  }
  0x14   :  { %s9643_s23 = smov [#allocation12]   ;;  %s9644_s25 = smov [#allocation6]  }
  0x15   :  { %s64_s24 = sshll.u32 %s9643_s23, 4  ;;  %s26_s26 = sshll.u32 %s9644_s25, 4  ;;  %s65_s24 = int_to_ptr.vmem [resolvable:$true] %s64_s24  ;;  %s27_s26 = int_to_ptr.vmem [resolvable:$true] %s26_s26 }
  0x16   :  { %s8994_s29 = scalar_lea.hbm %s13503_s6, 4096 }
  0x17   :  { %p8995_p8 = scmp.ne.s32.totalorder %s13503_s6, %s8994_s29  ;;  %p8998_p9 = scmp.lt.u32.totalorder %s8994_s29, %s13503_s6 }
  0x19   :  { %p9000_p10 = pnand %p8998_p9, %p8995_p8 }
  0x1b   :  { %9003 = shalt.err (!%p9000_p10)
}
  0x1c   :  { %s9004_s3 = scalar_lea.vmem %s65_s24, 4096  ;;  %p9009_p12 = scmp.lt.s32.totalorder %s65_s24, %s65_s24 }
  0x1d   :  { %p9005_p11 = scmp.ne.s32.totalorder %s65_s24, %s9004_s3  ;;  %p9010_p13 = scmp.lt.s32.totalorder %s9004_s3, %s9004_s3 }
  0x1f   :  { %p9011_p0 = por %p9010_p13, %p9009_p12 }
  0x21   :  { %p9012_p1 = pnand %p9011_p0, %p9005_p11 }
  0x23   :  { %9015 = shalt.err (!%p9012_p1)
}
  0x24   :  { %70 = dma.hbm_to_vmem [thread:$0]  %s13503_s6, 4096, %s65_s24, [#allocation13], %s9641_s19, %s9641_s19, %s9642_s20  }
  0x25   :  { %s9016_s17 = scalar_lea.hbm %s13499_s2, 8192 }
  0x26   :  { %p9017_p2 = scmp.ne.s32.totalorder %s13499_s2, %s9016_s17  ;;  %p9020_p3 = scmp.lt.u32.totalorder %s9016_s17, %s13499_s2 }
  0x28   :  { %p9022_p4 = pnand %p9020_p3, %p9017_p2 }
  0x2a   :  { %9025 = shalt.err (!%p9022_p4)
}
  0x2b   :  { %s9026_s25 = scalar_lea.vmem %s27_s26, 8192  ;;  %p9031_p6 = scmp.lt.s32.totalorder %s27_s26, %s27_s26 }
  0x2c   :  { %p9027_p5 = scmp.ne.s32.totalorder %s27_s26, %s9026_s25  ;;  %p9032_p7 = scmp.lt.s32.totalorder %s9026_s25, %s9026_s25 }
  0x2e   :  { %p9033_p8 = por %p9032_p7, %p9031_p6 }
  0x30   :  { %p9034_p9 = pnand %p9033_p8, %p9027_p5 }
  0x32   :  { %9037 = shalt.err (!%p9034_p9)
}
  0x33   :  { %s9645_s6 = smov 64   ;;  %s9646_s24 = smov 4  }
  0x34   :  { %32 = dma.hbm_to_vmem [thread:$0]  %s13499_s2, 8192, %s27_s26, [#allocation7], %s9645_s6, %s9645_s6, %s9646_s24  }
  0x35   :  { %s9647_s29 = smov [#allocation11]   ;;  %s9648_s11 = smov [#allocation14]  }
  0x36   :  { %s50_s30 = sshll.u32 %s9647_s29, 4  ;;  %s76_s12 = sshll.u32 %s9648_s11, 4  ;;  %s51_s30 = int_to_ptr.vmem [resolvable:$true] %s50_s30  ;;  %s77_s12 = int_to_ptr.vmem [resolvable:$true] %s76_s12 }
  0x37   :  { %s9038_s10 = scalar_lea.hbm %s13501_s4, 4096 }
  0x38   :  { %p9039_p10 = scmp.ne.s32.totalorder %s13501_s4, %s9038_s10  ;;  %p9042_p11 = scmp.lt.u32.totalorder %s9038_s10, %s13501_s4 }
  0x3a   :  { %p9044_p12 = pnand %p9042_p11, %p9039_p10 }
  0x3c   :  { %9047 = shalt.err (!%p9044_p12)
}
  0x3d   :  { %s9048_s2 = scalar_lea.vmem %s51_s30, 4096  ;;  %p9053_p0 = scmp.lt.s32.totalorder %s51_s30, %s51_s30 }
  0x3e   :  { %p9049_p13 = scmp.ne.s32.totalorder %s51_s30, %s9048_s2  ;;  %p9054_p1 = scmp.lt.s32.totalorder %s9048_s2, %s9048_s2 }
  0x40   :  { %p9055_p2 = por %p9054_p1, %p9053_p0 }
  0x42   :  { %p9056_p3 = pnand %p9055_p2, %p9049_p13 }
  0x44   :  { %9059 = shalt.err (!%p9056_p3)
}
  0x45   :  { %56 = dma.hbm_to_vmem [thread:$0]  %s13501_s4, 4096, %s51_s30, [#allocation10], %s9641_s19, %s9641_s19, %s9642_s20  }
  0x46   :  { %s9060_s23 = scalar_lea.hbm %s13504_s7, 4096 }
  0x47   :  { %p9061_p4 = scmp.ne.s32.totalorder %s13504_s7, %s9060_s23  ;;  %p9064_p5 = scmp.lt.u32.totalorder %s9060_s23, %s13504_s7 }
  0x49   :  { %p9066_p6 = pnand %p9064_p5, %p9061_p4 }
  0x4b   :  { %9069 = shalt.err (!%p9066_p6)
}
  0x4c   :  { %s9070_s28 = scalar_lea.vmem %s77_s12, 4096  ;;  %p9075_p8 = scmp.lt.s32.totalorder %s77_s12, %s77_s12 }
  0x4d   :  { %p9071_p7 = scmp.ne.s32.totalorder %s77_s12, %s9070_s28  ;;  %p9076_p9 = scmp.lt.s32.totalorder %s9070_s28, %s9070_s28 }
  0x4f   :  { %p9077_p10 = por %p9076_p9, %p9075_p8 }
  0x51   :  { %p9078_p11 = pnand %p9077_p10, %p9071_p7 }
  0x53   :  { %9081 = shalt.err (!%p9078_p11)
}
  0x54   :  { %82 = dma.hbm_to_vmem [thread:$0]  %s13504_s7, 4096, %s77_s12, [#allocation13], %s9641_s19, %s9641_s19, %s9642_s20  }
  0x55   :  { %9368 = dma.done.wait [#allocation7], 8192  }
  0x56   :  { %9369 = vsyncadd [#allocation7], 4294959104 }
  0x57   :  { %9370 = dma.done.wait [#allocation10], 8192  }
  0x58   :  { %9371 = vsyncadd [#allocation10], 4294959104 }
  0x59   :  { %9372 = dma.done.wait [#allocation13], 8192  }
  0x5a   :  { %9373 = vsyncadd [#allocation13], 4294959104  ;;  %v9778_v0 = vld [vmem:[%s13498_s1] sm:$0xff]  ;;  %v9783_v1 = vld [vmem:[%s13498_s1 + $0x8] sm:$0xff]  ;;  %p7189_p12 = scmp.ge.s32.totalorder %s13497_s0, 8 }
  0x5b   :  { %13720 = vst [vmem:[#allocation20_spill] sm:$0xff] %v9778_v0  ;;  %13721 = vst [vmem:[#allocation21_spill] sm:$0xff] %v9783_v1  ;;  %v9788_v2 = vld [vmem:[%s13498_s1 + $0x10] sm:$0xff]  ;;  %v9793_v3 = vld [vmem:[%s13498_s1 + $0x18] sm:$0xff]  ;;  %s13736_s26 = smov (!%p7189_p12), %s13497_s0 }
  0x5c   :  { %13722 = vst [vmem:[#allocation22_spill] sm:$0xff] %v9788_v2  ;;  %13723 = vst [vmem:[#allocation23_spill] sm:$0xff] %v9793_v3  ;;  %v9798_v4 = vld [vmem:[%s13498_s1 + $0x20] sm:$0xff]  ;;  %v9803_v5 = vld [vmem:[%s13498_s1 + $0x28] sm:$0xff]  ;;  %7190 = sbr.rel (%p7189_p12) target bundleno = 117 (0x75), region = 85 }
  0x5d   :  { %13724 = vst [vmem:[#allocation24_spill] sm:$0xff] %v9798_v4  ;;  %13725 = vst [vmem:[#allocation25_spill] sm:$0xff] %v9803_v5  ;;  %v9808_v6 = vld [vmem:[%s13498_s1 + $0x30] sm:$0xff]  ;;  %v9813_v7 = vld [vmem:[%s13498_s1 + $0x38] sm:$0xff] }
  0x5e   :  { %13726 = vst [vmem:[#allocation26_spill] sm:$0xff] %v9808_v6  ;;  %13727 = vst [vmem:[#allocation27_spill] sm:$0xff] %v9813_v7  ;;  %v9818_v8 = vld [vmem:[%s13498_s1 + $0x40] sm:$0xff]  ;;  %v9823_v9 = vld [vmem:[%s13498_s1 + $0x48] sm:$0xff] }
  0x5f   :  { %13728 = vst [vmem:[#allocation28_spill] sm:$0xff] %v9818_v8  ;;  %13729 = vst [vmem:[#allocation29_spill] sm:$0xff] %v9823_v9  ;;  %v9828_v10 = vld [vmem:[%s13498_s1 + $0x50] sm:$0xff]  ;;  %v9833_v11 = vld [vmem:[%s13498_s1 + $0x58] sm:$0xff] }
  0x60   :  { %13730 = vst [vmem:[#allocation30_spill] sm:$0xff] %v9828_v10  ;;  %13731 = vst [vmem:[#allocation31_spill] sm:$0xff] %v9833_v11  ;;  %v9838_v12 = vld [vmem:[%s13498_s1 + $0x60] sm:$0xff]  ;;  %v9843_v13 = vld [vmem:[%s13498_s1 + $0x68] sm:$0xff] }
  0x61   :  { %13732 = vst [vmem:[#allocation32_spill] sm:$0xff] %v9838_v12  ;;  %13733 = vst [vmem:[#allocation33_spill] sm:$0xff] %v9843_v13  ;;  %v9848_v14 = vld [vmem:[%s13498_s1 + $0x70] sm:$0xff]  ;;  %v9853_v15 = vld [vmem:[%s13498_s1 + $0x78] sm:$0xff] }
  0x62   :  { %13734 = vst [vmem:[#allocation34_spill] sm:$0xff] %v9848_v14  ;;  %13735 = vst [vmem:[#allocation35_spill] sm:$0xff] %v9853_v15 }
  0x63 LB: > { %s7688_s18 = sshll.u32 %s9378_s26, 8  ;;  %v9649_v16 = vmov 0.0   ;;  %s121_s26 = sadd.s32 1, %s9378_s26   ;;  %s9378_s26 = sphi %s13736_s26, %s121_s26  }
  0x64   : > { %s9867_s21 = scalar_lea.vmem [#allocation15], %s7688_s18  ;;  %p120_p13 = scmp.ge.s32.totalorder %s121_s26, 8 }
  0x65   : > { %127 = vst [vmem:[%s9867_s21] sm:$0xff] %v9649_v16  ;;  %128 = vst [vmem:[%s9867_s21 + $0x8] sm:$0xff] %v9649_v16 }
  0x66   : > { %129 = vst [vmem:[%s9867_s21 + $0x10] sm:$0xff] %v9649_v16  ;;  %130 = vst [vmem:[%s9867_s21 + $0x18] sm:$0xff] %v9649_v16 }
  0x67   : > { %131 = vst [vmem:[%s9867_s21 + $0x20] sm:$0xff] %v9649_v16  ;;  %132 = vst [vmem:[%s9867_s21 + $0x28] sm:$0xff] %v9649_v16 }
  0x68   : > { %133 = vst [vmem:[%s9867_s21 + $0x30] sm:$0xff] %v9649_v16  ;;  %134 = vst [vmem:[%s9867_s21 + $0x38] sm:$0xff] %v9649_v16 }
  0x69   : > { %135 = vst [vmem:[%s9867_s21 + $0x40] sm:$0xff] %v9649_v16  ;;  %136 = vst [vmem:[%s9867_s21 + $0x48] sm:$0xff] %v9649_v16 }
  0x6a   : > { %137 = vst [vmem:[%s9867_s21 + $0x50] sm:$0xff] %v9649_v16  ;;  %138 = vst [vmem:[%s9867_s21 + $0x58] sm:$0xff] %v9649_v16 }
  0x6b   : > { %139 = vst [vmem:[%s9867_s21 + $0x60] sm:$0xff] %v9649_v16  ;;  %140 = vst [vmem:[%s9867_s21 + $0x68] sm:$0xff] %v9649_v16 }
  0x6c   : > { %141 = vst [vmem:[%s9867_s21 + $0x70] sm:$0xff] %v9649_v16  ;;  %142 = vst [vmem:[%s9867_s21 + $0x78] sm:$0xff] %v9649_v16 }
  0x6d   : > { %143 = vst [vmem:[%s9867_s21 + $0x80] sm:$0xff] %v9649_v16  ;;  %144 = vst [vmem:[%s9867_s21 + $0x88] sm:$0xff] %v9649_v16 }
  0x6e   : > { %145 = vst [vmem:[%s9867_s21 + $0x90] sm:$0xff] %v9649_v16  ;;  %146 = vst [vmem:[%s9867_s21 + $0x98] sm:$0xff] %v9649_v16  ;;  %123 = sbr.rel (!%p120_p13) target bundleno = 99 (0x63), region = 91 }
  0x6f   : > { %147 = vst [vmem:[%s9867_s21 + $0xa0] sm:$0xff] %v9649_v16  ;;  %148 = vst [vmem:[%s9867_s21 + $0xa8] sm:$0xff] %v9649_v16 }
  0x70   : > { %149 = vst [vmem:[%s9867_s21 + $0xb0] sm:$0xff] %v9649_v16  ;;  %150 = vst [vmem:[%s9867_s21 + $0xb8] sm:$0xff] %v9649_v16 }
  0x71   : > { %151 = vst [vmem:[%s9867_s21 + $0xc0] sm:$0xff] %v9649_v16  ;;  %152 = vst [vmem:[%s9867_s21 + $0xc8] sm:$0xff] %v9649_v16 }
  0x72   : > { %153 = vst [vmem:[%s9867_s21 + $0xd0] sm:$0xff] %v9649_v16  ;;  %154 = vst [vmem:[%s9867_s21 + $0xd8] sm:$0xff] %v9649_v16 }
  0x73   : > { %155 = vst [vmem:[%s9867_s21 + $0xe0] sm:$0xff] %v9649_v16  ;;  %156 = vst [vmem:[%s9867_s21 + $0xe8] sm:$0xff] %v9649_v16 }
  0x74   : > { %157 = vst [vmem:[%s9867_s21 + $0xf0] sm:$0xff] %v9649_v16  ;;  %158 = vst [vmem:[%s9867_s21 + $0xf8] sm:$0xff] %v9649_v16 }
  0x75 PF:  { %v8234_v17 = vld [vmem:[#allocation9 + $0x4] ss:$16 sps:$4 sm:$0xff]   ;;  %v8236_v18 = vld [vmem:[#allocation9 + $0xc] ss:$16 sps:$4 sm:$0xff]   ;;  %v9650_v19 = vmov 0   ;;  %p7520_p0 = scmp.le.s32.totalorder %s13497_s0, 0 }
  0x76   :  { %917 = vmatprep.mubr.bf16.mxu0 %v9650_v19  ;;  %1590 = vmatprep.mubr.bf16.mxu1 %v9650_v19  ;;  %v8238_v20 = vld [vmem:[#allocation9] ss:$16 sps:$4 sm:$0xff]   ;;  %v8239_v21 = vld [vmem:[#allocation9 + $0x8] ss:$16 sps:$4 sm:$0xff]   ;;  %v8240_v22 = vld [vmem:[#allocation9 + $0x24] ss:$16 sps:$4 sm:$0xff]  }
  0x77   :  { %885 = vmatprep.subr.bf16.mxu0 %v8234_v17  ;;  %1558 = vmatprep.subr.bf16.mxu1 %v8236_v18  ;;  %v8242_v23 = vld [vmem:[#allocation9 + $0x2c] ss:$16 sps:$4 sm:$0xff]   ;;  %v8244_v24 = vld [vmem:[#allocation9 + $0x20] ss:$16 sps:$4 sm:$0xff]   ;;  %v8245_v25 = vld [vmem:[#allocation9 + $0x28] ss:$16 sps:$4 sm:$0xff]  }
  0x78   :  { %886 = vmatpush1.bf16.msra.mxu0 %v8238_v20  ;;  %1559 = vmatpush1.bf16.msra.mxu1 %v8239_v21  ;;  %v8246_v26 = vld [vmem:[#allocation9 + $0x44] ss:$16 sps:$4 sm:$0xff]   ;;  %v8248_v27 = vld [vmem:[#allocation9 + $0x4c] ss:$16 sps:$4 sm:$0xff]   ;;  %v8250_v28 = vld [vmem:[#allocation9 + $0x40] ss:$16 sps:$4 sm:$0xff]  }
  0x79   :  { %887 = vmatprep.subr.bf16.mxu0 %v8240_v22  ;;  %1560 = vmatprep.subr.bf16.mxu1 %v8242_v23  ;;  %v8251_v29 = vld [vmem:[#allocation9 + $0x48] ss:$16 sps:$4 sm:$0xff]   ;;  %v8252_v30 = vld [vmem:[#allocation9 + $0x64] ss:$16 sps:$4 sm:$0xff]   ;;  %v8254_v31 = vld [vmem:[#allocation9 + $0x6c] ss:$16 sps:$4 sm:$0xff]  }
  0x7a   :  { %v8256_v32 = vld [vmem:[#allocation9 + $0x60] ss:$16 sps:$4 sm:$0xff]   ;;  %v8257_v33 = vld [vmem:[#allocation9 + $0x68] ss:$16 sps:$4 sm:$0xff]   ;;  %v8258_v34 = vld [vmem:[#allocation9 + $0x84] ss:$16 sps:$4 sm:$0xff]  }
  0x7b   :  { %v8260_v35 = vld [vmem:[#allocation9 + $0x8c] ss:$16 sps:$4 sm:$0xff]   ;;  %v8262_v36 = vld [vmem:[#allocation9 + $0x80] ss:$16 sps:$4 sm:$0xff]   ;;  %v8263_v37 = vld [vmem:[#allocation9 + $0x88] ss:$16 sps:$4 sm:$0xff]  }
  0x7c   :  { %888 = vmatpush1.bf16.msra.mxu0 %v8244_v24  ;;  %1561 = vmatpush1.bf16.msra.mxu1 %v8245_v25  ;;  %v8264_v38 = vld [vmem:[#allocation9 + $0xa4] ss:$16 sps:$4 sm:$0xff]   ;;  %v8266_v39 = vld [vmem:[#allocation9 + $0xac] ss:$16 sps:$4 sm:$0xff]   ;;  %v8268_v40 = vld [vmem:[#allocation9 + $0xa0] ss:$16 sps:$4 sm:$0xff]  }
  0x7d   :  { %889 = vmatprep.subr.bf16.mxu0 %v8246_v26  ;;  %1562 = vmatprep.subr.bf16.mxu1 %v8248_v27  ;;  %v8269_v41 = vld [vmem:[#allocation9 + $0xa8] ss:$16 sps:$4 sm:$0xff]   ;;  %v8270_v42 = vld [vmem:[#allocation9 + $0xc4] ss:$16 sps:$4 sm:$0xff]   ;;  %v8272_v43 = vld [vmem:[#allocation9 + $0xcc] ss:$16 sps:$4 sm:$0xff]  }
  0x7e   :  { %v8274_v44 = vld [vmem:[#allocation9 + $0xc0] ss:$16 sps:$4 sm:$0xff]   ;;  %v8275_v45 = vld [vmem:[#allocation9 + $0xc8] ss:$16 sps:$4 sm:$0xff]   ;;  %v8276_v46 = vld [vmem:[#allocation9 + $0xe4] ss:$16 sps:$4 sm:$0xff]  }
  0x7f   :  { %v8278_v47 = vld [vmem:[#allocation9 + $0xec] ss:$16 sps:$4 sm:$0xff]   ;;  %v8280_v48 = vld [vmem:[#allocation9 + $0xe0] ss:$16 sps:$4 sm:$0xff]   ;;  %v8281_v49 = vld [vmem:[#allocation9 + $0xe8] ss:$16 sps:$4 sm:$0xff]  }
  0x80   :  { %890 = vmatpush1.bf16.msra.mxu0 %v8250_v28  ;;  %1563 = vmatpush1.bf16.msra.mxu1 %v8251_v29  ;;  %v8285_v50 = vld [vmem:[#allocation12 + $0x4] ss:$16 sps:$4 sm:$0xff]   ;;  %v8288_v51 = vld [vmem:[#allocation12 + $0xc] ss:$16 sps:$4 sm:$0xff]   ;;  %v8283_v53 = vld [vmem:[#allocation12] ss:$16 sps:$4 sm:$0xff]  }
  0x81   :  { %891 = vmatprep.subr.bf16.mxu0 %v8252_v30  ;;  %1564 = vmatprep.subr.bf16.mxu1 %v8254_v31  ;;  %v8282_v52 = vld [vmem:[#allocation6] sm:$0xff]   ;;  %v8286_v54 = vld [vmem:[#allocation12 + $0x8] ss:$16 sps:$4 sm:$0xff]   ;;  %v8302_v57 = vld [vmem:[#allocation12 + $0x2c] ss:$16 sps:$4 sm:$0xff]  }
  0x82   :  { %v8299_v55 = vld [vmem:[#allocation12 + $0x24] ss:$16 sps:$4 sm:$0xff]   ;;  %v8297_v56 = vld [vmem:[#allocation12 + $0x20] ss:$16 sps:$4 sm:$0xff]   ;;  %v8300_v58 = vld [vmem:[#allocation12 + $0x28] ss:$16 sps:$4 sm:$0xff]  }
  0x83   :  { %v8289_v59 = vld [vmem:[#allocation6 + $0x8] sm:$0xff]   ;;  %v8311_v60 = vld [vmem:[#allocation12 + $0x40] ss:$16 sps:$4 sm:$0xff]   ;;  %v8313_v61 = vld [vmem:[#allocation12 + $0x44] ss:$16 sps:$4 sm:$0xff]  }
  0x84   :  { %892 = vmatpush1.bf16.msra.mxu0 %v8256_v32  ;;  %1565 = vmatpush1.bf16.msra.mxu1 %v8257_v33  ;;  %v8314_v62 = vld [vmem:[#allocation12 + $0x48] ss:$16 sps:$4 sm:$0xff]   ;;  %v8316_v63 = vld [vmem:[#allocation12 + $0x4c] ss:$16 sps:$4 sm:$0xff]   ;;  %v8290_v16 = vld [vmem:[#allocation6 + $0x10] sm:$0xff]  }
  0x85   :  { %893 = vmatprep.subr.bf16.mxu0 %v8258_v34  ;;  %1566 = vmatprep.subr.bf16.mxu1 %v8260_v35  ;;  %v8291_v17 = vld [vmem:[#allocation6 + $0x18] sm:$0xff]   ;;  %v8292_v18 = vld [vmem:[#allocation6 + $0x20] sm:$0xff]   ;;  %v8293_v20 = vld [vmem:[#allocation6 + $0x28] sm:$0xff]  }
  0x86   :  { %v8294_v21 = vld [vmem:[#allocation6 + $0x30] sm:$0xff]   ;;  %v8295_v22 = vld [vmem:[#allocation6 + $0x38] sm:$0xff]   ;;  %v8296_v23 = vld [vmem:[#allocation6 + $0x40] sm:$0xff]  }
  0x87   :  { %v8325_v24 = vld [vmem:[#allocation12 + $0x60] ss:$16 sps:$4 sm:$0xff]   ;;  %v8327_v25 = vld [vmem:[#allocation12 + $0x64] ss:$16 sps:$4 sm:$0xff]   ;;  %v8328_v26 = vld [vmem:[#allocation12 + $0x68] ss:$16 sps:$4 sm:$0xff]  }
  0x88   :  { %894 = vmatpush1.bf16.msra.mxu0 %v8262_v36  ;;  %1567 = vmatpush1.bf16.msra.mxu1 %v8263_v37  ;;  %v8330_v27 = vld [vmem:[#allocation12 + $0x6c] ss:$16 sps:$4 sm:$0xff]   ;;  %v8304_v29 = vld [vmem:[#allocation6 + $0x50] sm:$0xff]   ;;  %v8306_v31 = vld [vmem:[#allocation6 + $0x60] sm:$0xff]  }
  0x89   :  { %895 = vmatprep.subr.bf16.mxu0 %v8264_v38  ;;  %1568 = vmatprep.subr.bf16.mxu1 %v8266_v39  ;;  %v8303_v28 = vld [vmem:[#allocation6 + $0x48] sm:$0xff]   ;;  %v8305_v30 = vld [vmem:[#allocation6 + $0x58] sm:$0xff]   ;;  %v8308_v33 = vld [vmem:[#allocation6 + $0x70] sm:$0xff]  }
  0x8a   :  { %v8307_v32 = vld [vmem:[#allocation6 + $0x68] sm:$0xff]   ;;  %v8309_v34 = vld [vmem:[#allocation6 + $0x78] sm:$0xff]   ;;  %v8310_v35 = vld [vmem:[#allocation6 + $0x80] sm:$0xff]  }
  0x8b   :  { %v8339_v36 = vld [vmem:[#allocation12 + $0x80] ss:$16 sps:$4 sm:$0xff]   ;;  %v8341_v37 = vld [vmem:[#allocation12 + $0x84] ss:$16 sps:$4 sm:$0xff]   ;;  %v8342_v38 = vld [vmem:[#allocation12 + $0x88] ss:$16 sps:$4 sm:$0xff]  }
  0x8c   :  { %896 = vmatpush1.bf16.msra.mxu0 %v8268_v40  ;;  %1569 = vmatpush1.bf16.msra.mxu1 %v8269_v41  ;;  %v8317_v39 = vld [vmem:[#allocation6 + $0x88] sm:$0xff]   ;;  %v8318_v41 = vld [vmem:[#allocation6 + $0x90] sm:$0xff]   ;;  %v11182_v12 = vld [vmem:[#allocation14 + $0x18] sm:$0xff] }
  0x8d   :  { %897 = vmatprep.subr.bf16.mxu0 %v8270_v42  ;;  %1570 = vmatprep.subr.bf16.mxu1 %v8272_v43  ;;  %v8344_v40 = vld [vmem:[#allocation12 + $0x8c] ss:$16 sps:$4 sm:$0xff]   ;;  %v8320_v43 = vld [vmem:[#allocation6 + $0xa0] sm:$0xff]   ;;  %v11180_v13 = vld [vmem:[#allocation14 + $0x10] sm:$0xff]  ;;  %13772 = vst [vmem:[#allocation71_spill] sm:$0xff] %v11182_v12 }
  0x8e   :  { %v8319_v42 = vld [vmem:[#allocation6 + $0x98] sm:$0xff]   ;;  %v11178_v14 = vld [vmem:[#allocation14 + $0x8] sm:$0xff]  ;;  %13771 = vst [vmem:[#allocation70_spill] sm:$0xff] %v11180_v13  ;;  %v11188_v9 = vld [vmem:[#allocation14 + $0x20] sm:$0xff] }
  0x8f   :  { %13770 = vst [vmem:[#allocation69_spill] sm:$0xff] %v11178_v14  ;;  %13773 = vst [vmem:[#allocation72_spill] sm:$0xff] %v11188_v9  ;;  %v11194_v6 = vld [vmem:[#allocation14 + $0x38] sm:$0xff]  ;;  %v11196_v5 = vld [vmem:[#allocation14 + $0x40] sm:$0xff] }
  0x90   :  { %898 = vmatpush1.bf16.msra.mxu0 %v8274_v44  ;;  %1571 = vmatpush1.bf16.msra.mxu1 %v8275_v45  ;;  %v8321_v44 = vld [vmem:[#allocation6 + $0xa8] sm:$0xff]   ;;  %v8322_v45 = vld [vmem:[#allocation6 + $0xb0] sm:$0xff]   ;;  %13776 = vst [vmem:[#allocation75_spill] sm:$0xff] %v11194_v6  ;;  %13777 = vst [vmem:[#allocation76_spill] sm:$0xff] %v11196_v5 }
  0x91   :  { %899 = vmatprep.subr.bf16.mxu0 %v8276_v46  ;;  %1572 = vmatprep.subr.bf16.mxu1 %v8278_v47  ;;  %v8323_v46 = vld [vmem:[#allocation6 + $0xb8] sm:$0xff]   ;;  %v8324_v47 = vld [vmem:[#allocation6 + $0xc0] sm:$0xff]   ;;  %v11198_v4 = vld [vmem:[#allocation14 + $0x48] sm:$0xff] }
  0x92   :  { %13778 = vst [vmem:[#allocation77_spill] sm:$0xff] %v11198_v4  ;;  %v11200_v3 = vld [vmem:[#allocation14 + $0x50] sm:$0xff]  ;;  %v11206_v1 = vld [vmem:[#allocation14 + $0x68] sm:$0xff]  ;;  %v11228_v4 = vld [vmem:[#allocation14 + $0xc0] sm:$0xff] }
  0x93   :  { %13779 = vst [vmem:[#allocation78_spill] sm:$0xff] %v11200_v3  ;;  %13782 = vst [vmem:[#allocation81_spill] sm:$0xff] %v11206_v1  ;;  %v11222_v1 = vld [vmem:[#allocation14 + $0xa8] sm:$0xff]  ;;  %v11238_v5 = vld [vmem:[#allocation14 + $0xd8] sm:$0xff] }
  0x94   :  { %900 = vmatpush1.bf16.msra.mxu0 %v8280_v48  ;;  %1573 = vmatpush1.bf16.msra.mxu1 %v8281_v49  ;;  %v8353_v48 = vld [vmem:[#allocation12 + $0xa0] ss:$16 sps:$4 sm:$0xff]   ;;  %v8355_v49 = vld [vmem:[#allocation12 + $0xa4] ss:$16 sps:$4 sm:$0xff]   ;;  %13790 = vst [vmem:[#allocation89_spill] sm:$0xff] %v11222_v1  ;;  %13793 = vst [vmem:[#allocation92_spill] sm:$0xff] %v11228_v4 }
  0x95   :  { %2957 = vmatprep.subr.bf16.mxu0 %v8285_v50  ;;  %3630 = vmatprep.subr.bf16.mxu1 %v8288_v51  ;;  %v8356_v50 = vld [vmem:[#allocation12 + $0xa8] ss:$16 sps:$4 sm:$0xff]   ;;  %v11236_v1 = vld [vmem:[#allocation14 + $0xd0] sm:$0xff]  ;;  %13796 = vst [vmem:[#allocation95_spill] sm:$0xff] %v11238_v5 }
  0x96   :  { %v8331_v51 = vld [vmem:[#allocation6 + $0xc8] sm:$0xff]   ;;  %13795 = vst [vmem:[#allocation94_spill] sm:$0xff] %v11236_v1  ;;  %v11250_v0 = vld [vmem:[#allocation14 + $0xf8] sm:$0xff] }
  0x97   :  { %918 = vmatmul.mubr.bf16.vlgmr.msra.gmra.mrb[0].mxu0 %v8282_v52  ;;  %1591 = vmatmul.mubr.bf16.vlgmr.msra.gmra.mrb[0].mxu1 %v8282_v52  ;;  %v8358_v52 = vld [vmem:[#allocation12 + $0xac] ss:$16 sps:$4 sm:$0xff]   ;;  %13800 = vst [vmem:[#allocation99_spill] sm:$0xff] %v11250_v0 }
  0x98   :  { %2958 = vmatpush1.bf16.msra.mxu0 %v8283_v53  ;;  %3631 = vmatpush1.bf16.msra.mxu1 %v8286_v54  ;;  %v321_v53 = vlaneseq  ;;  %v11234_v2 = vld [vmem:[#allocation14 + $0xc8] sm:$0xff] }
  0x99   :  { %927 = vmatprep.mubr.bf16.mxu0 %v9650_v19  ;;  %1600 = vmatprep.mubr.bf16.mxu1 %v9650_v19  ;;  %13794 = vst [vmem:[#allocation93_spill] sm:$0xff] %v11234_v2 }
  0x9a   :  { %2959 = vmatprep.subr.bf16.mxu0 %v8299_v55  ;;  %3632 = vmatprep.subr.bf16.mxu1 %v8302_v57  ;;  %v9958_v54 = vshrl.u32 %v321_v53, 7  ;;  %v8332_v55 = vld [vmem:[#allocation6 + $0xd0] sm:$0xff]  }
  0x9c   :  { %2960 = vmatpush1.bf16.msra.mxu0 %v8297_v56  ;;  %3633 = vmatpush1.bf16.msra.mxu1 %v8300_v58  ;;  %v323_v56 = vsub.s32 0, %v9958_v54  ;;  %v331_v57 = vsub.s32 2, %v9958_v54  ;;  %v319_v58 = vld [vmem:[%s13502_s5] sm:$0xf] }
  0x9d   :  { %2961 = vmatprep.subr.bf16.mxu0 %v8313_v61  ;;  %3634 = vmatprep.subr.bf16.mxu1 %v8316_v63 }
  0x9e   :  { %v9971_v61 = vrot.slane %v319_v58, %v323_v56 }
  0x9f   :  { %928 = vmatmul.mubr.bf16.gmra.mrb[4].mxu0 %v8289_v59  ;;  %1601 = vmatmul.mubr.bf16.gmra.mrb[4].mxu1 %v8289_v59  ;;  %v327_v59 = vsub.s32 1, %v9958_v54 }
  0xa0   :  { %937 = vmatprep.mubr.bf16.mxu0 %v9650_v19  ;;  %1610 = vmatprep.mubr.bf16.mxu1 %v9650_v19 }
  0xa1   :  { %2962 = vmatpush1.bf16.msra.mxu0 %v8311_v60  ;;  %3635 = vmatpush1.bf16.msra.mxu1 %v8314_v62  ;;  %v335_v60 = vsub.s32 3, %v9958_v54  ;;  %v9975_v62 = vrot.slane %v319_v58, %v331_v57 }
  0xa2   :  { %2963 = vmatprep.subr.bf16.mxu0 %v8327_v25  ;;  %3636 = vmatprep.subr.bf16.mxu1 %v8330_v27 }
  0xa5   :  { %2964 = vmatpush1.bf16.msra.mxu0 %v8325_v24  ;;  %3637 = vmatpush1.bf16.msra.mxu1 %v8328_v26 }
  0xa6   :  { %2965 = vmatprep.subr.bf16.mxu0 %v8341_v37  ;;  %3638 = vmatprep.subr.bf16.mxu1 %v8344_v40 }
  0xa7   :  { %938 = vmatmul.mubr.bf16.gmra.mrb[8].mxu0 %v8290_v16  ;;  %1611 = vmatmul.mubr.bf16.gmra.mrb[8].mxu1 %v8290_v16 }
  0xa8   :  { %947 = vmatprep.mubr.bf16.mxu0 %v9650_v19  ;;  %1620 = vmatprep.mubr.bf16.mxu1 %v9650_v19 }
  0xa9   :  { %2966 = vmatpush1.bf16.msra.mxu0 %v8339_v36  ;;  %3639 = vmatpush1.bf16.msra.mxu1 %v8342_v38 }
  0xaa   :  { %2967 = vmatprep.subr.bf16.mxu0 %v8355_v49  ;;  %3640 = vmatprep.subr.bf16.mxu1 %v8358_v52 }
  0xad   :  { %2968 = vmatpush1.bf16.msra.mxu0 %v8353_v48  ;;  %3641 = vmatpush1.bf16.msra.mxu1 %v8356_v50 }
  0xaf   :  { %948 = vmatmul.mubr.bf16.gmra.mrb[12].mxu0 %v8291_v17  ;;  %1621 = vmatmul.mubr.bf16.gmra.mrb[12].mxu1 %v8291_v17  ;;  %v9979_v17 = vrot.slane %v319_v58, %v327_v59 }
  0xb0   :  { %957 = vmatprep.mubr.bf16.mxu0 %v9650_v19  ;;  %1630 = vmatprep.mubr.bf16.mxu1 %v9650_v19 }
  0xb7   :  { %958 = vmatmul.mubr.bf16.gmra.mrb[16].mxu0 %v8292_v18  ;;  %1631 = vmatmul.mubr.bf16.gmra.mrb[16].mxu1 %v8292_v18  ;;  %v9983_v18 = vrot.slane %v319_v58, %v335_v60 }
  0xb8   :  { %967 = vmatprep.mubr.bf16.mxu0 %v9650_v19  ;;  %1640 = vmatprep.mubr.bf16.mxu1 %v9650_v19 }
  0xbf   :  { %968 = vmatmul.mubr.bf16.gmra.mrb[20].mxu0 %v8293_v20  ;;  %1641 = vmatmul.mubr.bf16.gmra.mrb[20].mxu1 %v8293_v20 }
  0xc0   :  { %977 = vmatprep.mubr.bf16.mxu0 %v9650_v19  ;;  %1650 = vmatprep.mubr.bf16.mxu1 %v9650_v19 }
  0xc7   :  { %978 = vmatmul.mubr.bf16.gmra.mrb[24].mxu0 %v8294_v21  ;;  %1651 = vmatmul.mubr.bf16.gmra.mrb[24].mxu1 %v8294_v21 }
  0xc8   :  { %987 = vmatprep.mubr.bf16.mxu0 %v9650_v19  ;;  %1660 = vmatprep.mubr.bf16.mxu1 %v9650_v19 }
  0xcf   :  { %988 = vmatmul.mubr.bf16.gmra.mrb[28].mxu0 %v8295_v22  ;;  %1661 = vmatmul.mubr.bf16.gmra.mrb[28].mxu1 %v8295_v22  ;;  %v8333_v22 = vld [vmem:[#allocation6 + $0xd8] sm:$0xff]  }
  0xd0   :  { %997 = vmatprep.mubr.bf16.mxu0 %v9650_v19  ;;  %1670 = vmatprep.mubr.bf16.mxu1 %v9650_v19 }
  0xd7   :  { %998 = vmatmul.mubr.bf16.gmra.mrb[32].mxu0 %v8296_v23  ;;  %1671 = vmatmul.mubr.bf16.gmra.mrb[32].mxu1 %v8296_v23 }
  0xd8   :  { %1007 = vmatprep.mubr.bf16.mxu0 %v9650_v19  ;;  %1680 = vmatprep.mubr.bf16.mxu1 %v9650_v19 }
  0xdf   :  { %1008 = vmatmul.mubr.bf16.gmra.mrb[36].mxu0 %v8303_v28  ;;  %1681 = vmatmul.mubr.bf16.gmra.mrb[36].mxu1 %v8303_v28 }
  0xe0   :  { %1017 = vmatprep.mubr.bf16.mxu0 %v9650_v19  ;;  %1690 = vmatprep.mubr.bf16.mxu1 %v9650_v19 }
  0xe7   :  { %1018 = vmatmul.mubr.bf16.gmra.mrb[40].mxu0 %v8304_v29  ;;  %1691 = vmatmul.mubr.bf16.gmra.mrb[40].mxu1 %v8304_v29 }
  0xe8   :  { %1027 = vmatprep.mubr.bf16.mxu0 %v9650_v19  ;;  %1700 = vmatprep.mubr.bf16.mxu1 %v9650_v19 }
  0xef   :  { %1028 = vmatmul.mubr.bf16.gmra.mrb[44].mxu0 %v8305_v30  ;;  %1701 = vmatmul.mubr.bf16.gmra.mrb[44].mxu1 %v8305_v30 }
  0xf0   :  { %1037 = vmatprep.mubr.bf16.mxu0 %v9650_v19  ;;  %1710 = vmatprep.mubr.bf16.mxu1 %v9650_v19 }
  0xf7   :  { %1038 = vmatmul.mubr.bf16.gmra.mrb[48].mxu0 %v8306_v31  ;;  %1711 = vmatmul.mubr.bf16.gmra.mrb[48].mxu1 %v8306_v31 }
  0xf8   :  { %1047 = vmatprep.mubr.bf16.mxu0 %v9650_v19  ;;  %1720 = vmatprep.mubr.bf16.mxu1 %v9650_v19 }
  0xff   :  { %1048 = vmatmul.mubr.bf16.gmra.mrb[52].mxu0 %v8307_v32  ;;  %1721 = vmatmul.mubr.bf16.gmra.mrb[52].mxu1 %v8307_v32 }
 0x100   :  { %1057 = vmatprep.mubr.bf16.mxu0 %v9650_v19  ;;  %1730 = vmatprep.mubr.bf16.mxu1 %v9650_v19 }
 0x107   :  { %1058 = vmatmul.mubr.bf16.gmra.mrb[56].mxu0 %v8308_v33  ;;  %1731 = vmatmul.mubr.bf16.gmra.mrb[56].mxu1 %v8308_v33 }
 0x108   :  { %1067 = vmatprep.mubr.bf16.mxu0 %v9650_v19  ;;  %1740 = vmatprep.mubr.bf16.mxu1 %v9650_v19 }
 0x10f   :  { %1068 = vmatmul.mubr.bf16.gmra.mrb[60].mxu0 %v8309_v34  ;;  %1741 = vmatmul.mubr.bf16.gmra.mrb[60].mxu1 %v8309_v34 }
 0x110   :  { %1077 = vmatprep.mubr.bf16.mxu0 %v9650_v19  ;;  %1750 = vmatprep.mubr.bf16.mxu1 %v9650_v19 }
 0x117   :  { %1078 = vmatmul.mubr.bf16.gmra.mrb[64].mxu0 %v8310_v35  ;;  %1751 = vmatmul.mubr.bf16.gmra.mrb[64].mxu1 %v8310_v35 }
 0x118   :  { %1087 = vmatprep.mubr.bf16.mxu0 %v9650_v19  ;;  %1760 = vmatprep.mubr.bf16.mxu1 %v9650_v19 }
 0x11f   :  { %1088 = vmatmul.mubr.bf16.gmra.mrb[68].mxu0 %v8317_v39  ;;  %1761 = vmatmul.mubr.bf16.gmra.mrb[68].mxu1 %v8317_v39 }
 0x120   :  { %1097 = vmatprep.mubr.bf16.mxu0 %v9650_v19  ;;  %1770 = vmatprep.mubr.bf16.mxu1 %v9650_v19 }
 0x127   :  { %1098 = vmatmul.mubr.bf16.gmra.mrb[72].mxu0 %v8318_v41  ;;  %1771 = vmatmul.mubr.bf16.gmra.mrb[72].mxu1 %v8318_v41 }
 0x128   :  { %1107 = vmatprep.mubr.bf16.mxu0 %v9650_v19  ;;  %1780 = vmatprep.mubr.bf16.mxu1 %v9650_v19 }
 0x12f   :  { %1108 = vmatmul.mubr.bf16.gmra.mrb[76].mxu0 %v8319_v42  ;;  %1781 = vmatmul.mubr.bf16.gmra.mrb[76].mxu1 %v8319_v42 }
 0x130   :  { %1117 = vmatprep.mubr.bf16.mxu0 %v9650_v19  ;;  %1790 = vmatprep.mubr.bf16.mxu1 %v9650_v19 }
 0x137   :  { %1118 = vmatmul.mubr.bf16.gmra.mrb[80].mxu0 %v8320_v43  ;;  %1791 = vmatmul.mubr.bf16.gmra.mrb[80].mxu1 %v8320_v43  ;;  %v8334_v43 = vld [vmem:[#allocation6 + $0xe0] sm:$0xff]  }
 0x138   :  { %1127 = vmatprep.mubr.bf16.mxu0 %v9650_v19  ;;  %1800 = vmatprep.mubr.bf16.mxu1 %v9650_v19 }
 0x13f   :  { %1128 = vmatmul.mubr.bf16.gmra.mrb[84].mxu0 %v8321_v44  ;;  %1801 = vmatmul.mubr.bf16.gmra.mrb[84].mxu1 %v8321_v44 }
 0x140   :  { %1137 = vmatprep.mubr.bf16.mxu0 %v9650_v19  ;;  %1810 = vmatprep.mubr.bf16.mxu1 %v9650_v19 }
 0x147   :  { %1138 = vmatmul.mubr.bf16.gmra.mrb[88].mxu0 %v8322_v45  ;;  %1811 = vmatmul.mubr.bf16.gmra.mrb[88].mxu1 %v8322_v45 }
 0x148   :  { %1147 = vmatprep.mubr.bf16.mxu0 %v9650_v19  ;;  %1820 = vmatprep.mubr.bf16.mxu1 %v9650_v19 }
 0x14f   :  { %1148 = vmatmul.mubr.bf16.gmra.mrb[92].mxu0 %v8323_v46  ;;  %1821 = vmatmul.mubr.bf16.gmra.mrb[92].mxu1 %v8323_v46 }
 0x150   :  { %1157 = vmatprep.mubr.bf16.mxu0 %v9650_v19  ;;  %1830 = vmatprep.mubr.bf16.mxu1 %v9650_v19 }
 0x157   :  { %1158 = vmatmul.mubr.bf16.gmra.mrb[96].mxu0 %v8324_v47  ;;  %1831 = vmatmul.mubr.bf16.gmra.mrb[96].mxu1 %v8324_v47 }
 0x158   :  { %1167 = vmatprep.mubr.bf16.mxu0 %v9650_v19  ;;  %1840 = vmatprep.mubr.bf16.mxu1 %v9650_v19 }
 0x15f   :  { %1168 = vmatmul.mubr.bf16.gmra.mrb[100].mxu0 %v8331_v51  ;;  %1841 = vmatmul.mubr.bf16.gmra.mrb[100].mxu1 %v8331_v51 }
 0x160   :  { %1177 = vmatprep.mubr.bf16.mxu0 %v9650_v19  ;;  %1850 = vmatprep.mubr.bf16.mxu1 %v9650_v19 }
 0x167   :  { %1178 = vmatmul.mubr.bf16.gmra.mrb[104].mxu0 %v8332_v55  ;;  %1851 = vmatmul.mubr.bf16.gmra.mrb[104].mxu1 %v8332_v55 }
 0x168   :  { %1187 = vmatprep.mubr.bf16.mxu0 %v9650_v19  ;;  %1860 = vmatprep.mubr.bf16.mxu1 %v9650_v19 }
 0x16a   :  { %v919_v63 = vpop.f32.mrb[0].mxu0  ;;  %v1592_v16 = vpop.f32.mrb[0].mxu1 }
 0x16b   :  { %v921_v20 = vpop.f32.mrb[1].mxu0  ;;  %v1594_v21 = vpop.f32.mrb[1].mxu1  ;;  %v920_v25 = vadd.f32 %v919_v63, %v9971_v61  ;;  %v1593_v26 = vadd.f32 %v1592_v16, %v9975_v62 }
 0x16c   :  { %v923_v23 = vpop.f32.mrb[2].mxu0  ;;  %v1596_v24 = vpop.f32.mrb[2].mxu1  ;;  %v922_v31 = vadd.f32 %v921_v20, %v9979_v17  ;;  %v1595_v32 = vadd.f32 %v1594_v21, %v9983_v18 }
 0x16d   :  { %v924_v27 = vadd.f32 %v923_v23, %v9971_v61  ;;  %v1597_v28 = vadd.f32 %v1596_v24, %v9975_v62  ;;  %v925_v29 = vpop.f32.mrb[3].mxu0  ;;  %v1598_v30 = vpop.f32.mrb[3].mxu1 }
 0x16e   :  { %v926_v33 = vadd.f32 %v925_v29, %v9979_v17  ;;  %v1599_v34 = vadd.f32 %v1598_v30, %v9983_v18 }
 0x16f   :  { %v2231_v35 = vpack.c.bf16 %v924_v27, %v920_v25  ;;  %v2233_v36 = vpack.c.bf16 %v1597_v28, %v1593_v26  ;;  %1188 = vmatmul.mubr.bf16.gmra.mrb[108].mxu0 %v8333_v22  ;;  %1861 = vmatmul.mubr.bf16.gmra.mrb[108].mxu1 %v8333_v22  ;;  %v8335_v26 = vld [vmem:[#allocation6 + $0xe8] sm:$0xff]  }
 0x170   :  { %v2232_v37 = vpack.c.bf16 %v926_v33, %v922_v31  ;;  %v2234_v38 = vpack.c.bf16 %v1599_v34, %v1595_v32  ;;  %1197 = vmatprep.mubr.bf16.mxu0 %v9650_v19  ;;  %1870 = vmatprep.mubr.bf16.mxu1 %v9650_v19 }
 0x171   :  { %2487 = vst [vmem:[#allocation2] sm:$0xff] %v2231_v35  ;;  %2489 = vst [vmem:[#allocation2 + $0x10] sm:$0xff] %v2233_v36 }
 0x172   :  { %2488 = vst [vmem:[#allocation2 + $0x8] sm:$0xff] %v2232_v37  ;;  %2490 = vst [vmem:[#allocation2 + $0x18] sm:$0xff] %v2234_v38  ;;  %v929_v39 = vpop.f32.mrb[4].mxu0  ;;  %v1602_v40 = vpop.f32.mrb[4].mxu1 }
 0x173   :  { %v931_v41 = vpop.f32.mrb[5].mxu0  ;;  %v1604_v42 = vpop.f32.mrb[5].mxu1  ;;  %v930_v46 = vadd.f32 %v929_v39, %v9971_v61  ;;  %v1603_v47 = vadd.f32 %v1602_v40, %v9975_v62 }
 0x174   :  { %v933_v44 = vpop.f32.mrb[6].mxu0  ;;  %v1606_v45 = vpop.f32.mrb[6].mxu1  ;;  %v932_v52 = vadd.f32 %v931_v41, %v9979_v17  ;;  %v1605_v53 = vadd.f32 %v1604_v42, %v9983_v18 }
 0x175   :  { %v934_v48 = vadd.f32 %v933_v44, %v9971_v61  ;;  %v1607_v49 = vadd.f32 %v1606_v45, %v9975_v62  ;;  %v935_v50 = vpop.f32.mrb[7].mxu0  ;;  %v1608_v51 = vpop.f32.mrb[7].mxu1 }
 0x176   :  { %v936_v55 = vadd.f32 %v935_v50, %v9979_v17  ;;  %v1609_v58 = vadd.f32 %v1608_v51, %v9983_v18 }
 0x177   :  { %v2235_v63 = vpack.c.bf16 %v934_v48, %v930_v46  ;;  %v2237_v16 = vpack.c.bf16 %v1607_v49, %v1603_v47  ;;  %1198 = vmatmul.mubr.bf16.gmra.mrb[112].mxu0 %v8334_v43  ;;  %1871 = vmatmul.mubr.bf16.gmra.mrb[112].mxu1 %v8334_v43  ;;  %v8336_v47 = vld [vmem:[#allocation6 + $0xf0] sm:$0xff]  }
 0x178   :  { %v2236_v20 = vpack.c.bf16 %v936_v55, %v932_v52  ;;  %v2238_v21 = vpack.c.bf16 %v1609_v58, %v1605_v53  ;;  %1207 = vmatprep.mubr.bf16.mxu0 %v9650_v19  ;;  %1880 = vmatprep.mubr.bf16.mxu1 %v9650_v19 }
 0x179   :  { %2491 = vst [vmem:[#allocation2 + $0x20] sm:$0xff] %v2235_v63  ;;  %2493 = vst [vmem:[#allocation2 + $0x30] sm:$0xff] %v2237_v16 }
 0x17a   :  { %2492 = vst [vmem:[#allocation2 + $0x28] sm:$0xff] %v2236_v20  ;;  %2494 = vst [vmem:[#allocation2 + $0x38] sm:$0xff] %v2238_v21  ;;  %v939_v22 = vpop.f32.mrb[8].mxu0  ;;  %v1612_v23 = vpop.f32.mrb[8].mxu1 }
 0x17b   :  { %v941_v24 = vpop.f32.mrb[9].mxu0  ;;  %v1614_v25 = vpop.f32.mrb[9].mxu1  ;;  %v940_v29 = vadd.f32 %v939_v22, %v9971_v61  ;;  %v1613_v30 = vadd.f32 %v1612_v23, %v9975_v62 }
 0x17c   :  { %v943_v27 = vpop.f32.mrb[10].mxu0  ;;  %v1616_v28 = vpop.f32.mrb[10].mxu1  ;;  %v942_v35 = vadd.f32 %v941_v24, %v9979_v17  ;;  %v1615_v36 = vadd.f32 %v1614_v25, %v9983_v18 }
 0x17d   :  { %v944_v31 = vadd.f32 %v943_v27, %v9971_v61  ;;  %v1617_v32 = vadd.f32 %v1616_v28, %v9975_v62  ;;  %v945_v33 = vpop.f32.mrb[11].mxu0  ;;  %v1618_v34 = vpop.f32.mrb[11].mxu1 }
 0x17e   :  { %v946_v37 = vadd.f32 %v945_v33, %v9979_v17  ;;  %v1619_v38 = vadd.f32 %v1618_v34, %v9983_v18 }
 0x17f   :  { %v2239_v39 = vpack.c.bf16 %v944_v31, %v940_v29  ;;  %v2241_v40 = vpack.c.bf16 %v1617_v32, %v1613_v30  ;;  %1208 = vmatmul.mubr.bf16.gmra.mrb[116].mxu0 %v8335_v26  ;;  %1881 = vmatmul.mubr.bf16.gmra.mrb[116].mxu1 %v8335_v26  ;;  %v8337_v30 = vld [vmem:[#allocation6 + $0xf8] sm:$0xff]  }
 0x180   :  { %v2240_v41 = vpack.c.bf16 %v946_v37, %v942_v35  ;;  %v2242_v42 = vpack.c.bf16 %v1619_v38, %v1615_v36  ;;  %1217 = vmatprep.mubr.bf16.mxu0 %v9650_v19  ;;  %1890 = vmatprep.mubr.bf16.mxu1 %v9650_v19 }
 0x181   :  { %2495 = vst [vmem:[#allocation2 + $0x40] sm:$0xff] %v2239_v39  ;;  %2497 = vst [vmem:[#allocation2 + $0x50] sm:$0xff] %v2241_v40 }
 0x182   :  { %2496 = vst [vmem:[#allocation2 + $0x48] sm:$0xff] %v2240_v41  ;;  %2498 = vst [vmem:[#allocation2 + $0x58] sm:$0xff] %v2242_v42  ;;  %v949_v43 = vpop.f32.mrb[12].mxu0  ;;  %v1622_v44 = vpop.f32.mrb[12].mxu1 }
 0x183   :  { %v951_v45 = vpop.f32.mrb[13].mxu0  ;;  %v1624_v46 = vpop.f32.mrb[13].mxu1  ;;  %v950_v50 = vadd.f32 %v949_v43, %v9971_v61  ;;  %v1623_v51 = vadd.f32 %v1622_v44, %v9975_v62 }
 0x184   :  { %v953_v48 = vpop.f32.mrb[14].mxu0  ;;  %v1626_v49 = vpop.f32.mrb[14].mxu1  ;;  %v952_v63 = vadd.f32 %v951_v45, %v9979_v17  ;;  %v1625_v16 = vadd.f32 %v1624_v46, %v9983_v18 }
 0x185   :  { %v954_v52 = vadd.f32 %v953_v48, %v9971_v61  ;;  %v1627_v53 = vadd.f32 %v1626_v49, %v9975_v62  ;;  %v955_v55 = vpop.f32.mrb[15].mxu0  ;;  %v1628_v58 = vpop.f32.mrb[15].mxu1 }
 0x186   :  { %v956_v20 = vadd.f32 %v955_v55, %v9979_v17  ;;  %v1629_v21 = vadd.f32 %v1628_v58, %v9983_v18 }
 0x187   :  { %v2243_v22 = vpack.c.bf16 %v954_v52, %v950_v50  ;;  %v2245_v23 = vpack.c.bf16 %v1627_v53, %v1623_v51  ;;  %1218 = vmatmul.mubr.bf16.gmra.mrb[120].mxu0 %v8336_v47  ;;  %1891 = vmatmul.mubr.bf16.gmra.mrb[120].mxu1 %v8336_v47  ;;  %v8338_v51 = vld [vmem:[#allocation6 + $0x100] sm:$0xff]  }
 0x188   :  { %v2244_v24 = vpack.c.bf16 %v956_v20, %v952_v63  ;;  %v2246_v25 = vpack.c.bf16 %v1629_v21, %v1625_v16  ;;  %1227 = vmatprep.mubr.bf16.mxu0 %v9650_v19  ;;  %1900 = vmatprep.mubr.bf16.mxu1 %v9650_v19 }
 0x189   :  { %2499 = vst [vmem:[#allocation2 + $0x60] sm:$0xff] %v2243_v22  ;;  %2501 = vst [vmem:[#allocation2 + $0x70] sm:$0xff] %v2245_v23 }
 0x18a   :  { %2500 = vst [vmem:[#allocation2 + $0x68] sm:$0xff] %v2244_v24  ;;  %2502 = vst [vmem:[#allocation2 + $0x78] sm:$0xff] %v2246_v25  ;;  %v959_v26 = vpop.f32.mrb[16].mxu0  ;;  %v1632_v27 = vpop.f32.mrb[16].mxu1 }
 0x18b   :  { %v961_v28 = vpop.f32.mrb[17].mxu0  ;;  %v1634_v29 = vpop.f32.mrb[17].mxu1  ;;  %v960_v33 = vadd.f32 %v959_v26, %v9971_v61  ;;  %v1633_v34 = vadd.f32 %v1632_v27, %v9975_v62 }
 0x18c   :  { %v963_v31 = vpop.f32.mrb[18].mxu0  ;;  %v1636_v32 = vpop.f32.mrb[18].mxu1  ;;  %v962_v39 = vadd.f32 %v961_v28, %v9979_v17  ;;  %v1635_v40 = vadd.f32 %v1634_v29, %v9983_v18 }
 0x18d   :  { %v964_v35 = vadd.f32 %v963_v31, %v9971_v61  ;;  %v1637_v36 = vadd.f32 %v1636_v32, %v9975_v62  ;;  %v965_v37 = vpop.f32.mrb[19].mxu0  ;;  %v1638_v38 = vpop.f32.mrb[19].mxu1 }
 0x18e   :  { %v966_v41 = vadd.f32 %v965_v37, %v9979_v17  ;;  %v1639_v42 = vadd.f32 %v1638_v38, %v9983_v18  ;;  %v8370_v37 = vld [vmem:[#allocation12 + $0xc8] ss:$16 sps:$4 sm:$0xff]   ;;  %v8372_v38 = vld [vmem:[#allocation12 + $0xcc] ss:$16 sps:$4 sm:$0xff]  }
 0x18f   :  { %v2247_v43 = vpack.c.bf16 %v964_v35, %v960_v33  ;;  %v2249_v44 = vpack.c.bf16 %v1637_v36, %v1633_v34  ;;  %1228 = vmatmul.mubr.bf16.gmra.mrb[124].mxu0 %v8337_v30  ;;  %1901 = vmatmul.mubr.bf16.gmra.mrb[124].mxu1 %v8337_v30  ;;  %v8345_v30 = vld [vmem:[#allocation6 + $0x108] sm:$0xff]   ;;  %v8367_v33 = vld [vmem:[#allocation12 + $0xc0] ss:$16 sps:$4 sm:$0xff]   ;;  %v8369_v34 = vld [vmem:[#allocation12 + $0xc4] ss:$16 sps:$4 sm:$0xff]  }
 0x190   :  { %v2248_v45 = vpack.c.bf16 %v966_v41, %v962_v39  ;;  %v2250_v46 = vpack.c.bf16 %v1639_v42, %v1635_v40  ;;  %1237 = vmatprep.mubr.bf16.mxu0 %v9650_v19  ;;  %1910 = vmatprep.mubr.bf16.mxu1 %v9650_v19 }
 0x191   :  { %2503 = vst [vmem:[#allocation2 + $0x80] sm:$0xff] %v2247_v43  ;;  %2505 = vst [vmem:[#allocation2 + $0x90] sm:$0xff] %v2249_v44  ;;  %2969 = vmatprep.subr.bf16.mxu0 %v8369_v34  ;;  %3642 = vmatprep.subr.bf16.mxu1 %v8372_v38 }
 0x192   :  { %2504 = vst [vmem:[#allocation2 + $0x88] sm:$0xff] %v2248_v45  ;;  %2506 = vst [vmem:[#allocation2 + $0x98] sm:$0xff] %v2250_v46  ;;  %v969_v47 = vpop.f32.mrb[20].mxu0  ;;  %v1642_v48 = vpop.f32.mrb[20].mxu1  ;;  %2970 = vmatpush1.bf16.msra.mxu0 %v8367_v33  ;;  %3643 = vmatpush1.bf16.msra.mxu1 %v8370_v37 }
 0x193   :  { %v971_v49 = vpop.f32.mrb[21].mxu0  ;;  %v1644_v50 = vpop.f32.mrb[21].mxu1  ;;  %v970_v55 = vadd.f32 %v969_v47, %v9971_v61  ;;  %v1643_v58 = vadd.f32 %v1642_v48, %v9975_v62 }
 0x194   :  { %v973_v52 = vpop.f32.mrb[22].mxu0  ;;  %v1646_v53 = vpop.f32.mrb[22].mxu1  ;;  %v972_v22 = vadd.f32 %v971_v49, %v9979_v17  ;;  %v1645_v23 = vadd.f32 %v1644_v50, %v9983_v18 }
 0x195   :  { %v974_v63 = vadd.f32 %v973_v52, %v9971_v61  ;;  %v1647_v16 = vadd.f32 %v1646_v53, %v9975_v62  ;;  %v975_v20 = vpop.f32.mrb[23].mxu0  ;;  %v1648_v21 = vpop.f32.mrb[23].mxu1 }
 0x196   :  { %v976_v24 = vadd.f32 %v975_v20, %v9979_v17  ;;  %v1649_v25 = vadd.f32 %v1648_v21, %v9983_v18  ;;  %v8346_v21 = vld [vmem:[#allocation6 + $0x110] sm:$0xff]  }
 0x197   :  { %v2251_v26 = vpack.c.bf16 %v974_v63, %v970_v55  ;;  %v2253_v27 = vpack.c.bf16 %v1647_v16, %v1643_v58  ;;  %1238 = vmatmul.mubr.bf16.gmra.mrb[128].mxu0 %v8338_v51  ;;  %1911 = vmatmul.mubr.bf16.gmra.mrb[128].mxu1 %v8338_v51 }
 0x198   :  { %v2252_v28 = vpack.c.bf16 %v976_v24, %v972_v22  ;;  %v2254_v29 = vpack.c.bf16 %v1649_v25, %v1645_v23  ;;  %1247 = vmatprep.mubr.bf16.mxu0 %v9650_v19  ;;  %1920 = vmatprep.mubr.bf16.mxu1 %v9650_v19 }
 0x199   :  { %2507 = vst [vmem:[#allocation2 + $0xa0] sm:$0xff] %v2251_v26  ;;  %2509 = vst [vmem:[#allocation2 + $0xb0] sm:$0xff] %v2253_v27 }
 0x19a   :  { %2508 = vst [vmem:[#allocation2 + $0xa8] sm:$0xff] %v2252_v28  ;;  %2510 = vst [vmem:[#allocation2 + $0xb8] sm:$0xff] %v2254_v29  ;;  %v979_v31 = vpop.f32.mrb[24].mxu0  ;;  %v1652_v32 = vpop.f32.mrb[24].mxu1 }
 0x19b   :  { %v981_v35 = vpop.f32.mrb[25].mxu0  ;;  %v1654_v36 = vpop.f32.mrb[25].mxu1  ;;  %v980_v39 = vadd.f32 %v979_v31, %v9971_v61  ;;  %v1653_v42 = vadd.f32 %v1652_v32, %v9975_v62 }
 0x19c   :  { %v983_v40 = vpop.f32.mrb[26].mxu0  ;;  %v1656_v41 = vpop.f32.mrb[26].mxu1  ;;  %v982_v47 = vadd.f32 %v981_v35, %v9979_v17  ;;  %v1655_v48 = vadd.f32 %v1654_v36, %v9983_v18 }
 0x19d   :  { %v984_v43 = vadd.f32 %v983_v40, %v9971_v61  ;;  %v1657_v44 = vadd.f32 %v1656_v41, %v9975_v62  ;;  %v985_v45 = vpop.f32.mrb[27].mxu0  ;;  %v1658_v46 = vpop.f32.mrb[27].mxu1 }
 0x19e   :  { %v986_v49 = vadd.f32 %v985_v45, %v9979_v17  ;;  %v1659_v50 = vadd.f32 %v1658_v46, %v9983_v18 }
 0x19f   :  { %v2255_v51 = vpack.c.bf16 %v984_v43, %v980_v39  ;;  %v2257_v52 = vpack.c.bf16 %v1657_v44, %v1653_v42  ;;  %1248 = vmatmul.mubr.bf16.gmra.mrb[132].mxu0 %v8345_v30  ;;  %1921 = vmatmul.mubr.bf16.gmra.mrb[132].mxu1 %v8345_v30  ;;  %v8347_v42 = vld [vmem:[#allocation6 + $0x118] sm:$0xff]  }
 0x1a0   :  { %v2256_v53 = vpack.c.bf16 %v986_v49, %v982_v47  ;;  %v2258_v55 = vpack.c.bf16 %v1659_v50, %v1655_v48  ;;  %1257 = vmatprep.mubr.bf16.mxu0 %v9650_v19  ;;  %1930 = vmatprep.mubr.bf16.mxu1 %v9650_v19 }
 0x1a1   :  { %2511 = vst [vmem:[#allocation2 + $0xc0] sm:$0xff] %v2255_v51  ;;  %2513 = vst [vmem:[#allocation2 + $0xd0] sm:$0xff] %v2257_v52 }
 0x1a2   :  { %2512 = vst [vmem:[#allocation2 + $0xc8] sm:$0xff] %v2256_v53  ;;  %2514 = vst [vmem:[#allocation2 + $0xd8] sm:$0xff] %v2258_v55  ;;  %v989_v58 = vpop.f32.mrb[28].mxu0  ;;  %v1662_v63 = vpop.f32.mrb[28].mxu1 }
 0x1a3   :  { %v991_v16 = vpop.f32.mrb[29].mxu0  ;;  %v1664_v20 = vpop.f32.mrb[29].mxu1  ;;  %v990_v24 = vadd.f32 %v989_v58, %v9971_v61  ;;  %v1663_v25 = vadd.f32 %v1662_v63, %v9975_v62 }
 0x1a4   :  { %v993_v22 = vpop.f32.mrb[30].mxu0  ;;  %v1666_v23 = vpop.f32.mrb[30].mxu1  ;;  %v992_v30 = vadd.f32 %v991_v16, %v9979_v17  ;;  %v1665_v31 = vadd.f32 %v1664_v20, %v9983_v18 }
 0x1a5   :  { %v994_v26 = vadd.f32 %v993_v22, %v9971_v61  ;;  %v1667_v27 = vadd.f32 %v1666_v23, %v9975_v62  ;;  %v995_v28 = vpop.f32.mrb[31].mxu0  ;;  %v1668_v29 = vpop.f32.mrb[31].mxu1 }
 0x1a6   :  { %v996_v32 = vadd.f32 %v995_v28, %v9979_v17  ;;  %v1669_v33 = vadd.f32 %v1668_v29, %v9983_v18 }
 0x1a7   :  { %v2259_v34 = vpack.c.bf16 %v994_v26, %v990_v24  ;;  %v2261_v35 = vpack.c.bf16 %v1667_v27, %v1663_v25  ;;  %1258 = vmatmul.mubr.bf16.gmra.mrb[136].mxu0 %v8346_v21  ;;  %1931 = vmatmul.mubr.bf16.gmra.mrb[136].mxu1 %v8346_v21  ;;  %v8348_v25 = vld [vmem:[#allocation6 + $0x120] sm:$0xff]  }
 0x1a8   :  { %v2260_v36 = vpack.c.bf16 %v996_v32, %v992_v30  ;;  %v2262_v37 = vpack.c.bf16 %v1669_v33, %v1665_v31  ;;  %1267 = vmatprep.mubr.bf16.mxu0 %v9650_v19  ;;  %1940 = vmatprep.mubr.bf16.mxu1 %v9650_v19 }
 0x1a9   :  { %2515 = vst [vmem:[#allocation2 + $0xe0] sm:$0xff] %v2259_v34  ;;  %2517 = vst [vmem:[#allocation2 + $0xf0] sm:$0xff] %v2261_v35 }
 0x1aa   :  { %2516 = vst [vmem:[#allocation2 + $0xe8] sm:$0xff] %v2260_v36  ;;  %2518 = vst [vmem:[#allocation2 + $0xf8] sm:$0xff] %v2262_v37  ;;  %v999_v38 = vpop.f32.mrb[32].mxu0  ;;  %v1672_v39 = vpop.f32.mrb[32].mxu1 }
 0x1ab   :  { %v1001_v40 = vpop.f32.mrb[33].mxu0  ;;  %v1674_v41 = vpop.f32.mrb[33].mxu1  ;;  %v1000_v45 = vadd.f32 %v999_v38, %v9971_v61  ;;  %v1673_v46 = vadd.f32 %v1672_v39, %v9975_v62 }
 0x1ac   :  { %v1003_v43 = vpop.f32.mrb[34].mxu0  ;;  %v1676_v44 = vpop.f32.mrb[34].mxu1  ;;  %v1002_v51 = vadd.f32 %v1001_v40, %v9979_v17  ;;  %v1675_v52 = vadd.f32 %v1674_v41, %v9983_v18 }
 0x1ad   :  { %v1004_v47 = vadd.f32 %v1003_v43, %v9971_v61  ;;  %v1677_v48 = vadd.f32 %v1676_v44, %v9975_v62  ;;  %v1005_v49 = vpop.f32.mrb[35].mxu0  ;;  %v1678_v50 = vpop.f32.mrb[35].mxu1 }
 0x1ae   :  { %v1006_v53 = vadd.f32 %v1005_v49, %v9979_v17  ;;  %v1679_v55 = vadd.f32 %v1678_v50, %v9983_v18 }
 0x1af   :  { %v2263_v58 = vpack.c.bf16 %v1004_v47, %v1000_v45  ;;  %v2265_v63 = vpack.c.bf16 %v1677_v48, %v1673_v46  ;;  %1268 = vmatmul.mubr.bf16.gmra.mrb[140].mxu0 %v8347_v42  ;;  %1941 = vmatmul.mubr.bf16.gmra.mrb[140].mxu1 %v8347_v42  ;;  %v8349_v46 = vld [vmem:[#allocation6 + $0x128] sm:$0xff]  }
 0x1b0   :  { %v2264_v16 = vpack.c.bf16 %v1006_v53, %v1002_v51  ;;  %v2266_v20 = vpack.c.bf16 %v1679_v55, %v1675_v52  ;;  %1277 = vmatprep.mubr.bf16.mxu0 %v9650_v19  ;;  %1950 = vmatprep.mubr.bf16.mxu1 %v9650_v19 }
 0x1b1   :  { %2519 = vst [vmem:[#allocation2 + $0x100] sm:$0xff] %v2263_v58  ;;  %2521 = vst [vmem:[#allocation2 + $0x110] sm:$0xff] %v2265_v63 }
 0x1b2   :  { %2520 = vst [vmem:[#allocation2 + $0x108] sm:$0xff] %v2264_v16  ;;  %2522 = vst [vmem:[#allocation2 + $0x118] sm:$0xff] %v2266_v20  ;;  %v1009_v21 = vpop.f32.mrb[36].mxu0  ;;  %v1682_v22 = vpop.f32.mrb[36].mxu1 }
 0x1b3   :  { %v1011_v23 = vpop.f32.mrb[37].mxu0  ;;  %v1684_v24 = vpop.f32.mrb[37].mxu1  ;;  %v1010_v28 = vadd.f32 %v1009_v21, %v9971_v61  ;;  %v1683_v29 = vadd.f32 %v1682_v22, %v9975_v62 }
 0x1b4   :  { %v1013_v26 = vpop.f32.mrb[38].mxu0  ;;  %v1686_v27 = vpop.f32.mrb[38].mxu1  ;;  %v1012_v34 = vadd.f32 %v1011_v23, %v9979_v17  ;;  %v1685_v35 = vadd.f32 %v1684_v24, %v9983_v18 }
 0x1b5   :  { %v1014_v30 = vadd.f32 %v1013_v26, %v9971_v61  ;;  %v1687_v31 = vadd.f32 %v1686_v27, %v9975_v62  ;;  %v1015_v32 = vpop.f32.mrb[39].mxu0  ;;  %v1688_v33 = vpop.f32.mrb[39].mxu1 }
 0x1b6   :  { %v1016_v36 = vadd.f32 %v1015_v32, %v9979_v17  ;;  %v1689_v37 = vadd.f32 %v1688_v33, %v9983_v18 }
 0x1b7   :  { %v2267_v38 = vpack.c.bf16 %v1014_v30, %v1010_v28  ;;  %v2269_v39 = vpack.c.bf16 %v1687_v31, %v1683_v29  ;;  %1278 = vmatmul.mubr.bf16.gmra.mrb[144].mxu0 %v8348_v25  ;;  %1951 = vmatmul.mubr.bf16.gmra.mrb[144].mxu1 %v8348_v25  ;;  %v8350_v29 = vld [vmem:[#allocation6 + $0x130] sm:$0xff]  }
 0x1b8   :  { %v2268_v40 = vpack.c.bf16 %v1016_v36, %v1012_v34  ;;  %v2270_v41 = vpack.c.bf16 %v1689_v37, %v1685_v35  ;;  %1287 = vmatprep.mubr.bf16.mxu0 %v9650_v19  ;;  %1960 = vmatprep.mubr.bf16.mxu1 %v9650_v19 }
 0x1b9   :  { %2523 = vst [vmem:[#allocation2 + $0x120] sm:$0xff] %v2267_v38  ;;  %2525 = vst [vmem:[#allocation2 + $0x130] sm:$0xff] %v2269_v39 }
 0x1ba   :  { %2524 = vst [vmem:[#allocation2 + $0x128] sm:$0xff] %v2268_v40  ;;  %2526 = vst [vmem:[#allocation2 + $0x138] sm:$0xff] %v2270_v41  ;;  %v1019_v42 = vpop.f32.mrb[40].mxu0  ;;  %v1692_v43 = vpop.f32.mrb[40].mxu1 }
 0x1bb   :  { %v1021_v44 = vpop.f32.mrb[41].mxu0  ;;  %v1694_v45 = vpop.f32.mrb[41].mxu1  ;;  %v1020_v49 = vadd.f32 %v1019_v42, %v9971_v61  ;;  %v1693_v50 = vadd.f32 %v1692_v43, %v9975_v62 }
 0x1bc   :  { %v1023_v47 = vpop.f32.mrb[42].mxu0  ;;  %v1696_v48 = vpop.f32.mrb[42].mxu1  ;;  %v1022_v58 = vadd.f32 %v1021_v44, %v9979_v17  ;;  %v1695_v63 = vadd.f32 %v1694_v45, %v9983_v18 }
 0x1bd   :  { %v1024_v51 = vadd.f32 %v1023_v47, %v9971_v61  ;;  %v1697_v52 = vadd.f32 %v1696_v48, %v9975_v62  ;;  %v1025_v53 = vpop.f32.mrb[43].mxu0  ;;  %v1698_v55 = vpop.f32.mrb[43].mxu1 }
 0x1be   :  { %v1026_v16 = vadd.f32 %v1025_v53, %v9979_v17  ;;  %v1699_v20 = vadd.f32 %v1698_v55, %v9983_v18 }
 0x1bf   :  { %v2271_v21 = vpack.c.bf16 %v1024_v51, %v1020_v49  ;;  %v2273_v22 = vpack.c.bf16 %v1697_v52, %v1693_v50  ;;  %1288 = vmatmul.mubr.bf16.gmra.mrb[148].mxu0 %v8349_v46  ;;  %1961 = vmatmul.mubr.bf16.gmra.mrb[148].mxu1 %v8349_v46  ;;  %v8351_v50 = vld [vmem:[#allocation6 + $0x138] sm:$0xff]  }
 0x1c0   :  { %v2272_v23 = vpack.c.bf16 %v1026_v16, %v1022_v58  ;;  %v2274_v24 = vpack.c.bf16 %v1699_v20, %v1695_v63  ;;  %1297 = vmatprep.mubr.bf16.mxu0 %v9650_v19  ;;  %1970 = vmatprep.mubr.bf16.mxu1 %v9650_v19 }
 0x1c1   :  { %2527 = vst [vmem:[#allocation2 + $0x140] sm:$0xff] %v2271_v21  ;;  %2529 = vst [vmem:[#allocation2 + $0x150] sm:$0xff] %v2273_v22 }
 0x1c2   :  { %2528 = vst [vmem:[#allocation2 + $0x148] sm:$0xff] %v2272_v23  ;;  %2530 = vst [vmem:[#allocation2 + $0x158] sm:$0xff] %v2274_v24  ;;  %v1029_v25 = vpop.f32.mrb[44].mxu0  ;;  %v1702_v26 = vpop.f32.mrb[44].mxu1 }
 0x1c3   :  { %v1031_v27 = vpop.f32.mrb[45].mxu0  ;;  %v1704_v28 = vpop.f32.mrb[45].mxu1  ;;  %v1030_v32 = vadd.f32 %v1029_v25, %v9971_v61  ;;  %v1703_v33 = vadd.f32 %v1702_v26, %v9975_v62 }
 0x1c4   :  { %v1033_v30 = vpop.f32.mrb[46].mxu0  ;;  %v1706_v31 = vpop.f32.mrb[46].mxu1  ;;  %v1032_v38 = vadd.f32 %v1031_v27, %v9979_v17  ;;  %v1705_v39 = vadd.f32 %v1704_v28, %v9983_v18 }
 0x1c5   :  { %v1034_v34 = vadd.f32 %v1033_v30, %v9971_v61  ;;  %v1707_v35 = vadd.f32 %v1706_v31, %v9975_v62  ;;  %v1035_v36 = vpop.f32.mrb[47].mxu0  ;;  %v1708_v37 = vpop.f32.mrb[47].mxu1 }
 0x1c6   :  { %v1036_v40 = vadd.f32 %v1035_v36, %v9979_v17  ;;  %v1709_v41 = vadd.f32 %v1708_v37, %v9983_v18 }
 0x1c7   :  { %v2275_v42 = vpack.c.bf16 %v1034_v34, %v1030_v32  ;;  %v2277_v43 = vpack.c.bf16 %v1707_v35, %v1703_v33  ;;  %1298 = vmatmul.mubr.bf16.gmra.mrb[152].mxu0 %v8350_v29  ;;  %1971 = vmatmul.mubr.bf16.gmra.mrb[152].mxu1 %v8350_v29  ;;  %v8352_v33 = vld [vmem:[#allocation6 + $0x140] sm:$0xff]  }
 0x1c8   :  { %v2276_v44 = vpack.c.bf16 %v1036_v40, %v1032_v38  ;;  %v2278_v45 = vpack.c.bf16 %v1709_v41, %v1705_v39  ;;  %1307 = vmatprep.mubr.bf16.mxu0 %v9650_v19  ;;  %1980 = vmatprep.mubr.bf16.mxu1 %v9650_v19 }
 0x1c9   :  { %2531 = vst [vmem:[#allocation2 + $0x160] sm:$0xff] %v2275_v42  ;;  %2533 = vst [vmem:[#allocation2 + $0x170] sm:$0xff] %v2277_v43 }
 0x1ca   :  { %2532 = vst [vmem:[#allocation2 + $0x168] sm:$0xff] %v2276_v44  ;;  %2534 = vst [vmem:[#allocation2 + $0x178] sm:$0xff] %v2278_v45  ;;  %v1039_v46 = vpop.f32.mrb[48].mxu0  ;;  %v1712_v47 = vpop.f32.mrb[48].mxu1 }
 0x1cb   :  { %v1041_v48 = vpop.f32.mrb[49].mxu0  ;;  %v1714_v49 = vpop.f32.mrb[49].mxu1  ;;  %v1040_v53 = vadd.f32 %v1039_v46, %v9971_v61  ;;  %v1713_v55 = vadd.f32 %v1712_v47, %v9975_v62 }
 0x1cc   :  { %v1043_v51 = vpop.f32.mrb[50].mxu0  ;;  %v1716_v52 = vpop.f32.mrb[50].mxu1  ;;  %v1042_v21 = vadd.f32 %v1041_v48, %v9979_v17  ;;  %v1715_v22 = vadd.f32 %v1714_v49, %v9983_v18 }
 0x1cd   :  { %v1044_v58 = vadd.f32 %v1043_v51, %v9971_v61  ;;  %v1717_v63 = vadd.f32 %v1716_v52, %v9975_v62  ;;  %v1045_v16 = vpop.f32.mrb[51].mxu0  ;;  %v1718_v20 = vpop.f32.mrb[51].mxu1 }
 0x1ce   :  { %v1046_v23 = vadd.f32 %v1045_v16, %v9979_v17  ;;  %v1719_v24 = vadd.f32 %v1718_v20, %v9983_v18  ;;  %v8384_v16 = vld [vmem:[#allocation12 + $0xe8] ss:$16 sps:$4 sm:$0xff]   ;;  %v8386_v20 = vld [vmem:[#allocation12 + $0xec] ss:$16 sps:$4 sm:$0xff]  }
 0x1cf   :  { %v2279_v25 = vpack.c.bf16 %v1044_v58, %v1040_v53  ;;  %v2281_v26 = vpack.c.bf16 %v1717_v63, %v1713_v55  ;;  %1308 = vmatmul.mubr.bf16.gmra.mrb[156].mxu0 %v8351_v50  ;;  %1981 = vmatmul.mubr.bf16.gmra.mrb[156].mxu1 %v8351_v50  ;;  %v8359_v50 = vld [vmem:[#allocation6 + $0x148] sm:$0xff]   ;;  %v8381_v53 = vld [vmem:[#allocation12 + $0xe0] ss:$16 sps:$4 sm:$0xff]   ;;  %v8383_v55 = vld [vmem:[#allocation12 + $0xe4] ss:$16 sps:$4 sm:$0xff]  }
 0x1d0   :  { %v2280_v27 = vpack.c.bf16 %v1046_v23, %v1042_v21  ;;  %v2282_v28 = vpack.c.bf16 %v1719_v24, %v1715_v22  ;;  %1317 = vmatprep.mubr.bf16.mxu0 %v9650_v19  ;;  %1990 = vmatprep.mubr.bf16.mxu1 %v9650_v19 }
 0x1d1   :  { %2535 = vst [vmem:[#allocation2 + $0x180] sm:$0xff] %v2279_v25  ;;  %2537 = vst [vmem:[#allocation2 + $0x190] sm:$0xff] %v2281_v26  ;;  %2971 = vmatprep.subr.bf16.mxu0 %v8383_v55  ;;  %3644 = vmatprep.subr.bf16.mxu1 %v8386_v20 }
 0x1d2   :  { %2536 = vst [vmem:[#allocation2 + $0x188] sm:$0xff] %v2280_v27  ;;  %2538 = vst [vmem:[#allocation2 + $0x198] sm:$0xff] %v2282_v28  ;;  %v1049_v29 = vpop.f32.mrb[52].mxu0  ;;  %v1722_v30 = vpop.f32.mrb[52].mxu1  ;;  %2972 = vmatpush1.bf16.msra.mxu0 %v8381_v53  ;;  %3645 = vmatpush1.bf16.msra.mxu1 %v8384_v16 }
 0x1d3   :  { %v1051_v31 = vpop.f32.mrb[53].mxu0  ;;  %v1724_v32 = vpop.f32.mrb[53].mxu1  ;;  %v1050_v36 = vadd.f32 %v1049_v29, %v9971_v61  ;;  %v1723_v37 = vadd.f32 %v1722_v30, %v9975_v62 }
 0x1d4   :  { %v1053_v34 = vpop.f32.mrb[54].mxu0  ;;  %v1726_v35 = vpop.f32.mrb[54].mxu1  ;;  %v1052_v42 = vadd.f32 %v1051_v31, %v9979_v17  ;;  %v1725_v43 = vadd.f32 %v1724_v32, %v9983_v18 }
 0x1d5   :  { %v1054_v38 = vadd.f32 %v1053_v34, %v9971_v61  ;;  %v1727_v39 = vadd.f32 %v1726_v35, %v9975_v62  ;;  %v1055_v40 = vpop.f32.mrb[55].mxu0  ;;  %v1728_v41 = vpop.f32.mrb[55].mxu1 }
 0x1d6   :  { %v1056_v44 = vadd.f32 %v1055_v40, %v9979_v17  ;;  %v1729_v45 = vadd.f32 %v1728_v41, %v9983_v18  ;;  %v8360_v41 = vld [vmem:[#allocation6 + $0x150] sm:$0xff]  }
 0x1d7   :  { %v2283_v46 = vpack.c.bf16 %v1054_v38, %v1050_v36  ;;  %v2285_v47 = vpack.c.bf16 %v1727_v39, %v1723_v37  ;;  %1318 = vmatmul.mubr.bf16.gmra.mrb[160].mxu0 %v8352_v33  ;;  %1991 = vmatmul.mubr.bf16.gmra.mrb[160].mxu1 %v8352_v33 }
 0x1d8   :  { %v2284_v48 = vpack.c.bf16 %v1056_v44, %v1052_v42  ;;  %v2286_v49 = vpack.c.bf16 %v1729_v45, %v1725_v43  ;;  %1327 = vmatprep.mubr.bf16.mxu0 %v9650_v19  ;;  %2000 = vmatprep.mubr.bf16.mxu1 %v9650_v19 }
 0x1d9   :  { %2539 = vst [vmem:[#allocation2 + $0x1a0] sm:$0xff] %v2283_v46  ;;  %2541 = vst [vmem:[#allocation2 + $0x1b0] sm:$0xff] %v2285_v47 }
 0x1da   :  { %2540 = vst [vmem:[#allocation2 + $0x1a8] sm:$0xff] %v2284_v48  ;;  %2542 = vst [vmem:[#allocation2 + $0x1b8] sm:$0xff] %v2286_v49  ;;  %v1059_v51 = vpop.f32.mrb[56].mxu0  ;;  %v1732_v52 = vpop.f32.mrb[56].mxu1 }
 0x1db   :  { %v1061_v58 = vpop.f32.mrb[57].mxu0  ;;  %v1734_v63 = vpop.f32.mrb[57].mxu1  ;;  %v1060_v21 = vadd.f32 %v1059_v51, %v9971_v61  ;;  %v1733_v24 = vadd.f32 %v1732_v52, %v9975_v62 }
 0x1dc   :  { %v1063_v22 = vpop.f32.mrb[58].mxu0  ;;  %v1736_v23 = vpop.f32.mrb[58].mxu1  ;;  %v1062_v29 = vadd.f32 %v1061_v58, %v9979_v17  ;;  %v1735_v30 = vadd.f32 %v1734_v63, %v9983_v18 }
 0x1dd   :  { %v1064_v25 = vadd.f32 %v1063_v22, %v9971_v61  ;;  %v1737_v26 = vadd.f32 %v1736_v23, %v9975_v62  ;;  %v1065_v27 = vpop.f32.mrb[59].mxu0  ;;  %v1738_v28 = vpop.f32.mrb[59].mxu1 }
 0x1de   :  { %v1066_v31 = vadd.f32 %v1065_v27, %v9979_v17  ;;  %v1739_v32 = vadd.f32 %v1738_v28, %v9983_v18 }
 0x1df   :  { %v2287_v33 = vpack.c.bf16 %v1064_v25, %v1060_v21  ;;  %v2289_v34 = vpack.c.bf16 %v1737_v26, %v1733_v24  ;;  %1328 = vmatmul.mubr.bf16.gmra.mrb[164].mxu0 %v8359_v50  ;;  %2001 = vmatmul.mubr.bf16.gmra.mrb[164].mxu1 %v8359_v50  ;;  %v8361_v24 = vld [vmem:[#allocation6 + $0x158] sm:$0xff]  }
 0x1e0   :  { %v2288_v35 = vpack.c.bf16 %v1066_v31, %v1062_v29  ;;  %v2290_v36 = vpack.c.bf16 %v1739_v32, %v1735_v30  ;;  %1337 = vmatprep.mubr.bf16.mxu0 %v9650_v19  ;;  %2010 = vmatprep.mubr.bf16.mxu1 %v9650_v19 }
 0x1e1   :  { %2543 = vst [vmem:[#allocation2 + $0x1c0] sm:$0xff] %v2287_v33  ;;  %2545 = vst [vmem:[#allocation2 + $0x1d0] sm:$0xff] %v2289_v34 }
 0x1e2   :  { %2544 = vst [vmem:[#allocation2 + $0x1c8] sm:$0xff] %v2288_v35  ;;  %2546 = vst [vmem:[#allocation2 + $0x1d8] sm:$0xff] %v2290_v36  ;;  %v1069_v37 = vpop.f32.mrb[60].mxu0  ;;  %v1742_v38 = vpop.f32.mrb[60].mxu1 }
 0x1e3   :  { %v1071_v39 = vpop.f32.mrb[61].mxu0  ;;  %v1744_v40 = vpop.f32.mrb[61].mxu1  ;;  %v1070_v44 = vadd.f32 %v1069_v37, %v9971_v61  ;;  %v1743_v45 = vadd.f32 %v1742_v38, %v9975_v62 }
 0x1e4   :  { %v1073_v42 = vpop.f32.mrb[62].mxu0  ;;  %v1746_v43 = vpop.f32.mrb[62].mxu1  ;;  %v1072_v50 = vadd.f32 %v1071_v39, %v9979_v17  ;;  %v1745_v51 = vadd.f32 %v1744_v40, %v9983_v18 }
 0x1e5   :  { %v1074_v46 = vadd.f32 %v1073_v42, %v9971_v61  ;;  %v1747_v47 = vadd.f32 %v1746_v43, %v9975_v62  ;;  %v1075_v48 = vpop.f32.mrb[63].mxu0  ;;  %v1748_v49 = vpop.f32.mrb[63].mxu1 }
 0x1e6   :  { %v1076_v52 = vadd.f32 %v1075_v48, %v9979_v17  ;;  %v1749_v53 = vadd.f32 %v1748_v49, %v9983_v18 }
 0x1e7   :  { %v2291_v55 = vpack.c.bf16 %v1074_v46, %v1070_v44  ;;  %v2293_v58 = vpack.c.bf16 %v1747_v47, %v1743_v45  ;;  %1338 = vmatmul.mubr.bf16.gmra.mrb[168].mxu0 %v8360_v41  ;;  %2011 = vmatmul.mubr.bf16.gmra.mrb[168].mxu1 %v8360_v41  ;;  %v8362_v45 = vld [vmem:[#allocation6 + $0x160] sm:$0xff]  }
 0x1e8   :  { %v2292_v63 = vpack.c.bf16 %v1076_v52, %v1072_v50  ;;  %v2294_v16 = vpack.c.bf16 %v1749_v53, %v1745_v51  ;;  %1347 = vmatprep.mubr.bf16.mxu0 %v9650_v19  ;;  %2020 = vmatprep.mubr.bf16.mxu1 %v9650_v19 }
 0x1e9   :  { %2547 = vst [vmem:[#allocation2 + $0x1e0] sm:$0xff] %v2291_v55  ;;  %2549 = vst [vmem:[#allocation2 + $0x1f0] sm:$0xff] %v2293_v58 }
 0x1ea   :  { %2548 = vst [vmem:[#allocation2 + $0x1e8] sm:$0xff] %v2292_v63  ;;  %2550 = vst [vmem:[#allocation2 + $0x1f8] sm:$0xff] %v2294_v16  ;;  %v1079_v20 = vpop.f32.mrb[64].mxu0  ;;  %v1752_v21 = vpop.f32.mrb[64].mxu1 }
 0x1eb   :  { %v1081_v22 = vpop.f32.mrb[65].mxu0  ;;  %v1754_v23 = vpop.f32.mrb[65].mxu1  ;;  %v1080_v27 = vadd.f32 %v1079_v20, %v9971_v61  ;;  %v1753_v28 = vadd.f32 %v1752_v21, %v9975_v62 }
 0x1ec   :  { %v1083_v25 = vpop.f32.mrb[66].mxu0  ;;  %v1756_v26 = vpop.f32.mrb[66].mxu1  ;;  %v1082_v33 = vadd.f32 %v1081_v22, %v9979_v17  ;;  %v1755_v34 = vadd.f32 %v1754_v23, %v9983_v18 }
 0x1ed   :  { %v1084_v29 = vadd.f32 %v1083_v25, %v9971_v61  ;;  %v1757_v30 = vadd.f32 %v1756_v26, %v9975_v62  ;;  %v1085_v31 = vpop.f32.mrb[67].mxu0  ;;  %v1758_v32 = vpop.f32.mrb[67].mxu1 }
 0x1ee   :  { %v1086_v35 = vadd.f32 %v1085_v31, %v9979_v17  ;;  %v1759_v36 = vadd.f32 %v1758_v32, %v9983_v18 }
 0x1ef   :  { %v2295_v37 = vpack.c.bf16 %v1084_v29, %v1080_v27  ;;  %v2297_v38 = vpack.c.bf16 %v1757_v30, %v1753_v28  ;;  %1348 = vmatmul.mubr.bf16.gmra.mrb[172].mxu0 %v8361_v24  ;;  %2021 = vmatmul.mubr.bf16.gmra.mrb[172].mxu1 %v8361_v24  ;;  %v8363_v28 = vld [vmem:[#allocation6 + $0x168] sm:$0xff]  }
 0x1f0   :  { %v2296_v39 = vpack.c.bf16 %v1086_v35, %v1082_v33  ;;  %v2298_v40 = vpack.c.bf16 %v1759_v36, %v1755_v34  ;;  %1357 = vmatprep.mubr.bf16.mxu0 %v9650_v19  ;;  %2030 = vmatprep.mubr.bf16.mxu1 %v9650_v19 }
 0x1f1   :  { %2551 = vst [vmem:[#allocation2 + $0x200] sm:$0xff] %v2295_v37  ;;  %2553 = vst [vmem:[#allocation2 + $0x210] sm:$0xff] %v2297_v38 }
 0x1f2   :  { %2552 = vst [vmem:[#allocation2 + $0x208] sm:$0xff] %v2296_v39  ;;  %2554 = vst [vmem:[#allocation2 + $0x218] sm:$0xff] %v2298_v40  ;;  %v1089_v41 = vpop.f32.mrb[68].mxu0  ;;  %v1762_v42 = vpop.f32.mrb[68].mxu1 }
 0x1f3   :  { %v1091_v43 = vpop.f32.mrb[69].mxu0  ;;  %v1764_v44 = vpop.f32.mrb[69].mxu1  ;;  %v1090_v48 = vadd.f32 %v1089_v41, %v9971_v61  ;;  %v1763_v49 = vadd.f32 %v1762_v42, %v9975_v62 }
 0x1f4   :  { %v1093_v46 = vpop.f32.mrb[70].mxu0  ;;  %v1766_v47 = vpop.f32.mrb[70].mxu1  ;;  %v1092_v55 = vadd.f32 %v1091_v43, %v9979_v17  ;;  %v1765_v58 = vadd.f32 %v1764_v44, %v9983_v18 }
 0x1f5   :  { %v1094_v50 = vadd.f32 %v1093_v46, %v9971_v61  ;;  %v1767_v51 = vadd.f32 %v1766_v47, %v9975_v62  ;;  %v1095_v52 = vpop.f32.mrb[71].mxu0  ;;  %v1768_v53 = vpop.f32.mrb[71].mxu1 }
 0x1f6   :  { %v1096_v63 = vadd.f32 %v1095_v52, %v9979_v17  ;;  %v1769_v16 = vadd.f32 %v1768_v53, %v9983_v18 }
 0x1f7   :  { %v2299_v20 = vpack.c.bf16 %v1094_v50, %v1090_v48  ;;  %v2301_v21 = vpack.c.bf16 %v1767_v51, %v1763_v49  ;;  %1358 = vmatmul.mubr.bf16.gmra.mrb[176].mxu0 %v8362_v45  ;;  %2031 = vmatmul.mubr.bf16.gmra.mrb[176].mxu1 %v8362_v45  ;;  %v8364_v49 = vld [vmem:[#allocation6 + $0x170] sm:$0xff]  }
 0x1f8   :  { %v2300_v22 = vpack.c.bf16 %v1096_v63, %v1092_v55  ;;  %v2302_v23 = vpack.c.bf16 %v1769_v16, %v1765_v58  ;;  %1367 = vmatprep.mubr.bf16.mxu0 %v9650_v19  ;;  %2040 = vmatprep.mubr.bf16.mxu1 %v9650_v19 }
 0x1f9   :  { %2555 = vst [vmem:[#allocation2 + $0x220] sm:$0xff] %v2299_v20  ;;  %2557 = vst [vmem:[#allocation2 + $0x230] sm:$0xff] %v2301_v21 }
 0x1fa   :  { %2556 = vst [vmem:[#allocation2 + $0x228] sm:$0xff] %v2300_v22  ;;  %2558 = vst [vmem:[#allocation2 + $0x238] sm:$0xff] %v2302_v23  ;;  %v1099_v24 = vpop.f32.mrb[72].mxu0  ;;  %v1772_v25 = vpop.f32.mrb[72].mxu1 }
 0x1fb   :  { %v1101_v26 = vpop.f32.mrb[73].mxu0  ;;  %v1774_v27 = vpop.f32.mrb[73].mxu1  ;;  %v1100_v31 = vadd.f32 %v1099_v24, %v9971_v61  ;;  %v1773_v32 = vadd.f32 %v1772_v25, %v9975_v62 }
 0x1fc   :  { %v1103_v29 = vpop.f32.mrb[74].mxu0  ;;  %v1776_v30 = vpop.f32.mrb[74].mxu1  ;;  %v1102_v37 = vadd.f32 %v1101_v26, %v9979_v17  ;;  %v1775_v38 = vadd.f32 %v1774_v27, %v9983_v18 }
 0x1fd   :  { %v1104_v33 = vadd.f32 %v1103_v29, %v9971_v61  ;;  %v1777_v34 = vadd.f32 %v1776_v30, %v9975_v62  ;;  %v1105_v35 = vpop.f32.mrb[75].mxu0  ;;  %v1778_v36 = vpop.f32.mrb[75].mxu1 }
 0x1fe   :  { %v1106_v39 = vadd.f32 %v1105_v35, %v9979_v17  ;;  %v1779_v40 = vadd.f32 %v1778_v36, %v9983_v18 }
 0x1ff   :  { %v2303_v41 = vpack.c.bf16 %v1104_v33, %v1100_v31  ;;  %v2305_v42 = vpack.c.bf16 %v1777_v34, %v1773_v32  ;;  %1368 = vmatmul.mubr.bf16.gmra.mrb[180].mxu0 %v8363_v28  ;;  %2041 = vmatmul.mubr.bf16.gmra.mrb[180].mxu1 %v8363_v28  ;;  %v8365_v32 = vld [vmem:[#allocation6 + $0x178] sm:$0xff]  }
 0x200   :  { %v2304_v43 = vpack.c.bf16 %v1106_v39, %v1102_v37  ;;  %v2306_v44 = vpack.c.bf16 %v1779_v40, %v1775_v38  ;;  %1377 = vmatprep.mubr.bf16.mxu0 %v9650_v19  ;;  %2050 = vmatprep.mubr.bf16.mxu1 %v9650_v19 }
 0x201   :  { %2559 = vst [vmem:[#allocation2 + $0x240] sm:$0xff] %v2303_v41  ;;  %2561 = vst [vmem:[#allocation2 + $0x250] sm:$0xff] %v2305_v42 }
 0x202   :  { %2560 = vst [vmem:[#allocation2 + $0x248] sm:$0xff] %v2304_v43  ;;  %2562 = vst [vmem:[#allocation2 + $0x258] sm:$0xff] %v2306_v44  ;;  %v1109_v45 = vpop.f32.mrb[76].mxu0  ;;  %v1782_v46 = vpop.f32.mrb[76].mxu1 }
 0x203   :  { %v1111_v47 = vpop.f32.mrb[77].mxu0  ;;  %v1784_v48 = vpop.f32.mrb[77].mxu1  ;;  %v1110_v52 = vadd.f32 %v1109_v45, %v9971_v61  ;;  %v1783_v53 = vadd.f32 %v1782_v46, %v9975_v62 }
 0x204   :  { %v1113_v50 = vpop.f32.mrb[78].mxu0  ;;  %v1786_v51 = vpop.f32.mrb[78].mxu1  ;;  %v1112_v20 = vadd.f32 %v1111_v47, %v9979_v17  ;;  %v1785_v21 = vadd.f32 %v1784_v48, %v9983_v18 }
 0x205   :  { %v1114_v55 = vadd.f32 %v1113_v50, %v9971_v61  ;;  %v1787_v58 = vadd.f32 %v1786_v51, %v9975_v62  ;;  %v1115_v63 = vpop.f32.mrb[79].mxu0  ;;  %v1788_v16 = vpop.f32.mrb[79].mxu1 }
 0x206   :  { %v1116_v22 = vadd.f32 %v1115_v63, %v9979_v17  ;;  %v1789_v23 = vadd.f32 %v1788_v16, %v9983_v18 }
 0x207   :  { %v2307_v24 = vpack.c.bf16 %v1114_v55, %v1110_v52  ;;  %v2309_v25 = vpack.c.bf16 %v1787_v58, %v1783_v53  ;;  %1378 = vmatmul.mubr.bf16.gmra.mrb[184].mxu0 %v8364_v49  ;;  %2051 = vmatmul.mubr.bf16.gmra.mrb[184].mxu1 %v8364_v49  ;;  %v8366_v53 = vld [vmem:[#allocation6 + $0x180] sm:$0xff]  }
 0x208   :  { %v2308_v26 = vpack.c.bf16 %v1116_v22, %v1112_v20  ;;  %v2310_v27 = vpack.c.bf16 %v1789_v23, %v1785_v21  ;;  %1387 = vmatprep.mubr.bf16.mxu0 %v9650_v19  ;;  %2060 = vmatprep.mubr.bf16.mxu1 %v9650_v19 }
 0x209   :  { %2563 = vst [vmem:[#allocation2 + $0x260] sm:$0xff] %v2307_v24  ;;  %2565 = vst [vmem:[#allocation2 + $0x270] sm:$0xff] %v2309_v25 }
 0x20a   :  { %2564 = vst [vmem:[#allocation2 + $0x268] sm:$0xff] %v2308_v26  ;;  %2566 = vst [vmem:[#allocation2 + $0x278] sm:$0xff] %v2310_v27  ;;  %v1119_v28 = vpop.f32.mrb[80].mxu0  ;;  %v1792_v29 = vpop.f32.mrb[80].mxu1 }
 0x20b   :  { %v1121_v30 = vpop.f32.mrb[81].mxu0  ;;  %v1794_v31 = vpop.f32.mrb[81].mxu1  ;;  %v1120_v35 = vadd.f32 %v1119_v28, %v9971_v61  ;;  %v1793_v36 = vadd.f32 %v1792_v29, %v9975_v62 }
 0x20c   :  { %v1123_v33 = vpop.f32.mrb[82].mxu0  ;;  %v1796_v34 = vpop.f32.mrb[82].mxu1  ;;  %v1122_v41 = vadd.f32 %v1121_v30, %v9979_v17  ;;  %v1795_v42 = vadd.f32 %v1794_v31, %v9983_v18 }
 0x20d   :  { %v1124_v37 = vadd.f32 %v1123_v33, %v9971_v61  ;;  %v1797_v38 = vadd.f32 %v1796_v34, %v9975_v62  ;;  %v1125_v39 = vpop.f32.mrb[83].mxu0  ;;  %v1798_v40 = vpop.f32.mrb[83].mxu1 }
 0x20e   :  { %v1126_v43 = vadd.f32 %v1125_v39, %v9979_v17  ;;  %v1799_v44 = vadd.f32 %v1798_v40, %v9983_v18 }
 0x20f   :  { %v2311_v45 = vpack.c.bf16 %v1124_v37, %v1120_v35  ;;  %v2313_v46 = vpack.c.bf16 %v1797_v38, %v1793_v36  ;;  %1388 = vmatmul.mubr.bf16.gmra.mrb[188].mxu0 %v8365_v32  ;;  %2061 = vmatmul.mubr.bf16.gmra.mrb[188].mxu1 %v8365_v32  ;;  %v8373_v36 = vld [vmem:[#allocation6 + $0x188] sm:$0xff]  }
 0x210   :  { %v2312_v47 = vpack.c.bf16 %v1126_v43, %v1122_v41  ;;  %v2314_v48 = vpack.c.bf16 %v1799_v44, %v1795_v42  ;;  %1397 = vmatprep.mubr.bf16.mxu0 %v9650_v19  ;;  %2070 = vmatprep.mubr.bf16.mxu1 %v9650_v19 }
 0x211   :  { %2567 = vst [vmem:[#allocation2 + $0x280] sm:$0xff] %v2311_v45  ;;  %2569 = vst [vmem:[#allocation2 + $0x290] sm:$0xff] %v2313_v46 }
 0x212   :  { %2568 = vst [vmem:[#allocation2 + $0x288] sm:$0xff] %v2312_v47  ;;  %2570 = vst [vmem:[#allocation2 + $0x298] sm:$0xff] %v2314_v48  ;;  %v1129_v49 = vpop.f32.mrb[84].mxu0  ;;  %v1802_v50 = vpop.f32.mrb[84].mxu1 }
 0x213   :  { %v1131_v51 = vpop.f32.mrb[85].mxu0  ;;  %v1804_v52 = vpop.f32.mrb[85].mxu1  ;;  %v1130_v63 = vadd.f32 %v1129_v49, %v9971_v61  ;;  %v1803_v16 = vadd.f32 %v1802_v50, %v9975_v62 }
 0x214   :  { %v1133_v55 = vpop.f32.mrb[86].mxu0  ;;  %v1806_v58 = vpop.f32.mrb[86].mxu1  ;;  %v1132_v24 = vadd.f32 %v1131_v51, %v9979_v17  ;;  %v1805_v25 = vadd.f32 %v1804_v52, %v9983_v18 }
 0x215   :  { %v1134_v20 = vadd.f32 %v1133_v55, %v9971_v61  ;;  %v1807_v21 = vadd.f32 %v1806_v58, %v9975_v62  ;;  %v1135_v22 = vpop.f32.mrb[87].mxu0  ;;  %v1808_v23 = vpop.f32.mrb[87].mxu1 }
 0x216   :  { %v1136_v26 = vadd.f32 %v1135_v22, %v9979_v17  ;;  %v1809_v27 = vadd.f32 %v1808_v23, %v9983_v18 }
 0x217   :  { %v2315_v28 = vpack.c.bf16 %v1134_v20, %v1130_v63  ;;  %v2317_v29 = vpack.c.bf16 %v1807_v21, %v1803_v16  ;;  %1398 = vmatmul.mubr.bf16.gmra.mrb[192].mxu0 %v8366_v53  ;;  %2071 = vmatmul.mubr.bf16.gmra.mrb[192].mxu1 %v8366_v53  ;;  %v8374_v16 = vld [vmem:[#allocation6 + $0x190] sm:$0xff]  }
 0x218   :  { %v2316_v30 = vpack.c.bf16 %v1136_v26, %v1132_v24  ;;  %v2318_v31 = vpack.c.bf16 %v1809_v27, %v1805_v25  ;;  %1407 = vmatprep.mubr.bf16.mxu0 %v9650_v19  ;;  %2080 = vmatprep.mubr.bf16.mxu1 %v9650_v19 }
 0x219   :  { %2571 = vst [vmem:[#allocation2 + $0x2a0] sm:$0xff] %v2315_v28  ;;  %2573 = vst [vmem:[#allocation2 + $0x2b0] sm:$0xff] %v2317_v29 }
 0x21a   :  { %2572 = vst [vmem:[#allocation2 + $0x2a8] sm:$0xff] %v2316_v30  ;;  %2574 = vst [vmem:[#allocation2 + $0x2b8] sm:$0xff] %v2318_v31  ;;  %v1139_v32 = vpop.f32.mrb[88].mxu0  ;;  %v1812_v33 = vpop.f32.mrb[88].mxu1 }
 0x21b   :  { %v1141_v34 = vpop.f32.mrb[89].mxu0  ;;  %v1814_v35 = vpop.f32.mrb[89].mxu1  ;;  %v1140_v39 = vadd.f32 %v1139_v32, %v9971_v61  ;;  %v1813_v40 = vadd.f32 %v1812_v33, %v9975_v62 }
 0x21c   :  { %v1143_v37 = vpop.f32.mrb[90].mxu0  ;;  %v1816_v38 = vpop.f32.mrb[90].mxu1  ;;  %v1142_v45 = vadd.f32 %v1141_v34, %v9979_v17  ;;  %v1815_v46 = vadd.f32 %v1814_v35, %v9983_v18 }
 0x21d   :  { %v1144_v41 = vadd.f32 %v1143_v37, %v9971_v61  ;;  %v1817_v42 = vadd.f32 %v1816_v38, %v9975_v62  ;;  %v1145_v43 = vpop.f32.mrb[91].mxu0  ;;  %v1818_v44 = vpop.f32.mrb[91].mxu1 }
 0x21e   :  { %v1146_v47 = vadd.f32 %v1145_v43, %v9979_v17  ;;  %v1819_v48 = vadd.f32 %v1818_v44, %v9983_v18 }
 0x21f   :  { %v2319_v49 = vpack.c.bf16 %v1144_v41, %v1140_v39  ;;  %v2321_v50 = vpack.c.bf16 %v1817_v42, %v1813_v40  ;;  %1408 = vmatmul.mubr.bf16.gmra.mrb[196].mxu0 %v8373_v36  ;;  %2081 = vmatmul.mubr.bf16.gmra.mrb[196].mxu1 %v8373_v36  ;;  %v8375_v40 = vld [vmem:[#allocation6 + $0x198] sm:$0xff]  }
 0x220   :  { %v2320_v51 = vpack.c.bf16 %v1146_v47, %v1142_v45  ;;  %v2322_v52 = vpack.c.bf16 %v1819_v48, %v1815_v46  ;;  %1417 = vmatprep.mubr.bf16.mxu0 %v9650_v19  ;;  %2090 = vmatprep.mubr.bf16.mxu1 %v9650_v19 }
 0x221   :  { %2575 = vst [vmem:[#allocation2 + $0x2c0] sm:$0xff] %v2319_v49  ;;  %2577 = vst [vmem:[#allocation2 + $0x2d0] sm:$0xff] %v2321_v50 }
 0x222   :  { %2576 = vst [vmem:[#allocation2 + $0x2c8] sm:$0xff] %v2320_v51  ;;  %2578 = vst [vmem:[#allocation2 + $0x2d8] sm:$0xff] %v2322_v52  ;;  %v1149_v53 = vpop.f32.mrb[92].mxu0  ;;  %v1822_v55 = vpop.f32.mrb[92].mxu1 }
 0x223   :  { %v1151_v58 = vpop.f32.mrb[93].mxu0  ;;  %v1824_v63 = vpop.f32.mrb[93].mxu1  ;;  %v1150_v22 = vadd.f32 %v1149_v53, %v9971_v61  ;;  %v1823_v23 = vadd.f32 %v1822_v55, %v9975_v62 }
 0x224   :  { %v1153_v20 = vpop.f32.mrb[94].mxu0  ;;  %v1826_v21 = vpop.f32.mrb[94].mxu1  ;;  %v1152_v28 = vadd.f32 %v1151_v58, %v9979_v17  ;;  %v1825_v29 = vadd.f32 %v1824_v63, %v9983_v18 }
 0x225   :  { %v1154_v24 = vadd.f32 %v1153_v20, %v9971_v61  ;;  %v1827_v25 = vadd.f32 %v1826_v21, %v9975_v62  ;;  %v1155_v26 = vpop.f32.mrb[95].mxu0  ;;  %v1828_v27 = vpop.f32.mrb[95].mxu1 }
 0x226   :  { %v1156_v30 = vadd.f32 %v1155_v26, %v9979_v17  ;;  %v1829_v31 = vadd.f32 %v1828_v27, %v9983_v18 }
 0x227   :  { %v2323_v32 = vpack.c.bf16 %v1154_v24, %v1150_v22  ;;  %v2325_v33 = vpack.c.bf16 %v1827_v25, %v1823_v23  ;;  %1418 = vmatmul.mubr.bf16.gmra.mrb[200].mxu0 %v8374_v16  ;;  %2091 = vmatmul.mubr.bf16.gmra.mrb[200].mxu1 %v8374_v16  ;;  %v8376_v23 = vld [vmem:[#allocation6 + $0x1a0] sm:$0xff]  }
 0x228   :  { %v2324_v34 = vpack.c.bf16 %v1156_v30, %v1152_v28  ;;  %v2326_v35 = vpack.c.bf16 %v1829_v31, %v1825_v29  ;;  %1427 = vmatprep.mubr.bf16.mxu0 %v9650_v19  ;;  %2100 = vmatprep.mubr.bf16.mxu1 %v9650_v19 }
 0x229   :  { %2579 = vst [vmem:[#allocation2 + $0x2e0] sm:$0xff] %v2323_v32  ;;  %2581 = vst [vmem:[#allocation2 + $0x2f0] sm:$0xff] %v2325_v33 }
 0x22a   :  { %2580 = vst [vmem:[#allocation2 + $0x2e8] sm:$0xff] %v2324_v34  ;;  %2582 = vst [vmem:[#allocation2 + $0x2f8] sm:$0xff] %v2326_v35  ;;  %v1159_v36 = vpop.f32.mrb[96].mxu0  ;;  %v1832_v37 = vpop.f32.mrb[96].mxu1 }
 0x22b   :  { %v1161_v38 = vpop.f32.mrb[97].mxu0  ;;  %v1834_v39 = vpop.f32.mrb[97].mxu1  ;;  %v1160_v43 = vadd.f32 %v1159_v36, %v9971_v61  ;;  %v1833_v44 = vadd.f32 %v1832_v37, %v9975_v62 }
 0x22c   :  { %v1163_v41 = vpop.f32.mrb[98].mxu0  ;;  %v1836_v42 = vpop.f32.mrb[98].mxu1  ;;  %v1162_v49 = vadd.f32 %v1161_v38, %v9979_v17  ;;  %v1835_v50 = vadd.f32 %v1834_v39, %v9983_v18 }
 0x22d   :  { %v1164_v45 = vadd.f32 %v1163_v41, %v9971_v61  ;;  %v1837_v46 = vadd.f32 %v1836_v42, %v9975_v62  ;;  %v1165_v47 = vpop.f32.mrb[99].mxu0  ;;  %v1838_v48 = vpop.f32.mrb[99].mxu1 }
 0x22e   :  { %v1166_v51 = vadd.f32 %v1165_v47, %v9979_v17  ;;  %v1839_v52 = vadd.f32 %v1838_v48, %v9983_v18 }
 0x22f   :  { %v2327_v53 = vpack.c.bf16 %v1164_v45, %v1160_v43  ;;  %v2329_v55 = vpack.c.bf16 %v1837_v46, %v1833_v44  ;;  %1428 = vmatmul.mubr.bf16.gmra.mrb[204].mxu0 %v8375_v40  ;;  %2101 = vmatmul.mubr.bf16.gmra.mrb[204].mxu1 %v8375_v40  ;;  %v8377_v44 = vld [vmem:[#allocation6 + $0x1a8] sm:$0xff]  }
 0x230   :  { %v2328_v58 = vpack.c.bf16 %v1166_v51, %v1162_v49  ;;  %v2330_v63 = vpack.c.bf16 %v1839_v52, %v1835_v50  ;;  %1437 = vmatprep.mubr.bf16.mxu0 %v9650_v19  ;;  %2110 = vmatprep.mubr.bf16.mxu1 %v9650_v19 }
 0x231   :  { %2583 = vst [vmem:[#allocation2 + $0x300] sm:$0xff] %v2327_v53  ;;  %2585 = vst [vmem:[#allocation2 + $0x310] sm:$0xff] %v2329_v55 }
 0x232   :  { %2584 = vst [vmem:[#allocation2 + $0x308] sm:$0xff] %v2328_v58  ;;  %2586 = vst [vmem:[#allocation2 + $0x318] sm:$0xff] %v2330_v63  ;;  %v1169_v16 = vpop.f32.mrb[100].mxu0  ;;  %v1842_v20 = vpop.f32.mrb[100].mxu1 }
 0x233   :  { %v1171_v21 = vpop.f32.mrb[101].mxu0  ;;  %v1844_v22 = vpop.f32.mrb[101].mxu1  ;;  %v1170_v26 = vadd.f32 %v1169_v16, %v9971_v61  ;;  %v1843_v27 = vadd.f32 %v1842_v20, %v9975_v62 }
 0x234   :  { %v1173_v24 = vpop.f32.mrb[102].mxu0  ;;  %v1846_v25 = vpop.f32.mrb[102].mxu1  ;;  %v1172_v32 = vadd.f32 %v1171_v21, %v9979_v17  ;;  %v1845_v33 = vadd.f32 %v1844_v22, %v9983_v18 }
 0x235   :  { %v1174_v28 = vadd.f32 %v1173_v24, %v9971_v61  ;;  %v1847_v29 = vadd.f32 %v1846_v25, %v9975_v62  ;;  %v1175_v30 = vpop.f32.mrb[103].mxu0  ;;  %v1848_v31 = vpop.f32.mrb[103].mxu1 }
 0x236   :  { %v1176_v34 = vadd.f32 %v1175_v30, %v9979_v17  ;;  %v1849_v35 = vadd.f32 %v1848_v31, %v9983_v18 }
 0x237   :  { %v2331_v36 = vpack.c.bf16 %v1174_v28, %v1170_v26  ;;  %v2333_v37 = vpack.c.bf16 %v1847_v29, %v1843_v27  ;;  %1438 = vmatmul.mubr.bf16.gmra.mrb[208].mxu0 %v8376_v23  ;;  %2111 = vmatmul.mubr.bf16.gmra.mrb[208].mxu1 %v8376_v23  ;;  %v8378_v27 = vld [vmem:[#allocation6 + $0x1b0] sm:$0xff]  }
 0x238   :  { %v2332_v38 = vpack.c.bf16 %v1176_v34, %v1172_v32  ;;  %v2334_v39 = vpack.c.bf16 %v1849_v35, %v1845_v33  ;;  %1447 = vmatprep.mubr.bf16.mxu0 %v9650_v19  ;;  %2120 = vmatprep.mubr.bf16.mxu1 %v9650_v19 }
 0x239   :  { %2587 = vst [vmem:[#allocation2 + $0x320] sm:$0xff] %v2331_v36  ;;  %2589 = vst [vmem:[#allocation2 + $0x330] sm:$0xff] %v2333_v37 }
 0x23a   :  { %2588 = vst [vmem:[#allocation2 + $0x328] sm:$0xff] %v2332_v38  ;;  %2590 = vst [vmem:[#allocation2 + $0x338] sm:$0xff] %v2334_v39  ;;  %v1179_v40 = vpop.f32.mrb[104].mxu0  ;;  %v1852_v41 = vpop.f32.mrb[104].mxu1 }
 0x23b   :  { %v1181_v42 = vpop.f32.mrb[105].mxu0  ;;  %v1854_v43 = vpop.f32.mrb[105].mxu1  ;;  %v1180_v47 = vadd.f32 %v1179_v40, %v9971_v61  ;;  %v1853_v48 = vadd.f32 %v1852_v41, %v9975_v62 }
 0x23c   :  { %v1183_v45 = vpop.f32.mrb[106].mxu0  ;;  %v1856_v46 = vpop.f32.mrb[106].mxu1  ;;  %v1182_v53 = vadd.f32 %v1181_v42, %v9979_v17  ;;  %v1855_v55 = vadd.f32 %v1854_v43, %v9983_v18 }
 0x23d   :  { %v1184_v49 = vadd.f32 %v1183_v45, %v9971_v61  ;;  %v1857_v50 = vadd.f32 %v1856_v46, %v9975_v62  ;;  %v1185_v51 = vpop.f32.mrb[107].mxu0  ;;  %v1858_v52 = vpop.f32.mrb[107].mxu1 }
 0x23e   :  { %v1186_v58 = vadd.f32 %v1185_v51, %v9979_v17  ;;  %v1859_v63 = vadd.f32 %v1858_v52, %v9983_v18 }
 0x23f   :  { %v2335_v16 = vpack.c.bf16 %v1184_v49, %v1180_v47  ;;  %v2337_v20 = vpack.c.bf16 %v1857_v50, %v1853_v48  ;;  %1448 = vmatmul.mubr.bf16.gmra.mrb[212].mxu0 %v8377_v44  ;;  %2121 = vmatmul.mubr.bf16.gmra.mrb[212].mxu1 %v8377_v44  ;;  %v8379_v48 = vld [vmem:[#allocation6 + $0x1b8] sm:$0xff]  }
 0x240   :  { %v2336_v21 = vpack.c.bf16 %v1186_v58, %v1182_v53  ;;  %v2338_v22 = vpack.c.bf16 %v1859_v63, %v1855_v55  ;;  %1457 = vmatprep.mubr.bf16.mxu0 %v9650_v19  ;;  %2130 = vmatprep.mubr.bf16.mxu1 %v9650_v19 }
 0x241   :  { %2591 = vst [vmem:[#allocation2 + $0x340] sm:$0xff] %v2335_v16  ;;  %2593 = vst [vmem:[#allocation2 + $0x350] sm:$0xff] %v2337_v20 }
 0x242   :  { %2592 = vst [vmem:[#allocation2 + $0x348] sm:$0xff] %v2336_v21  ;;  %2594 = vst [vmem:[#allocation2 + $0x358] sm:$0xff] %v2338_v22  ;;  %v1189_v23 = vpop.f32.mrb[108].mxu0  ;;  %v1862_v24 = vpop.f32.mrb[108].mxu1 }
 0x243   :  { %v1191_v25 = vpop.f32.mrb[109].mxu0  ;;  %v1864_v26 = vpop.f32.mrb[109].mxu1  ;;  %v1190_v30 = vadd.f32 %v1189_v23, %v9971_v61  ;;  %v1863_v31 = vadd.f32 %v1862_v24, %v9975_v62 }
 0x244   :  { %v1193_v28 = vpop.f32.mrb[110].mxu0  ;;  %v1866_v29 = vpop.f32.mrb[110].mxu1  ;;  %v1192_v36 = vadd.f32 %v1191_v25, %v9979_v17  ;;  %v1865_v37 = vadd.f32 %v1864_v26, %v9983_v18 }
 0x245   :  { %v1194_v32 = vadd.f32 %v1193_v28, %v9971_v61  ;;  %v1867_v33 = vadd.f32 %v1866_v29, %v9975_v62  ;;  %v1195_v34 = vpop.f32.mrb[111].mxu0  ;;  %v1868_v35 = vpop.f32.mrb[111].mxu1 }
 0x246   :  { %v1196_v38 = vadd.f32 %v1195_v34, %v9979_v17  ;;  %v1869_v39 = vadd.f32 %v1868_v35, %v9983_v18 }
 0x247   :  { %v2339_v40 = vpack.c.bf16 %v1194_v32, %v1190_v30  ;;  %v2341_v41 = vpack.c.bf16 %v1867_v33, %v1863_v31  ;;  %1458 = vmatmul.mubr.bf16.gmra.mrb[216].mxu0 %v8378_v27  ;;  %2131 = vmatmul.mubr.bf16.gmra.mrb[216].mxu1 %v8378_v27  ;;  %v8380_v31 = vld [vmem:[#allocation6 + $0x1c0] sm:$0xff]  }
 0x248   :  { %v2340_v42 = vpack.c.bf16 %v1196_v38, %v1192_v36  ;;  %v2342_v43 = vpack.c.bf16 %v1869_v39, %v1865_v37  ;;  %1467 = vmatprep.mubr.bf16.mxu0 %v9650_v19  ;;  %2140 = vmatprep.mubr.bf16.mxu1 %v9650_v19 }
 0x249   :  { %2595 = vst [vmem:[#allocation2 + $0x360] sm:$0xff] %v2339_v40  ;;  %2597 = vst [vmem:[#allocation2 + $0x370] sm:$0xff] %v2341_v41 }
 0x24a   :  { %2596 = vst [vmem:[#allocation2 + $0x368] sm:$0xff] %v2340_v42  ;;  %2598 = vst [vmem:[#allocation2 + $0x378] sm:$0xff] %v2342_v43  ;;  %v1199_v44 = vpop.f32.mrb[112].mxu0  ;;  %v1872_v45 = vpop.f32.mrb[112].mxu1 }
 0x24b   :  { %v1201_v46 = vpop.f32.mrb[113].mxu0  ;;  %v1874_v47 = vpop.f32.mrb[113].mxu1  ;;  %v1200_v51 = vadd.f32 %v1199_v44, %v9971_v61  ;;  %v1873_v52 = vadd.f32 %v1872_v45, %v9975_v62 }
 0x24c   :  { %v1203_v49 = vpop.f32.mrb[114].mxu0  ;;  %v1876_v50 = vpop.f32.mrb[114].mxu1  ;;  %v1202_v16 = vadd.f32 %v1201_v46, %v9979_v17  ;;  %v1875_v20 = vadd.f32 %v1874_v47, %v9983_v18 }
 0x24d   :  { %v1204_v53 = vadd.f32 %v1203_v49, %v9971_v61  ;;  %v1877_v55 = vadd.f32 %v1876_v50, %v9975_v62  ;;  %v1205_v58 = vpop.f32.mrb[115].mxu0  ;;  %v1878_v63 = vpop.f32.mrb[115].mxu1 }
 0x24e   :  { %v1206_v21 = vadd.f32 %v1205_v58, %v9979_v17  ;;  %v1879_v22 = vadd.f32 %v1878_v63, %v9983_v18 }
 0x24f   :  { %v2343_v23 = vpack.c.bf16 %v1204_v53, %v1200_v51  ;;  %v2345_v24 = vpack.c.bf16 %v1877_v55, %v1873_v52  ;;  %1468 = vmatmul.mubr.bf16.gmra.mrb[220].mxu0 %v8379_v48  ;;  %2141 = vmatmul.mubr.bf16.gmra.mrb[220].mxu1 %v8379_v48  ;;  %v8387_v52 = vld [vmem:[#allocation6 + $0x1c8] sm:$0xff]  }
 0x250   :  { %v2344_v25 = vpack.c.bf16 %v1206_v21, %v1202_v16  ;;  %v2346_v26 = vpack.c.bf16 %v1879_v22, %v1875_v20  ;;  %1477 = vmatprep.mubr.bf16.mxu0 %v9650_v19  ;;  %2150 = vmatprep.mubr.bf16.mxu1 %v9650_v19 }
 0x251   :  { %2599 = vst [vmem:[#allocation2 + $0x380] sm:$0xff] %v2343_v23  ;;  %2601 = vst [vmem:[#allocation2 + $0x390] sm:$0xff] %v2345_v24 }
 0x252   :  { %2600 = vst [vmem:[#allocation2 + $0x388] sm:$0xff] %v2344_v25  ;;  %2602 = vst [vmem:[#allocation2 + $0x398] sm:$0xff] %v2346_v26  ;;  %v1209_v27 = vpop.f32.mrb[116].mxu0  ;;  %v1882_v28 = vpop.f32.mrb[116].mxu1 }
 0x253   :  { %v1211_v29 = vpop.f32.mrb[117].mxu0  ;;  %v1884_v30 = vpop.f32.mrb[117].mxu1  ;;  %v1210_v34 = vadd.f32 %v1209_v27, %v9971_v61  ;;  %v1883_v35 = vadd.f32 %v1882_v28, %v9975_v62 }
 0x254   :  { %v1213_v32 = vpop.f32.mrb[118].mxu0  ;;  %v1886_v33 = vpop.f32.mrb[118].mxu1  ;;  %v1212_v40 = vadd.f32 %v1211_v29, %v9979_v17  ;;  %v1885_v41 = vadd.f32 %v1884_v30, %v9983_v18 }
 0x255   :  { %v1214_v36 = vadd.f32 %v1213_v32, %v9971_v61  ;;  %v1887_v37 = vadd.f32 %v1886_v33, %v9975_v62  ;;  %v1215_v38 = vpop.f32.mrb[119].mxu0  ;;  %v1888_v39 = vpop.f32.mrb[119].mxu1 }
 0x256   :  { %v1216_v42 = vadd.f32 %v1215_v38, %v9979_v17  ;;  %v1889_v43 = vadd.f32 %v1888_v39, %v9983_v18 }
 0x257   :  { %v2347_v44 = vpack.c.bf16 %v1214_v36, %v1210_v34  ;;  %v2349_v45 = vpack.c.bf16 %v1887_v37, %v1883_v35  ;;  %1478 = vmatmul.mubr.bf16.gmra.mrb[224].mxu0 %v8380_v31  ;;  %2151 = vmatmul.mubr.bf16.gmra.mrb[224].mxu1 %v8380_v31  ;;  %v8388_v35 = vld [vmem:[#allocation6 + $0x1d0] sm:$0xff]  }
 0x258   :  { %v2348_v46 = vpack.c.bf16 %v1216_v42, %v1212_v40  ;;  %v2350_v47 = vpack.c.bf16 %v1889_v43, %v1885_v41  ;;  %1487 = vmatprep.mubr.bf16.mxu0 %v9650_v19  ;;  %2160 = vmatprep.mubr.bf16.mxu1 %v9650_v19 }
 0x259   :  { %2603 = vst [vmem:[#allocation2 + $0x3a0] sm:$0xff] %v2347_v44  ;;  %2605 = vst [vmem:[#allocation2 + $0x3b0] sm:$0xff] %v2349_v45 }
 0x25a   :  { %2604 = vst [vmem:[#allocation2 + $0x3a8] sm:$0xff] %v2348_v46  ;;  %2606 = vst [vmem:[#allocation2 + $0x3b8] sm:$0xff] %v2350_v47  ;;  %v1219_v48 = vpop.f32.mrb[120].mxu0  ;;  %v1892_v49 = vpop.f32.mrb[120].mxu1 }
 0x25b   :  { %v1221_v50 = vpop.f32.mrb[121].mxu0  ;;  %v1894_v51 = vpop.f32.mrb[121].mxu1  ;;  %v1220_v58 = vadd.f32 %v1219_v48, %v9971_v61  ;;  %v1893_v63 = vadd.f32 %v1892_v49, %v9975_v62 }
 0x25c   :  { %v1223_v53 = vpop.f32.mrb[122].mxu0  ;;  %v1896_v55 = vpop.f32.mrb[122].mxu1  ;;  %v1222_v23 = vadd.f32 %v1221_v50, %v9979_v17  ;;  %v1895_v24 = vadd.f32 %v1894_v51, %v9983_v18 }
 0x25d   :  { %v1224_v16 = vadd.f32 %v1223_v53, %v9971_v61  ;;  %v1897_v20 = vadd.f32 %v1896_v55, %v9975_v62  ;;  %v1225_v21 = vpop.f32.mrb[123].mxu0  ;;  %v1898_v22 = vpop.f32.mrb[123].mxu1 }
 0x25e   :  { %v1226_v25 = vadd.f32 %v1225_v21, %v9979_v17  ;;  %v1899_v26 = vadd.f32 %v1898_v22, %v9983_v18 }
 0x25f   :  { %v2351_v27 = vpack.c.bf16 %v1224_v16, %v1220_v58  ;;  %v2353_v28 = vpack.c.bf16 %v1897_v20, %v1893_v63  ;;  %1488 = vmatmul.mubr.bf16.gmra.mrb[228].mxu0 %v8387_v52  ;;  %2161 = vmatmul.mubr.bf16.gmra.mrb[228].mxu1 %v8387_v52  ;;  %v8389_v63 = vld [vmem:[#allocation6 + $0x1d8] sm:$0xff]  }
 0x260   :  { %v2352_v29 = vpack.c.bf16 %v1226_v25, %v1222_v23  ;;  %v2354_v30 = vpack.c.bf16 %v1899_v26, %v1895_v24  ;;  %1497 = vmatprep.mubr.bf16.mxu0 %v9650_v19  ;;  %2170 = vmatprep.mubr.bf16.mxu1 %v9650_v19 }
 0x261   :  { %2607 = vst [vmem:[#allocation2 + $0x3c0] sm:$0xff] %v2351_v27  ;;  %2609 = vst [vmem:[#allocation2 + $0x3d0] sm:$0xff] %v2353_v28 }
 0x262   :  { %2608 = vst [vmem:[#allocation2 + $0x3c8] sm:$0xff] %v2352_v29  ;;  %2610 = vst [vmem:[#allocation2 + $0x3d8] sm:$0xff] %v2354_v30  ;;  %v1229_v31 = vpop.f32.mrb[124].mxu0  ;;  %v1902_v32 = vpop.f32.mrb[124].mxu1 }
 0x263   :  { %v1231_v33 = vpop.f32.mrb[125].mxu0  ;;  %v1904_v34 = vpop.f32.mrb[125].mxu1  ;;  %v1230_v38 = vadd.f32 %v1229_v31, %v9971_v61  ;;  %v1903_v39 = vadd.f32 %v1902_v32, %v9975_v62 }
 0x264   :  { %v1233_v36 = vpop.f32.mrb[126].mxu0  ;;  %v1906_v37 = vpop.f32.mrb[126].mxu1  ;;  %v1232_v44 = vadd.f32 %v1231_v33, %v9979_v17  ;;  %v1905_v45 = vadd.f32 %v1904_v34, %v9983_v18 }
 0x265   :  { %v1234_v40 = vadd.f32 %v1233_v36, %v9971_v61  ;;  %v1907_v41 = vadd.f32 %v1906_v37, %v9975_v62  ;;  %v1235_v42 = vpop.f32.mrb[127].mxu0  ;;  %v1908_v43 = vpop.f32.mrb[127].mxu1 }
 0x266   :  { %v1236_v46 = vadd.f32 %v1235_v42, %v9979_v17  ;;  %v1909_v47 = vadd.f32 %v1908_v43, %v9983_v18 }
 0x267   :  { %v2355_v48 = vpack.c.bf16 %v1234_v40, %v1230_v38  ;;  %v2357_v49 = vpack.c.bf16 %v1907_v41, %v1903_v39  ;;  %1498 = vmatmul.mubr.bf16.gmra.mrb[232].mxu0 %v8388_v35  ;;  %2171 = vmatmul.mubr.bf16.gmra.mrb[232].mxu1 %v8388_v35  ;;  %v8390_v39 = vld [vmem:[#allocation6 + $0x1e0] sm:$0xff]  }
 0x268   :  { %v2356_v50 = vpack.c.bf16 %v1236_v46, %v1232_v44  ;;  %v2358_v51 = vpack.c.bf16 %v1909_v47, %v1905_v45  ;;  %1507 = vmatprep.mubr.bf16.mxu0 %v9650_v19  ;;  %2180 = vmatprep.mubr.bf16.mxu1 %v9650_v19 }
 0x269   :  { %2611 = vst [vmem:[#allocation2 + $0x3e0] sm:$0xff] %v2355_v48  ;;  %2613 = vst [vmem:[#allocation2 + $0x3f0] sm:$0xff] %v2357_v49 }
 0x26a   :  { %2612 = vst [vmem:[#allocation2 + $0x3e8] sm:$0xff] %v2356_v50  ;;  %2614 = vst [vmem:[#allocation2 + $0x3f8] sm:$0xff] %v2358_v51  ;;  %v1239_v52 = vpop.f32.mrb[128].mxu0  ;;  %v1912_v53 = vpop.f32.mrb[128].mxu1 }
 0x26b   :  { %v1241_v55 = vpop.f32.mrb[129].mxu0  ;;  %v1914_v58 = vpop.f32.mrb[129].mxu1  ;;  %v1240_v21 = vadd.f32 %v1239_v52, %v9971_v61  ;;  %v1913_v22 = vadd.f32 %v1912_v53, %v9975_v62 }
 0x26c   :  { %v1243_v16 = vpop.f32.mrb[130].mxu0  ;;  %v1916_v20 = vpop.f32.mrb[130].mxu1  ;;  %v1242_v27 = vadd.f32 %v1241_v55, %v9979_v17  ;;  %v1915_v28 = vadd.f32 %v1914_v58, %v9983_v18 }
 0x26d   :  { %v1244_v23 = vadd.f32 %v1243_v16, %v9971_v61  ;;  %v1917_v24 = vadd.f32 %v1916_v20, %v9975_v62  ;;  %v1245_v25 = vpop.f32.mrb[131].mxu0  ;;  %v1918_v26 = vpop.f32.mrb[131].mxu1 }
 0x26e   :  { %v1246_v29 = vadd.f32 %v1245_v25, %v9979_v17  ;;  %v1919_v30 = vadd.f32 %v1918_v26, %v9983_v18 }
 0x26f   :  { %v2359_v31 = vpack.c.bf16 %v1244_v23, %v1240_v21  ;;  %v2361_v32 = vpack.c.bf16 %v1917_v24, %v1913_v22  ;;  %1508 = vmatmul.mubr.bf16.gmra.mrb[236].mxu0 %v8389_v63  ;;  %2181 = vmatmul.mubr.bf16.gmra.mrb[236].mxu1 %v8389_v63  ;;  %v8391_v22 = vld [vmem:[#allocation6 + $0x1e8] sm:$0xff]  }
 0x270   :  { %v2360_v33 = vpack.c.bf16 %v1246_v29, %v1242_v27  ;;  %v2362_v34 = vpack.c.bf16 %v1919_v30, %v1915_v28  ;;  %1517 = vmatprep.mubr.bf16.mxu0 %v9650_v19  ;;  %2190 = vmatprep.mubr.bf16.mxu1 %v9650_v19 }
 0x271   :  { %2615 = vst [vmem:[#allocation2 + $0x400] sm:$0xff] %v2359_v31  ;;  %2617 = vst [vmem:[#allocation2 + $0x410] sm:$0xff] %v2361_v32 }
 0x272   :  { %2616 = vst [vmem:[#allocation2 + $0x408] sm:$0xff] %v2360_v33  ;;  %2618 = vst [vmem:[#allocation2 + $0x418] sm:$0xff] %v2362_v34  ;;  %v1249_v35 = vpop.f32.mrb[132].mxu0  ;;  %v1922_v36 = vpop.f32.mrb[132].mxu1 }
 0x273   :  { %v1251_v37 = vpop.f32.mrb[133].mxu0  ;;  %v1924_v38 = vpop.f32.mrb[133].mxu1  ;;  %v1250_v42 = vadd.f32 %v1249_v35, %v9971_v61  ;;  %v1923_v43 = vadd.f32 %v1922_v36, %v9975_v62 }
 0x274   :  { %v1253_v40 = vpop.f32.mrb[134].mxu0  ;;  %v1926_v41 = vpop.f32.mrb[134].mxu1  ;;  %v1252_v48 = vadd.f32 %v1251_v37, %v9979_v17  ;;  %v1925_v49 = vadd.f32 %v1924_v38, %v9983_v18 }
 0x275   :  { %v1254_v44 = vadd.f32 %v1253_v40, %v9971_v61  ;;  %v1927_v45 = vadd.f32 %v1926_v41, %v9975_v62  ;;  %v1255_v46 = vpop.f32.mrb[135].mxu0  ;;  %v1928_v47 = vpop.f32.mrb[135].mxu1 }
 0x276   :  { %v1256_v50 = vadd.f32 %v1255_v46, %v9979_v17  ;;  %v1929_v51 = vadd.f32 %v1928_v47, %v9983_v18 }
 0x277   :  { %v2363_v52 = vpack.c.bf16 %v1254_v44, %v1250_v42  ;;  %v2365_v53 = vpack.c.bf16 %v1927_v45, %v1923_v43  ;;  %1518 = vmatmul.mubr.bf16.gmra.mrb[240].mxu0 %v8390_v39  ;;  %2191 = vmatmul.mubr.bf16.gmra.mrb[240].mxu1 %v8390_v39  ;;  %v8392_v43 = vld [vmem:[#allocation6 + $0x1f0] sm:$0xff]  }
 0x278   :  { %v2364_v55 = vpack.c.bf16 %v1256_v50, %v1252_v48  ;;  %v2366_v58 = vpack.c.bf16 %v1929_v51, %v1925_v49  ;;  %1527 = vmatprep.mubr.bf16.mxu0 %v9650_v19  ;;  %2200 = vmatprep.mubr.bf16.mxu1 %v9650_v19 }
 0x279   :  { %2619 = vst [vmem:[#allocation2 + $0x420] sm:$0xff] %v2363_v52  ;;  %2621 = vst [vmem:[#allocation2 + $0x430] sm:$0xff] %v2365_v53 }
 0x27a   :  { %2620 = vst [vmem:[#allocation2 + $0x428] sm:$0xff] %v2364_v55  ;;  %2622 = vst [vmem:[#allocation2 + $0x438] sm:$0xff] %v2366_v58  ;;  %v1259_v63 = vpop.f32.mrb[136].mxu0  ;;  %v1932_v16 = vpop.f32.mrb[136].mxu1 }
 0x27b   :  { %v1261_v20 = vpop.f32.mrb[137].mxu0  ;;  %v1934_v21 = vpop.f32.mrb[137].mxu1  ;;  %v1260_v25 = vadd.f32 %v1259_v63, %v9971_v61  ;;  %v1933_v26 = vadd.f32 %v1932_v16, %v9975_v62 }
 0x27c   :  { %v1263_v23 = vpop.f32.mrb[138].mxu0  ;;  %v1936_v24 = vpop.f32.mrb[138].mxu1  ;;  %v1262_v31 = vadd.f32 %v1261_v20, %v9979_v17  ;;  %v1935_v32 = vadd.f32 %v1934_v21, %v9983_v18 }
 0x27d   :  { %v1264_v27 = vadd.f32 %v1263_v23, %v9971_v61  ;;  %v1937_v28 = vadd.f32 %v1936_v24, %v9975_v62  ;;  %v1265_v29 = vpop.f32.mrb[139].mxu0  ;;  %v1938_v30 = vpop.f32.mrb[139].mxu1 }
 0x27e   :  { %v1266_v33 = vadd.f32 %v1265_v29, %v9979_v17  ;;  %v1939_v34 = vadd.f32 %v1938_v30, %v9983_v18 }
 0x27f   :  { %v2367_v35 = vpack.c.bf16 %v1264_v27, %v1260_v25  ;;  %v2369_v36 = vpack.c.bf16 %v1937_v28, %v1933_v26  ;;  %1528 = vmatmul.mubr.bf16.gmra.mrb[244].mxu0 %v8391_v22  ;;  %2201 = vmatmul.mubr.bf16.gmra.mrb[244].mxu1 %v8391_v22  ;;  %v8393_v26 = vld [vmem:[#allocation6 + $0x1f8] sm:$0xff]  }
 0x280   :  { %v2368_v37 = vpack.c.bf16 %v1266_v33, %v1262_v31  ;;  %v2370_v38 = vpack.c.bf16 %v1939_v34, %v1935_v32  ;;  %1537 = vmatprep.mubr.bf16.mxu0 %v9650_v19  ;;  %2210 = vmatprep.mubr.bf16.mxu1 %v9650_v19 }
 0x281   :  { %2623 = vst [vmem:[#allocation2 + $0x440] sm:$0xff] %v2367_v35  ;;  %2625 = vst [vmem:[#allocation2 + $0x450] sm:$0xff] %v2369_v36 }
 0x282   :  { %2624 = vst [vmem:[#allocation2 + $0x448] sm:$0xff] %v2368_v37  ;;  %2626 = vst [vmem:[#allocation2 + $0x458] sm:$0xff] %v2370_v38  ;;  %v1269_v39 = vpop.f32.mrb[140].mxu0  ;;  %v1942_v40 = vpop.f32.mrb[140].mxu1 }
 0x283   :  { %v1271_v41 = vpop.f32.mrb[141].mxu0  ;;  %v1944_v42 = vpop.f32.mrb[141].mxu1  ;;  %v1270_v46 = vadd.f32 %v1269_v39, %v9971_v61  ;;  %v1943_v47 = vadd.f32 %v1942_v40, %v9975_v62 }
 0x284   :  { %v1273_v44 = vpop.f32.mrb[142].mxu0  ;;  %v1946_v45 = vpop.f32.mrb[142].mxu1  ;;  %v1272_v52 = vadd.f32 %v1271_v41, %v9979_v17  ;;  %v1945_v53 = vadd.f32 %v1944_v42, %v9983_v18 }
 0x285   :  { %v1274_v48 = vadd.f32 %v1273_v44, %v9971_v61  ;;  %v1947_v49 = vadd.f32 %v1946_v45, %v9975_v62  ;;  %v1275_v50 = vpop.f32.mrb[143].mxu0  ;;  %v1948_v51 = vpop.f32.mrb[143].mxu1 }
 0x286   :  { %v1276_v55 = vadd.f32 %v1275_v50, %v9979_v17  ;;  %v1949_v58 = vadd.f32 %v1948_v51, %v9983_v18 }
 0x287   :  { %v2371_v63 = vpack.c.bf16 %v1274_v48, %v1270_v46  ;;  %v2373_v16 = vpack.c.bf16 %v1947_v49, %v1943_v47  ;;  %1538 = vmatmul.mubr.bf16.gmra.mrb[248].mxu0 %v8392_v43  ;;  %2211 = vmatmul.mubr.bf16.gmra.mrb[248].mxu1 %v8392_v43 }
 0x288   :  { %v2372_v20 = vpack.c.bf16 %v1276_v55, %v1272_v52  ;;  %v2374_v21 = vpack.c.bf16 %v1949_v58, %v1945_v53  ;;  %1547 = vmatprep.mubr.bf16.mxu0 %v9650_v19  ;;  %2220 = vmatprep.mubr.bf16.mxu1 %v9650_v19 }
 0x289   :  { %2627 = vst [vmem:[#allocation2 + $0x460] sm:$0xff] %v2371_v63  ;;  %2629 = vst [vmem:[#allocation2 + $0x470] sm:$0xff] %v2373_v16 }
 0x28a   :  { %2628 = vst [vmem:[#allocation2 + $0x468] sm:$0xff] %v2372_v20  ;;  %2630 = vst [vmem:[#allocation2 + $0x478] sm:$0xff] %v2374_v21  ;;  %v1279_v22 = vpop.f32.mrb[144].mxu0  ;;  %v1952_v23 = vpop.f32.mrb[144].mxu1 }
 0x28b   :  { %v1281_v24 = vpop.f32.mrb[145].mxu0  ;;  %v1954_v25 = vpop.f32.mrb[145].mxu1  ;;  %v1280_v29 = vadd.f32 %v1279_v22, %v9971_v61  ;;  %v1953_v30 = vadd.f32 %v1952_v23, %v9975_v62  ;;  %v8394_v23 = vld [vmem:[#allocation6] sm:$0xff]  }
 0x28c   :  { %v1283_v27 = vpop.f32.mrb[146].mxu0  ;;  %v1956_v28 = vpop.f32.mrb[146].mxu1  ;;  %v1282_v35 = vadd.f32 %v1281_v24, %v9979_v17  ;;  %v1955_v36 = vadd.f32 %v1954_v25, %v9983_v18 }
 0x28d   :  { %v1284_v31 = vadd.f32 %v1283_v27, %v9971_v61  ;;  %v1957_v32 = vadd.f32 %v1956_v28, %v9975_v62  ;;  %v1285_v33 = vpop.f32.mrb[147].mxu0  ;;  %v1958_v34 = vpop.f32.mrb[147].mxu1 }
 0x28e   :  { %v1286_v37 = vadd.f32 %v1285_v33, %v9979_v17  ;;  %v1959_v38 = vadd.f32 %v1958_v34, %v9983_v18 }
 0x28f   :  { %v2375_v39 = vpack.c.bf16 %v1284_v31, %v1280_v29  ;;  %v2377_v40 = vpack.c.bf16 %v1957_v32, %v1953_v30  ;;  %1548 = vmatmul.mubr.bf16.gmra.mrb[252].mxu0 %v8393_v26  ;;  %2221 = vmatmul.mubr.bf16.gmra.mrb[252].mxu1 %v8393_v26 }
 0x290   :  { %v2376_v41 = vpack.c.bf16 %v1286_v37, %v1282_v35  ;;  %v2378_v42 = vpack.c.bf16 %v1959_v38, %v1955_v36  ;;  %2989 = vmatprep.mubr.bf16.mxu0 %v9650_v19  ;;  %3662 = vmatprep.mubr.bf16.mxu1 %v9650_v19 }
 0x291   :  { %2631 = vst [vmem:[#allocation2 + $0x480] sm:$0xff] %v2375_v39  ;;  %2633 = vst [vmem:[#allocation2 + $0x490] sm:$0xff] %v2377_v40 }
 0x292   :  { %2632 = vst [vmem:[#allocation2 + $0x488] sm:$0xff] %v2376_v41  ;;  %2634 = vst [vmem:[#allocation2 + $0x498] sm:$0xff] %v2378_v42  ;;  %v1289_v43 = vpop.f32.mrb[148].mxu0  ;;  %v1962_v44 = vpop.f32.mrb[148].mxu1 }
 0x293   :  { %v1291_v45 = vpop.f32.mrb[149].mxu0  ;;  %v1964_v46 = vpop.f32.mrb[149].mxu1  ;;  %v1290_v49 = vadd.f32 %v1289_v43, %v9971_v61  ;;  %v1963_v50 = vadd.f32 %v1962_v44, %v9975_v62  ;;  %v8395_v44 = vld [vmem:[#allocation6 + $0x8] sm:$0xff]  }
 0x294   :  { %v1293_v47 = vpop.f32.mrb[150].mxu0  ;;  %v1966_v48 = vpop.f32.mrb[150].mxu1  ;;  %v1292_v58 = vadd.f32 %v1291_v45, %v9979_v17  ;;  %v1965_v63 = vadd.f32 %v1964_v46, %v9983_v18 }
 0x295   :  { %v1294_v51 = vadd.f32 %v1293_v47, %v9971_v61  ;;  %v1967_v52 = vadd.f32 %v1966_v48, %v9975_v62  ;;  %v1295_v53 = vpop.f32.mrb[151].mxu0  ;;  %v1968_v55 = vpop.f32.mrb[151].mxu1 }
 0x296   :  { %v1296_v16 = vadd.f32 %v1295_v53, %v9979_v17  ;;  %v1969_v20 = vadd.f32 %v1968_v55, %v9983_v18 }
 0x297   :  { %v2379_v21 = vpack.c.bf16 %v1294_v51, %v1290_v49  ;;  %v2381_v22 = vpack.c.bf16 %v1967_v52, %v1963_v50  ;;  %2990 = vmatmul.mubr.bf16.vlgmr.msra.gmra.mrb[0].mxu0 %v8394_v23  ;;  %3663 = vmatmul.mubr.bf16.vlgmr.msra.gmra.mrb[0].mxu1 %v8394_v23 }
 0x298   :  { %v2380_v24 = vpack.c.bf16 %v1296_v16, %v1292_v58  ;;  %v2382_v25 = vpack.c.bf16 %v1969_v20, %v1965_v63  ;;  %2999 = vmatprep.mubr.bf16.mxu0 %v9650_v19  ;;  %3672 = vmatprep.mubr.bf16.mxu1 %v9650_v19 }
 0x299   :  { %2635 = vst [vmem:[#allocation2 + $0x4a0] sm:$0xff] %v2379_v21  ;;  %2637 = vst [vmem:[#allocation2 + $0x4b0] sm:$0xff] %v2381_v22 }
 0x29a   :  { %2636 = vst [vmem:[#allocation2 + $0x4a8] sm:$0xff] %v2380_v24  ;;  %2638 = vst [vmem:[#allocation2 + $0x4b8] sm:$0xff] %v2382_v25  ;;  %v1299_v26 = vpop.f32.mrb[152].mxu0  ;;  %v1972_v27 = vpop.f32.mrb[152].mxu1 }
 0x29b   :  { %v1301_v28 = vpop.f32.mrb[153].mxu0  ;;  %v1974_v29 = vpop.f32.mrb[153].mxu1  ;;  %v1300_v32 = vadd.f32 %v1299_v26, %v9971_v61  ;;  %v1973_v33 = vadd.f32 %v1972_v27, %v9975_v62  ;;  %v8396_v27 = vld [vmem:[#allocation6 + $0x10] sm:$0xff]  }
 0x29c   :  { %v1303_v30 = vpop.f32.mrb[154].mxu0  ;;  %v1976_v31 = vpop.f32.mrb[154].mxu1  ;;  %v1302_v38 = vadd.f32 %v1301_v28, %v9979_v17  ;;  %v1975_v39 = vadd.f32 %v1974_v29, %v9983_v18 }
 0x29d   :  { %v1304_v34 = vadd.f32 %v1303_v30, %v9971_v61  ;;  %v1977_v35 = vadd.f32 %v1976_v31, %v9975_v62  ;;  %v1305_v36 = vpop.f32.mrb[155].mxu0  ;;  %v1978_v37 = vpop.f32.mrb[155].mxu1 }
 0x29e   :  { %v1306_v40 = vadd.f32 %v1305_v36, %v9979_v17  ;;  %v1979_v41 = vadd.f32 %v1978_v37, %v9983_v18 }
 0x29f   :  { %v2383_v42 = vpack.c.bf16 %v1304_v34, %v1300_v32  ;;  %v2385_v43 = vpack.c.bf16 %v1977_v35, %v1973_v33  ;;  %3000 = vmatmul.mubr.bf16.gmra.mrb[4].mxu0 %v8395_v44  ;;  %3673 = vmatmul.mubr.bf16.gmra.mrb[4].mxu1 %v8395_v44 }
 0x2a0   :  { %v2384_v45 = vpack.c.bf16 %v1306_v40, %v1302_v38  ;;  %v2386_v46 = vpack.c.bf16 %v1979_v41, %v1975_v39  ;;  %3009 = vmatprep.mubr.bf16.mxu0 %v9650_v19  ;;  %3682 = vmatprep.mubr.bf16.mxu1 %v9650_v19 }
 0x2a1   :  { %2639 = vst [vmem:[#allocation2 + $0x4c0] sm:$0xff] %v2383_v42  ;;  %2641 = vst [vmem:[#allocation2 + $0x4d0] sm:$0xff] %v2385_v43 }
 0x2a2   :  { %2640 = vst [vmem:[#allocation2 + $0x4c8] sm:$0xff] %v2384_v45  ;;  %2642 = vst [vmem:[#allocation2 + $0x4d8] sm:$0xff] %v2386_v46  ;;  %v1309_v47 = vpop.f32.mrb[156].mxu0  ;;  %v1982_v48 = vpop.f32.mrb[156].mxu1 }
 0x2a3   :  { %v1311_v49 = vpop.f32.mrb[157].mxu0  ;;  %v1984_v50 = vpop.f32.mrb[157].mxu1  ;;  %v1310_v53 = vadd.f32 %v1309_v47, %v9971_v61  ;;  %v1983_v55 = vadd.f32 %v1982_v48, %v9975_v62  ;;  %v8397_v48 = vld [vmem:[#allocation6 + $0x18] sm:$0xff]  }
 0x2a4   :  { %v1313_v51 = vpop.f32.mrb[158].mxu0  ;;  %v1986_v52 = vpop.f32.mrb[158].mxu1  ;;  %v1312_v21 = vadd.f32 %v1311_v49, %v9979_v17  ;;  %v1985_v22 = vadd.f32 %v1984_v50, %v9983_v18 }
 0x2a5   :  { %v1314_v58 = vadd.f32 %v1313_v51, %v9971_v61  ;;  %v1987_v63 = vadd.f32 %v1986_v52, %v9975_v62  ;;  %v1315_v16 = vpop.f32.mrb[159].mxu0  ;;  %v1988_v20 = vpop.f32.mrb[159].mxu1 }
 0x2a6   :  { %v1316_v23 = vadd.f32 %v1315_v16, %v9979_v17  ;;  %v1989_v24 = vadd.f32 %v1988_v20, %v9983_v18 }
 0x2a7   :  { %v2387_v25 = vpack.c.bf16 %v1314_v58, %v1310_v53  ;;  %v2389_v26 = vpack.c.bf16 %v1987_v63, %v1983_v55  ;;  %3010 = vmatmul.mubr.bf16.gmra.mrb[8].mxu0 %v8396_v27  ;;  %3683 = vmatmul.mubr.bf16.gmra.mrb[8].mxu1 %v8396_v27 }
 0x2a8   :  { %v2388_v28 = vpack.c.bf16 %v1316_v23, %v1312_v21  ;;  %v2390_v29 = vpack.c.bf16 %v1989_v24, %v1985_v22  ;;  %3019 = vmatprep.mubr.bf16.mxu0 %v9650_v19  ;;  %3692 = vmatprep.mubr.bf16.mxu1 %v9650_v19 }
 0x2a9   :  { %2643 = vst [vmem:[#allocation2 + $0x4e0] sm:$0xff] %v2387_v25  ;;  %2645 = vst [vmem:[#allocation2 + $0x4f0] sm:$0xff] %v2389_v26 }
 0x2aa   :  { %2644 = vst [vmem:[#allocation2 + $0x4e8] sm:$0xff] %v2388_v28  ;;  %2646 = vst [vmem:[#allocation2 + $0x4f8] sm:$0xff] %v2390_v29  ;;  %v1319_v30 = vpop.f32.mrb[160].mxu0  ;;  %v1992_v31 = vpop.f32.mrb[160].mxu1 }
 0x2ab   :  { %v1321_v32 = vpop.f32.mrb[161].mxu0  ;;  %v1994_v33 = vpop.f32.mrb[161].mxu1  ;;  %v1320_v36 = vadd.f32 %v1319_v30, %v9971_v61  ;;  %v1993_v37 = vadd.f32 %v1992_v31, %v9975_v62  ;;  %v8398_v31 = vld [vmem:[#allocation6 + $0x20] sm:$0xff]  }
 0x2ac   :  { %v1323_v34 = vpop.f32.mrb[162].mxu0  ;;  %v1996_v35 = vpop.f32.mrb[162].mxu1  ;;  %v1322_v42 = vadd.f32 %v1321_v32, %v9979_v17  ;;  %v1995_v43 = vadd.f32 %v1994_v33, %v9983_v18 }
 0x2ad   :  { %v1324_v38 = vadd.f32 %v1323_v34, %v9971_v61  ;;  %v1997_v39 = vadd.f32 %v1996_v35, %v9975_v62  ;;  %v1325_v40 = vpop.f32.mrb[163].mxu0  ;;  %v1998_v41 = vpop.f32.mrb[163].mxu1 }
 0x2ae   :  { %v1326_v44 = vadd.f32 %v1325_v40, %v9979_v17  ;;  %v1999_v45 = vadd.f32 %v1998_v41, %v9983_v18 }
 0x2af   :  { %v2391_v46 = vpack.c.bf16 %v1324_v38, %v1320_v36  ;;  %v2393_v47 = vpack.c.bf16 %v1997_v39, %v1993_v37  ;;  %3020 = vmatmul.mubr.bf16.gmra.mrb[12].mxu0 %v8397_v48  ;;  %3693 = vmatmul.mubr.bf16.gmra.mrb[12].mxu1 %v8397_v48 }
 0x2b0   :  { %v2392_v49 = vpack.c.bf16 %v1326_v44, %v1322_v42  ;;  %v2394_v50 = vpack.c.bf16 %v1999_v45, %v1995_v43  ;;  %3029 = vmatprep.mubr.bf16.mxu0 %v9650_v19  ;;  %3702 = vmatprep.mubr.bf16.mxu1 %v9650_v19 }
 0x2b1   :  { %2647 = vst [vmem:[#allocation2 + $0x500] sm:$0xff] %v2391_v46  ;;  %2649 = vst [vmem:[#allocation2 + $0x510] sm:$0xff] %v2393_v47 }
 0x2b2   :  { %2648 = vst [vmem:[#allocation2 + $0x508] sm:$0xff] %v2392_v49  ;;  %2650 = vst [vmem:[#allocation2 + $0x518] sm:$0xff] %v2394_v50  ;;  %v1329_v51 = vpop.f32.mrb[164].mxu0  ;;  %v2002_v52 = vpop.f32.mrb[164].mxu1 }
 0x2b3   :  { %v1331_v53 = vpop.f32.mrb[165].mxu0  ;;  %v2004_v55 = vpop.f32.mrb[165].mxu1  ;;  %v1330_v16 = vadd.f32 %v1329_v51, %v9971_v61  ;;  %v2003_v20 = vadd.f32 %v2002_v52, %v9975_v62  ;;  %v8399_v52 = vld [vmem:[#allocation6 + $0x28] sm:$0xff]  }
 0x2b4   :  { %v1333_v58 = vpop.f32.mrb[166].mxu0  ;;  %v2006_v63 = vpop.f32.mrb[166].mxu1  ;;  %v1332_v25 = vadd.f32 %v1331_v53, %v9979_v17  ;;  %v2005_v26 = vadd.f32 %v2004_v55, %v9983_v18 }
 0x2b5   :  { %v1334_v21 = vadd.f32 %v1333_v58, %v9971_v61  ;;  %v2007_v22 = vadd.f32 %v2006_v63, %v9975_v62  ;;  %v1335_v23 = vpop.f32.mrb[167].mxu0  ;;  %v2008_v24 = vpop.f32.mrb[167].mxu1 }
 0x2b6   :  { %v1336_v27 = vadd.f32 %v1335_v23, %v9979_v17  ;;  %v2009_v28 = vadd.f32 %v2008_v24, %v9983_v18 }
 0x2b7   :  { %v2395_v29 = vpack.c.bf16 %v1334_v21, %v1330_v16  ;;  %v2397_v30 = vpack.c.bf16 %v2007_v22, %v2003_v20  ;;  %3030 = vmatmul.mubr.bf16.gmra.mrb[16].mxu0 %v8398_v31  ;;  %3703 = vmatmul.mubr.bf16.gmra.mrb[16].mxu1 %v8398_v31 }
 0x2b8   :  { %v2396_v32 = vpack.c.bf16 %v1336_v27, %v1332_v25  ;;  %v2398_v33 = vpack.c.bf16 %v2009_v28, %v2005_v26  ;;  %3039 = vmatprep.mubr.bf16.mxu0 %v9650_v19  ;;  %3712 = vmatprep.mubr.bf16.mxu1 %v9650_v19 }
 0x2b9   :  { %2651 = vst [vmem:[#allocation2 + $0x520] sm:$0xff] %v2395_v29  ;;  %2653 = vst [vmem:[#allocation2 + $0x530] sm:$0xff] %v2397_v30 }
 0x2ba   :  { %2652 = vst [vmem:[#allocation2 + $0x528] sm:$0xff] %v2396_v32  ;;  %2654 = vst [vmem:[#allocation2 + $0x538] sm:$0xff] %v2398_v33  ;;  %v1339_v34 = vpop.f32.mrb[168].mxu0  ;;  %v2012_v35 = vpop.f32.mrb[168].mxu1 }
 0x2bb   :  { %v1341_v36 = vpop.f32.mrb[169].mxu0  ;;  %v2014_v37 = vpop.f32.mrb[169].mxu1  ;;  %v1340_v40 = vadd.f32 %v1339_v34, %v9971_v61  ;;  %v2013_v41 = vadd.f32 %v2012_v35, %v9975_v62  ;;  %v8400_v35 = vld [vmem:[#allocation6 + $0x30] sm:$0xff]  }
 0x2bc   :  { %v1343_v38 = vpop.f32.mrb[170].mxu0  ;;  %v2016_v39 = vpop.f32.mrb[170].mxu1  ;;  %v1342_v46 = vadd.f32 %v1341_v36, %v9979_v17  ;;  %v2015_v47 = vadd.f32 %v2014_v37, %v9983_v18 }
 0x2bd   :  { %v1344_v42 = vadd.f32 %v1343_v38, %v9971_v61  ;;  %v2017_v43 = vadd.f32 %v2016_v39, %v9975_v62  ;;  %v1345_v44 = vpop.f32.mrb[171].mxu0  ;;  %v2018_v45 = vpop.f32.mrb[171].mxu1 }
 0x2be   :  { %v1346_v48 = vadd.f32 %v1345_v44, %v9979_v17  ;;  %v2019_v49 = vadd.f32 %v2018_v45, %v9983_v18 }
 0x2bf   :  { %v2399_v50 = vpack.c.bf16 %v1344_v42, %v1340_v40  ;;  %v2401_v51 = vpack.c.bf16 %v2017_v43, %v2013_v41  ;;  %3040 = vmatmul.mubr.bf16.gmra.mrb[20].mxu0 %v8399_v52  ;;  %3713 = vmatmul.mubr.bf16.gmra.mrb[20].mxu1 %v8399_v52 }
 0x2c0   :  { %v2400_v53 = vpack.c.bf16 %v1346_v48, %v1342_v46  ;;  %v2402_v55 = vpack.c.bf16 %v2019_v49, %v2015_v47  ;;  %3049 = vmatprep.mubr.bf16.mxu0 %v9650_v19  ;;  %3722 = vmatprep.mubr.bf16.mxu1 %v9650_v19 }
 0x2c1   :  { %2655 = vst [vmem:[#allocation2 + $0x540] sm:$0xff] %v2399_v50  ;;  %2657 = vst [vmem:[#allocation2 + $0x550] sm:$0xff] %v2401_v51 }
 0x2c2   :  { %2656 = vst [vmem:[#allocation2 + $0x548] sm:$0xff] %v2400_v53  ;;  %2658 = vst [vmem:[#allocation2 + $0x558] sm:$0xff] %v2402_v55  ;;  %v1349_v58 = vpop.f32.mrb[172].mxu0  ;;  %v2022_v63 = vpop.f32.mrb[172].mxu1 }
 0x2c3   :  { %v1351_v16 = vpop.f32.mrb[173].mxu0  ;;  %v2024_v20 = vpop.f32.mrb[173].mxu1  ;;  %v1350_v23 = vadd.f32 %v1349_v58, %v9971_v61  ;;  %v2023_v24 = vadd.f32 %v2022_v63, %v9975_v62  ;;  %v8401_v63 = vld [vmem:[#allocation6 + $0x38] sm:$0xff]  }
 0x2c4   :  { %v1353_v21 = vpop.f32.mrb[174].mxu0  ;;  %v2026_v22 = vpop.f32.mrb[174].mxu1  ;;  %v1352_v29 = vadd.f32 %v1351_v16, %v9979_v17  ;;  %v2025_v30 = vadd.f32 %v2024_v20, %v9983_v18 }
 0x2c5   :  { %v1354_v25 = vadd.f32 %v1353_v21, %v9971_v61  ;;  %v2027_v26 = vadd.f32 %v2026_v22, %v9975_v62  ;;  %v1355_v27 = vpop.f32.mrb[175].mxu0  ;;  %v2028_v28 = vpop.f32.mrb[175].mxu1 }
 0x2c6   :  { %v1356_v31 = vadd.f32 %v1355_v27, %v9979_v17  ;;  %v2029_v32 = vadd.f32 %v2028_v28, %v9983_v18 }
 0x2c7   :  { %v2403_v33 = vpack.c.bf16 %v1354_v25, %v1350_v23  ;;  %v2405_v34 = vpack.c.bf16 %v2027_v26, %v2023_v24  ;;  %3050 = vmatmul.mubr.bf16.gmra.mrb[24].mxu0 %v8400_v35  ;;  %3723 = vmatmul.mubr.bf16.gmra.mrb[24].mxu1 %v8400_v35 }
 0x2c8   :  { %v2404_v36 = vpack.c.bf16 %v1356_v31, %v1352_v29  ;;  %v2406_v37 = vpack.c.bf16 %v2029_v32, %v2025_v30  ;;  %3059 = vmatprep.mubr.bf16.mxu0 %v9650_v19  ;;  %3732 = vmatprep.mubr.bf16.mxu1 %v9650_v19 }
 0x2c9   :  { %2659 = vst [vmem:[#allocation2 + $0x560] sm:$0xff] %v2403_v33  ;;  %2661 = vst [vmem:[#allocation2 + $0x570] sm:$0xff] %v2405_v34 }
 0x2ca   :  { %2660 = vst [vmem:[#allocation2 + $0x568] sm:$0xff] %v2404_v36  ;;  %2662 = vst [vmem:[#allocation2 + $0x578] sm:$0xff] %v2406_v37  ;;  %v1359_v38 = vpop.f32.mrb[176].mxu0  ;;  %v2032_v39 = vpop.f32.mrb[176].mxu1 }
 0x2cb   :  { %v1361_v40 = vpop.f32.mrb[177].mxu0  ;;  %v2034_v41 = vpop.f32.mrb[177].mxu1  ;;  %v1360_v44 = vadd.f32 %v1359_v38, %v9971_v61  ;;  %v2033_v45 = vadd.f32 %v2032_v39, %v9975_v62  ;;  %v8402_v39 = vld [vmem:[#allocation6 + $0x40] sm:$0xff]  }
 0x2cc   :  { %v1363_v42 = vpop.f32.mrb[178].mxu0  ;;  %v2036_v43 = vpop.f32.mrb[178].mxu1  ;;  %v1362_v50 = vadd.f32 %v1361_v40, %v9979_v17  ;;  %v2035_v51 = vadd.f32 %v2034_v41, %v9983_v18 }
 0x2cd   :  { %v1364_v46 = vadd.f32 %v1363_v42, %v9971_v61  ;;  %v2037_v47 = vadd.f32 %v2036_v43, %v9975_v62  ;;  %v1365_v48 = vpop.f32.mrb[179].mxu0  ;;  %v2038_v49 = vpop.f32.mrb[179].mxu1 }
 0x2ce   :  { %v1366_v52 = vadd.f32 %v1365_v48, %v9979_v17  ;;  %v2039_v53 = vadd.f32 %v2038_v49, %v9983_v18 }
 0x2cf   :  { %v2407_v55 = vpack.c.bf16 %v1364_v46, %v1360_v44  ;;  %v2409_v58 = vpack.c.bf16 %v2037_v47, %v2033_v45  ;;  %3060 = vmatmul.mubr.bf16.gmra.mrb[28].mxu0 %v8401_v63  ;;  %3733 = vmatmul.mubr.bf16.gmra.mrb[28].mxu1 %v8401_v63 }
 0x2d0   :  { %v2408_v16 = vpack.c.bf16 %v1366_v52, %v1362_v50  ;;  %v2410_v20 = vpack.c.bf16 %v2039_v53, %v2035_v51  ;;  %3069 = vmatprep.mubr.bf16.mxu0 %v9650_v19  ;;  %3742 = vmatprep.mubr.bf16.mxu1 %v9650_v19 }
 0x2d1   :  { %2663 = vst [vmem:[#allocation2 + $0x580] sm:$0xff] %v2407_v55  ;;  %2665 = vst [vmem:[#allocation2 + $0x590] sm:$0xff] %v2409_v58 }
 0x2d2   :  { %2664 = vst [vmem:[#allocation2 + $0x588] sm:$0xff] %v2408_v16  ;;  %2666 = vst [vmem:[#allocation2 + $0x598] sm:$0xff] %v2410_v20  ;;  %v1369_v21 = vpop.f32.mrb[180].mxu0  ;;  %v2042_v22 = vpop.f32.mrb[180].mxu1 }
 0x2d3   :  { %v1371_v23 = vpop.f32.mrb[181].mxu0  ;;  %v2044_v24 = vpop.f32.mrb[181].mxu1  ;;  %v1370_v27 = vadd.f32 %v1369_v21, %v9971_v61  ;;  %v2043_v28 = vadd.f32 %v2042_v22, %v9975_v62  ;;  %v8403_v22 = vld [vmem:[#allocation6 + $0x48] sm:$0xff]  }
 0x2d4   :  { %v1373_v25 = vpop.f32.mrb[182].mxu0  ;;  %v2046_v26 = vpop.f32.mrb[182].mxu1  ;;  %v1372_v33 = vadd.f32 %v1371_v23, %v9979_v17  ;;  %v2045_v34 = vadd.f32 %v2044_v24, %v9983_v18 }
 0x2d5   :  { %v1374_v29 = vadd.f32 %v1373_v25, %v9971_v61  ;;  %v2047_v30 = vadd.f32 %v2046_v26, %v9975_v62  ;;  %v1375_v31 = vpop.f32.mrb[183].mxu0  ;;  %v2048_v32 = vpop.f32.mrb[183].mxu1 }
 0x2d6   :  { %v1376_v35 = vadd.f32 %v1375_v31, %v9979_v17  ;;  %v2049_v36 = vadd.f32 %v2048_v32, %v9983_v18 }
 0x2d7   :  { %v2411_v37 = vpack.c.bf16 %v1374_v29, %v1370_v27  ;;  %v2413_v38 = vpack.c.bf16 %v2047_v30, %v2043_v28  ;;  %3070 = vmatmul.mubr.bf16.gmra.mrb[32].mxu0 %v8402_v39  ;;  %3743 = vmatmul.mubr.bf16.gmra.mrb[32].mxu1 %v8402_v39 }
 0x2d8   :  { %v2412_v40 = vpack.c.bf16 %v1376_v35, %v1372_v33  ;;  %v2414_v41 = vpack.c.bf16 %v2049_v36, %v2045_v34  ;;  %3079 = vmatprep.mubr.bf16.mxu0 %v9650_v19  ;;  %3752 = vmatprep.mubr.bf16.mxu1 %v9650_v19 }
 0x2d9   :  { %2667 = vst [vmem:[#allocation2 + $0x5a0] sm:$0xff] %v2411_v37  ;;  %2669 = vst [vmem:[#allocation2 + $0x5b0] sm:$0xff] %v2413_v38 }
 0x2da   :  { %2668 = vst [vmem:[#allocation2 + $0x5a8] sm:$0xff] %v2412_v40  ;;  %2670 = vst [vmem:[#allocation2 + $0x5b8] sm:$0xff] %v2414_v41  ;;  %v1379_v42 = vpop.f32.mrb[184].mxu0  ;;  %v2052_v43 = vpop.f32.mrb[184].mxu1 }
 0x2db   :  { %v1381_v44 = vpop.f32.mrb[185].mxu0  ;;  %v2054_v45 = vpop.f32.mrb[185].mxu1  ;;  %v1380_v48 = vadd.f32 %v1379_v42, %v9971_v61  ;;  %v2053_v49 = vadd.f32 %v2052_v43, %v9975_v62  ;;  %v8404_v43 = vld [vmem:[#allocation6 + $0x50] sm:$0xff]  }
 0x2dc   :  { %v1383_v46 = vpop.f32.mrb[186].mxu0  ;;  %v2056_v47 = vpop.f32.mrb[186].mxu1  ;;  %v1382_v55 = vadd.f32 %v1381_v44, %v9979_v17  ;;  %v2055_v58 = vadd.f32 %v2054_v45, %v9983_v18 }
 0x2dd   :  { %v1384_v50 = vadd.f32 %v1383_v46, %v9971_v61  ;;  %v2057_v51 = vadd.f32 %v2056_v47, %v9975_v62  ;;  %v1385_v52 = vpop.f32.mrb[187].mxu0  ;;  %v2058_v53 = vpop.f32.mrb[187].mxu1 }
 0x2de   :  { %v1386_v63 = vadd.f32 %v1385_v52, %v9979_v17  ;;  %v2059_v16 = vadd.f32 %v2058_v53, %v9983_v18 }
 0x2df   :  { %v2415_v20 = vpack.c.bf16 %v1384_v50, %v1380_v48  ;;  %v2417_v21 = vpack.c.bf16 %v2057_v51, %v2053_v49  ;;  %3080 = vmatmul.mubr.bf16.gmra.mrb[36].mxu0 %v8403_v22  ;;  %3753 = vmatmul.mubr.bf16.gmra.mrb[36].mxu1 %v8403_v22 }
 0x2e0   :  { %v2416_v23 = vpack.c.bf16 %v1386_v63, %v1382_v55  ;;  %v2418_v24 = vpack.c.bf16 %v2059_v16, %v2055_v58  ;;  %3089 = vmatprep.mubr.bf16.mxu0 %v9650_v19  ;;  %3762 = vmatprep.mubr.bf16.mxu1 %v9650_v19 }
 0x2e1   :  { %2671 = vst [vmem:[#allocation2 + $0x5c0] sm:$0xff] %v2415_v20  ;;  %2673 = vst [vmem:[#allocation2 + $0x5d0] sm:$0xff] %v2417_v21 }
 0x2e2   :  { %2672 = vst [vmem:[#allocation2 + $0x5c8] sm:$0xff] %v2416_v23  ;;  %2674 = vst [vmem:[#allocation2 + $0x5d8] sm:$0xff] %v2418_v24  ;;  %v1389_v25 = vpop.f32.mrb[188].mxu0  ;;  %v2062_v26 = vpop.f32.mrb[188].mxu1 }
 0x2e3   :  { %v1391_v27 = vpop.f32.mrb[189].mxu0  ;;  %v2064_v28 = vpop.f32.mrb[189].mxu1  ;;  %v1390_v31 = vadd.f32 %v1389_v25, %v9971_v61  ;;  %v2063_v32 = vadd.f32 %v2062_v26, %v9975_v62  ;;  %v8405_v26 = vld [vmem:[#allocation6 + $0x58] sm:$0xff]  }
 0x2e4   :  { %v1393_v29 = vpop.f32.mrb[190].mxu0  ;;  %v2066_v30 = vpop.f32.mrb[190].mxu1  ;;  %v1392_v37 = vadd.f32 %v1391_v27, %v9979_v17  ;;  %v2065_v38 = vadd.f32 %v2064_v28, %v9983_v18 }
 0x2e5   :  { %v1394_v33 = vadd.f32 %v1393_v29, %v9971_v61  ;;  %v2067_v34 = vadd.f32 %v2066_v30, %v9975_v62  ;;  %v1395_v35 = vpop.f32.mrb[191].mxu0  ;;  %v2068_v36 = vpop.f32.mrb[191].mxu1 }
 0x2e6   :  { %v1396_v39 = vadd.f32 %v1395_v35, %v9979_v17  ;;  %v2069_v40 = vadd.f32 %v2068_v36, %v9983_v18 }
 0x2e7   :  { %v2419_v41 = vpack.c.bf16 %v1394_v33, %v1390_v31  ;;  %v2421_v42 = vpack.c.bf16 %v2067_v34, %v2063_v32  ;;  %3090 = vmatmul.mubr.bf16.gmra.mrb[40].mxu0 %v8404_v43  ;;  %3763 = vmatmul.mubr.bf16.gmra.mrb[40].mxu1 %v8404_v43 }
 0x2e8   :  { %v2420_v44 = vpack.c.bf16 %v1396_v39, %v1392_v37  ;;  %v2422_v45 = vpack.c.bf16 %v2069_v40, %v2065_v38  ;;  %3099 = vmatprep.mubr.bf16.mxu0 %v9650_v19  ;;  %3772 = vmatprep.mubr.bf16.mxu1 %v9650_v19 }
 0x2e9   :  { %2675 = vst [vmem:[#allocation2 + $0x5e0] sm:$0xff] %v2419_v41  ;;  %2677 = vst [vmem:[#allocation2 + $0x5f0] sm:$0xff] %v2421_v42 }
 0x2ea   :  { %2676 = vst [vmem:[#allocation2 + $0x5e8] sm:$0xff] %v2420_v44  ;;  %2678 = vst [vmem:[#allocation2 + $0x5f8] sm:$0xff] %v2422_v45  ;;  %v1399_v46 = vpop.f32.mrb[192].mxu0  ;;  %v2072_v47 = vpop.f32.mrb[192].mxu1 }
 0x2eb   :  { %v1401_v48 = vpop.f32.mrb[193].mxu0  ;;  %v2074_v49 = vpop.f32.mrb[193].mxu1  ;;  %v1400_v52 = vadd.f32 %v1399_v46, %v9971_v61  ;;  %v2073_v53 = vadd.f32 %v2072_v47, %v9975_v62  ;;  %v8406_v47 = vld [vmem:[#allocation6 + $0x60] sm:$0xff]  }
 0x2ec   :  { %v1403_v50 = vpop.f32.mrb[194].mxu0  ;;  %v2076_v51 = vpop.f32.mrb[194].mxu1  ;;  %v1402_v20 = vadd.f32 %v1401_v48, %v9979_v17  ;;  %v2075_v21 = vadd.f32 %v2074_v49, %v9983_v18 }
 0x2ed   :  { %v1404_v55 = vadd.f32 %v1403_v50, %v9971_v61  ;;  %v2077_v58 = vadd.f32 %v2076_v51, %v9975_v62  ;;  %v1405_v63 = vpop.f32.mrb[195].mxu0  ;;  %v2078_v16 = vpop.f32.mrb[195].mxu1 }
 0x2ee   :  { %v1406_v22 = vadd.f32 %v1405_v63, %v9979_v17  ;;  %v2079_v23 = vadd.f32 %v2078_v16, %v9983_v18 }
 0x2ef   :  { %v2423_v24 = vpack.c.bf16 %v1404_v55, %v1400_v52  ;;  %v2425_v25 = vpack.c.bf16 %v2077_v58, %v2073_v53  ;;  %3100 = vmatmul.mubr.bf16.gmra.mrb[44].mxu0 %v8405_v26  ;;  %3773 = vmatmul.mubr.bf16.gmra.mrb[44].mxu1 %v8405_v26 }
 0x2f0   :  { %v2424_v27 = vpack.c.bf16 %v1406_v22, %v1402_v20  ;;  %v2426_v28 = vpack.c.bf16 %v2079_v23, %v2075_v21  ;;  %3109 = vmatprep.mubr.bf16.mxu0 %v9650_v19  ;;  %3782 = vmatprep.mubr.bf16.mxu1 %v9650_v19 }
 0x2f1   :  { %2679 = vst [vmem:[#allocation2 + $0x600] sm:$0xff] %v2423_v24  ;;  %2681 = vst [vmem:[#allocation2 + $0x610] sm:$0xff] %v2425_v25 }
 0x2f2   :  { %2680 = vst [vmem:[#allocation2 + $0x608] sm:$0xff] %v2424_v27  ;;  %2682 = vst [vmem:[#allocation2 + $0x618] sm:$0xff] %v2426_v28  ;;  %v1409_v29 = vpop.f32.mrb[196].mxu0  ;;  %v2082_v30 = vpop.f32.mrb[196].mxu1 }
 0x2f3   :  { %v1411_v31 = vpop.f32.mrb[197].mxu0  ;;  %v2084_v32 = vpop.f32.mrb[197].mxu1  ;;  %v1410_v35 = vadd.f32 %v1409_v29, %v9971_v61  ;;  %v2083_v36 = vadd.f32 %v2082_v30, %v9975_v62  ;;  %v8407_v30 = vld [vmem:[#allocation6 + $0x68] sm:$0xff]  }
 0x2f4   :  { %v1413_v33 = vpop.f32.mrb[198].mxu0  ;;  %v2086_v34 = vpop.f32.mrb[198].mxu1  ;;  %v1412_v41 = vadd.f32 %v1411_v31, %v9979_v17  ;;  %v2085_v42 = vadd.f32 %v2084_v32, %v9983_v18 }
 0x2f5   :  { %v1414_v37 = vadd.f32 %v1413_v33, %v9971_v61  ;;  %v2087_v38 = vadd.f32 %v2086_v34, %v9975_v62  ;;  %v1415_v39 = vpop.f32.mrb[199].mxu0  ;;  %v2088_v40 = vpop.f32.mrb[199].mxu1 }
 0x2f6   :  { %v1416_v43 = vadd.f32 %v1415_v39, %v9979_v17  ;;  %v2089_v44 = vadd.f32 %v2088_v40, %v9983_v18 }
 0x2f7   :  { %v2427_v45 = vpack.c.bf16 %v1414_v37, %v1410_v35  ;;  %v2429_v46 = vpack.c.bf16 %v2087_v38, %v2083_v36  ;;  %3110 = vmatmul.mubr.bf16.gmra.mrb[48].mxu0 %v8406_v47  ;;  %3783 = vmatmul.mubr.bf16.gmra.mrb[48].mxu1 %v8406_v47 }
 0x2f8   :  { %v2428_v48 = vpack.c.bf16 %v1416_v43, %v1412_v41  ;;  %v2430_v49 = vpack.c.bf16 %v2089_v44, %v2085_v42  ;;  %3119 = vmatprep.mubr.bf16.mxu0 %v9650_v19  ;;  %3792 = vmatprep.mubr.bf16.mxu1 %v9650_v19 }
 0x2f9   :  { %2683 = vst [vmem:[#allocation2 + $0x620] sm:$0xff] %v2427_v45  ;;  %2685 = vst [vmem:[#allocation2 + $0x630] sm:$0xff] %v2429_v46 }
 0x2fa   :  { %2684 = vst [vmem:[#allocation2 + $0x628] sm:$0xff] %v2428_v48  ;;  %2686 = vst [vmem:[#allocation2 + $0x638] sm:$0xff] %v2430_v49  ;;  %v1419_v50 = vpop.f32.mrb[200].mxu0  ;;  %v2092_v51 = vpop.f32.mrb[200].mxu1 }
 0x2fb   :  { %v1421_v52 = vpop.f32.mrb[201].mxu0  ;;  %v2094_v53 = vpop.f32.mrb[201].mxu1  ;;  %v1420_v63 = vadd.f32 %v1419_v50, %v9971_v61  ;;  %v2093_v16 = vadd.f32 %v2092_v51, %v9975_v62  ;;  %v8408_v51 = vld [vmem:[#allocation6 + $0x70] sm:$0xff]  }
 0x2fc   :  { %v1423_v55 = vpop.f32.mrb[202].mxu0  ;;  %v2096_v58 = vpop.f32.mrb[202].mxu1  ;;  %v1422_v24 = vadd.f32 %v1421_v52, %v9979_v17  ;;  %v2095_v25 = vadd.f32 %v2094_v53, %v9983_v18 }
 0x2fd   :  { %v1424_v20 = vadd.f32 %v1423_v55, %v9971_v61  ;;  %v2097_v21 = vadd.f32 %v2096_v58, %v9975_v62  ;;  %v1425_v22 = vpop.f32.mrb[203].mxu0  ;;  %v2098_v23 = vpop.f32.mrb[203].mxu1 }
 0x2fe   :  { %v1426_v26 = vadd.f32 %v1425_v22, %v9979_v17  ;;  %v2099_v27 = vadd.f32 %v2098_v23, %v9983_v18 }
 0x2ff   :  { %v2431_v28 = vpack.c.bf16 %v1424_v20, %v1420_v63  ;;  %v2433_v29 = vpack.c.bf16 %v2097_v21, %v2093_v16  ;;  %3120 = vmatmul.mubr.bf16.gmra.mrb[52].mxu0 %v8407_v30  ;;  %3793 = vmatmul.mubr.bf16.gmra.mrb[52].mxu1 %v8407_v30 }
 0x300   :  { %v2432_v31 = vpack.c.bf16 %v1426_v26, %v1422_v24  ;;  %v2434_v32 = vpack.c.bf16 %v2099_v27, %v2095_v25  ;;  %3129 = vmatprep.mubr.bf16.mxu0 %v9650_v19  ;;  %3802 = vmatprep.mubr.bf16.mxu1 %v9650_v19 }
 0x301   :  { %2687 = vst [vmem:[#allocation2 + $0x640] sm:$0xff] %v2431_v28  ;;  %2689 = vst [vmem:[#allocation2 + $0x650] sm:$0xff] %v2433_v29 }
 0x302   :  { %2688 = vst [vmem:[#allocation2 + $0x648] sm:$0xff] %v2432_v31  ;;  %2690 = vst [vmem:[#allocation2 + $0x658] sm:$0xff] %v2434_v32  ;;  %v1429_v33 = vpop.f32.mrb[204].mxu0  ;;  %v2102_v34 = vpop.f32.mrb[204].mxu1 }
 0x303   :  { %v1431_v35 = vpop.f32.mrb[205].mxu0  ;;  %v2104_v36 = vpop.f32.mrb[205].mxu1  ;;  %v1430_v39 = vadd.f32 %v1429_v33, %v9971_v61  ;;  %v2103_v40 = vadd.f32 %v2102_v34, %v9975_v62  ;;  %v8409_v34 = vld [vmem:[#allocation6 + $0x78] sm:$0xff]  }
 0x304   :  { %v1433_v37 = vpop.f32.mrb[206].mxu0  ;;  %v2106_v38 = vpop.f32.mrb[206].mxu1  ;;  %v1432_v45 = vadd.f32 %v1431_v35, %v9979_v17  ;;  %v2105_v46 = vadd.f32 %v2104_v36, %v9983_v18 }
 0x305   :  { %v1434_v41 = vadd.f32 %v1433_v37, %v9971_v61  ;;  %v2107_v42 = vadd.f32 %v2106_v38, %v9975_v62  ;;  %v1435_v43 = vpop.f32.mrb[207].mxu0  ;;  %v2108_v44 = vpop.f32.mrb[207].mxu1 }
 0x306   :  { %v1436_v47 = vadd.f32 %v1435_v43, %v9979_v17  ;;  %v2109_v48 = vadd.f32 %v2108_v44, %v9983_v18 }
 0x307   :  { %v2435_v49 = vpack.c.bf16 %v1434_v41, %v1430_v39  ;;  %v2437_v50 = vpack.c.bf16 %v2107_v42, %v2103_v40  ;;  %3130 = vmatmul.mubr.bf16.gmra.mrb[56].mxu0 %v8408_v51  ;;  %3803 = vmatmul.mubr.bf16.gmra.mrb[56].mxu1 %v8408_v51 }
 0x308   :  { %v2436_v52 = vpack.c.bf16 %v1436_v47, %v1432_v45  ;;  %v2438_v53 = vpack.c.bf16 %v2109_v48, %v2105_v46  ;;  %3139 = vmatprep.mubr.bf16.mxu0 %v9650_v19  ;;  %3812 = vmatprep.mubr.bf16.mxu1 %v9650_v19 }
 0x309   :  { %2691 = vst [vmem:[#allocation2 + $0x660] sm:$0xff] %v2435_v49  ;;  %2693 = vst [vmem:[#allocation2 + $0x670] sm:$0xff] %v2437_v50 }
 0x30a   :  { %2692 = vst [vmem:[#allocation2 + $0x668] sm:$0xff] %v2436_v52  ;;  %2694 = vst [vmem:[#allocation2 + $0x678] sm:$0xff] %v2438_v53  ;;  %v1439_v55 = vpop.f32.mrb[208].mxu0  ;;  %v2112_v58 = vpop.f32.mrb[208].mxu1 }
 0x30b   :  { %v1441_v63 = vpop.f32.mrb[209].mxu0  ;;  %v2114_v16 = vpop.f32.mrb[209].mxu1  ;;  %v1440_v22 = vadd.f32 %v1439_v55, %v9971_v61  ;;  %v2113_v23 = vadd.f32 %v2112_v58, %v9975_v62  ;;  %v8410_v58 = vld [vmem:[#allocation6 + $0x80] sm:$0xff]  }
 0x30c   :  { %v1443_v20 = vpop.f32.mrb[210].mxu0  ;;  %v2116_v21 = vpop.f32.mrb[210].mxu1  ;;  %v1442_v28 = vadd.f32 %v1441_v63, %v9979_v17  ;;  %v2115_v29 = vadd.f32 %v2114_v16, %v9983_v18 }
 0x30d   :  { %v1444_v24 = vadd.f32 %v1443_v20, %v9971_v61  ;;  %v2117_v25 = vadd.f32 %v2116_v21, %v9975_v62  ;;  %v1445_v26 = vpop.f32.mrb[211].mxu0  ;;  %v2118_v27 = vpop.f32.mrb[211].mxu1 }
 0x30e   :  { %v1446_v30 = vadd.f32 %v1445_v26, %v9979_v17  ;;  %v2119_v31 = vadd.f32 %v2118_v27, %v9983_v18 }
 0x30f   :  { %v2439_v32 = vpack.c.bf16 %v1444_v24, %v1440_v22  ;;  %v2441_v33 = vpack.c.bf16 %v2117_v25, %v2113_v23  ;;  %3140 = vmatmul.mubr.bf16.gmra.mrb[60].mxu0 %v8409_v34  ;;  %3813 = vmatmul.mubr.bf16.gmra.mrb[60].mxu1 %v8409_v34 }
 0x310   :  { %v2440_v35 = vpack.c.bf16 %v1446_v30, %v1442_v28  ;;  %v2442_v36 = vpack.c.bf16 %v2119_v31, %v2115_v29  ;;  %3149 = vmatprep.mubr.bf16.mxu0 %v9650_v19  ;;  %3822 = vmatprep.mubr.bf16.mxu1 %v9650_v19 }
 0x311   :  { %2695 = vst [vmem:[#allocation2 + $0x680] sm:$0xff] %v2439_v32  ;;  %2697 = vst [vmem:[#allocation2 + $0x690] sm:$0xff] %v2441_v33 }
 0x312   :  { %2696 = vst [vmem:[#allocation2 + $0x688] sm:$0xff] %v2440_v35  ;;  %2698 = vst [vmem:[#allocation2 + $0x698] sm:$0xff] %v2442_v36  ;;  %v1449_v37 = vpop.f32.mrb[212].mxu0  ;;  %v2122_v38 = vpop.f32.mrb[212].mxu1 }
 0x313   :  { %v1451_v39 = vpop.f32.mrb[213].mxu0  ;;  %v2124_v40 = vpop.f32.mrb[213].mxu1  ;;  %v1450_v43 = vadd.f32 %v1449_v37, %v9971_v61  ;;  %v2123_v44 = vadd.f32 %v2122_v38, %v9975_v62  ;;  %v8411_v38 = vld [vmem:[#allocation6 + $0x88] sm:$0xff]  }
 0x314   :  { %v1453_v41 = vpop.f32.mrb[214].mxu0  ;;  %v2126_v42 = vpop.f32.mrb[214].mxu1  ;;  %v1452_v49 = vadd.f32 %v1451_v39, %v9979_v17  ;;  %v2125_v50 = vadd.f32 %v2124_v40, %v9983_v18 }
 0x315   :  { %v1454_v45 = vadd.f32 %v1453_v41, %v9971_v61  ;;  %v2127_v46 = vadd.f32 %v2126_v42, %v9975_v62  ;;  %v1455_v47 = vpop.f32.mrb[215].mxu0  ;;  %v2128_v48 = vpop.f32.mrb[215].mxu1 }
 0x316   :  { %v1456_v51 = vadd.f32 %v1455_v47, %v9979_v17  ;;  %v2129_v52 = vadd.f32 %v2128_v48, %v9983_v18 }
 0x317   :  { %v2443_v53 = vpack.c.bf16 %v1454_v45, %v1450_v43  ;;  %v2445_v55 = vpack.c.bf16 %v2127_v46, %v2123_v44  ;;  %3150 = vmatmul.mubr.bf16.gmra.mrb[64].mxu0 %v8410_v58  ;;  %3823 = vmatmul.mubr.bf16.gmra.mrb[64].mxu1 %v8410_v58 }
 0x318   :  { %v2444_v63 = vpack.c.bf16 %v1456_v51, %v1452_v49  ;;  %v2446_v16 = vpack.c.bf16 %v2129_v52, %v2125_v50  ;;  %3159 = vmatprep.mubr.bf16.mxu0 %v9650_v19  ;;  %3832 = vmatprep.mubr.bf16.mxu1 %v9650_v19 }
 0x319   :  { %2699 = vst [vmem:[#allocation2 + $0x6a0] sm:$0xff] %v2443_v53  ;;  %2701 = vst [vmem:[#allocation2 + $0x6b0] sm:$0xff] %v2445_v55 }
 0x31a   :  { %2700 = vst [vmem:[#allocation2 + $0x6a8] sm:$0xff] %v2444_v63  ;;  %2702 = vst [vmem:[#allocation2 + $0x6b8] sm:$0xff] %v2446_v16  ;;  %v1459_v20 = vpop.f32.mrb[216].mxu0  ;;  %v2132_v21 = vpop.f32.mrb[216].mxu1 }
 0x31b   :  { %v1461_v22 = vpop.f32.mrb[217].mxu0  ;;  %v2134_v23 = vpop.f32.mrb[217].mxu1  ;;  %v1460_v26 = vadd.f32 %v1459_v20, %v9971_v61  ;;  %v2133_v27 = vadd.f32 %v2132_v21, %v9975_v62  ;;  %v8412_v21 = vld [vmem:[#allocation6 + $0x90] sm:$0xff]  }
 0x31c   :  { %v1463_v24 = vpop.f32.mrb[218].mxu0  ;;  %v2136_v25 = vpop.f32.mrb[218].mxu1  ;;  %v1462_v32 = vadd.f32 %v1461_v22, %v9979_v17  ;;  %v2135_v33 = vadd.f32 %v2134_v23, %v9983_v18 }
 0x31d   :  { %v1464_v28 = vadd.f32 %v1463_v24, %v9971_v61  ;;  %v2137_v29 = vadd.f32 %v2136_v25, %v9975_v62  ;;  %v1465_v30 = vpop.f32.mrb[219].mxu0  ;;  %v2138_v31 = vpop.f32.mrb[219].mxu1 }
 0x31e   :  { %v1466_v34 = vadd.f32 %v1465_v30, %v9979_v17  ;;  %v2139_v35 = vadd.f32 %v2138_v31, %v9983_v18 }
 0x31f   :  { %v2447_v36 = vpack.c.bf16 %v1464_v28, %v1460_v26  ;;  %v2449_v37 = vpack.c.bf16 %v2137_v29, %v2133_v27  ;;  %3160 = vmatmul.mubr.bf16.gmra.mrb[68].mxu0 %v8411_v38  ;;  %3833 = vmatmul.mubr.bf16.gmra.mrb[68].mxu1 %v8411_v38 }
 0x320   :  { %v2448_v39 = vpack.c.bf16 %v1466_v34, %v1462_v32  ;;  %v2450_v40 = vpack.c.bf16 %v2139_v35, %v2135_v33  ;;  %3169 = vmatprep.mubr.bf16.mxu0 %v9650_v19  ;;  %3842 = vmatprep.mubr.bf16.mxu1 %v9650_v19 }
 0x321   :  { %2703 = vst [vmem:[#allocation2 + $0x6c0] sm:$0xff] %v2447_v36  ;;  %2705 = vst [vmem:[#allocation2 + $0x6d0] sm:$0xff] %v2449_v37 }
 0x322   :  { %2704 = vst [vmem:[#allocation2 + $0x6c8] sm:$0xff] %v2448_v39  ;;  %2706 = vst [vmem:[#allocation2 + $0x6d8] sm:$0xff] %v2450_v40  ;;  %v1469_v41 = vpop.f32.mrb[220].mxu0  ;;  %v2142_v42 = vpop.f32.mrb[220].mxu1 }
 0x323   :  { %v1471_v43 = vpop.f32.mrb[221].mxu0  ;;  %v2144_v44 = vpop.f32.mrb[221].mxu1  ;;  %v1470_v47 = vadd.f32 %v1469_v41, %v9971_v61  ;;  %v2143_v48 = vadd.f32 %v2142_v42, %v9975_v62  ;;  %v8413_v42 = vld [vmem:[#allocation6 + $0x98] sm:$0xff]  }
 0x324   :  { %v1473_v45 = vpop.f32.mrb[222].mxu0  ;;  %v2146_v46 = vpop.f32.mrb[222].mxu1  ;;  %v1472_v53 = vadd.f32 %v1471_v43, %v9979_v17  ;;  %v2145_v55 = vadd.f32 %v2144_v44, %v9983_v18 }
 0x325   :  { %v1474_v49 = vadd.f32 %v1473_v45, %v9971_v61  ;;  %v2147_v50 = vadd.f32 %v2146_v46, %v9975_v62  ;;  %v1475_v51 = vpop.f32.mrb[223].mxu0  ;;  %v2148_v52 = vpop.f32.mrb[223].mxu1 }
 0x326   :  { %v1476_v58 = vadd.f32 %v1475_v51, %v9979_v17  ;;  %v2149_v63 = vadd.f32 %v2148_v52, %v9983_v18 }
 0x327   :  { %v2451_v16 = vpack.c.bf16 %v1474_v49, %v1470_v47  ;;  %v2453_v20 = vpack.c.bf16 %v2147_v50, %v2143_v48  ;;  %3170 = vmatmul.mubr.bf16.gmra.mrb[72].mxu0 %v8412_v21  ;;  %3843 = vmatmul.mubr.bf16.gmra.mrb[72].mxu1 %v8412_v21 }
 0x328   :  { %v2452_v22 = vpack.c.bf16 %v1476_v58, %v1472_v53  ;;  %v2454_v23 = vpack.c.bf16 %v2149_v63, %v2145_v55  ;;  %3179 = vmatprep.mubr.bf16.mxu0 %v9650_v19  ;;  %3852 = vmatprep.mubr.bf16.mxu1 %v9650_v19 }
 0x329   :  { %2707 = vst [vmem:[#allocation2 + $0x6e0] sm:$0xff] %v2451_v16  ;;  %2709 = vst [vmem:[#allocation2 + $0x6f0] sm:$0xff] %v2453_v20 }
 0x32a   :  { %2708 = vst [vmem:[#allocation2 + $0x6e8] sm:$0xff] %v2452_v22  ;;  %2710 = vst [vmem:[#allocation2 + $0x6f8] sm:$0xff] %v2454_v23  ;;  %v1479_v24 = vpop.f32.mrb[224].mxu0  ;;  %v2152_v25 = vpop.f32.mrb[224].mxu1 }
 0x32b   :  { %v1481_v26 = vpop.f32.mrb[225].mxu0  ;;  %v2154_v27 = vpop.f32.mrb[225].mxu1  ;;  %v1480_v30 = vadd.f32 %v1479_v24, %v9971_v61  ;;  %v2153_v31 = vadd.f32 %v2152_v25, %v9975_v62  ;;  %v8414_v25 = vld [vmem:[#allocation6 + $0xa0] sm:$0xff]  }
 0x32c   :  { %v1483_v28 = vpop.f32.mrb[226].mxu0  ;;  %v2156_v29 = vpop.f32.mrb[226].mxu1  ;;  %v1482_v36 = vadd.f32 %v1481_v26, %v9979_v17  ;;  %v2155_v37 = vadd.f32 %v2154_v27, %v9983_v18 }
 0x32d   :  { %v1484_v32 = vadd.f32 %v1483_v28, %v9971_v61  ;;  %v2157_v33 = vadd.f32 %v2156_v29, %v9975_v62  ;;  %v1485_v34 = vpop.f32.mrb[227].mxu0  ;;  %v2158_v35 = vpop.f32.mrb[227].mxu1 }
 0x32e   :  { %v1486_v38 = vadd.f32 %v1485_v34, %v9979_v17  ;;  %v2159_v39 = vadd.f32 %v2158_v35, %v9983_v18 }
 0x32f   :  { %v2455_v40 = vpack.c.bf16 %v1484_v32, %v1480_v30  ;;  %v2457_v41 = vpack.c.bf16 %v2157_v33, %v2153_v31  ;;  %3180 = vmatmul.mubr.bf16.gmra.mrb[76].mxu0 %v8413_v42  ;;  %3853 = vmatmul.mubr.bf16.gmra.mrb[76].mxu1 %v8413_v42 }
 0x330   :  { %v2456_v43 = vpack.c.bf16 %v1486_v38, %v1482_v36  ;;  %v2458_v44 = vpack.c.bf16 %v2159_v39, %v2155_v37  ;;  %3189 = vmatprep.mubr.bf16.mxu0 %v9650_v19  ;;  %3862 = vmatprep.mubr.bf16.mxu1 %v9650_v19 }
 0x331   :  { %2711 = vst [vmem:[#allocation2 + $0x700] sm:$0xff] %v2455_v40  ;;  %2713 = vst [vmem:[#allocation2 + $0x710] sm:$0xff] %v2457_v41 }
 0x332   :  { %2712 = vst [vmem:[#allocation2 + $0x708] sm:$0xff] %v2456_v43  ;;  %2714 = vst [vmem:[#allocation2 + $0x718] sm:$0xff] %v2458_v44  ;;  %v1489_v45 = vpop.f32.mrb[228].mxu0  ;;  %v2162_v46 = vpop.f32.mrb[228].mxu1 }
 0x333   :  { %v1491_v47 = vpop.f32.mrb[229].mxu0  ;;  %v2164_v48 = vpop.f32.mrb[229].mxu1  ;;  %v1490_v51 = vadd.f32 %v1489_v45, %v9971_v61  ;;  %v2163_v52 = vadd.f32 %v2162_v46, %v9975_v62  ;;  %v8415_v46 = vld [vmem:[#allocation6 + $0xa8] sm:$0xff]  }
 0x334   :  { %v1493_v49 = vpop.f32.mrb[230].mxu0  ;;  %v2166_v50 = vpop.f32.mrb[230].mxu1  ;;  %v1492_v16 = vadd.f32 %v1491_v47, %v9979_v17  ;;  %v2165_v20 = vadd.f32 %v2164_v48, %v9983_v18 }
 0x335   :  { %v1494_v53 = vadd.f32 %v1493_v49, %v9971_v61  ;;  %v2167_v55 = vadd.f32 %v2166_v50, %v9975_v62  ;;  %v1495_v58 = vpop.f32.mrb[231].mxu0  ;;  %v2168_v63 = vpop.f32.mrb[231].mxu1 }
 0x336   :  { %v1496_v21 = vadd.f32 %v1495_v58, %v9979_v17  ;;  %v2169_v22 = vadd.f32 %v2168_v63, %v9983_v18 }
 0x337   :  { %v2459_v23 = vpack.c.bf16 %v1494_v53, %v1490_v51  ;;  %v2461_v24 = vpack.c.bf16 %v2167_v55, %v2163_v52  ;;  %3190 = vmatmul.mubr.bf16.gmra.mrb[80].mxu0 %v8414_v25  ;;  %3863 = vmatmul.mubr.bf16.gmra.mrb[80].mxu1 %v8414_v25 }
 0x338   :  { %v2460_v26 = vpack.c.bf16 %v1496_v21, %v1492_v16  ;;  %v2462_v27 = vpack.c.bf16 %v2169_v22, %v2165_v20  ;;  %3199 = vmatprep.mubr.bf16.mxu0 %v9650_v19  ;;  %3872 = vmatprep.mubr.bf16.mxu1 %v9650_v19 }
 0x339   :  { %2715 = vst [vmem:[#allocation2 + $0x720] sm:$0xff] %v2459_v23  ;;  %2717 = vst [vmem:[#allocation2 + $0x730] sm:$0xff] %v2461_v24 }
 0x33a   :  { %2716 = vst [vmem:[#allocation2 + $0x728] sm:$0xff] %v2460_v26  ;;  %2718 = vst [vmem:[#allocation2 + $0x738] sm:$0xff] %v2462_v27  ;;  %v1499_v28 = vpop.f32.mrb[232].mxu0  ;;  %v2172_v29 = vpop.f32.mrb[232].mxu1 }
 0x33b   :  { %v1501_v30 = vpop.f32.mrb[233].mxu0  ;;  %v2174_v31 = vpop.f32.mrb[233].mxu1  ;;  %v1500_v34 = vadd.f32 %v1499_v28, %v9971_v61  ;;  %v2173_v35 = vadd.f32 %v2172_v29, %v9975_v62  ;;  %v8416_v29 = vld [vmem:[#allocation6 + $0xb0] sm:$0xff]  }
 0x33c   :  { %v1503_v32 = vpop.f32.mrb[234].mxu0  ;;  %v2176_v33 = vpop.f32.mrb[234].mxu1  ;;  %v1502_v40 = vadd.f32 %v1501_v30, %v9979_v17  ;;  %v2175_v41 = vadd.f32 %v2174_v31, %v9983_v18 }
 0x33d   :  { %v1504_v36 = vadd.f32 %v1503_v32, %v9971_v61  ;;  %v2177_v37 = vadd.f32 %v2176_v33, %v9975_v62  ;;  %v1505_v38 = vpop.f32.mrb[235].mxu0  ;;  %v2178_v39 = vpop.f32.mrb[235].mxu1 }
 0x33e   :  { %v1506_v42 = vadd.f32 %v1505_v38, %v9979_v17  ;;  %v2179_v43 = vadd.f32 %v2178_v39, %v9983_v18 }
 0x33f   :  { %v2463_v44 = vpack.c.bf16 %v1504_v36, %v1500_v34  ;;  %v2465_v45 = vpack.c.bf16 %v2177_v37, %v2173_v35  ;;  %3200 = vmatmul.mubr.bf16.gmra.mrb[84].mxu0 %v8415_v46  ;;  %3873 = vmatmul.mubr.bf16.gmra.mrb[84].mxu1 %v8415_v46 }
 0x340   :  { %v2464_v47 = vpack.c.bf16 %v1506_v42, %v1502_v40  ;;  %v2466_v48 = vpack.c.bf16 %v2179_v43, %v2175_v41  ;;  %3209 = vmatprep.mubr.bf16.mxu0 %v9650_v19  ;;  %3882 = vmatprep.mubr.bf16.mxu1 %v9650_v19 }
 0x341   :  { %2719 = vst [vmem:[#allocation2 + $0x740] sm:$0xff] %v2463_v44  ;;  %2721 = vst [vmem:[#allocation2 + $0x750] sm:$0xff] %v2465_v45 }
 0x342   :  { %2720 = vst [vmem:[#allocation2 + $0x748] sm:$0xff] %v2464_v47  ;;  %2722 = vst [vmem:[#allocation2 + $0x758] sm:$0xff] %v2466_v48  ;;  %v1509_v49 = vpop.f32.mrb[236].mxu0  ;;  %v2182_v50 = vpop.f32.mrb[236].mxu1 }
 0x343   :  { %v1511_v51 = vpop.f32.mrb[237].mxu0  ;;  %v2184_v52 = vpop.f32.mrb[237].mxu1  ;;  %v1510_v58 = vadd.f32 %v1509_v49, %v9971_v61  ;;  %v2183_v63 = vadd.f32 %v2182_v50, %v9975_v62  ;;  %v8417_v50 = vld [vmem:[#allocation6 + $0xb8] sm:$0xff]  }
 0x344   :  { %v1513_v53 = vpop.f32.mrb[238].mxu0  ;;  %v2186_v55 = vpop.f32.mrb[238].mxu1  ;;  %v1512_v23 = vadd.f32 %v1511_v51, %v9979_v17  ;;  %v2185_v24 = vadd.f32 %v2184_v52, %v9983_v18 }
 0x345   :  { %v1514_v16 = vadd.f32 %v1513_v53, %v9971_v61  ;;  %v2187_v20 = vadd.f32 %v2186_v55, %v9975_v62  ;;  %v1515_v21 = vpop.f32.mrb[239].mxu0  ;;  %v2188_v22 = vpop.f32.mrb[239].mxu1 }
 0x346   :  { %v1516_v25 = vadd.f32 %v1515_v21, %v9979_v17  ;;  %v2189_v26 = vadd.f32 %v2188_v22, %v9983_v18 }
 0x347   :  { %v2467_v27 = vpack.c.bf16 %v1514_v16, %v1510_v58  ;;  %v2469_v28 = vpack.c.bf16 %v2187_v20, %v2183_v63  ;;  %3210 = vmatmul.mubr.bf16.gmra.mrb[88].mxu0 %v8416_v29  ;;  %3883 = vmatmul.mubr.bf16.gmra.mrb[88].mxu1 %v8416_v29 }
 0x348   :  { %v2468_v30 = vpack.c.bf16 %v1516_v25, %v1512_v23  ;;  %v2470_v31 = vpack.c.bf16 %v2189_v26, %v2185_v24  ;;  %3219 = vmatprep.mubr.bf16.mxu0 %v9650_v19  ;;  %3892 = vmatprep.mubr.bf16.mxu1 %v9650_v19 }
 0x349   :  { %2723 = vst [vmem:[#allocation2 + $0x760] sm:$0xff] %v2467_v27  ;;  %2725 = vst [vmem:[#allocation2 + $0x770] sm:$0xff] %v2469_v28 }
 0x34a   :  { %2724 = vst [vmem:[#allocation2 + $0x768] sm:$0xff] %v2468_v30  ;;  %2726 = vst [vmem:[#allocation2 + $0x778] sm:$0xff] %v2470_v31  ;;  %v1519_v32 = vpop.f32.mrb[240].mxu0  ;;  %v2192_v33 = vpop.f32.mrb[240].mxu1 }
 0x34b   :  { %v1521_v34 = vpop.f32.mrb[241].mxu0  ;;  %v2194_v35 = vpop.f32.mrb[241].mxu1  ;;  %v1520_v38 = vadd.f32 %v1519_v32, %v9971_v61  ;;  %v2193_v39 = vadd.f32 %v2192_v33, %v9975_v62  ;;  %v8418_v33 = vld [vmem:[#allocation6 + $0xc0] sm:$0xff]  }
 0x34c   :  { %v1523_v36 = vpop.f32.mrb[242].mxu0  ;;  %v2196_v37 = vpop.f32.mrb[242].mxu1  ;;  %v1522_v44 = vadd.f32 %v1521_v34, %v9979_v17  ;;  %v2195_v45 = vadd.f32 %v2194_v35, %v9983_v18 }
 0x34d   :  { %v1524_v40 = vadd.f32 %v1523_v36, %v9971_v61  ;;  %v2197_v41 = vadd.f32 %v2196_v37, %v9975_v62  ;;  %v1525_v42 = vpop.f32.mrb[243].mxu0  ;;  %v2198_v43 = vpop.f32.mrb[243].mxu1 }
 0x34e   :  { %v1526_v46 = vadd.f32 %v1525_v42, %v9979_v17  ;;  %v2199_v47 = vadd.f32 %v2198_v43, %v9983_v18 }
 0x34f   :  { %v2471_v48 = vpack.c.bf16 %v1524_v40, %v1520_v38  ;;  %v2473_v49 = vpack.c.bf16 %v2197_v41, %v2193_v39  ;;  %3220 = vmatmul.mubr.bf16.gmra.mrb[92].mxu0 %v8417_v50  ;;  %3893 = vmatmul.mubr.bf16.gmra.mrb[92].mxu1 %v8417_v50 }
 0x350   :  { %v2472_v51 = vpack.c.bf16 %v1526_v46, %v1522_v44  ;;  %v2474_v52 = vpack.c.bf16 %v2199_v47, %v2195_v45  ;;  %3229 = vmatprep.mubr.bf16.mxu0 %v9650_v19  ;;  %3902 = vmatprep.mubr.bf16.mxu1 %v9650_v19 }
 0x351   :  { %2727 = vst [vmem:[#allocation2 + $0x780] sm:$0xff] %v2471_v48  ;;  %2729 = vst [vmem:[#allocation2 + $0x790] sm:$0xff] %v2473_v49 }
 0x352   :  { %2728 = vst [vmem:[#allocation2 + $0x788] sm:$0xff] %v2472_v51  ;;  %2730 = vst [vmem:[#allocation2 + $0x798] sm:$0xff] %v2474_v52  ;;  %v1529_v53 = vpop.f32.mrb[244].mxu0  ;;  %v2202_v55 = vpop.f32.mrb[244].mxu1 }
 0x353   :  { %v1531_v58 = vpop.f32.mrb[245].mxu0  ;;  %v2204_v63 = vpop.f32.mrb[245].mxu1  ;;  %v1530_v21 = vadd.f32 %v1529_v53, %v9971_v61  ;;  %v2203_v22 = vadd.f32 %v2202_v55, %v9975_v62  ;;  %v8419_v55 = vld [vmem:[#allocation6 + $0xc8] sm:$0xff]  }
 0x354   :  { %v1533_v16 = vpop.f32.mrb[246].mxu0  ;;  %v2206_v20 = vpop.f32.mrb[246].mxu1  ;;  %v1532_v27 = vadd.f32 %v1531_v58, %v9979_v17  ;;  %v2205_v28 = vadd.f32 %v2204_v63, %v9983_v18 }
 0x355   :  { %v1534_v23 = vadd.f32 %v1533_v16, %v9971_v61  ;;  %v2207_v24 = vadd.f32 %v2206_v20, %v9975_v62  ;;  %v1535_v25 = vpop.f32.mrb[247].mxu0  ;;  %v2208_v26 = vpop.f32.mrb[247].mxu1 }
 0x356   :  { %v1536_v29 = vadd.f32 %v1535_v25, %v9979_v17  ;;  %v2209_v30 = vadd.f32 %v2208_v26, %v9983_v18 }
 0x357   :  { %v2475_v31 = vpack.c.bf16 %v1534_v23, %v1530_v21  ;;  %v2477_v32 = vpack.c.bf16 %v2207_v24, %v2203_v22  ;;  %3230 = vmatmul.mubr.bf16.gmra.mrb[96].mxu0 %v8418_v33  ;;  %3903 = vmatmul.mubr.bf16.gmra.mrb[96].mxu1 %v8418_v33 }
 0x358   :  { %v2476_v34 = vpack.c.bf16 %v1536_v29, %v1532_v27  ;;  %v2478_v35 = vpack.c.bf16 %v2209_v30, %v2205_v28  ;;  %3239 = vmatprep.mubr.bf16.mxu0 %v9650_v19  ;;  %3912 = vmatprep.mubr.bf16.mxu1 %v9650_v19 }
 0x359   :  { %2731 = vst [vmem:[#allocation2 + $0x7a0] sm:$0xff] %v2475_v31  ;;  %2733 = vst [vmem:[#allocation2 + $0x7b0] sm:$0xff] %v2477_v32 }
 0x35a   :  { %2732 = vst [vmem:[#allocation2 + $0x7a8] sm:$0xff] %v2476_v34  ;;  %2734 = vst [vmem:[#allocation2 + $0x7b8] sm:$0xff] %v2478_v35  ;;  %v1539_v36 = vpop.f32.mrb[248].mxu0  ;;  %v2212_v37 = vpop.f32.mrb[248].mxu1  ;;  %v2775_v35 = vld [vmem:[%s13505_s8] sm:$0xf] }
 0x35b   :  { %v1541_v38 = vpop.f32.mrb[249].mxu0  ;;  %v2214_v39 = vpop.f32.mrb[249].mxu1  ;;  %v1540_v42 = vadd.f32 %v1539_v36, %v9971_v61  ;;  %v2213_v43 = vadd.f32 %v2212_v37, %v9975_v62 }
 0x35c   :  { %v1543_v40 = vpop.f32.mrb[250].mxu0  ;;  %v2216_v41 = vpop.f32.mrb[250].mxu1  ;;  %v1542_v48 = vadd.f32 %v1541_v38, %v9979_v17  ;;  %v2215_v49 = vadd.f32 %v2214_v39, %v9983_v18  ;;  %v8420_v38 = vld [vmem:[#allocation6 + $0xd0] sm:$0xff]  }
 0x35d   :  { %v1544_v44 = vadd.f32 %v1543_v40, %v9971_v61  ;;  %v2217_v45 = vadd.f32 %v2216_v41, %v9975_v62  ;;  %v1545_v46 = vpop.f32.mrb[251].mxu0  ;;  %v2218_v47 = vpop.f32.mrb[251].mxu1  ;;  %v10638_v41 = vrot.slane %v2775_v35, %v327_v59 }
 0x35e   :  { %v1546_v50 = vadd.f32 %v1545_v46, %v9979_v17  ;;  %v2219_v51 = vadd.f32 %v2218_v47, %v9983_v18 }
 0x35f   :  { %v2479_v52 = vpack.c.bf16 %v1544_v44, %v1540_v42  ;;  %v2481_v53 = vpack.c.bf16 %v2217_v45, %v2213_v43  ;;  %3240 = vmatmul.mubr.bf16.gmra.mrb[100].mxu0 %v8419_v55  ;;  %3913 = vmatmul.mubr.bf16.gmra.mrb[100].mxu1 %v8419_v55  ;;  %v10642_v42 = vrot.slane %v2775_v35, %v335_v60  ;;  %v8421_v55 = vld [vmem:[#allocation6 + $0xd8] sm:$0xff]  }
 0x360   :  { %v2480_v58 = vpack.c.bf16 %v1546_v50, %v1542_v48  ;;  %v2482_v63 = vpack.c.bf16 %v2219_v51, %v2215_v49  ;;  %3249 = vmatprep.mubr.bf16.mxu0 %v9650_v19  ;;  %3922 = vmatprep.mubr.bf16.mxu1 %v9650_v19 }
 0x361   :  { %2735 = vst [vmem:[#allocation2 + $0x7c0] sm:$0xff] %v2479_v52  ;;  %2737 = vst [vmem:[#allocation2 + $0x7d0] sm:$0xff] %v2481_v53 }
 0x362   :  { %2736 = vst [vmem:[#allocation2 + $0x7c8] sm:$0xff] %v2480_v58  ;;  %2738 = vst [vmem:[#allocation2 + $0x7d8] sm:$0xff] %v2482_v63  ;;  %v1549_v16 = vpop.f32.mrb[252].mxu0  ;;  %v2222_v20 = vpop.f32.mrb[252].mxu1 }
 0x363   :  { %v1551_v21 = vpop.f32.mrb[253].mxu0  ;;  %v2224_v22 = vpop.f32.mrb[253].mxu1  ;;  %v1550_v25 = vadd.f32 %v1549_v16, %v9971_v61  ;;  %v2223_v26 = vadd.f32 %v2222_v20, %v9975_v62 }
 0x364   :  { %v1553_v23 = vpop.f32.mrb[254].mxu0  ;;  %v2226_v24 = vpop.f32.mrb[254].mxu1  ;;  %v1552_v31 = vadd.f32 %v1551_v21, %v9979_v17  ;;  %v2225_v32 = vadd.f32 %v2224_v22, %v9983_v18 }
 0x365   :  { %v1554_v27 = vadd.f32 %v1553_v23, %v9971_v61  ;;  %v2227_v28 = vadd.f32 %v2226_v24, %v9975_v62  ;;  %v1555_v29 = vpop.f32.mrb[255].mxu0  ;;  %v2228_v30 = vpop.f32.mrb[255].mxu1 }
 0x366   :  { %v1556_v33 = vadd.f32 %v1555_v29, %v9979_v17  ;;  %v2229_v34 = vadd.f32 %v2228_v30, %v9983_v18  ;;  %v10630_v17 = vrot.slane %v2775_v35, %v323_v56  ;;  %v10634_v18 = vrot.slane %v2775_v35, %v331_v57 }
 0x367   :  { %v2483_v36 = vpack.c.bf16 %v1554_v27, %v1550_v25  ;;  %v2485_v37 = vpack.c.bf16 %v2227_v28, %v2223_v26  ;;  %3250 = vmatmul.mubr.bf16.gmra.mrb[104].mxu0 %v8420_v38  ;;  %3923 = vmatmul.mubr.bf16.gmra.mrb[104].mxu1 %v8420_v38 }
 0x368   :  { %v2484_v61 = vpack.c.bf16 %v1556_v33, %v1552_v31  ;;  %v2486_v62 = vpack.c.bf16 %v2229_v34, %v2225_v32  ;;  %3259 = vmatprep.mubr.bf16.mxu0 %v9650_v19  ;;  %3932 = vmatprep.mubr.bf16.mxu1 %v9650_v19 }
 0x369   :  { %2739 = vst [vmem:[#allocation2 + $0x7e0] sm:$0xff] %v2483_v36  ;;  %2741 = vst [vmem:[#allocation2 + $0x7f0] sm:$0xff] %v2485_v37  ;;  %v8422_v37 = vld [vmem:[#allocation6 + $0xe0] sm:$0xff]  }
 0x36a   :  { %2740 = vst [vmem:[#allocation2 + $0x7e8] sm:$0xff] %v2484_v61  ;;  %2742 = vst [vmem:[#allocation2 + $0x7f8] sm:$0xff] %v2486_v62  ;;  %v2991_v39 = vpop.f32.mrb[0].mxu0  ;;  %v3664_v40 = vpop.f32.mrb[0].mxu1 }
 0x36b   :  { %v2993_v43 = vpop.f32.mrb[1].mxu0  ;;  %v3666_v44 = vpop.f32.mrb[1].mxu1  ;;  %v2992_v46 = vadd.f32 %v2991_v39, %v10630_v17  ;;  %v3665_v57 = vadd.f32 %v3664_v40, %v10634_v18 }
 0x36c   :  { %v2995_v56 = vpop.f32.mrb[2].mxu0  ;;  %v3668_v45 = vpop.f32.mrb[2].mxu1  ;;  %v2994_v59 = vadd.f32 %v2993_v43, %v10638_v41  ;;  %v3667_v54 = vadd.f32 %v3666_v44, %v10642_v42 }
 0x36d   :  { %v2996_v47 = vadd.f32 %v2995_v56, %v10630_v17  ;;  %v3669_v48 = vadd.f32 %v3668_v45, %v10634_v18  ;;  %v2997_v49 = vpop.f32.mrb[3].mxu0  ;;  %v3670_v50 = vpop.f32.mrb[3].mxu1 }
 0x36e   :  { %v2998_v60 = vadd.f32 %v2997_v49, %v10638_v41  ;;  %v3671_v51 = vadd.f32 %v3670_v50, %v10642_v42 }
 0x36f   :  { %v4303_v52 = vpack.c.bf16 %v2996_v47, %v2992_v46  ;;  %v4305_v53 = vpack.c.bf16 %v3669_v48, %v3665_v57  ;;  %3260 = vmatmul.mubr.bf16.gmra.mrb[108].mxu0 %v8421_v55  ;;  %3933 = vmatmul.mubr.bf16.gmra.mrb[108].mxu1 %v8421_v55 }
 0x370   :  { %v4304_v58 = vpack.c.bf16 %v2998_v60, %v2994_v59  ;;  %v4306_v63 = vpack.c.bf16 %v3671_v51, %v3667_v54  ;;  %3269 = vmatprep.mubr.bf16.mxu0 %v9650_v19  ;;  %3942 = vmatprep.mubr.bf16.mxu1 %v9650_v19 }
 0x371   :  { %4559 = vst [vmem:[#allocation3] sm:$0xff] %v4303_v52  ;;  %4561 = vst [vmem:[#allocation3 + $0x10] sm:$0xff] %v4305_v53  ;;  %v8423_v53 = vld [vmem:[#allocation6 + $0xe8] sm:$0xff]  }
 0x372   :  { %4560 = vst [vmem:[#allocation3 + $0x8] sm:$0xff] %v4304_v58  ;;  %4562 = vst [vmem:[#allocation3 + $0x18] sm:$0xff] %v4306_v63  ;;  %v3001_v16 = vpop.f32.mrb[4].mxu0  ;;  %v3674_v20 = vpop.f32.mrb[4].mxu1 }
 0x373   :  { %v3003_v21 = vpop.f32.mrb[5].mxu0  ;;  %v3676_v22 = vpop.f32.mrb[5].mxu1  ;;  %v3002_v25 = vadd.f32 %v3001_v16, %v10630_v17  ;;  %v3675_v26 = vadd.f32 %v3674_v20, %v10634_v18 }
 0x374   :  { %v3005_v23 = vpop.f32.mrb[6].mxu0  ;;  %v3678_v24 = vpop.f32.mrb[6].mxu1  ;;  %v3004_v31 = vadd.f32 %v3003_v21, %v10638_v41  ;;  %v3677_v32 = vadd.f32 %v3676_v22, %v10642_v42 }
 0x375   :  { %v3006_v27 = vadd.f32 %v3005_v23, %v10630_v17  ;;  %v3679_v28 = vadd.f32 %v3678_v24, %v10634_v18  ;;  %v3007_v29 = vpop.f32.mrb[7].mxu0  ;;  %v3680_v30 = vpop.f32.mrb[7].mxu1 }
 0x376   :  { %v3008_v33 = vadd.f32 %v3007_v29, %v10638_v41  ;;  %v3681_v34 = vadd.f32 %v3680_v30, %v10642_v42 }
 0x377   :  { %v4307_v35 = vpack.c.bf16 %v3006_v27, %v3002_v25  ;;  %v4309_v36 = vpack.c.bf16 %v3679_v28, %v3675_v26  ;;  %3270 = vmatmul.mubr.bf16.gmra.mrb[112].mxu0 %v8422_v37  ;;  %3943 = vmatmul.mubr.bf16.gmra.mrb[112].mxu1 %v8422_v37 }
 0x378   :  { %v4308_v38 = vpack.c.bf16 %v3008_v33, %v3004_v31  ;;  %v4310_v61 = vpack.c.bf16 %v3681_v34, %v3677_v32  ;;  %3279 = vmatprep.mubr.bf16.mxu0 %v9650_v19  ;;  %3952 = vmatprep.mubr.bf16.mxu1 %v9650_v19 }
 0x379   :  { %4563 = vst [vmem:[#allocation3 + $0x20] sm:$0xff] %v4307_v35  ;;  %4565 = vst [vmem:[#allocation3 + $0x30] sm:$0xff] %v4309_v36  ;;  %v8424_v36 = vld [vmem:[#allocation6 + $0xf0] sm:$0xff]  }
 0x37a   :  { %4564 = vst [vmem:[#allocation3 + $0x28] sm:$0xff] %v4308_v38  ;;  %4566 = vst [vmem:[#allocation3 + $0x38] sm:$0xff] %v4310_v61  ;;  %v3011_v62 = vpop.f32.mrb[8].mxu0  ;;  %v3684_v39 = vpop.f32.mrb[8].mxu1 }
 0x37b   :  { %v3013_v40 = vpop.f32.mrb[9].mxu0  ;;  %v3686_v43 = vpop.f32.mrb[9].mxu1  ;;  %v3012_v45 = vadd.f32 %v3011_v62, %v10630_v17  ;;  %v3685_v46 = vadd.f32 %v3684_v39, %v10634_v18 }
 0x37c   :  { %v3015_v44 = vpop.f32.mrb[10].mxu0  ;;  %v3688_v56 = vpop.f32.mrb[10].mxu1  ;;  %v3014_v50 = vadd.f32 %v3013_v40, %v10638_v41  ;;  %v3687_v59 = vadd.f32 %v3686_v43, %v10642_v42 }
 0x37d   :  { %v3016_v57 = vadd.f32 %v3015_v44, %v10630_v17  ;;  %v3689_v47 = vadd.f32 %v3688_v56, %v10634_v18  ;;  %v3017_v48 = vpop.f32.mrb[11].mxu0  ;;  %v3690_v49 = vpop.f32.mrb[11].mxu1 }
 0x37e   :  { %v3018_v54 = vadd.f32 %v3017_v48, %v10638_v41  ;;  %v3691_v60 = vadd.f32 %v3690_v49, %v10642_v42 }
 0x37f   :  { %v4311_v51 = vpack.c.bf16 %v3016_v57, %v3012_v45  ;;  %v4313_v52 = vpack.c.bf16 %v3689_v47, %v3685_v46  ;;  %3280 = vmatmul.mubr.bf16.gmra.mrb[116].mxu0 %v8423_v53  ;;  %3953 = vmatmul.mubr.bf16.gmra.mrb[116].mxu1 %v8423_v53 }
 0x380   :  { %v4312_v55 = vpack.c.bf16 %v3018_v54, %v3014_v50  ;;  %v4314_v58 = vpack.c.bf16 %v3691_v60, %v3687_v59  ;;  %3289 = vmatprep.mubr.bf16.mxu0 %v9650_v19  ;;  %3962 = vmatprep.mubr.bf16.mxu1 %v9650_v19 }
 0x381   :  { %4567 = vst [vmem:[#allocation3 + $0x40] sm:$0xff] %v4311_v51  ;;  %4569 = vst [vmem:[#allocation3 + $0x50] sm:$0xff] %v4313_v52  ;;  %v8425_v52 = vld [vmem:[#allocation6 + $0xf8] sm:$0xff]  }
 0x382   :  { %4568 = vst [vmem:[#allocation3 + $0x48] sm:$0xff] %v4312_v55  ;;  %4570 = vst [vmem:[#allocation3 + $0x58] sm:$0xff] %v4314_v58  ;;  %v3021_v63 = vpop.f32.mrb[12].mxu0  ;;  %v3694_v16 = vpop.f32.mrb[12].mxu1 }
 0x383   :  { %v3023_v20 = vpop.f32.mrb[13].mxu0  ;;  %v3696_v21 = vpop.f32.mrb[13].mxu1  ;;  %v3022_v24 = vadd.f32 %v3021_v63, %v10630_v17  ;;  %v3695_v25 = vadd.f32 %v3694_v16, %v10634_v18 }
 0x384   :  { %v3025_v22 = vpop.f32.mrb[14].mxu0  ;;  %v3698_v23 = vpop.f32.mrb[14].mxu1  ;;  %v3024_v30 = vadd.f32 %v3023_v20, %v10638_v41  ;;  %v3697_v31 = vadd.f32 %v3696_v21, %v10642_v42 }
 0x385   :  { %v3026_v26 = vadd.f32 %v3025_v22, %v10630_v17  ;;  %v3699_v27 = vadd.f32 %v3698_v23, %v10634_v18  ;;  %v3027_v28 = vpop.f32.mrb[15].mxu0  ;;  %v3700_v29 = vpop.f32.mrb[15].mxu1 }
 0x386   :  { %v3028_v32 = vadd.f32 %v3027_v28, %v10638_v41  ;;  %v3701_v33 = vadd.f32 %v3700_v29, %v10642_v42 }
 0x387   :  { %v4315_v34 = vpack.c.bf16 %v3026_v26, %v3022_v24  ;;  %v4317_v35 = vpack.c.bf16 %v3699_v27, %v3695_v25  ;;  %3290 = vmatmul.mubr.bf16.gmra.mrb[120].mxu0 %v8424_v36  ;;  %3963 = vmatmul.mubr.bf16.gmra.mrb[120].mxu1 %v8424_v36 }
 0x388   :  { %v4316_v37 = vpack.c.bf16 %v3028_v32, %v3024_v30  ;;  %v4318_v38 = vpack.c.bf16 %v3701_v33, %v3697_v31  ;;  %3299 = vmatprep.mubr.bf16.mxu0 %v9650_v19  ;;  %3972 = vmatprep.mubr.bf16.mxu1 %v9650_v19 }
 0x389   :  { %4571 = vst [vmem:[#allocation3 + $0x60] sm:$0xff] %v4315_v34  ;;  %4573 = vst [vmem:[#allocation3 + $0x70] sm:$0xff] %v4317_v35  ;;  %v8426_v35 = vld [vmem:[#allocation6 + $0x100] sm:$0xff]  }
 0x38a   :  { %4572 = vst [vmem:[#allocation3 + $0x68] sm:$0xff] %v4316_v37  ;;  %4574 = vst [vmem:[#allocation3 + $0x78] sm:$0xff] %v4318_v38  ;;  %v3031_v61 = vpop.f32.mrb[16].mxu0  ;;  %v3704_v62 = vpop.f32.mrb[16].mxu1 }
 0x38b   :  { %v3033_v39 = vpop.f32.mrb[17].mxu0  ;;  %v3706_v40 = vpop.f32.mrb[17].mxu1  ;;  %v3032_v56 = vadd.f32 %v3031_v61, %v10630_v17  ;;  %v3705_v45 = vadd.f32 %v3704_v62, %v10634_v18 }
 0x38c   :  { %v3035_v43 = vpop.f32.mrb[18].mxu0  ;;  %v3708_v44 = vpop.f32.mrb[18].mxu1  ;;  %v3034_v49 = vadd.f32 %v3033_v39, %v10638_v41  ;;  %v3707_v50 = vadd.f32 %v3706_v40, %v10642_v42 }
 0x38d   :  { %v3036_v46 = vadd.f32 %v3035_v43, %v10630_v17  ;;  %v3709_v57 = vadd.f32 %v3708_v44, %v10634_v18  ;;  %v3037_v47 = vpop.f32.mrb[19].mxu0  ;;  %v3710_v48 = vpop.f32.mrb[19].mxu1 }
 0x38e   :  { %v3038_v59 = vadd.f32 %v3037_v47, %v10638_v41  ;;  %v3711_v54 = vadd.f32 %v3710_v48, %v10642_v42 }
 0x38f   :  { %v4319_v60 = vpack.c.bf16 %v3036_v46, %v3032_v56  ;;  %v4321_v51 = vpack.c.bf16 %v3709_v57, %v3705_v45  ;;  %3300 = vmatmul.mubr.bf16.gmra.mrb[124].mxu0 %v8425_v52  ;;  %3973 = vmatmul.mubr.bf16.gmra.mrb[124].mxu1 %v8425_v52 }
 0x390   :  { %v4320_v53 = vpack.c.bf16 %v3038_v59, %v3034_v49  ;;  %v4322_v55 = vpack.c.bf16 %v3711_v54, %v3707_v50  ;;  %3309 = vmatprep.mubr.bf16.mxu0 %v9650_v19  ;;  %3982 = vmatprep.mubr.bf16.mxu1 %v9650_v19 }
 0x391   :  { %4575 = vst [vmem:[#allocation3 + $0x80] sm:$0xff] %v4319_v60  ;;  %4577 = vst [vmem:[#allocation3 + $0x90] sm:$0xff] %v4321_v51  ;;  %v8427_v51 = vld [vmem:[#allocation6 + $0x108] sm:$0xff]  }
 0x392   :  { %4576 = vst [vmem:[#allocation3 + $0x88] sm:$0xff] %v4320_v53  ;;  %4578 = vst [vmem:[#allocation3 + $0x98] sm:$0xff] %v4322_v55  ;;  %v3041_v58 = vpop.f32.mrb[20].mxu0  ;;  %v3714_v63 = vpop.f32.mrb[20].mxu1 }
 0x393   :  { %v3043_v16 = vpop.f32.mrb[21].mxu0  ;;  %v3716_v20 = vpop.f32.mrb[21].mxu1  ;;  %v3042_v23 = vadd.f32 %v3041_v58, %v10630_v17  ;;  %v3715_v24 = vadd.f32 %v3714_v63, %v10634_v18 }
 0x394   :  { %v3045_v21 = vpop.f32.mrb[22].mxu0  ;;  %v3718_v22 = vpop.f32.mrb[22].mxu1  ;;  %v3044_v29 = vadd.f32 %v3043_v16, %v10638_v41  ;;  %v3717_v30 = vadd.f32 %v3716_v20, %v10642_v42 }
 0x395   :  { %v3046_v25 = vadd.f32 %v3045_v21, %v10630_v17  ;;  %v3719_v26 = vadd.f32 %v3718_v22, %v10634_v18  ;;  %v3047_v27 = vpop.f32.mrb[23].mxu0  ;;  %v3720_v28 = vpop.f32.mrb[23].mxu1 }
 0x396   :  { %v3048_v31 = vadd.f32 %v3047_v27, %v10638_v41  ;;  %v3721_v32 = vadd.f32 %v3720_v28, %v10642_v42 }
 0x397   :  { %v4323_v33 = vpack.c.bf16 %v3046_v25, %v3042_v23  ;;  %v4325_v34 = vpack.c.bf16 %v3719_v26, %v3715_v24  ;;  %3310 = vmatmul.mubr.bf16.gmra.mrb[128].mxu0 %v8426_v35  ;;  %3983 = vmatmul.mubr.bf16.gmra.mrb[128].mxu1 %v8426_v35 }
 0x398   :  { %v4324_v36 = vpack.c.bf16 %v3048_v31, %v3044_v29  ;;  %v4326_v37 = vpack.c.bf16 %v3721_v32, %v3717_v30  ;;  %3319 = vmatprep.mubr.bf16.mxu0 %v9650_v19  ;;  %3992 = vmatprep.mubr.bf16.mxu1 %v9650_v19 }
 0x399   :  { %4579 = vst [vmem:[#allocation3 + $0xa0] sm:$0xff] %v4323_v33  ;;  %4581 = vst [vmem:[#allocation3 + $0xb0] sm:$0xff] %v4325_v34  ;;  %v8428_v34 = vld [vmem:[#allocation6 + $0x110] sm:$0xff]  }
 0x39a   :  { %4580 = vst [vmem:[#allocation3 + $0xa8] sm:$0xff] %v4324_v36  ;;  %4582 = vst [vmem:[#allocation3 + $0xb8] sm:$0xff] %v4326_v37  ;;  %v3051_v38 = vpop.f32.mrb[24].mxu0  ;;  %v3724_v61 = vpop.f32.mrb[24].mxu1 }
 0x39b   :  { %v3053_v62 = vpop.f32.mrb[25].mxu0  ;;  %v3726_v39 = vpop.f32.mrb[25].mxu1  ;;  %v3052_v44 = vadd.f32 %v3051_v38, %v10630_v17  ;;  %v3725_v56 = vadd.f32 %v3724_v61, %v10634_v18 }
 0x39c   :  { %v3055_v40 = vpop.f32.mrb[26].mxu0  ;;  %v3728_v43 = vpop.f32.mrb[26].mxu1  ;;  %v3054_v48 = vadd.f32 %v3053_v62, %v10638_v41  ;;  %v3727_v49 = vadd.f32 %v3726_v39, %v10642_v42 }
 0x39d   :  { %v3056_v45 = vadd.f32 %v3055_v40, %v10630_v17  ;;  %v3729_v46 = vadd.f32 %v3728_v43, %v10634_v18  ;;  %v3057_v57 = vpop.f32.mrb[27].mxu0  ;;  %v3730_v47 = vpop.f32.mrb[27].mxu1 }
 0x39e   :  { %v3058_v50 = vadd.f32 %v3057_v57, %v10638_v41  ;;  %v3731_v59 = vadd.f32 %v3730_v47, %v10642_v42 }
 0x39f   :  { %v4327_v54 = vpack.c.bf16 %v3056_v45, %v3052_v44  ;;  %v4329_v60 = vpack.c.bf16 %v3729_v46, %v3725_v56  ;;  %3320 = vmatmul.mubr.bf16.gmra.mrb[132].mxu0 %v8427_v51  ;;  %3993 = vmatmul.mubr.bf16.gmra.mrb[132].mxu1 %v8427_v51 }
 0x3a0   :  { %v4328_v52 = vpack.c.bf16 %v3058_v50, %v3054_v48  ;;  %v4330_v53 = vpack.c.bf16 %v3731_v59, %v3727_v49  ;;  %3329 = vmatprep.mubr.bf16.mxu0 %v9650_v19  ;;  %4002 = vmatprep.mubr.bf16.mxu1 %v9650_v19 }
 0x3a1   :  { %4583 = vst [vmem:[#allocation3 + $0xc0] sm:$0xff] %v4327_v54  ;;  %4585 = vst [vmem:[#allocation3 + $0xd0] sm:$0xff] %v4329_v60  ;;  %v8429_v60 = vld [vmem:[#allocation6 + $0x118] sm:$0xff]  }
 0x3a2   :  { %4584 = vst [vmem:[#allocation3 + $0xc8] sm:$0xff] %v4328_v52  ;;  %4586 = vst [vmem:[#allocation3 + $0xd8] sm:$0xff] %v4330_v53  ;;  %v3061_v55 = vpop.f32.mrb[28].mxu0  ;;  %v3734_v58 = vpop.f32.mrb[28].mxu1 }
 0x3a3   :  { %v3063_v63 = vpop.f32.mrb[29].mxu0  ;;  %v3736_v16 = vpop.f32.mrb[29].mxu1  ;;  %v3062_v22 = vadd.f32 %v3061_v55, %v10630_v17  ;;  %v3735_v23 = vadd.f32 %v3734_v58, %v10634_v18 }
 0x3a4   :  { %v3065_v20 = vpop.f32.mrb[30].mxu0  ;;  %v3738_v21 = vpop.f32.mrb[30].mxu1  ;;  %v3064_v28 = vadd.f32 %v3063_v63, %v10638_v41  ;;  %v3737_v29 = vadd.f32 %v3736_v16, %v10642_v42 }
 0x3a5   :  { %v3066_v24 = vadd.f32 %v3065_v20, %v10630_v17  ;;  %v3739_v25 = vadd.f32 %v3738_v21, %v10634_v18  ;;  %v3067_v26 = vpop.f32.mrb[31].mxu0  ;;  %v3740_v27 = vpop.f32.mrb[31].mxu1 }
 0x3a6   :  { %v3068_v30 = vadd.f32 %v3067_v26, %v10638_v41  ;;  %v3741_v31 = vadd.f32 %v3740_v27, %v10642_v42 }
 0x3a7   :  { %v4331_v32 = vpack.c.bf16 %v3066_v24, %v3062_v22  ;;  %v4333_v33 = vpack.c.bf16 %v3739_v25, %v3735_v23  ;;  %3330 = vmatmul.mubr.bf16.gmra.mrb[136].mxu0 %v8428_v34  ;;  %4003 = vmatmul.mubr.bf16.gmra.mrb[136].mxu1 %v8428_v34 }
 0x3a8   :  { %v4332_v35 = vpack.c.bf16 %v3068_v30, %v3064_v28  ;;  %v4334_v36 = vpack.c.bf16 %v3741_v31, %v3737_v29  ;;  %3339 = vmatprep.mubr.bf16.mxu0 %v9650_v19  ;;  %4012 = vmatprep.mubr.bf16.mxu1 %v9650_v19 }
 0x3a9   :  { %4587 = vst [vmem:[#allocation3 + $0xe0] sm:$0xff] %v4331_v32  ;;  %4589 = vst [vmem:[#allocation3 + $0xf0] sm:$0xff] %v4333_v33  ;;  %v8430_v33 = vld [vmem:[#allocation6 + $0x120] sm:$0xff]  }
 0x3aa   :  { %4588 = vst [vmem:[#allocation3 + $0xe8] sm:$0xff] %v4332_v35  ;;  %4590 = vst [vmem:[#allocation3 + $0xf8] sm:$0xff] %v4334_v36  ;;  %v3071_v37 = vpop.f32.mrb[32].mxu0  ;;  %v3744_v38 = vpop.f32.mrb[32].mxu1 }
 0x3ab   :  { %v3073_v61 = vpop.f32.mrb[33].mxu0  ;;  %v3746_v62 = vpop.f32.mrb[33].mxu1  ;;  %v3072_v43 = vadd.f32 %v3071_v37, %v10630_v17  ;;  %v3745_v44 = vadd.f32 %v3744_v38, %v10634_v18 }
 0x3ac   :  { %v3075_v39 = vpop.f32.mrb[34].mxu0  ;;  %v3748_v40 = vpop.f32.mrb[34].mxu1  ;;  %v3074_v47 = vadd.f32 %v3073_v61, %v10638_v41  ;;  %v3747_v48 = vadd.f32 %v3746_v62, %v10642_v42 }
 0x3ad   :  { %v3076_v56 = vadd.f32 %v3075_v39, %v10630_v17  ;;  %v3749_v45 = vadd.f32 %v3748_v40, %v10634_v18  ;;  %v3077_v46 = vpop.f32.mrb[35].mxu0  ;;  %v3750_v57 = vpop.f32.mrb[35].mxu1 }
 0x3ae   :  { %v3078_v49 = vadd.f32 %v3077_v46, %v10638_v41  ;;  %v3751_v50 = vadd.f32 %v3750_v57, %v10642_v42 }
 0x3af   :  { %v4335_v59 = vpack.c.bf16 %v3076_v56, %v3072_v43  ;;  %v4337_v54 = vpack.c.bf16 %v3749_v45, %v3745_v44  ;;  %3340 = vmatmul.mubr.bf16.gmra.mrb[140].mxu0 %v8429_v60  ;;  %4013 = vmatmul.mubr.bf16.gmra.mrb[140].mxu1 %v8429_v60 }
 0x3b0   :  { %v4336_v51 = vpack.c.bf16 %v3078_v49, %v3074_v47  ;;  %v4338_v52 = vpack.c.bf16 %v3751_v50, %v3747_v48  ;;  %3349 = vmatprep.mubr.bf16.mxu0 %v9650_v19  ;;  %4022 = vmatprep.mubr.bf16.mxu1 %v9650_v19 }
 0x3b1   :  { %4591 = vst [vmem:[#allocation3 + $0x100] sm:$0xff] %v4335_v59  ;;  %4593 = vst [vmem:[#allocation3 + $0x110] sm:$0xff] %v4337_v54  ;;  %v8431_v54 = vld [vmem:[#allocation6 + $0x128] sm:$0xff]  }
 0x3b2   :  { %4592 = vst [vmem:[#allocation3 + $0x108] sm:$0xff] %v4336_v51  ;;  %4594 = vst [vmem:[#allocation3 + $0x118] sm:$0xff] %v4338_v52  ;;  %v3081_v53 = vpop.f32.mrb[36].mxu0  ;;  %v3754_v55 = vpop.f32.mrb[36].mxu1 }
 0x3b3   :  { %v3083_v58 = vpop.f32.mrb[37].mxu0  ;;  %v3756_v63 = vpop.f32.mrb[37].mxu1  ;;  %v3082_v21 = vadd.f32 %v3081_v53, %v10630_v17  ;;  %v3755_v22 = vadd.f32 %v3754_v55, %v10634_v18 }
 0x3b4   :  { %v3085_v16 = vpop.f32.mrb[38].mxu0  ;;  %v3758_v20 = vpop.f32.mrb[38].mxu1  ;;  %v3084_v27 = vadd.f32 %v3083_v58, %v10638_v41  ;;  %v3757_v28 = vadd.f32 %v3756_v63, %v10642_v42 }
 0x3b5   :  { %v3086_v23 = vadd.f32 %v3085_v16, %v10630_v17  ;;  %v3759_v24 = vadd.f32 %v3758_v20, %v10634_v18  ;;  %v3087_v25 = vpop.f32.mrb[39].mxu0  ;;  %v3760_v26 = vpop.f32.mrb[39].mxu1 }
 0x3b6   :  { %v3088_v29 = vadd.f32 %v3087_v25, %v10638_v41  ;;  %v3761_v30 = vadd.f32 %v3760_v26, %v10642_v42 }
 0x3b7   :  { %v4339_v31 = vpack.c.bf16 %v3086_v23, %v3082_v21  ;;  %v4341_v32 = vpack.c.bf16 %v3759_v24, %v3755_v22  ;;  %3350 = vmatmul.mubr.bf16.gmra.mrb[144].mxu0 %v8430_v33  ;;  %4023 = vmatmul.mubr.bf16.gmra.mrb[144].mxu1 %v8430_v33 }
 0x3b8   :  { %v4340_v34 = vpack.c.bf16 %v3088_v29, %v3084_v27  ;;  %v4342_v35 = vpack.c.bf16 %v3761_v30, %v3757_v28  ;;  %3359 = vmatprep.mubr.bf16.mxu0 %v9650_v19  ;;  %4032 = vmatprep.mubr.bf16.mxu1 %v9650_v19 }
 0x3b9   :  { %4595 = vst [vmem:[#allocation3 + $0x120] sm:$0xff] %v4339_v31  ;;  %4597 = vst [vmem:[#allocation3 + $0x130] sm:$0xff] %v4341_v32  ;;  %v8432_v32 = vld [vmem:[#allocation6 + $0x130] sm:$0xff]  }
 0x3ba   :  { %4596 = vst [vmem:[#allocation3 + $0x128] sm:$0xff] %v4340_v34  ;;  %4598 = vst [vmem:[#allocation3 + $0x138] sm:$0xff] %v4342_v35  ;;  %v3091_v36 = vpop.f32.mrb[40].mxu0  ;;  %v3764_v37 = vpop.f32.mrb[40].mxu1 }
 0x3bb   :  { %v3093_v38 = vpop.f32.mrb[41].mxu0  ;;  %v3766_v61 = vpop.f32.mrb[41].mxu1  ;;  %v3092_v40 = vadd.f32 %v3091_v36, %v10630_v17  ;;  %v3765_v43 = vadd.f32 %v3764_v37, %v10634_v18 }
 0x3bc   :  { %v3095_v62 = vpop.f32.mrb[42].mxu0  ;;  %v3768_v39 = vpop.f32.mrb[42].mxu1  ;;  %v3094_v57 = vadd.f32 %v3093_v38, %v10638_v41  ;;  %v3767_v47 = vadd.f32 %v3766_v61, %v10642_v42 }
 0x3bd   :  { %v3096_v44 = vadd.f32 %v3095_v62, %v10630_v17  ;;  %v3769_v56 = vadd.f32 %v3768_v39, %v10634_v18  ;;  %v3097_v45 = vpop.f32.mrb[43].mxu0  ;;  %v3770_v46 = vpop.f32.mrb[43].mxu1 }
 0x3be   :  { %v3098_v48 = vadd.f32 %v3097_v45, %v10638_v41  ;;  %v3771_v49 = vadd.f32 %v3770_v46, %v10642_v42 }
 0x3bf   :  { %v4343_v50 = vpack.c.bf16 %v3096_v44, %v3092_v40  ;;  %v4345_v59 = vpack.c.bf16 %v3769_v56, %v3765_v43  ;;  %3360 = vmatmul.mubr.bf16.gmra.mrb[148].mxu0 %v8431_v54  ;;  %4033 = vmatmul.mubr.bf16.gmra.mrb[148].mxu1 %v8431_v54 }
 0x3c0   :  { %v4344_v60 = vpack.c.bf16 %v3098_v48, %v3094_v57  ;;  %v4346_v51 = vpack.c.bf16 %v3771_v49, %v3767_v47  ;;  %3369 = vmatprep.mubr.bf16.mxu0 %v9650_v19  ;;  %4042 = vmatprep.mubr.bf16.mxu1 %v9650_v19 }
 0x3c1   :  { %4599 = vst [vmem:[#allocation3 + $0x140] sm:$0xff] %v4343_v50  ;;  %4601 = vst [vmem:[#allocation3 + $0x150] sm:$0xff] %v4345_v59  ;;  %v8433_v59 = vld [vmem:[#allocation6 + $0x138] sm:$0xff]  }
 0x3c2   :  { %4600 = vst [vmem:[#allocation3 + $0x148] sm:$0xff] %v4344_v60  ;;  %4602 = vst [vmem:[#allocation3 + $0x158] sm:$0xff] %v4346_v51  ;;  %v3101_v52 = vpop.f32.mrb[44].mxu0  ;;  %v3774_v53 = vpop.f32.mrb[44].mxu1 }
 0x3c3   :  { %v3103_v55 = vpop.f32.mrb[45].mxu0  ;;  %v3776_v58 = vpop.f32.mrb[45].mxu1  ;;  %v3102_v20 = vadd.f32 %v3101_v52, %v10630_v17  ;;  %v3775_v21 = vadd.f32 %v3774_v53, %v10634_v18 }
 0x3c4   :  { %v3105_v63 = vpop.f32.mrb[46].mxu0  ;;  %v3778_v16 = vpop.f32.mrb[46].mxu1  ;;  %v3104_v26 = vadd.f32 %v3103_v55, %v10638_v41  ;;  %v3777_v27 = vadd.f32 %v3776_v58, %v10642_v42 }
 0x3c5   :  { %v3106_v22 = vadd.f32 %v3105_v63, %v10630_v17  ;;  %v3779_v23 = vadd.f32 %v3778_v16, %v10634_v18  ;;  %v3107_v24 = vpop.f32.mrb[47].mxu0  ;;  %v3780_v25 = vpop.f32.mrb[47].mxu1 }
 0x3c6   :  { %v3108_v28 = vadd.f32 %v3107_v24, %v10638_v41  ;;  %v3781_v29 = vadd.f32 %v3780_v25, %v10642_v42 }
 0x3c7   :  { %v4347_v30 = vpack.c.bf16 %v3106_v22, %v3102_v20  ;;  %v4349_v31 = vpack.c.bf16 %v3779_v23, %v3775_v21  ;;  %3370 = vmatmul.mubr.bf16.gmra.mrb[152].mxu0 %v8432_v32  ;;  %4043 = vmatmul.mubr.bf16.gmra.mrb[152].mxu1 %v8432_v32 }
 0x3c8   :  { %v4348_v33 = vpack.c.bf16 %v3108_v28, %v3104_v26  ;;  %v4350_v34 = vpack.c.bf16 %v3781_v29, %v3777_v27  ;;  %3379 = vmatprep.mubr.bf16.mxu0 %v9650_v19  ;;  %4052 = vmatprep.mubr.bf16.mxu1 %v9650_v19 }
 0x3c9   :  { %4603 = vst [vmem:[#allocation3 + $0x160] sm:$0xff] %v4347_v30  ;;  %4605 = vst [vmem:[#allocation3 + $0x170] sm:$0xff] %v4349_v31  ;;  %v8434_v31 = vld [vmem:[#allocation6 + $0x140] sm:$0xff]  }
 0x3ca   :  { %4604 = vst [vmem:[#allocation3 + $0x168] sm:$0xff] %v4348_v33  ;;  %4606 = vst [vmem:[#allocation3 + $0x178] sm:$0xff] %v4350_v34  ;;  %v3111_v35 = vpop.f32.mrb[48].mxu0  ;;  %v3784_v36 = vpop.f32.mrb[48].mxu1 }
 0x3cb   :  { %v3113_v37 = vpop.f32.mrb[49].mxu0  ;;  %v3786_v38 = vpop.f32.mrb[49].mxu1  ;;  %v3112_v39 = vadd.f32 %v3111_v35, %v10630_v17  ;;  %v3785_v40 = vadd.f32 %v3784_v36, %v10634_v18 }
 0x3cc   :  { %v3115_v61 = vpop.f32.mrb[50].mxu0  ;;  %v3788_v62 = vpop.f32.mrb[50].mxu1  ;;  %v3114_v46 = vadd.f32 %v3113_v37, %v10638_v41  ;;  %v3787_v57 = vadd.f32 %v3786_v38, %v10642_v42 }
 0x3cd   :  { %v3116_v43 = vadd.f32 %v3115_v61, %v10630_v17  ;;  %v3789_v44 = vadd.f32 %v3788_v62, %v10634_v18  ;;  %v3117_v56 = vpop.f32.mrb[51].mxu0  ;;  %v3790_v45 = vpop.f32.mrb[51].mxu1 }
 0x3ce   :  { %v3118_v47 = vadd.f32 %v3117_v56, %v10638_v41  ;;  %v3791_v48 = vadd.f32 %v3790_v45, %v10642_v42 }
 0x3cf   :  { %v4351_v49 = vpack.c.bf16 %v3116_v43, %v3112_v39  ;;  %v4353_v50 = vpack.c.bf16 %v3789_v44, %v3785_v40  ;;  %3380 = vmatmul.mubr.bf16.gmra.mrb[156].mxu0 %v8433_v59  ;;  %4053 = vmatmul.mubr.bf16.gmra.mrb[156].mxu1 %v8433_v59 }
 0x3d0   :  { %v4352_v54 = vpack.c.bf16 %v3118_v47, %v3114_v46  ;;  %v4354_v60 = vpack.c.bf16 %v3791_v48, %v3787_v57  ;;  %3389 = vmatprep.mubr.bf16.mxu0 %v9650_v19  ;;  %4062 = vmatprep.mubr.bf16.mxu1 %v9650_v19 }
 0x3d1   :  { %4607 = vst [vmem:[#allocation3 + $0x180] sm:$0xff] %v4351_v49  ;;  %4609 = vst [vmem:[#allocation3 + $0x190] sm:$0xff] %v4353_v50  ;;  %v8435_v50 = vld [vmem:[#allocation6 + $0x148] sm:$0xff]  }
 0x3d2   :  { %4608 = vst [vmem:[#allocation3 + $0x188] sm:$0xff] %v4352_v54  ;;  %4610 = vst [vmem:[#allocation3 + $0x198] sm:$0xff] %v4354_v60  ;;  %v3121_v51 = vpop.f32.mrb[52].mxu0  ;;  %v3794_v52 = vpop.f32.mrb[52].mxu1 }
 0x3d3   :  { %v3123_v53 = vpop.f32.mrb[53].mxu0  ;;  %v3796_v55 = vpop.f32.mrb[53].mxu1  ;;  %v3122_v16 = vadd.f32 %v3121_v51, %v10630_v17  ;;  %v3795_v20 = vadd.f32 %v3794_v52, %v10634_v18 }
 0x3d4   :  { %v3125_v58 = vpop.f32.mrb[54].mxu0  ;;  %v3798_v63 = vpop.f32.mrb[54].mxu1  ;;  %v3124_v25 = vadd.f32 %v3123_v53, %v10638_v41  ;;  %v3797_v26 = vadd.f32 %v3796_v55, %v10642_v42 }
 0x3d5   :  { %v3126_v21 = vadd.f32 %v3125_v58, %v10630_v17  ;;  %v3799_v22 = vadd.f32 %v3798_v63, %v10634_v18  ;;  %v3127_v23 = vpop.f32.mrb[55].mxu0  ;;  %v3800_v24 = vpop.f32.mrb[55].mxu1 }
 0x3d6   :  { %v3128_v27 = vadd.f32 %v3127_v23, %v10638_v41  ;;  %v3801_v28 = vadd.f32 %v3800_v24, %v10642_v42 }
 0x3d7   :  { %v4355_v29 = vpack.c.bf16 %v3126_v21, %v3122_v16  ;;  %v4357_v30 = vpack.c.bf16 %v3799_v22, %v3795_v20  ;;  %3390 = vmatmul.mubr.bf16.gmra.mrb[160].mxu0 %v8434_v31  ;;  %4063 = vmatmul.mubr.bf16.gmra.mrb[160].mxu1 %v8434_v31 }
 0x3d8   :  { %v4356_v32 = vpack.c.bf16 %v3128_v27, %v3124_v25  ;;  %v4358_v33 = vpack.c.bf16 %v3801_v28, %v3797_v26  ;;  %3399 = vmatprep.mubr.bf16.mxu0 %v9650_v19  ;;  %4072 = vmatprep.mubr.bf16.mxu1 %v9650_v19 }
 0x3d9   :  { %4611 = vst [vmem:[#allocation3 + $0x1a0] sm:$0xff] %v4355_v29  ;;  %4613 = vst [vmem:[#allocation3 + $0x1b0] sm:$0xff] %v4357_v30  ;;  %v8436_v30 = vld [vmem:[#allocation6 + $0x150] sm:$0xff]  }
 0x3da   :  { %4612 = vst [vmem:[#allocation3 + $0x1a8] sm:$0xff] %v4356_v32  ;;  %4614 = vst [vmem:[#allocation3 + $0x1b8] sm:$0xff] %v4358_v33  ;;  %v3131_v34 = vpop.f32.mrb[56].mxu0  ;;  %v3804_v35 = vpop.f32.mrb[56].mxu1 }
 0x3db   :  { %v3133_v36 = vpop.f32.mrb[57].mxu0  ;;  %v3806_v37 = vpop.f32.mrb[57].mxu1  ;;  %v3132_v62 = vadd.f32 %v3131_v34, %v10630_v17  ;;  %v3805_v39 = vadd.f32 %v3804_v35, %v10634_v18 }
 0x3dc   :  { %v3135_v38 = vpop.f32.mrb[58].mxu0  ;;  %v3808_v61 = vpop.f32.mrb[58].mxu1  ;;  %v3134_v45 = vadd.f32 %v3133_v36, %v10638_v41  ;;  %v3807_v46 = vadd.f32 %v3806_v37, %v10642_v42 }
 0x3dd   :  { %v3136_v40 = vadd.f32 %v3135_v38, %v10630_v17  ;;  %v3809_v43 = vadd.f32 %v3808_v61, %v10634_v18  ;;  %v3137_v44 = vpop.f32.mrb[59].mxu0  ;;  %v3810_v56 = vpop.f32.mrb[59].mxu1 }
 0x3de   :  { %v3138_v57 = vadd.f32 %v3137_v44, %v10638_v41  ;;  %v3811_v47 = vadd.f32 %v3810_v56, %v10642_v42 }
 0x3df   :  { %v4359_v48 = vpack.c.bf16 %v3136_v40, %v3132_v62  ;;  %v4361_v49 = vpack.c.bf16 %v3809_v43, %v3805_v39  ;;  %3400 = vmatmul.mubr.bf16.gmra.mrb[164].mxu0 %v8435_v50  ;;  %4073 = vmatmul.mubr.bf16.gmra.mrb[164].mxu1 %v8435_v50 }
 0x3e0   :  { %v4360_v59 = vpack.c.bf16 %v3138_v57, %v3134_v45  ;;  %v4362_v54 = vpack.c.bf16 %v3811_v47, %v3807_v46  ;;  %3409 = vmatprep.mubr.bf16.mxu0 %v9650_v19  ;;  %4082 = vmatprep.mubr.bf16.mxu1 %v9650_v19 }
 0x3e1   :  { %4615 = vst [vmem:[#allocation3 + $0x1c0] sm:$0xff] %v4359_v48  ;;  %4617 = vst [vmem:[#allocation3 + $0x1d0] sm:$0xff] %v4361_v49  ;;  %v8437_v49 = vld [vmem:[#allocation6 + $0x158] sm:$0xff]  }
 0x3e2   :  { %4616 = vst [vmem:[#allocation3 + $0x1c8] sm:$0xff] %v4360_v59  ;;  %4618 = vst [vmem:[#allocation3 + $0x1d8] sm:$0xff] %v4362_v54  ;;  %v3141_v60 = vpop.f32.mrb[60].mxu0  ;;  %v3814_v51 = vpop.f32.mrb[60].mxu1 }
 0x3e3   :  { %v3143_v52 = vpop.f32.mrb[61].mxu0  ;;  %v3816_v53 = vpop.f32.mrb[61].mxu1  ;;  %v3142_v63 = vadd.f32 %v3141_v60, %v10630_v17  ;;  %v3815_v16 = vadd.f32 %v3814_v51, %v10634_v18 }
 0x3e4   :  { %v3145_v55 = vpop.f32.mrb[62].mxu0  ;;  %v3818_v58 = vpop.f32.mrb[62].mxu1  ;;  %v3144_v24 = vadd.f32 %v3143_v52, %v10638_v41  ;;  %v3817_v25 = vadd.f32 %v3816_v53, %v10642_v42 }
 0x3e5   :  { %v3146_v20 = vadd.f32 %v3145_v55, %v10630_v17  ;;  %v3819_v21 = vadd.f32 %v3818_v58, %v10634_v18  ;;  %v3147_v22 = vpop.f32.mrb[63].mxu0  ;;  %v3820_v23 = vpop.f32.mrb[63].mxu1 }
 0x3e6   :  { %v3148_v26 = vadd.f32 %v3147_v22, %v10638_v41  ;;  %v3821_v27 = vadd.f32 %v3820_v23, %v10642_v42 }
 0x3e7   :  { %v4363_v28 = vpack.c.bf16 %v3146_v20, %v3142_v63  ;;  %v4365_v29 = vpack.c.bf16 %v3819_v21, %v3815_v16  ;;  %3410 = vmatmul.mubr.bf16.gmra.mrb[168].mxu0 %v8436_v30  ;;  %4083 = vmatmul.mubr.bf16.gmra.mrb[168].mxu1 %v8436_v30 }
 0x3e8   :  { %v4364_v31 = vpack.c.bf16 %v3148_v26, %v3144_v24  ;;  %v4366_v32 = vpack.c.bf16 %v3821_v27, %v3817_v25  ;;  %3419 = vmatprep.mubr.bf16.mxu0 %v9650_v19  ;;  %4092 = vmatprep.mubr.bf16.mxu1 %v9650_v19 }
 0x3e9   :  { %4619 = vst [vmem:[#allocation3 + $0x1e0] sm:$0xff] %v4363_v28  ;;  %4621 = vst [vmem:[#allocation3 + $0x1f0] sm:$0xff] %v4365_v29  ;;  %v8438_v29 = vld [vmem:[#allocation6 + $0x160] sm:$0xff]  }
 0x3ea   :  { %4620 = vst [vmem:[#allocation3 + $0x1e8] sm:$0xff] %v4364_v31  ;;  %4622 = vst [vmem:[#allocation3 + $0x1f8] sm:$0xff] %v4366_v32  ;;  %v3151_v33 = vpop.f32.mrb[64].mxu0  ;;  %v3824_v34 = vpop.f32.mrb[64].mxu1 }
 0x3eb   :  { %v3153_v35 = vpop.f32.mrb[65].mxu0  ;;  %v3826_v36 = vpop.f32.mrb[65].mxu1  ;;  %v3152_v61 = vadd.f32 %v3151_v33, %v10630_v17  ;;  %v3825_v62 = vadd.f32 %v3824_v34, %v10634_v18 }
 0x3ec   :  { %v3155_v37 = vpop.f32.mrb[66].mxu0  ;;  %v3828_v38 = vpop.f32.mrb[66].mxu1  ;;  %v3154_v56 = vadd.f32 %v3153_v35, %v10638_v41  ;;  %v3827_v45 = vadd.f32 %v3826_v36, %v10642_v42 }
 0x3ed   :  { %v3156_v39 = vadd.f32 %v3155_v37, %v10630_v17  ;;  %v3829_v40 = vadd.f32 %v3828_v38, %v10634_v18  ;;  %v3157_v43 = vpop.f32.mrb[67].mxu0  ;;  %v3830_v44 = vpop.f32.mrb[67].mxu1 }
 0x3ee   :  { %v3158_v46 = vadd.f32 %v3157_v43, %v10638_v41  ;;  %v3831_v57 = vadd.f32 %v3830_v44, %v10642_v42 }
 0x3ef   :  { %v4367_v47 = vpack.c.bf16 %v3156_v39, %v3152_v61  ;;  %v4369_v48 = vpack.c.bf16 %v3829_v40, %v3825_v62  ;;  %3420 = vmatmul.mubr.bf16.gmra.mrb[172].mxu0 %v8437_v49  ;;  %4093 = vmatmul.mubr.bf16.gmra.mrb[172].mxu1 %v8437_v49 }
 0x3f0   :  { %v4368_v50 = vpack.c.bf16 %v3158_v46, %v3154_v56  ;;  %v4370_v59 = vpack.c.bf16 %v3831_v57, %v3827_v45  ;;  %3429 = vmatprep.mubr.bf16.mxu0 %v9650_v19  ;;  %4102 = vmatprep.mubr.bf16.mxu1 %v9650_v19 }
 0x3f1   :  { %4623 = vst [vmem:[#allocation3 + $0x200] sm:$0xff] %v4367_v47  ;;  %4625 = vst [vmem:[#allocation3 + $0x210] sm:$0xff] %v4369_v48  ;;  %v8439_v48 = vld [vmem:[#allocation6 + $0x168] sm:$0xff]  }
 0x3f2   :  { %4624 = vst [vmem:[#allocation3 + $0x208] sm:$0xff] %v4368_v50  ;;  %4626 = vst [vmem:[#allocation3 + $0x218] sm:$0xff] %v4370_v59  ;;  %v3161_v54 = vpop.f32.mrb[68].mxu0  ;;  %v3834_v60 = vpop.f32.mrb[68].mxu1 }
 0x3f3   :  { %v3163_v51 = vpop.f32.mrb[69].mxu0  ;;  %v3836_v52 = vpop.f32.mrb[69].mxu1  ;;  %v3162_v58 = vadd.f32 %v3161_v54, %v10630_v17  ;;  %v3835_v63 = vadd.f32 %v3834_v60, %v10634_v18 }
 0x3f4   :  { %v3165_v53 = vpop.f32.mrb[70].mxu0  ;;  %v3838_v55 = vpop.f32.mrb[70].mxu1  ;;  %v3164_v23 = vadd.f32 %v3163_v51, %v10638_v41  ;;  %v3837_v24 = vadd.f32 %v3836_v52, %v10642_v42 }
 0x3f5   :  { %v3166_v16 = vadd.f32 %v3165_v53, %v10630_v17  ;;  %v3839_v20 = vadd.f32 %v3838_v55, %v10634_v18  ;;  %v3167_v21 = vpop.f32.mrb[71].mxu0  ;;  %v3840_v22 = vpop.f32.mrb[71].mxu1 }
 0x3f6   :  { %v3168_v25 = vadd.f32 %v3167_v21, %v10638_v41  ;;  %v3841_v26 = vadd.f32 %v3840_v22, %v10642_v42 }
 0x3f7   :  { %v4371_v27 = vpack.c.bf16 %v3166_v16, %v3162_v58  ;;  %v4373_v28 = vpack.c.bf16 %v3839_v20, %v3835_v63  ;;  %3430 = vmatmul.mubr.bf16.gmra.mrb[176].mxu0 %v8438_v29  ;;  %4103 = vmatmul.mubr.bf16.gmra.mrb[176].mxu1 %v8438_v29 }
 0x3f8   :  { %v4372_v30 = vpack.c.bf16 %v3168_v25, %v3164_v23  ;;  %v4374_v31 = vpack.c.bf16 %v3841_v26, %v3837_v24  ;;  %3439 = vmatprep.mubr.bf16.mxu0 %v9650_v19  ;;  %4112 = vmatprep.mubr.bf16.mxu1 %v9650_v19 }
 0x3f9   :  { %4627 = vst [vmem:[#allocation3 + $0x220] sm:$0xff] %v4371_v27  ;;  %4629 = vst [vmem:[#allocation3 + $0x230] sm:$0xff] %v4373_v28  ;;  %v8440_v28 = vld [vmem:[#allocation6 + $0x170] sm:$0xff]  }
 0x3fa   :  { %4628 = vst [vmem:[#allocation3 + $0x228] sm:$0xff] %v4372_v30  ;;  %4630 = vst [vmem:[#allocation3 + $0x238] sm:$0xff] %v4374_v31  ;;  %v3171_v32 = vpop.f32.mrb[72].mxu0  ;;  %v3844_v33 = vpop.f32.mrb[72].mxu1 }
 0x3fb   :  { %v3173_v34 = vpop.f32.mrb[73].mxu0  ;;  %v3846_v35 = vpop.f32.mrb[73].mxu1  ;;  %v3172_v38 = vadd.f32 %v3171_v32, %v10630_v17  ;;  %v3845_v61 = vadd.f32 %v3844_v33, %v10634_v18 }
 0x3fc   :  { %v3175_v36 = vpop.f32.mrb[74].mxu0  ;;  %v3848_v37 = vpop.f32.mrb[74].mxu1  ;;  %v3174_v44 = vadd.f32 %v3173_v34, %v10638_v41  ;;  %v3847_v56 = vadd.f32 %v3846_v35, %v10642_v42 }
 0x3fd   :  { %v3176_v62 = vadd.f32 %v3175_v36, %v10630_v17  ;;  %v3849_v39 = vadd.f32 %v3848_v37, %v10634_v18  ;;  %v3177_v40 = vpop.f32.mrb[75].mxu0  ;;  %v3850_v43 = vpop.f32.mrb[75].mxu1 }
 0x3fe   :  { %v3178_v45 = vadd.f32 %v3177_v40, %v10638_v41  ;;  %v3851_v46 = vadd.f32 %v3850_v43, %v10642_v42 }
 0x3ff   :  { %v4375_v57 = vpack.c.bf16 %v3176_v62, %v3172_v38  ;;  %v4377_v47 = vpack.c.bf16 %v3849_v39, %v3845_v61  ;;  %3440 = vmatmul.mubr.bf16.gmra.mrb[180].mxu0 %v8439_v48  ;;  %4113 = vmatmul.mubr.bf16.gmra.mrb[180].mxu1 %v8439_v48 }
 0x400   :  { %v4376_v49 = vpack.c.bf16 %v3178_v45, %v3174_v44  ;;  %v4378_v50 = vpack.c.bf16 %v3851_v46, %v3847_v56  ;;  %3449 = vmatprep.mubr.bf16.mxu0 %v9650_v19  ;;  %4122 = vmatprep.mubr.bf16.mxu1 %v9650_v19 }
 0x401   :  { %4631 = vst [vmem:[#allocation3 + $0x240] sm:$0xff] %v4375_v57  ;;  %4633 = vst [vmem:[#allocation3 + $0x250] sm:$0xff] %v4377_v47  ;;  %v8441_v47 = vld [vmem:[#allocation6 + $0x178] sm:$0xff]  }
 0x402   :  { %4632 = vst [vmem:[#allocation3 + $0x248] sm:$0xff] %v4376_v49  ;;  %4634 = vst [vmem:[#allocation3 + $0x258] sm:$0xff] %v4378_v50  ;;  %v3181_v59 = vpop.f32.mrb[76].mxu0  ;;  %v3854_v54 = vpop.f32.mrb[76].mxu1 }
 0x403   :  { %v3183_v60 = vpop.f32.mrb[77].mxu0  ;;  %v3856_v51 = vpop.f32.mrb[77].mxu1  ;;  %v3182_v55 = vadd.f32 %v3181_v59, %v10630_v17  ;;  %v3855_v58 = vadd.f32 %v3854_v54, %v10634_v18 }
 0x404   :  { %v3185_v52 = vpop.f32.mrb[78].mxu0  ;;  %v3858_v53 = vpop.f32.mrb[78].mxu1  ;;  %v3184_v22 = vadd.f32 %v3183_v60, %v10638_v41  ;;  %v3857_v23 = vadd.f32 %v3856_v51, %v10642_v42 }
 0x405   :  { %v3186_v63 = vadd.f32 %v3185_v52, %v10630_v17  ;;  %v3859_v16 = vadd.f32 %v3858_v53, %v10634_v18  ;;  %v3187_v20 = vpop.f32.mrb[79].mxu0  ;;  %v3860_v21 = vpop.f32.mrb[79].mxu1 }
 0x406   :  { %v3188_v24 = vadd.f32 %v3187_v20, %v10638_v41  ;;  %v3861_v25 = vadd.f32 %v3860_v21, %v10642_v42 }
 0x407   :  { %v4379_v26 = vpack.c.bf16 %v3186_v63, %v3182_v55  ;;  %v4381_v27 = vpack.c.bf16 %v3859_v16, %v3855_v58  ;;  %3450 = vmatmul.mubr.bf16.gmra.mrb[184].mxu0 %v8440_v28  ;;  %4123 = vmatmul.mubr.bf16.gmra.mrb[184].mxu1 %v8440_v28 }
 0x408   :  { %v4380_v29 = vpack.c.bf16 %v3188_v24, %v3184_v22  ;;  %v4382_v30 = vpack.c.bf16 %v3861_v25, %v3857_v23  ;;  %3459 = vmatprep.mubr.bf16.mxu0 %v9650_v19  ;;  %4132 = vmatprep.mubr.bf16.mxu1 %v9650_v19 }
 0x409   :  { %4635 = vst [vmem:[#allocation3 + $0x260] sm:$0xff] %v4379_v26  ;;  %4637 = vst [vmem:[#allocation3 + $0x270] sm:$0xff] %v4381_v27  ;;  %v8442_v27 = vld [vmem:[#allocation6 + $0x180] sm:$0xff]  }
 0x40a   :  { %4636 = vst [vmem:[#allocation3 + $0x268] sm:$0xff] %v4380_v29  ;;  %4638 = vst [vmem:[#allocation3 + $0x278] sm:$0xff] %v4382_v30  ;;  %v3191_v31 = vpop.f32.mrb[80].mxu0  ;;  %v3864_v32 = vpop.f32.mrb[80].mxu1 }
 0x40b   :  { %v3193_v33 = vpop.f32.mrb[81].mxu0  ;;  %v3866_v34 = vpop.f32.mrb[81].mxu1  ;;  %v3192_v37 = vadd.f32 %v3191_v31, %v10630_v17  ;;  %v3865_v38 = vadd.f32 %v3864_v32, %v10634_v18 }
 0x40c   :  { %v3195_v35 = vpop.f32.mrb[82].mxu0  ;;  %v3868_v36 = vpop.f32.mrb[82].mxu1  ;;  %v3194_v43 = vadd.f32 %v3193_v33, %v10638_v41  ;;  %v3867_v44 = vadd.f32 %v3866_v34, %v10642_v42 }
 0x40d   :  { %v3196_v61 = vadd.f32 %v3195_v35, %v10630_v17  ;;  %v3869_v62 = vadd.f32 %v3868_v36, %v10634_v18  ;;  %v3197_v39 = vpop.f32.mrb[83].mxu0  ;;  %v3870_v40 = vpop.f32.mrb[83].mxu1 }
 0x40e   :  { %v3198_v56 = vadd.f32 %v3197_v39, %v10638_v41  ;;  %v3871_v45 = vadd.f32 %v3870_v40, %v10642_v42 }
 0x40f   :  { %v4383_v46 = vpack.c.bf16 %v3196_v61, %v3192_v37  ;;  %v4385_v57 = vpack.c.bf16 %v3869_v62, %v3865_v38  ;;  %3460 = vmatmul.mubr.bf16.gmra.mrb[188].mxu0 %v8441_v47  ;;  %4133 = vmatmul.mubr.bf16.gmra.mrb[188].mxu1 %v8441_v47 }
 0x410   :  { %v4384_v48 = vpack.c.bf16 %v3198_v56, %v3194_v43  ;;  %v4386_v49 = vpack.c.bf16 %v3871_v45, %v3867_v44  ;;  %3469 = vmatprep.mubr.bf16.mxu0 %v9650_v19  ;;  %4142 = vmatprep.mubr.bf16.mxu1 %v9650_v19 }
 0x411   :  { %4639 = vst [vmem:[#allocation3 + $0x280] sm:$0xff] %v4383_v46  ;;  %4641 = vst [vmem:[#allocation3 + $0x290] sm:$0xff] %v4385_v57  ;;  %v8443_v57 = vld [vmem:[#allocation6 + $0x188] sm:$0xff]  }
 0x412   :  { %4640 = vst [vmem:[#allocation3 + $0x288] sm:$0xff] %v4384_v48  ;;  %4642 = vst [vmem:[#allocation3 + $0x298] sm:$0xff] %v4386_v49  ;;  %v3201_v50 = vpop.f32.mrb[84].mxu0  ;;  %v3874_v59 = vpop.f32.mrb[84].mxu1 }
 0x413   :  { %v3203_v54 = vpop.f32.mrb[85].mxu0  ;;  %v3876_v60 = vpop.f32.mrb[85].mxu1  ;;  %v3202_v53 = vadd.f32 %v3201_v50, %v10630_v17  ;;  %v3875_v55 = vadd.f32 %v3874_v59, %v10634_v18 }
 0x414   :  { %v3205_v51 = vpop.f32.mrb[86].mxu0  ;;  %v3878_v52 = vpop.f32.mrb[86].mxu1  ;;  %v3204_v21 = vadd.f32 %v3203_v54, %v10638_v41  ;;  %v3877_v22 = vadd.f32 %v3876_v60, %v10642_v42 }
 0x415   :  { %v3206_v58 = vadd.f32 %v3205_v51, %v10630_v17  ;;  %v3879_v63 = vadd.f32 %v3878_v52, %v10634_v18  ;;  %v3207_v16 = vpop.f32.mrb[87].mxu0  ;;  %v3880_v20 = vpop.f32.mrb[87].mxu1 }
 0x416   :  { %v3208_v23 = vadd.f32 %v3207_v16, %v10638_v41  ;;  %v3881_v24 = vadd.f32 %v3880_v20, %v10642_v42 }
 0x417   :  { %v4387_v25 = vpack.c.bf16 %v3206_v58, %v3202_v53  ;;  %v4389_v26 = vpack.c.bf16 %v3879_v63, %v3875_v55  ;;  %3470 = vmatmul.mubr.bf16.gmra.mrb[192].mxu0 %v8442_v27  ;;  %4143 = vmatmul.mubr.bf16.gmra.mrb[192].mxu1 %v8442_v27 }
 0x418   :  { %v4388_v28 = vpack.c.bf16 %v3208_v23, %v3204_v21  ;;  %v4390_v29 = vpack.c.bf16 %v3881_v24, %v3877_v22  ;;  %3479 = vmatprep.mubr.bf16.mxu0 %v9650_v19  ;;  %4152 = vmatprep.mubr.bf16.mxu1 %v9650_v19 }
 0x419   :  { %4643 = vst [vmem:[#allocation3 + $0x2a0] sm:$0xff] %v4387_v25  ;;  %4645 = vst [vmem:[#allocation3 + $0x2b0] sm:$0xff] %v4389_v26  ;;  %v8444_v26 = vld [vmem:[#allocation6 + $0x190] sm:$0xff]  }
 0x41a   :  { %4644 = vst [vmem:[#allocation3 + $0x2a8] sm:$0xff] %v4388_v28  ;;  %4646 = vst [vmem:[#allocation3 + $0x2b8] sm:$0xff] %v4390_v29  ;;  %v3211_v30 = vpop.f32.mrb[88].mxu0  ;;  %v3884_v31 = vpop.f32.mrb[88].mxu1 }
 0x41b   :  { %v3213_v32 = vpop.f32.mrb[89].mxu0  ;;  %v3886_v33 = vpop.f32.mrb[89].mxu1  ;;  %v3212_v36 = vadd.f32 %v3211_v30, %v10630_v17  ;;  %v3885_v37 = vadd.f32 %v3884_v31, %v10634_v18 }
 0x41c   :  { %v3215_v34 = vpop.f32.mrb[90].mxu0  ;;  %v3888_v35 = vpop.f32.mrb[90].mxu1  ;;  %v3214_v40 = vadd.f32 %v3213_v32, %v10638_v41  ;;  %v3887_v43 = vadd.f32 %v3886_v33, %v10642_v42 }
 0x41d   :  { %v3216_v38 = vadd.f32 %v3215_v34, %v10630_v17  ;;  %v3889_v61 = vadd.f32 %v3888_v35, %v10634_v18  ;;  %v3217_v62 = vpop.f32.mrb[91].mxu0  ;;  %v3890_v39 = vpop.f32.mrb[91].mxu1 }
 0x41e   :  { %v3218_v44 = vadd.f32 %v3217_v62, %v10638_v41  ;;  %v3891_v56 = vadd.f32 %v3890_v39, %v10642_v42 }
 0x41f   :  { %v4391_v45 = vpack.c.bf16 %v3216_v38, %v3212_v36  ;;  %v4393_v46 = vpack.c.bf16 %v3889_v61, %v3885_v37  ;;  %3480 = vmatmul.mubr.bf16.gmra.mrb[196].mxu0 %v8443_v57  ;;  %4153 = vmatmul.mubr.bf16.gmra.mrb[196].mxu1 %v8443_v57 }
 0x420   :  { %v4392_v47 = vpack.c.bf16 %v3218_v44, %v3214_v40  ;;  %v4394_v48 = vpack.c.bf16 %v3891_v56, %v3887_v43  ;;  %3489 = vmatprep.mubr.bf16.mxu0 %v9650_v19  ;;  %4162 = vmatprep.mubr.bf16.mxu1 %v9650_v19 }
 0x421   :  { %4647 = vst [vmem:[#allocation3 + $0x2c0] sm:$0xff] %v4391_v45  ;;  %4649 = vst [vmem:[#allocation3 + $0x2d0] sm:$0xff] %v4393_v46  ;;  %v8445_v46 = vld [vmem:[#allocation6 + $0x198] sm:$0xff]  }
 0x422   :  { %4648 = vst [vmem:[#allocation3 + $0x2c8] sm:$0xff] %v4392_v47  ;;  %4650 = vst [vmem:[#allocation3 + $0x2d8] sm:$0xff] %v4394_v48  ;;  %v3221_v49 = vpop.f32.mrb[92].mxu0  ;;  %v3894_v50 = vpop.f32.mrb[92].mxu1 }
 0x423   :  { %v3223_v59 = vpop.f32.mrb[93].mxu0  ;;  %v3896_v54 = vpop.f32.mrb[93].mxu1  ;;  %v3222_v52 = vadd.f32 %v3221_v49, %v10630_v17  ;;  %v3895_v53 = vadd.f32 %v3894_v50, %v10634_v18 }
 0x424   :  { %v3225_v60 = vpop.f32.mrb[94].mxu0  ;;  %v3898_v51 = vpop.f32.mrb[94].mxu1  ;;  %v3224_v20 = vadd.f32 %v3223_v59, %v10638_v41  ;;  %v3897_v21 = vadd.f32 %v3896_v54, %v10642_v42 }
 0x425   :  { %v3226_v55 = vadd.f32 %v3225_v60, %v10630_v17  ;;  %v3899_v58 = vadd.f32 %v3898_v51, %v10634_v18  ;;  %v3227_v63 = vpop.f32.mrb[95].mxu0  ;;  %v3900_v16 = vpop.f32.mrb[95].mxu1 }
 0x426   :  { %v3228_v22 = vadd.f32 %v3227_v63, %v10638_v41  ;;  %v3901_v23 = vadd.f32 %v3900_v16, %v10642_v42 }
 0x427   :  { %v4395_v24 = vpack.c.bf16 %v3226_v55, %v3222_v52  ;;  %v4397_v25 = vpack.c.bf16 %v3899_v58, %v3895_v53  ;;  %3490 = vmatmul.mubr.bf16.gmra.mrb[200].mxu0 %v8444_v26  ;;  %4163 = vmatmul.mubr.bf16.gmra.mrb[200].mxu1 %v8444_v26 }
 0x428   :  { %v4396_v27 = vpack.c.bf16 %v3228_v22, %v3224_v20  ;;  %v4398_v28 = vpack.c.bf16 %v3901_v23, %v3897_v21  ;;  %3499 = vmatprep.mubr.bf16.mxu0 %v9650_v19  ;;  %4172 = vmatprep.mubr.bf16.mxu1 %v9650_v19 }
 0x429   :  { %4651 = vst [vmem:[#allocation3 + $0x2e0] sm:$0xff] %v4395_v24  ;;  %4653 = vst [vmem:[#allocation3 + $0x2f0] sm:$0xff] %v4397_v25  ;;  %v8446_v25 = vld [vmem:[#allocation6 + $0x1a0] sm:$0xff]  }
 0x42a   :  { %4652 = vst [vmem:[#allocation3 + $0x2e8] sm:$0xff] %v4396_v27  ;;  %4654 = vst [vmem:[#allocation3 + $0x2f8] sm:$0xff] %v4398_v28  ;;  %v3231_v29 = vpop.f32.mrb[96].mxu0  ;;  %v3904_v30 = vpop.f32.mrb[96].mxu1 }
 0x42b   :  { %v3233_v31 = vpop.f32.mrb[97].mxu0  ;;  %v3906_v32 = vpop.f32.mrb[97].mxu1  ;;  %v3232_v35 = vadd.f32 %v3231_v29, %v10630_v17  ;;  %v3905_v36 = vadd.f32 %v3904_v30, %v10634_v18 }
 0x42c   :  { %v3235_v33 = vpop.f32.mrb[98].mxu0  ;;  %v3908_v34 = vpop.f32.mrb[98].mxu1  ;;  %v3234_v39 = vadd.f32 %v3233_v31, %v10638_v41  ;;  %v3907_v40 = vadd.f32 %v3906_v32, %v10642_v42 }
 0x42d   :  { %v3236_v37 = vadd.f32 %v3235_v33, %v10630_v17  ;;  %v3909_v38 = vadd.f32 %v3908_v34, %v10634_v18  ;;  %v3237_v61 = vpop.f32.mrb[99].mxu0  ;;  %v3910_v62 = vpop.f32.mrb[99].mxu1 }
 0x42e   :  { %v3238_v43 = vadd.f32 %v3237_v61, %v10638_v41  ;;  %v3911_v44 = vadd.f32 %v3910_v62, %v10642_v42 }
 0x42f   :  { %v4399_v56 = vpack.c.bf16 %v3236_v37, %v3232_v35  ;;  %v4401_v45 = vpack.c.bf16 %v3909_v38, %v3905_v36  ;;  %3500 = vmatmul.mubr.bf16.gmra.mrb[204].mxu0 %v8445_v46  ;;  %4173 = vmatmul.mubr.bf16.gmra.mrb[204].mxu1 %v8445_v46 }
 0x430   :  { %v4400_v57 = vpack.c.bf16 %v3238_v43, %v3234_v39  ;;  %v4402_v47 = vpack.c.bf16 %v3911_v44, %v3907_v40  ;;  %3509 = vmatprep.mubr.bf16.mxu0 %v9650_v19  ;;  %4182 = vmatprep.mubr.bf16.mxu1 %v9650_v19 }
 0x431   :  { %4655 = vst [vmem:[#allocation3 + $0x300] sm:$0xff] %v4399_v56  ;;  %4657 = vst [vmem:[#allocation3 + $0x310] sm:$0xff] %v4401_v45  ;;  %v8447_v45 = vld [vmem:[#allocation6 + $0x1a8] sm:$0xff]  }
 0x432   :  { %4656 = vst [vmem:[#allocation3 + $0x308] sm:$0xff] %v4400_v57  ;;  %4658 = vst [vmem:[#allocation3 + $0x318] sm:$0xff] %v4402_v47  ;;  %v3241_v48 = vpop.f32.mrb[100].mxu0  ;;  %v3914_v49 = vpop.f32.mrb[100].mxu1 }
 0x433   :  { %v3243_v50 = vpop.f32.mrb[101].mxu0  ;;  %v3916_v59 = vpop.f32.mrb[101].mxu1  ;;  %v3242_v51 = vadd.f32 %v3241_v48, %v10630_v17  ;;  %v3915_v52 = vadd.f32 %v3914_v49, %v10634_v18 }
 0x434   :  { %v3245_v54 = vpop.f32.mrb[102].mxu0  ;;  %v3918_v60 = vpop.f32.mrb[102].mxu1  ;;  %v3244_v16 = vadd.f32 %v3243_v50, %v10638_v41  ;;  %v3917_v20 = vadd.f32 %v3916_v59, %v10642_v42 }
 0x435   :  { %v3246_v53 = vadd.f32 %v3245_v54, %v10630_v17  ;;  %v3919_v55 = vadd.f32 %v3918_v60, %v10634_v18  ;;  %v3247_v58 = vpop.f32.mrb[103].mxu0  ;;  %v3920_v63 = vpop.f32.mrb[103].mxu1 }
 0x436   :  { %v3248_v21 = vadd.f32 %v3247_v58, %v10638_v41  ;;  %v3921_v22 = vadd.f32 %v3920_v63, %v10642_v42 }
 0x437   :  { %v4403_v23 = vpack.c.bf16 %v3246_v53, %v3242_v51  ;;  %v4405_v24 = vpack.c.bf16 %v3919_v55, %v3915_v52  ;;  %3510 = vmatmul.mubr.bf16.gmra.mrb[208].mxu0 %v8446_v25  ;;  %4183 = vmatmul.mubr.bf16.gmra.mrb[208].mxu1 %v8446_v25 }
 0x438   :  { %v4404_v26 = vpack.c.bf16 %v3248_v21, %v3244_v16  ;;  %v4406_v27 = vpack.c.bf16 %v3921_v22, %v3917_v20  ;;  %3519 = vmatprep.mubr.bf16.mxu0 %v9650_v19  ;;  %4192 = vmatprep.mubr.bf16.mxu1 %v9650_v19 }
 0x439   :  { %4659 = vst [vmem:[#allocation3 + $0x320] sm:$0xff] %v4403_v23  ;;  %4661 = vst [vmem:[#allocation3 + $0x330] sm:$0xff] %v4405_v24  ;;  %v8448_v24 = vld [vmem:[#allocation6 + $0x1b0] sm:$0xff]  }
 0x43a   :  { %4660 = vst [vmem:[#allocation3 + $0x328] sm:$0xff] %v4404_v26  ;;  %4662 = vst [vmem:[#allocation3 + $0x338] sm:$0xff] %v4406_v27  ;;  %v3251_v28 = vpop.f32.mrb[104].mxu0  ;;  %v3924_v29 = vpop.f32.mrb[104].mxu1 }
 0x43b   :  { %v3253_v30 = vpop.f32.mrb[105].mxu0  ;;  %v3926_v31 = vpop.f32.mrb[105].mxu1  ;;  %v3252_v34 = vadd.f32 %v3251_v28, %v10630_v17  ;;  %v3925_v35 = vadd.f32 %v3924_v29, %v10634_v18 }
 0x43c   :  { %v3255_v32 = vpop.f32.mrb[106].mxu0  ;;  %v3928_v33 = vpop.f32.mrb[106].mxu1  ;;  %v3254_v62 = vadd.f32 %v3253_v30, %v10638_v41  ;;  %v3927_v39 = vadd.f32 %v3926_v31, %v10642_v42 }
 0x43d   :  { %v3256_v36 = vadd.f32 %v3255_v32, %v10630_v17  ;;  %v3929_v37 = vadd.f32 %v3928_v33, %v10634_v18  ;;  %v3257_v38 = vpop.f32.mrb[107].mxu0  ;;  %v3930_v61 = vpop.f32.mrb[107].mxu1 }
 0x43e   :  { %v3258_v40 = vadd.f32 %v3257_v38, %v10638_v41  ;;  %v3931_v43 = vadd.f32 %v3930_v61, %v10642_v42 }
 0x43f   :  { %v4407_v44 = vpack.c.bf16 %v3256_v36, %v3252_v34  ;;  %v4409_v56 = vpack.c.bf16 %v3929_v37, %v3925_v35  ;;  %3520 = vmatmul.mubr.bf16.gmra.mrb[212].mxu0 %v8447_v45  ;;  %4193 = vmatmul.mubr.bf16.gmra.mrb[212].mxu1 %v8447_v45 }
 0x440   :  { %v4408_v46 = vpack.c.bf16 %v3258_v40, %v3254_v62  ;;  %v4410_v57 = vpack.c.bf16 %v3931_v43, %v3927_v39  ;;  %3529 = vmatprep.mubr.bf16.mxu0 %v9650_v19  ;;  %4202 = vmatprep.mubr.bf16.mxu1 %v9650_v19 }
 0x441   :  { %4663 = vst [vmem:[#allocation3 + $0x340] sm:$0xff] %v4407_v44  ;;  %4665 = vst [vmem:[#allocation3 + $0x350] sm:$0xff] %v4409_v56  ;;  %v8449_v56 = vld [vmem:[#allocation6 + $0x1b8] sm:$0xff]  }
 0x442   :  { %4664 = vst [vmem:[#allocation3 + $0x348] sm:$0xff] %v4408_v46  ;;  %4666 = vst [vmem:[#allocation3 + $0x358] sm:$0xff] %v4410_v57  ;;  %v3261_v47 = vpop.f32.mrb[108].mxu0  ;;  %v3934_v48 = vpop.f32.mrb[108].mxu1 }
 0x443   :  { %v3263_v49 = vpop.f32.mrb[109].mxu0  ;;  %v3936_v50 = vpop.f32.mrb[109].mxu1  ;;  %v3262_v60 = vadd.f32 %v3261_v47, %v10630_v17  ;;  %v3935_v51 = vadd.f32 %v3934_v48, %v10634_v18 }
 0x444   :  { %v3265_v59 = vpop.f32.mrb[110].mxu0  ;;  %v3938_v54 = vpop.f32.mrb[110].mxu1  ;;  %v3264_v63 = vadd.f32 %v3263_v49, %v10638_v41  ;;  %v3937_v16 = vadd.f32 %v3936_v50, %v10642_v42 }
 0x445   :  { %v3266_v52 = vadd.f32 %v3265_v59, %v10630_v17  ;;  %v3939_v53 = vadd.f32 %v3938_v54, %v10634_v18  ;;  %v3267_v55 = vpop.f32.mrb[111].mxu0  ;;  %v3940_v58 = vpop.f32.mrb[111].mxu1 }
 0x446   :  { %v3268_v20 = vadd.f32 %v3267_v55, %v10638_v41  ;;  %v3941_v21 = vadd.f32 %v3940_v58, %v10642_v42 }
 0x447   :  { %v4411_v22 = vpack.c.bf16 %v3266_v52, %v3262_v60  ;;  %v4413_v23 = vpack.c.bf16 %v3939_v53, %v3935_v51  ;;  %3530 = vmatmul.mubr.bf16.gmra.mrb[216].mxu0 %v8448_v24  ;;  %4203 = vmatmul.mubr.bf16.gmra.mrb[216].mxu1 %v8448_v24 }
 0x448   :  { %v4412_v25 = vpack.c.bf16 %v3268_v20, %v3264_v63  ;;  %v4414_v26 = vpack.c.bf16 %v3941_v21, %v3937_v16  ;;  %3539 = vmatprep.mubr.bf16.mxu0 %v9650_v19  ;;  %4212 = vmatprep.mubr.bf16.mxu1 %v9650_v19 }
 0x449   :  { %4667 = vst [vmem:[#allocation3 + $0x360] sm:$0xff] %v4411_v22  ;;  %4669 = vst [vmem:[#allocation3 + $0x370] sm:$0xff] %v4413_v23  ;;  %v8450_v23 = vld [vmem:[#allocation6 + $0x1c0] sm:$0xff]  }
 0x44a   :  { %4668 = vst [vmem:[#allocation3 + $0x368] sm:$0xff] %v4412_v25  ;;  %4670 = vst [vmem:[#allocation3 + $0x378] sm:$0xff] %v4414_v26  ;;  %v3271_v27 = vpop.f32.mrb[112].mxu0  ;;  %v3944_v28 = vpop.f32.mrb[112].mxu1 }
 0x44b   :  { %v3273_v29 = vpop.f32.mrb[113].mxu0  ;;  %v3946_v30 = vpop.f32.mrb[113].mxu1  ;;  %v3272_v33 = vadd.f32 %v3271_v27, %v10630_v17  ;;  %v3945_v34 = vadd.f32 %v3944_v28, %v10634_v18 }
 0x44c   :  { %v3275_v31 = vpop.f32.mrb[114].mxu0  ;;  %v3948_v32 = vpop.f32.mrb[114].mxu1  ;;  %v3274_v61 = vadd.f32 %v3273_v29, %v10638_v41  ;;  %v3947_v62 = vadd.f32 %v3946_v30, %v10642_v42 }
 0x44d   :  { %v3276_v35 = vadd.f32 %v3275_v31, %v10630_v17  ;;  %v3949_v36 = vadd.f32 %v3948_v32, %v10634_v18  ;;  %v3277_v37 = vpop.f32.mrb[115].mxu0  ;;  %v3950_v38 = vpop.f32.mrb[115].mxu1 }
 0x44e   :  { %v3278_v39 = vadd.f32 %v3277_v37, %v10638_v41  ;;  %v3951_v40 = vadd.f32 %v3950_v38, %v10642_v42 }
 0x44f   :  { %v4415_v43 = vpack.c.bf16 %v3276_v35, %v3272_v33  ;;  %v4417_v44 = vpack.c.bf16 %v3949_v36, %v3945_v34  ;;  %3540 = vmatmul.mubr.bf16.gmra.mrb[220].mxu0 %v8449_v56  ;;  %4213 = vmatmul.mubr.bf16.gmra.mrb[220].mxu1 %v8449_v56 }
 0x450   :  { %v4416_v45 = vpack.c.bf16 %v3278_v39, %v3274_v61  ;;  %v4418_v46 = vpack.c.bf16 %v3951_v40, %v3947_v62  ;;  %3549 = vmatprep.mubr.bf16.mxu0 %v9650_v19  ;;  %4222 = vmatprep.mubr.bf16.mxu1 %v9650_v19 }
 0x451   :  { %4671 = vst [vmem:[#allocation3 + $0x380] sm:$0xff] %v4415_v43  ;;  %4673 = vst [vmem:[#allocation3 + $0x390] sm:$0xff] %v4417_v44  ;;  %v8451_v44 = vld [vmem:[#allocation6 + $0x1c8] sm:$0xff]  }
 0x452   :  { %4672 = vst [vmem:[#allocation3 + $0x388] sm:$0xff] %v4416_v45  ;;  %4674 = vst [vmem:[#allocation3 + $0x398] sm:$0xff] %v4418_v46  ;;  %v3281_v57 = vpop.f32.mrb[116].mxu0  ;;  %v3954_v47 = vpop.f32.mrb[116].mxu1 }
 0x453   :  { %v3283_v48 = vpop.f32.mrb[117].mxu0  ;;  %v3956_v49 = vpop.f32.mrb[117].mxu1  ;;  %v3282_v54 = vadd.f32 %v3281_v57, %v10630_v17  ;;  %v3955_v60 = vadd.f32 %v3954_v47, %v10634_v18 }
 0x454   :  { %v3285_v50 = vpop.f32.mrb[118].mxu0  ;;  %v3958_v59 = vpop.f32.mrb[118].mxu1  ;;  %v3284_v58 = vadd.f32 %v3283_v48, %v10638_v41  ;;  %v3957_v63 = vadd.f32 %v3956_v49, %v10642_v42 }
 0x455   :  { %v3286_v51 = vadd.f32 %v3285_v50, %v10630_v17  ;;  %v3959_v52 = vadd.f32 %v3958_v59, %v10634_v18  ;;  %v3287_v53 = vpop.f32.mrb[119].mxu0  ;;  %v3960_v55 = vpop.f32.mrb[119].mxu1 }
 0x456   :  { %v3288_v16 = vadd.f32 %v3287_v53, %v10638_v41  ;;  %v3961_v20 = vadd.f32 %v3960_v55, %v10642_v42 }
 0x457   :  { %v4419_v21 = vpack.c.bf16 %v3286_v51, %v3282_v54  ;;  %v4421_v22 = vpack.c.bf16 %v3959_v52, %v3955_v60  ;;  %3550 = vmatmul.mubr.bf16.gmra.mrb[224].mxu0 %v8450_v23  ;;  %4223 = vmatmul.mubr.bf16.gmra.mrb[224].mxu1 %v8450_v23 }
 0x458   :  { %v4420_v24 = vpack.c.bf16 %v3288_v16, %v3284_v58  ;;  %v4422_v25 = vpack.c.bf16 %v3961_v20, %v3957_v63  ;;  %3559 = vmatprep.mubr.bf16.mxu0 %v9650_v19  ;;  %4232 = vmatprep.mubr.bf16.mxu1 %v9650_v19 }
 0x459   :  { %4675 = vst [vmem:[#allocation3 + $0x3a0] sm:$0xff] %v4419_v21  ;;  %4677 = vst [vmem:[#allocation3 + $0x3b0] sm:$0xff] %v4421_v22  ;;  %v8452_v22 = vld [vmem:[#allocation6 + $0x1d0] sm:$0xff]  }
 0x45a   :  { %4676 = vst [vmem:[#allocation3 + $0x3a8] sm:$0xff] %v4420_v24  ;;  %4678 = vst [vmem:[#allocation3 + $0x3b8] sm:$0xff] %v4422_v25  ;;  %v3291_v26 = vpop.f32.mrb[120].mxu0  ;;  %v3964_v27 = vpop.f32.mrb[120].mxu1 }
 0x45b   :  { %v3293_v28 = vpop.f32.mrb[121].mxu0  ;;  %v3966_v29 = vpop.f32.mrb[121].mxu1  ;;  %v3292_v32 = vadd.f32 %v3291_v26, %v10630_v17  ;;  %v3965_v33 = vadd.f32 %v3964_v27, %v10634_v18 }
 0x45c   :  { %v3295_v30 = vpop.f32.mrb[122].mxu0  ;;  %v3968_v31 = vpop.f32.mrb[122].mxu1  ;;  %v3294_v38 = vadd.f32 %v3293_v28, %v10638_v41  ;;  %v3967_v61 = vadd.f32 %v3966_v29, %v10642_v42 }
 0x45d   :  { %v3296_v34 = vadd.f32 %v3295_v30, %v10630_v17  ;;  %v3969_v35 = vadd.f32 %v3968_v31, %v10634_v18  ;;  %v3297_v36 = vpop.f32.mrb[123].mxu0  ;;  %v3970_v37 = vpop.f32.mrb[123].mxu1 }
 0x45e   :  { %v3298_v62 = vadd.f32 %v3297_v36, %v10638_v41  ;;  %v3971_v39 = vadd.f32 %v3970_v37, %v10642_v42 }
 0x45f   :  { %v4423_v40 = vpack.c.bf16 %v3296_v34, %v3292_v32  ;;  %v4425_v43 = vpack.c.bf16 %v3969_v35, %v3965_v33  ;;  %3560 = vmatmul.mubr.bf16.gmra.mrb[228].mxu0 %v8451_v44  ;;  %4233 = vmatmul.mubr.bf16.gmra.mrb[228].mxu1 %v8451_v44 }
 0x460   :  { %v4424_v56 = vpack.c.bf16 %v3298_v62, %v3294_v38  ;;  %v4426_v45 = vpack.c.bf16 %v3971_v39, %v3967_v61  ;;  %3569 = vmatprep.mubr.bf16.mxu0 %v9650_v19  ;;  %4242 = vmatprep.mubr.bf16.mxu1 %v9650_v19 }
 0x461   :  { %4679 = vst [vmem:[#allocation3 + $0x3c0] sm:$0xff] %v4423_v40  ;;  %4681 = vst [vmem:[#allocation3 + $0x3d0] sm:$0xff] %v4425_v43  ;;  %v8453_v43 = vld [vmem:[#allocation6 + $0x1d8] sm:$0xff]  }
 0x462   :  { %4680 = vst [vmem:[#allocation3 + $0x3c8] sm:$0xff] %v4424_v56  ;;  %4682 = vst [vmem:[#allocation3 + $0x3d8] sm:$0xff] %v4426_v45  ;;  %v3301_v46 = vpop.f32.mrb[124].mxu0  ;;  %v3974_v57 = vpop.f32.mrb[124].mxu1 }
 0x463   :  { %v3303_v47 = vpop.f32.mrb[125].mxu0  ;;  %v3976_v48 = vpop.f32.mrb[125].mxu1  ;;  %v3302_v59 = vadd.f32 %v3301_v46, %v10630_v17  ;;  %v3975_v54 = vadd.f32 %v3974_v57, %v10634_v18 }
 0x464   :  { %v3305_v49 = vpop.f32.mrb[126].mxu0  ;;  %v3978_v50 = vpop.f32.mrb[126].mxu1  ;;  %v3304_v55 = vadd.f32 %v3303_v47, %v10638_v41  ;;  %v3977_v58 = vadd.f32 %v3976_v48, %v10642_v42 }
 0x465   :  { %v3306_v60 = vadd.f32 %v3305_v49, %v10630_v17  ;;  %v3979_v51 = vadd.f32 %v3978_v50, %v10634_v18  ;;  %v3307_v52 = vpop.f32.mrb[127].mxu0  ;;  %v3980_v53 = vpop.f32.mrb[127].mxu1 }
 0x466   :  { %v3308_v63 = vadd.f32 %v3307_v52, %v10638_v41  ;;  %v3981_v16 = vadd.f32 %v3980_v53, %v10642_v42 }
 0x467   :  { %v4427_v20 = vpack.c.bf16 %v3306_v60, %v3302_v59  ;;  %v4429_v21 = vpack.c.bf16 %v3979_v51, %v3975_v54  ;;  %3570 = vmatmul.mubr.bf16.gmra.mrb[232].mxu0 %v8452_v22  ;;  %4243 = vmatmul.mubr.bf16.gmra.mrb[232].mxu1 %v8452_v22 }
 0x468   :  { %v4428_v23 = vpack.c.bf16 %v3308_v63, %v3304_v55  ;;  %v4430_v24 = vpack.c.bf16 %v3981_v16, %v3977_v58  ;;  %3579 = vmatprep.mubr.bf16.mxu0 %v9650_v19  ;;  %4252 = vmatprep.mubr.bf16.mxu1 %v9650_v19 }
 0x469   :  { %4683 = vst [vmem:[#allocation3 + $0x3e0] sm:$0xff] %v4427_v20  ;;  %4685 = vst [vmem:[#allocation3 + $0x3f0] sm:$0xff] %v4429_v21  ;;  %v8454_v21 = vld [vmem:[#allocation6 + $0x1e0] sm:$0xff]  }
 0x46a   :  { %4684 = vst [vmem:[#allocation3 + $0x3e8] sm:$0xff] %v4428_v23  ;;  %4686 = vst [vmem:[#allocation3 + $0x3f8] sm:$0xff] %v4430_v24  ;;  %v3311_v25 = vpop.f32.mrb[128].mxu0  ;;  %v3984_v26 = vpop.f32.mrb[128].mxu1 }
 0x46b   :  { %v3313_v27 = vpop.f32.mrb[129].mxu0  ;;  %v3986_v28 = vpop.f32.mrb[129].mxu1  ;;  %v3312_v31 = vadd.f32 %v3311_v25, %v10630_v17  ;;  %v3985_v32 = vadd.f32 %v3984_v26, %v10634_v18 }
 0x46c   :  { %v3315_v29 = vpop.f32.mrb[130].mxu0  ;;  %v3988_v30 = vpop.f32.mrb[130].mxu1  ;;  %v3314_v37 = vadd.f32 %v3313_v27, %v10638_v41  ;;  %v3987_v38 = vadd.f32 %v3986_v28, %v10642_v42 }
 0x46d   :  { %v3316_v33 = vadd.f32 %v3315_v29, %v10630_v17  ;;  %v3989_v34 = vadd.f32 %v3988_v30, %v10634_v18  ;;  %v3317_v35 = vpop.f32.mrb[131].mxu0  ;;  %v3990_v36 = vpop.f32.mrb[131].mxu1 }
 0x46e   :  { %v3318_v61 = vadd.f32 %v3317_v35, %v10638_v41  ;;  %v3991_v62 = vadd.f32 %v3990_v36, %v10642_v42 }
 0x46f   :  { %v4431_v39 = vpack.c.bf16 %v3316_v33, %v3312_v31  ;;  %v4433_v40 = vpack.c.bf16 %v3989_v34, %v3985_v32  ;;  %3580 = vmatmul.mubr.bf16.gmra.mrb[236].mxu0 %v8453_v43  ;;  %4253 = vmatmul.mubr.bf16.gmra.mrb[236].mxu1 %v8453_v43 }
 0x470   :  { %v4432_v44 = vpack.c.bf16 %v3318_v61, %v3314_v37  ;;  %v4434_v56 = vpack.c.bf16 %v3991_v62, %v3987_v38  ;;  %3589 = vmatprep.mubr.bf16.mxu0 %v9650_v19  ;;  %4262 = vmatprep.mubr.bf16.mxu1 %v9650_v19 }
 0x471   :  { %4687 = vst [vmem:[#allocation3 + $0x400] sm:$0xff] %v4431_v39  ;;  %4689 = vst [vmem:[#allocation3 + $0x410] sm:$0xff] %v4433_v40  ;;  %v8455_v40 = vld [vmem:[#allocation6 + $0x1e8] sm:$0xff]  }
 0x472   :  { %4688 = vst [vmem:[#allocation3 + $0x408] sm:$0xff] %v4432_v44  ;;  %4690 = vst [vmem:[#allocation3 + $0x418] sm:$0xff] %v4434_v56  ;;  %v3321_v45 = vpop.f32.mrb[132].mxu0  ;;  %v3994_v46 = vpop.f32.mrb[132].mxu1 }
 0x473   :  { %v3323_v57 = vpop.f32.mrb[133].mxu0  ;;  %v3996_v47 = vpop.f32.mrb[133].mxu1  ;;  %v3322_v50 = vadd.f32 %v3321_v45, %v10630_v17  ;;  %v3995_v59 = vadd.f32 %v3994_v46, %v10634_v18 }
 0x474   :  { %v3325_v48 = vpop.f32.mrb[134].mxu0  ;;  %v3998_v49 = vpop.f32.mrb[134].mxu1  ;;  %v3324_v53 = vadd.f32 %v3323_v57, %v10638_v41  ;;  %v3997_v55 = vadd.f32 %v3996_v47, %v10642_v42 }
 0x475   :  { %v3326_v54 = vadd.f32 %v3325_v48, %v10630_v17  ;;  %v3999_v60 = vadd.f32 %v3998_v49, %v10634_v18  ;;  %v3327_v51 = vpop.f32.mrb[135].mxu0  ;;  %v4000_v52 = vpop.f32.mrb[135].mxu1 }
 0x476   :  { %v3328_v58 = vadd.f32 %v3327_v51, %v10638_v41  ;;  %v4001_v63 = vadd.f32 %v4000_v52, %v10642_v42 }
 0x477   :  { %v4435_v16 = vpack.c.bf16 %v3326_v54, %v3322_v50  ;;  %v4437_v20 = vpack.c.bf16 %v3999_v60, %v3995_v59  ;;  %3590 = vmatmul.mubr.bf16.gmra.mrb[240].mxu0 %v8454_v21  ;;  %4263 = vmatmul.mubr.bf16.gmra.mrb[240].mxu1 %v8454_v21 }
 0x478   :  { %v4436_v22 = vpack.c.bf16 %v3328_v58, %v3324_v53  ;;  %v4438_v23 = vpack.c.bf16 %v4001_v63, %v3997_v55  ;;  %3599 = vmatprep.mubr.bf16.mxu0 %v9650_v19  ;;  %4272 = vmatprep.mubr.bf16.mxu1 %v9650_v19 }
 0x479   :  { %4691 = vst [vmem:[#allocation3 + $0x420] sm:$0xff] %v4435_v16  ;;  %4693 = vst [vmem:[#allocation3 + $0x430] sm:$0xff] %v4437_v20  ;;  %v8456_v20 = vld [vmem:[#allocation6 + $0x1f0] sm:$0xff]  }
 0x47a   :  { %4692 = vst [vmem:[#allocation3 + $0x428] sm:$0xff] %v4436_v22  ;;  %4694 = vst [vmem:[#allocation3 + $0x438] sm:$0xff] %v4438_v23  ;;  %v3331_v24 = vpop.f32.mrb[136].mxu0  ;;  %v4004_v25 = vpop.f32.mrb[136].mxu1 }
 0x47b   :  { %v3333_v26 = vpop.f32.mrb[137].mxu0  ;;  %v4006_v27 = vpop.f32.mrb[137].mxu1  ;;  %v3332_v30 = vadd.f32 %v3331_v24, %v10630_v17  ;;  %v4005_v31 = vadd.f32 %v4004_v25, %v10634_v18 }
 0x47c   :  { %v3335_v28 = vpop.f32.mrb[138].mxu0  ;;  %v4008_v29 = vpop.f32.mrb[138].mxu1  ;;  %v3334_v36 = vadd.f32 %v3333_v26, %v10638_v41  ;;  %v4007_v37 = vadd.f32 %v4006_v27, %v10642_v42 }
 0x47d   :  { %v3336_v32 = vadd.f32 %v3335_v28, %v10630_v17  ;;  %v4009_v33 = vadd.f32 %v4008_v29, %v10634_v18  ;;  %v3337_v34 = vpop.f32.mrb[139].mxu0  ;;  %v4010_v35 = vpop.f32.mrb[139].mxu1 }
 0x47e   :  { %v3338_v38 = vadd.f32 %v3337_v34, %v10638_v41  ;;  %v4011_v61 = vadd.f32 %v4010_v35, %v10642_v42 }
 0x47f   :  { %v4439_v62 = vpack.c.bf16 %v3336_v32, %v3332_v30  ;;  %v4441_v39 = vpack.c.bf16 %v4009_v33, %v4005_v31  ;;  %3600 = vmatmul.mubr.bf16.gmra.mrb[244].mxu0 %v8455_v40  ;;  %4273 = vmatmul.mubr.bf16.gmra.mrb[244].mxu1 %v8455_v40 }
 0x480   :  { %v4440_v43 = vpack.c.bf16 %v3338_v38, %v3334_v36  ;;  %v4442_v44 = vpack.c.bf16 %v4011_v61, %v4007_v37  ;;  %3609 = vmatprep.mubr.bf16.mxu0 %v9650_v19  ;;  %4282 = vmatprep.mubr.bf16.mxu1 %v9650_v19 }
 0x481   :  { %4695 = vst [vmem:[#allocation3 + $0x440] sm:$0xff] %v4439_v62  ;;  %4697 = vst [vmem:[#allocation3 + $0x450] sm:$0xff] %v4441_v39  ;;  %v8457_v62 = vld [vmem:[#allocation6 + $0x1f8] sm:$0xff]  }
 0x482   :  { %4696 = vst [vmem:[#allocation3 + $0x448] sm:$0xff] %v4440_v43  ;;  %4698 = vst [vmem:[#allocation3 + $0x458] sm:$0xff] %v4442_v44  ;;  %v3341_v56 = vpop.f32.mrb[140].mxu0  ;;  %v4014_v45 = vpop.f32.mrb[140].mxu1 }
 0x483   :  { %v3343_v46 = vpop.f32.mrb[141].mxu0  ;;  %v4016_v57 = vpop.f32.mrb[141].mxu1  ;;  %v3342_v49 = vadd.f32 %v3341_v56, %v10630_v17  ;;  %v4015_v50 = vadd.f32 %v4014_v45, %v10634_v18 }
 0x484   :  { %v3345_v47 = vpop.f32.mrb[142].mxu0  ;;  %v4018_v48 = vpop.f32.mrb[142].mxu1  ;;  %v3344_v52 = vadd.f32 %v3343_v46, %v10638_v41  ;;  %v4017_v53 = vadd.f32 %v4016_v57, %v10642_v42 }
 0x485   :  { %v3346_v59 = vadd.f32 %v3345_v47, %v10630_v17  ;;  %v4019_v54 = vadd.f32 %v4018_v48, %v10634_v18  ;;  %v3347_v60 = vpop.f32.mrb[143].mxu0  ;;  %v4020_v51 = vpop.f32.mrb[143].mxu1 }
 0x486   :  { %v3348_v55 = vadd.f32 %v3347_v60, %v10638_v41  ;;  %v4021_v58 = vadd.f32 %v4020_v51, %v10642_v42 }
 0x487   :  { %v4443_v63 = vpack.c.bf16 %v3346_v59, %v3342_v49  ;;  %v4445_v16 = vpack.c.bf16 %v4019_v54, %v4015_v50  ;;  %3610 = vmatmul.mubr.bf16.gmra.mrb[248].mxu0 %v8456_v20  ;;  %4283 = vmatmul.mubr.bf16.gmra.mrb[248].mxu1 %v8456_v20 }
 0x488   :  { %v4444_v21 = vpack.c.bf16 %v3348_v55, %v3344_v52  ;;  %v4446_v22 = vpack.c.bf16 %v4021_v58, %v4017_v53  ;;  %3619 = vmatprep.mubr.bf16.mxu0 %v9650_v19  ;;  %4292 = vmatprep.mubr.bf16.mxu1 %v9650_v19 }
 0x489   :  { %4699 = vst [vmem:[#allocation3 + $0x460] sm:$0xff] %v4443_v63  ;;  %4701 = vst [vmem:[#allocation3 + $0x470] sm:$0xff] %v4445_v16 }
 0x48a   :  { %4700 = vst [vmem:[#allocation3 + $0x468] sm:$0xff] %v4444_v21  ;;  %4702 = vst [vmem:[#allocation3 + $0x478] sm:$0xff] %v4446_v22  ;;  %v3351_v23 = vpop.f32.mrb[144].mxu0  ;;  %v4024_v24 = vpop.f32.mrb[144].mxu1 }
 0x48b   :  { %v3353_v25 = vpop.f32.mrb[145].mxu0  ;;  %v4026_v26 = vpop.f32.mrb[145].mxu1  ;;  %v3352_v29 = vadd.f32 %v3351_v23, %v10630_v17  ;;  %v4025_v30 = vadd.f32 %v4024_v24, %v10634_v18 }
 0x48c   :  { %v3355_v27 = vpop.f32.mrb[146].mxu0  ;;  %v4028_v28 = vpop.f32.mrb[146].mxu1  ;;  %v3354_v34 = vadd.f32 %v3353_v25, %v10638_v41  ;;  %v4027_v35 = vadd.f32 %v4026_v26, %v10642_v42 }
 0x48d   :  { %v3356_v31 = vadd.f32 %v3355_v27, %v10630_v17  ;;  %v4029_v32 = vadd.f32 %v4028_v28, %v10634_v18  ;;  %v3357_v33 = vpop.f32.mrb[147].mxu0  ;;  %v4030_v19 = vpop.f32.mrb[147].mxu1 }
 0x48e   :  { %v3358_v36 = vadd.f32 %v3357_v33, %v10638_v41  ;;  %v4031_v37 = vadd.f32 %v4030_v19, %v10642_v42 }
 0x48f   :  { %v4447_v38 = vpack.c.bf16 %v3356_v31, %v3352_v29  ;;  %v4449_v61 = vpack.c.bf16 %v4029_v32, %v4025_v30  ;;  %3620 = vmatmul.mubr.bf16.gmra.mrb[252].mxu0 %v8457_v62  ;;  %4293 = vmatmul.mubr.bf16.gmra.mrb[252].mxu1 %v8457_v62 }
 0x490   :  { %v4448_v39 = vpack.c.bf16 %v3358_v36, %v3354_v34  ;;  %v4450_v40 = vpack.c.bf16 %v4031_v37, %v4027_v35 }
 0x491   :  { %4703 = vst [vmem:[#allocation3 + $0x480] sm:$0xff] %v4447_v38  ;;  %4705 = vst [vmem:[#allocation3 + $0x490] sm:$0xff] %v4449_v61 }
 0x492   :  { %4704 = vst [vmem:[#allocation3 + $0x488] sm:$0xff] %v4448_v39  ;;  %4706 = vst [vmem:[#allocation3 + $0x498] sm:$0xff] %v4450_v40  ;;  %v3361_v43 = vpop.f32.mrb[148].mxu0  ;;  %v4034_v44 = vpop.f32.mrb[148].mxu1 }
 0x493   :  { %v3363_v56 = vpop.f32.mrb[149].mxu0  ;;  %v4036_v45 = vpop.f32.mrb[149].mxu1  ;;  %v3362_v47 = vadd.f32 %v3361_v43, %v10630_v17  ;;  %v4035_v48 = vadd.f32 %v4034_v44, %v10634_v18 }
 0x494   :  { %v3365_v46 = vpop.f32.mrb[150].mxu0  ;;  %v4038_v57 = vpop.f32.mrb[150].mxu1  ;;  %v3364_v60 = vadd.f32 %v3363_v56, %v10638_v41  ;;  %v4037_v51 = vadd.f32 %v4036_v45, %v10642_v42 }
 0x495   :  { %v3366_v49 = vadd.f32 %v3365_v46, %v10630_v17  ;;  %v4039_v50 = vadd.f32 %v4038_v57, %v10634_v18  ;;  %v3367_v59 = vpop.f32.mrb[151].mxu0  ;;  %v4040_v54 = vpop.f32.mrb[151].mxu1 }
 0x496   :  { %v3368_v52 = vadd.f32 %v3367_v59, %v10638_v41  ;;  %v4041_v53 = vadd.f32 %v4040_v54, %v10642_v42 }
 0x497   :  { %v4451_v55 = vpack.c.bf16 %v3366_v49, %v3362_v47  ;;  %v4453_v58 = vpack.c.bf16 %v4039_v50, %v4035_v48 }
 0x498   :  { %v4452_v63 = vpack.c.bf16 %v3368_v52, %v3364_v60  ;;  %v4454_v16 = vpack.c.bf16 %v4041_v53, %v4037_v51 }
 0x499   :  { %4707 = vst [vmem:[#allocation3 + $0x4a0] sm:$0xff] %v4451_v55  ;;  %4709 = vst [vmem:[#allocation3 + $0x4b0] sm:$0xff] %v4453_v58 }
 0x49a   :  { %4708 = vst [vmem:[#allocation3 + $0x4a8] sm:$0xff] %v4452_v63  ;;  %4710 = vst [vmem:[#allocation3 + $0x4b8] sm:$0xff] %v4454_v16  ;;  %v3371_v20 = vpop.f32.mrb[152].mxu0  ;;  %v4044_v21 = vpop.f32.mrb[152].mxu1 }
 0x49b   :  { %v3373_v22 = vpop.f32.mrb[153].mxu0  ;;  %v4046_v23 = vpop.f32.mrb[153].mxu1  ;;  %v3372_v26 = vadd.f32 %v3371_v20, %v10630_v17  ;;  %v4045_v27 = vadd.f32 %v4044_v21, %v10634_v18 }
 0x49c   :  { %v3375_v24 = vpop.f32.mrb[154].mxu0  ;;  %v4048_v25 = vpop.f32.mrb[154].mxu1  ;;  %v3374_v32 = vadd.f32 %v3373_v22, %v10638_v41  ;;  %v4047_v33 = vadd.f32 %v4046_v23, %v10642_v42 }
 0x49d   :  { %v3376_v28 = vadd.f32 %v3375_v24, %v10630_v17  ;;  %v4049_v29 = vadd.f32 %v4048_v25, %v10634_v18  ;;  %v3377_v30 = vpop.f32.mrb[155].mxu0  ;;  %v4050_v31 = vpop.f32.mrb[155].mxu1 }
 0x49e   :  { %v3378_v19 = vadd.f32 %v3377_v30, %v10638_v41  ;;  %v4051_v34 = vadd.f32 %v4050_v31, %v10642_v42 }
 0x49f   :  { %v4455_v35 = vpack.c.bf16 %v3376_v28, %v3372_v26  ;;  %v4457_v36 = vpack.c.bf16 %v4049_v29, %v4045_v27 }
 0x4a0   :  { %v4456_v37 = vpack.c.bf16 %v3378_v19, %v3374_v32  ;;  %v4458_v38 = vpack.c.bf16 %v4051_v34, %v4047_v33 }
 0x4a1   :  { %4711 = vst [vmem:[#allocation3 + $0x4c0] sm:$0xff] %v4455_v35  ;;  %4713 = vst [vmem:[#allocation3 + $0x4d0] sm:$0xff] %v4457_v36 }
 0x4a2   :  { %4712 = vst [vmem:[#allocation3 + $0x4c8] sm:$0xff] %v4456_v37  ;;  %4714 = vst [vmem:[#allocation3 + $0x4d8] sm:$0xff] %v4458_v38  ;;  %v3381_v61 = vpop.f32.mrb[156].mxu0  ;;  %v4054_v62 = vpop.f32.mrb[156].mxu1 }
 0x4a3   :  { %v3383_v39 = vpop.f32.mrb[157].mxu0  ;;  %v4056_v40 = vpop.f32.mrb[157].mxu1  ;;  %v3382_v56 = vadd.f32 %v3381_v61, %v10630_v17  ;;  %v4055_v45 = vadd.f32 %v4054_v62, %v10634_v18 }
 0x4a4   :  { %v3385_v43 = vpop.f32.mrb[158].mxu0  ;;  %v4058_v44 = vpop.f32.mrb[158].mxu1  ;;  %v3384_v49 = vadd.f32 %v3383_v39, %v10638_v41  ;;  %v4057_v50 = vadd.f32 %v4056_v40, %v10642_v42 }
 0x4a5   :  { %v3386_v46 = vadd.f32 %v3385_v43, %v10630_v17  ;;  %v4059_v57 = vadd.f32 %v4058_v44, %v10634_v18  ;;  %v3387_v47 = vpop.f32.mrb[159].mxu0  ;;  %v4060_v48 = vpop.f32.mrb[159].mxu1 }
 0x4a6   :  { %v3388_v59 = vadd.f32 %v3387_v47, %v10638_v41  ;;  %v4061_v54 = vadd.f32 %v4060_v48, %v10642_v42 }
 0x4a7   :  { %v4459_v60 = vpack.c.bf16 %v3386_v46, %v3382_v56  ;;  %v4461_v51 = vpack.c.bf16 %v4059_v57, %v4055_v45 }
 0x4a8   :  { %v4460_v52 = vpack.c.bf16 %v3388_v59, %v3384_v49  ;;  %v4462_v53 = vpack.c.bf16 %v4061_v54, %v4057_v50 }
 0x4a9   :  { %4715 = vst [vmem:[#allocation3 + $0x4e0] sm:$0xff] %v4459_v60  ;;  %4717 = vst [vmem:[#allocation3 + $0x4f0] sm:$0xff] %v4461_v51 }
 0x4aa   :  { %4716 = vst [vmem:[#allocation3 + $0x4e8] sm:$0xff] %v4460_v52  ;;  %4718 = vst [vmem:[#allocation3 + $0x4f8] sm:$0xff] %v4462_v53  ;;  %v3391_v55 = vpop.f32.mrb[160].mxu0  ;;  %v4064_v58 = vpop.f32.mrb[160].mxu1 }
 0x4ab   :  { %v3393_v63 = vpop.f32.mrb[161].mxu0  ;;  %v4066_v16 = vpop.f32.mrb[161].mxu1  ;;  %v3392_v22 = vadd.f32 %v3391_v55, %v10630_v17  ;;  %v4065_v23 = vadd.f32 %v4064_v58, %v10634_v18 }
 0x4ac   :  { %v3395_v20 = vpop.f32.mrb[162].mxu0  ;;  %v4068_v21 = vpop.f32.mrb[162].mxu1  ;;  %v3394_v28 = vadd.f32 %v3393_v63, %v10638_v41  ;;  %v4067_v29 = vadd.f32 %v4066_v16, %v10642_v42 }
 0x4ad   :  { %v3396_v24 = vadd.f32 %v3395_v20, %v10630_v17  ;;  %v4069_v25 = vadd.f32 %v4068_v21, %v10634_v18  ;;  %v3397_v26 = vpop.f32.mrb[163].mxu0  ;;  %v4070_v27 = vpop.f32.mrb[163].mxu1 }
 0x4ae   :  { %v3398_v30 = vadd.f32 %v3397_v26, %v10638_v41  ;;  %v4071_v31 = vadd.f32 %v4070_v27, %v10642_v42 }
 0x4af   :  { %v4463_v32 = vpack.c.bf16 %v3396_v24, %v3392_v22  ;;  %v4465_v33 = vpack.c.bf16 %v4069_v25, %v4065_v23 }
 0x4b0   :  { %v4464_v19 = vpack.c.bf16 %v3398_v30, %v3394_v28  ;;  %v4466_v34 = vpack.c.bf16 %v4071_v31, %v4067_v29 }
 0x4b1   :  { %4719 = vst [vmem:[#allocation3 + $0x500] sm:$0xff] %v4463_v32  ;;  %4721 = vst [vmem:[#allocation3 + $0x510] sm:$0xff] %v4465_v33 }
 0x4b2   :  { %4720 = vst [vmem:[#allocation3 + $0x508] sm:$0xff] %v4464_v19  ;;  %4722 = vst [vmem:[#allocation3 + $0x518] sm:$0xff] %v4466_v34  ;;  %v3401_v35 = vpop.f32.mrb[164].mxu0  ;;  %v4074_v36 = vpop.f32.mrb[164].mxu1 }
 0x4b3   :  { %v3403_v37 = vpop.f32.mrb[165].mxu0  ;;  %v4076_v38 = vpop.f32.mrb[165].mxu1  ;;  %v3402_v39 = vadd.f32 %v3401_v35, %v10630_v17  ;;  %v4075_v40 = vadd.f32 %v4074_v36, %v10634_v18 }
 0x4b4   :  { %v3405_v61 = vpop.f32.mrb[166].mxu0  ;;  %v4078_v62 = vpop.f32.mrb[166].mxu1  ;;  %v3404_v46 = vadd.f32 %v3403_v37, %v10638_v41  ;;  %v4077_v57 = vadd.f32 %v4076_v38, %v10642_v42 }
 0x4b5   :  { %v3406_v43 = vadd.f32 %v3405_v61, %v10630_v17  ;;  %v4079_v44 = vadd.f32 %v4078_v62, %v10634_v18  ;;  %v3407_v56 = vpop.f32.mrb[167].mxu0  ;;  %v4080_v45 = vpop.f32.mrb[167].mxu1 }
 0x4b6   :  { %v3408_v47 = vadd.f32 %v3407_v56, %v10638_v41  ;;  %v4081_v48 = vadd.f32 %v4080_v45, %v10642_v42 }
 0x4b7   :  { %v4467_v49 = vpack.c.bf16 %v3406_v43, %v3402_v39  ;;  %v4469_v50 = vpack.c.bf16 %v4079_v44, %v4075_v40 }
 0x4b8   :  { %v4468_v59 = vpack.c.bf16 %v3408_v47, %v3404_v46  ;;  %v4470_v54 = vpack.c.bf16 %v4081_v48, %v4077_v57 }
 0x4b9   :  { %4723 = vst [vmem:[#allocation3 + $0x520] sm:$0xff] %v4467_v49  ;;  %4725 = vst [vmem:[#allocation3 + $0x530] sm:$0xff] %v4469_v50 }
 0x4ba   :  { %4724 = vst [vmem:[#allocation3 + $0x528] sm:$0xff] %v4468_v59  ;;  %4726 = vst [vmem:[#allocation3 + $0x538] sm:$0xff] %v4470_v54  ;;  %v3411_v60 = vpop.f32.mrb[168].mxu0  ;;  %v4084_v51 = vpop.f32.mrb[168].mxu1 }
 0x4bb   :  { %v3413_v52 = vpop.f32.mrb[169].mxu0  ;;  %v4086_v53 = vpop.f32.mrb[169].mxu1  ;;  %v3412_v63 = vadd.f32 %v3411_v60, %v10630_v17  ;;  %v4085_v16 = vadd.f32 %v4084_v51, %v10634_v18 }
 0x4bc   :  { %v3415_v55 = vpop.f32.mrb[170].mxu0  ;;  %v4088_v58 = vpop.f32.mrb[170].mxu1  ;;  %v3414_v24 = vadd.f32 %v3413_v52, %v10638_v41  ;;  %v4087_v25 = vadd.f32 %v4086_v53, %v10642_v42 }
 0x4bd   :  { %v3416_v20 = vadd.f32 %v3415_v55, %v10630_v17  ;;  %v4089_v21 = vadd.f32 %v4088_v58, %v10634_v18  ;;  %v3417_v22 = vpop.f32.mrb[171].mxu0  ;;  %v4090_v23 = vpop.f32.mrb[171].mxu1 }
 0x4be   :  { %v3418_v26 = vadd.f32 %v3417_v22, %v10638_v41  ;;  %v4091_v27 = vadd.f32 %v4090_v23, %v10642_v42 }
 0x4bf   :  { %v4471_v28 = vpack.c.bf16 %v3416_v20, %v3412_v63  ;;  %v4473_v29 = vpack.c.bf16 %v4089_v21, %v4085_v16 }
 0x4c0   :  { %v4472_v30 = vpack.c.bf16 %v3418_v26, %v3414_v24  ;;  %v4474_v31 = vpack.c.bf16 %v4091_v27, %v4087_v25 }
 0x4c1   :  { %4727 = vst [vmem:[#allocation3 + $0x540] sm:$0xff] %v4471_v28  ;;  %4729 = vst [vmem:[#allocation3 + $0x550] sm:$0xff] %v4473_v29 }
 0x4c2   :  { %4728 = vst [vmem:[#allocation3 + $0x548] sm:$0xff] %v4472_v30  ;;  %4730 = vst [vmem:[#allocation3 + $0x558] sm:$0xff] %v4474_v31  ;;  %v3421_v32 = vpop.f32.mrb[172].mxu0  ;;  %v4094_v33 = vpop.f32.mrb[172].mxu1 }
 0x4c3   :  { %v3423_v19 = vpop.f32.mrb[173].mxu0  ;;  %v4096_v34 = vpop.f32.mrb[173].mxu1  ;;  %v3422_v37 = vadd.f32 %v3421_v32, %v10630_v17  ;;  %v4095_v38 = vadd.f32 %v4094_v33, %v10634_v18 }
 0x4c4   :  { %v3425_v35 = vpop.f32.mrb[174].mxu0  ;;  %v4098_v36 = vpop.f32.mrb[174].mxu1  ;;  %v3424_v43 = vadd.f32 %v3423_v19, %v10638_v41  ;;  %v4097_v44 = vadd.f32 %v4096_v34, %v10642_v42 }
 0x4c5   :  { %v3426_v61 = vadd.f32 %v3425_v35, %v10630_v17  ;;  %v4099_v62 = vadd.f32 %v4098_v36, %v10634_v18  ;;  %v3427_v39 = vpop.f32.mrb[175].mxu0  ;;  %v4100_v40 = vpop.f32.mrb[175].mxu1 }
 0x4c6   :  { %v3428_v56 = vadd.f32 %v3427_v39, %v10638_v41  ;;  %v4101_v45 = vadd.f32 %v4100_v40, %v10642_v42 }
 0x4c7   :  { %v4475_v46 = vpack.c.bf16 %v3426_v61, %v3422_v37  ;;  %v4477_v57 = vpack.c.bf16 %v4099_v62, %v4095_v38 }
 0x4c8   :  { %v4476_v47 = vpack.c.bf16 %v3428_v56, %v3424_v43  ;;  %v4478_v48 = vpack.c.bf16 %v4101_v45, %v4097_v44 }
 0x4c9   :  { %4731 = vst [vmem:[#allocation3 + $0x560] sm:$0xff] %v4475_v46  ;;  %4733 = vst [vmem:[#allocation3 + $0x570] sm:$0xff] %v4477_v57 }
 0x4ca   :  { %4732 = vst [vmem:[#allocation3 + $0x568] sm:$0xff] %v4476_v47  ;;  %4734 = vst [vmem:[#allocation3 + $0x578] sm:$0xff] %v4478_v48  ;;  %v3431_v49 = vpop.f32.mrb[176].mxu0  ;;  %v4104_v50 = vpop.f32.mrb[176].mxu1 }
 0x4cb   :  { %v3433_v59 = vpop.f32.mrb[177].mxu0  ;;  %v4106_v54 = vpop.f32.mrb[177].mxu1  ;;  %v3432_v52 = vadd.f32 %v3431_v49, %v10630_v17  ;;  %v4105_v53 = vadd.f32 %v4104_v50, %v10634_v18 }
 0x4cc   :  { %v3435_v60 = vpop.f32.mrb[178].mxu0  ;;  %v4108_v51 = vpop.f32.mrb[178].mxu1  ;;  %v3434_v20 = vadd.f32 %v3433_v59, %v10638_v41  ;;  %v4107_v21 = vadd.f32 %v4106_v54, %v10642_v42 }
 0x4cd   :  { %v3436_v55 = vadd.f32 %v3435_v60, %v10630_v17  ;;  %v4109_v58 = vadd.f32 %v4108_v51, %v10634_v18  ;;  %v3437_v63 = vpop.f32.mrb[179].mxu0  ;;  %v4110_v16 = vpop.f32.mrb[179].mxu1 }
 0x4ce   :  { %v3438_v22 = vadd.f32 %v3437_v63, %v10638_v41  ;;  %v4111_v23 = vadd.f32 %v4110_v16, %v10642_v42 }
 0x4cf   :  { %v4479_v24 = vpack.c.bf16 %v3436_v55, %v3432_v52  ;;  %v4481_v25 = vpack.c.bf16 %v4109_v58, %v4105_v53 }
 0x4d0   :  { %v4480_v26 = vpack.c.bf16 %v3438_v22, %v3434_v20  ;;  %v4482_v27 = vpack.c.bf16 %v4111_v23, %v4107_v21 }
 0x4d1   :  { %4735 = vst [vmem:[#allocation3 + $0x580] sm:$0xff] %v4479_v24  ;;  %4737 = vst [vmem:[#allocation3 + $0x590] sm:$0xff] %v4481_v25 }
 0x4d2   :  { %4736 = vst [vmem:[#allocation3 + $0x588] sm:$0xff] %v4480_v26  ;;  %4738 = vst [vmem:[#allocation3 + $0x598] sm:$0xff] %v4482_v27  ;;  %v3441_v28 = vpop.f32.mrb[180].mxu0  ;;  %v4114_v29 = vpop.f32.mrb[180].mxu1 }
 0x4d3   :  { %v3443_v30 = vpop.f32.mrb[181].mxu0  ;;  %v4116_v31 = vpop.f32.mrb[181].mxu1  ;;  %v3442_v19 = vadd.f32 %v3441_v28, %v10630_v17  ;;  %v4115_v34 = vadd.f32 %v4114_v29, %v10634_v18 }
 0x4d4   :  { %v3445_v32 = vpop.f32.mrb[182].mxu0  ;;  %v4118_v33 = vpop.f32.mrb[182].mxu1  ;;  %v3444_v61 = vadd.f32 %v3443_v30, %v10638_v41  ;;  %v4117_v62 = vadd.f32 %v4116_v31, %v10642_v42 }
 0x4d5   :  { %v3446_v35 = vadd.f32 %v3445_v32, %v10630_v17  ;;  %v4119_v36 = vadd.f32 %v4118_v33, %v10634_v18  ;;  %v3447_v37 = vpop.f32.mrb[183].mxu0  ;;  %v4120_v38 = vpop.f32.mrb[183].mxu1 }
 0x4d6   :  { %v3448_v39 = vadd.f32 %v3447_v37, %v10638_v41  ;;  %v4121_v40 = vadd.f32 %v4120_v38, %v10642_v42 }
 0x4d7   :  { %v4483_v43 = vpack.c.bf16 %v3446_v35, %v3442_v19  ;;  %v4485_v44 = vpack.c.bf16 %v4119_v36, %v4115_v34 }
 0x4d8   :  { %v4484_v56 = vpack.c.bf16 %v3448_v39, %v3444_v61  ;;  %v4486_v45 = vpack.c.bf16 %v4121_v40, %v4117_v62 }
 0x4d9   :  { %4739 = vst [vmem:[#allocation3 + $0x5a0] sm:$0xff] %v4483_v43  ;;  %4741 = vst [vmem:[#allocation3 + $0x5b0] sm:$0xff] %v4485_v44 }
 0x4da   :  { %4740 = vst [vmem:[#allocation3 + $0x5a8] sm:$0xff] %v4484_v56  ;;  %4742 = vst [vmem:[#allocation3 + $0x5b8] sm:$0xff] %v4486_v45  ;;  %v3451_v46 = vpop.f32.mrb[184].mxu0  ;;  %v4124_v57 = vpop.f32.mrb[184].mxu1  ;;  %v11100_v56 = vld [vmem:[#allocation11] sm:$0xff]  ;;  %v11102_v45 = vld [vmem:[#allocation11 + $0x8] sm:$0xff] }
 0x4db   :  { %v3453_v47 = vpop.f32.mrb[185].mxu0  ;;  %v4126_v48 = vpop.f32.mrb[185].mxu1  ;;  %v3452_v59 = vadd.f32 %v3451_v46, %v10630_v17  ;;  %v4125_v54 = vadd.f32 %v4124_v57, %v10634_v18  ;;  %13737 = vst [vmem:[#allocation36_spill] sm:$0xff] %v11100_v56  ;;  %13738 = vst [vmem:[#allocation37_spill] sm:$0xff] %v11102_v45  ;;  %v11104_v46 = vld [vmem:[#allocation11 + $0x10] sm:$0xff] }
 0x4dc   :  { %v3455_v49 = vpop.f32.mrb[186].mxu0  ;;  %v4128_v50 = vpop.f32.mrb[186].mxu1  ;;  %v3454_v55 = vadd.f32 %v3453_v47, %v10638_v41  ;;  %v4127_v58 = vadd.f32 %v4126_v48, %v10642_v42  ;;  %13739 = vst [vmem:[#allocation38_spill] sm:$0xff] %v11104_v46  ;;  %v11106_v48 = vld [vmem:[#allocation11 + $0x18] sm:$0xff] }
 0x4dd   :  { %v3456_v60 = vadd.f32 %v3455_v49, %v10630_v17  ;;  %v4129_v51 = vadd.f32 %v4128_v50, %v10634_v18  ;;  %v3457_v52 = vpop.f32.mrb[187].mxu0  ;;  %v4130_v53 = vpop.f32.mrb[187].mxu1  ;;  %13740 = vst [vmem:[#allocation39_spill] sm:$0xff] %v11106_v48  ;;  %v11108_v49 = vld [vmem:[#allocation11 + $0x20] sm:$0xff]  ;;  %v11110_v50 = vld [vmem:[#allocation11 + $0x28] sm:$0xff] }
 0x4de   :  { %v3458_v63 = vadd.f32 %v3457_v52, %v10638_v41  ;;  %v4131_v16 = vadd.f32 %v4130_v53, %v10642_v42  ;;  %13741 = vst [vmem:[#allocation40_spill] sm:$0xff] %v11108_v49  ;;  %13742 = vst [vmem:[#allocation41_spill] sm:$0xff] %v11110_v50  ;;  %v11116_v52 = vld [vmem:[#allocation11 + $0x40] sm:$0xff] }
 0x4df   :  { %v4487_v20 = vpack.c.bf16 %v3456_v60, %v3452_v59  ;;  %v4489_v21 = vpack.c.bf16 %v4129_v51, %v4125_v54  ;;  %v11112_v60 = vld [vmem:[#allocation11 + $0x30] sm:$0xff]  ;;  %v11114_v51 = vld [vmem:[#allocation11 + $0x38] sm:$0xff]  ;;  %13745 = vst [vmem:[#allocation44_spill] sm:$0xff] %v11116_v52 }
 0x4e0   :  { %v4488_v22 = vpack.c.bf16 %v3458_v63, %v3454_v55  ;;  %v4490_v23 = vpack.c.bf16 %v4131_v16, %v4127_v58  ;;  %13743 = vst [vmem:[#allocation42_spill] sm:$0xff] %v11112_v60  ;;  %13744 = vst [vmem:[#allocation43_spill] sm:$0xff] %v11114_v51 }
 0x4e1   :  { %4743 = vst [vmem:[#allocation3 + $0x5c0] sm:$0xff] %v4487_v20  ;;  %4745 = vst [vmem:[#allocation3 + $0x5d0] sm:$0xff] %v4489_v21  ;;  %v11122_v21 = vld [vmem:[#allocation11 + $0x48] sm:$0xff] }
 0x4e2   :  { %4744 = vst [vmem:[#allocation3 + $0x5c8] sm:$0xff] %v4488_v22  ;;  %4746 = vst [vmem:[#allocation3 + $0x5d8] sm:$0xff] %v4490_v23  ;;  %v3461_v24 = vpop.f32.mrb[188].mxu0  ;;  %v4134_v25 = vpop.f32.mrb[188].mxu1  ;;  %v11124_v22 = vld [vmem:[#allocation11 + $0x50] sm:$0xff]  ;;  %v11126_v23 = vld [vmem:[#allocation11 + $0x58] sm:$0xff] }
 0x4e3   :  { %v3463_v26 = vpop.f32.mrb[189].mxu0  ;;  %v4136_v27 = vpop.f32.mrb[189].mxu1  ;;  %v3462_v30 = vadd.f32 %v3461_v24, %v10630_v17  ;;  %v4135_v31 = vadd.f32 %v4134_v25, %v10634_v18  ;;  %13746 = vst [vmem:[#allocation45_spill] sm:$0xff] %v11122_v21  ;;  %13747 = vst [vmem:[#allocation46_spill] sm:$0xff] %v11124_v22 }
 0x4e4   :  { %v3465_v28 = vpop.f32.mrb[190].mxu0  ;;  %v4138_v29 = vpop.f32.mrb[190].mxu1  ;;  %v3464_v35 = vadd.f32 %v3463_v26, %v10638_v41  ;;  %v4137_v36 = vadd.f32 %v4136_v27, %v10642_v42  ;;  %13748 = vst [vmem:[#allocation47_spill] sm:$0xff] %v11126_v23 }
 0x4e5   :  { %v3466_v32 = vadd.f32 %v3465_v28, %v10630_v17  ;;  %v4139_v33 = vadd.f32 %v4138_v29, %v10634_v18  ;;  %v3467_v19 = vpop.f32.mrb[191].mxu0  ;;  %v4140_v34 = vpop.f32.mrb[191].mxu1  ;;  %v11132_v28 = vld [vmem:[#allocation11 + $0x60] sm:$0xff]  ;;  %v11134_v29 = vld [vmem:[#allocation11 + $0x68] sm:$0xff] }
 0x4e6   :  { %v3468_v37 = vadd.f32 %v3467_v19, %v10638_v41  ;;  %v4141_v38 = vadd.f32 %v4140_v34, %v10642_v42  ;;  %13749 = vst [vmem:[#allocation48_spill] sm:$0xff] %v11132_v28  ;;  %13750 = vst [vmem:[#allocation49_spill] sm:$0xff] %v11134_v29  ;;  %v11140_v19 = vld [vmem:[#allocation11 + $0x80] sm:$0xff]  ;;  %v11142_v34 = vld [vmem:[#allocation11 + $0x88] sm:$0xff] }
 0x4e7   :  { %v4491_v61 = vpack.c.bf16 %v3466_v32, %v3462_v30  ;;  %v4493_v62 = vpack.c.bf16 %v4139_v33, %v4135_v31  ;;  %v11136_v30 = vld [vmem:[#allocation11 + $0x70] sm:$0xff]  ;;  %v11138_v33 = vld [vmem:[#allocation11 + $0x78] sm:$0xff]  ;;  %13753 = vst [vmem:[#allocation52_spill] sm:$0xff] %v11140_v19  ;;  %13754 = vst [vmem:[#allocation53_spill] sm:$0xff] %v11142_v34 }
 0x4e8   :  { %v4492_v39 = vpack.c.bf16 %v3468_v37, %v3464_v35  ;;  %v4494_v40 = vpack.c.bf16 %v4141_v38, %v4137_v36  ;;  %13751 = vst [vmem:[#allocation50_spill] sm:$0xff] %v11136_v30  ;;  %13752 = vst [vmem:[#allocation51_spill] sm:$0xff] %v11138_v33  ;;  %v11144_v37 = vld [vmem:[#allocation11 + $0x90] sm:$0xff]  ;;  %v11146_v38 = vld [vmem:[#allocation11 + $0x98] sm:$0xff] }
 0x4e9   :  { %4747 = vst [vmem:[#allocation3 + $0x5e0] sm:$0xff] %v4491_v61  ;;  %4749 = vst [vmem:[#allocation3 + $0x5f0] sm:$0xff] %v4493_v62  ;;  %v11148_v61 = vld [vmem:[#allocation11 + $0xa0] sm:$0xff]  ;;  %v11150_v62 = vld [vmem:[#allocation11 + $0xa8] sm:$0xff] }
 0x4ea   :  { %4748 = vst [vmem:[#allocation3 + $0x5e8] sm:$0xff] %v4492_v39  ;;  %4750 = vst [vmem:[#allocation3 + $0x5f8] sm:$0xff] %v4494_v40  ;;  %v3471_v43 = vpop.f32.mrb[192].mxu0  ;;  %v4144_v44 = vpop.f32.mrb[192].mxu1  ;;  %v11152_v39 = vld [vmem:[#allocation11 + $0xb0] sm:$0xff]  ;;  %v11154_v40 = vld [vmem:[#allocation11 + $0xb8] sm:$0xff] }
 0x4eb   :  { %v3473_v57 = vpop.f32.mrb[193].mxu0  ;;  %v4146_v47 = vpop.f32.mrb[193].mxu1  ;;  %v3472_v53 = vadd.f32 %v3471_v43, %v10630_v17  ;;  %v4145_v55 = vadd.f32 %v4144_v44, %v10634_v18  ;;  %13755 = vst [vmem:[#allocation54_spill] sm:$0xff] %v11144_v37  ;;  %13756 = vst [vmem:[#allocation55_spill] sm:$0xff] %v11146_v38 }
 0x4ec   :  { %v3475_v59 = vpop.f32.mrb[194].mxu0  ;;  %v4148_v54 = vpop.f32.mrb[194].mxu1  ;;  %v3474_v24 = vadd.f32 %v3473_v57, %v10638_v41  ;;  %v4147_v25 = vadd.f32 %v4146_v47, %v10642_v42  ;;  %13757 = vst [vmem:[#allocation56_spill] sm:$0xff] %v11148_v61  ;;  %13758 = vst [vmem:[#allocation57_spill] sm:$0xff] %v11150_v62  ;;  %v11156_v57 = vld [vmem:[#allocation11 + $0xc0] sm:$0xff]  ;;  %v11158_v47 = vld [vmem:[#allocation11 + $0xc8] sm:$0xff] }
 0x4ed   :  { %v3476_v58 = vadd.f32 %v3475_v59, %v10630_v17  ;;  %v4149_v63 = vadd.f32 %v4148_v54, %v10634_v18  ;;  %v3477_v16 = vpop.f32.mrb[195].mxu0  ;;  %v4150_v20 = vpop.f32.mrb[195].mxu1  ;;  %13759 = vst [vmem:[#allocation58_spill] sm:$0xff] %v11152_v39  ;;  %13760 = vst [vmem:[#allocation59_spill] sm:$0xff] %v11154_v40  ;;  %v11160_v59 = vld [vmem:[#allocation11 + $0xd0] sm:$0xff] }
 0x4ee   :  { %v3478_v26 = vadd.f32 %v3477_v16, %v10638_v41  ;;  %v4151_v27 = vadd.f32 %v4150_v20, %v10642_v42  ;;  %13761 = vst [vmem:[#allocation60_spill] sm:$0xff] %v11156_v57  ;;  %13762 = vst [vmem:[#allocation61_spill] sm:$0xff] %v11158_v47 }
 0x4ef   :  { %v4495_v31 = vpack.c.bf16 %v3476_v58, %v3472_v53  ;;  %v4497_v32 = vpack.c.bf16 %v4149_v63, %v4145_v55  ;;  %13763 = vst [vmem:[#allocation62_spill] sm:$0xff] %v11160_v59  ;;  %v11162_v55 = vld [vmem:[#allocation11 + $0xd8] sm:$0xff]  ;;  %v11164_v58 = vld [vmem:[#allocation11 + $0xe0] sm:$0xff]  ;;  %v11166_v63 = vld [vmem:[#allocation11 + $0xe8] sm:$0xff] }
 0x4f0   :  { %v4496_v35 = vpack.c.bf16 %v3478_v26, %v3474_v24  ;;  %v4498_v36 = vpack.c.bf16 %v4151_v27, %v4147_v25  ;;  %13764 = vst [vmem:[#allocation63_spill] sm:$0xff] %v11162_v55  ;;  %13765 = vst [vmem:[#allocation64_spill] sm:$0xff] %v11164_v58  ;;  %v11168_v24 = vld [vmem:[#allocation11 + $0xf0] sm:$0xff]  ;;  %v11170_v25 = vld [vmem:[#allocation11 + $0xf8] sm:$0xff] }
 0x4f1   :  { %4751 = vst [vmem:[#allocation3 + $0x600] sm:$0xff] %v4495_v31  ;;  %4753 = vst [vmem:[#allocation3 + $0x610] sm:$0xff] %v4497_v32  ;;  %v11172_v26 = vld [vmem:[#allocation14] sm:$0xff] }
 0x4f2   :  { %4752 = vst [vmem:[#allocation3 + $0x608] sm:$0xff] %v4496_v35  ;;  %4754 = vst [vmem:[#allocation3 + $0x618] sm:$0xff] %v4498_v36  ;;  %v3481_v43 = vpop.f32.mrb[196].mxu0  ;;  %v4154_v44 = vpop.f32.mrb[196].mxu1 }
 0x4f3   :  { %v3483_v54 = vpop.f32.mrb[197].mxu0  ;;  %v4156_v53 = vpop.f32.mrb[197].mxu1  ;;  %13766 = vst [vmem:[#allocation65_spill] sm:$0xff] %v11166_v63  ;;  %13767 = vst [vmem:[#allocation66_spill] sm:$0xff] %v11168_v24  ;;  %v3482_v27 = vadd.f32 %v3481_v43, %v10630_v17  ;;  %v4155_v31 = vadd.f32 %v4154_v44, %v10634_v18 }
 0x4f4   :  { %v3485_v16 = vpop.f32.mrb[198].mxu0  ;;  %v4158_v20 = vpop.f32.mrb[198].mxu1  ;;  %13768 = vst [vmem:[#allocation67_spill] sm:$0xff] %v11170_v25  ;;  %13769 = vst [vmem:[#allocation68_spill] sm:$0xff] %v11172_v26  ;;  %v3484_v11 = vadd.f32 %v3483_v54, %v10638_v41  ;;  %v4157_v10 = vadd.f32 %v4156_v53, %v10642_v42 }
 0x4f5   :  { %v3486_v32 = vadd.f32 %v3485_v16, %v10630_v17  ;;  %v4159_v35 = vadd.f32 %v4158_v20, %v10634_v18  ;;  %v3487_v36 = vpop.f32.mrb[199].mxu0  ;;  %v4160_v15 = vpop.f32.mrb[199].mxu1  ;;  %v11190_v16 = vld [vmem:[#allocation14 + $0x28] sm:$0xff]  ;;  %v11192_v20 = vld [vmem:[#allocation14 + $0x30] sm:$0xff] }
 0x4f6   :  { %v3488_v43 = vadd.f32 %v3487_v36, %v10638_v41  ;;  %v4161_v44 = vadd.f32 %v4160_v15, %v10642_v42  ;;  %13774 = vst [vmem:[#allocation73_spill] sm:$0xff] %v11190_v16  ;;  %13775 = vst [vmem:[#allocation74_spill] sm:$0xff] %v11192_v20  ;;  %v11202_v36 = vld [vmem:[#allocation14 + $0x58] sm:$0xff]  ;;  %v11204_v15 = vld [vmem:[#allocation14 + $0x60] sm:$0xff] }
 0x4f7   :  { %v4499_v8 = vpack.c.bf16 %v3486_v32, %v3482_v27  ;;  %v4501_v7 = vpack.c.bf16 %v4159_v35, %v4155_v31  ;;  %13780 = vst [vmem:[#allocation79_spill] sm:$0xff] %v11202_v36  ;;  %13781 = vst [vmem:[#allocation80_spill] sm:$0xff] %v11204_v15  ;;  %v11208_v27 = vld [vmem:[#allocation14 + $0x70] sm:$0xff]  ;;  %v11210_v31 = vld [vmem:[#allocation14 + $0x78] sm:$0xff] }
 0x4f8   :  { %v4500_v54 = vpack.c.bf16 %v3488_v43, %v3484_v11  ;;  %v4502_v53 = vpack.c.bf16 %v4161_v44, %v4157_v10  ;;  %13783 = vst [vmem:[#allocation82_spill] sm:$0xff] %v11208_v27  ;;  %13784 = vst [vmem:[#allocation83_spill] sm:$0xff] %v11210_v31  ;;  %v11212_v11 = vld [vmem:[#allocation14 + $0x80] sm:$0xff]  ;;  %v11214_v10 = vld [vmem:[#allocation14 + $0x88] sm:$0xff] }
 0x4f9   :  { %4755 = vst [vmem:[#allocation3 + $0x620] sm:$0xff] %v4499_v8  ;;  %4757 = vst [vmem:[#allocation3 + $0x630] sm:$0xff] %v4501_v7  ;;  %v11216_v43 = vld [vmem:[#allocation14 + $0x90] sm:$0xff]  ;;  %v11218_v8 = vld [vmem:[#allocation14 + $0x98] sm:$0xff] }
 0x4fa   :  { %4756 = vst [vmem:[#allocation3 + $0x628] sm:$0xff] %v4500_v54  ;;  %4758 = vst [vmem:[#allocation3 + $0x638] sm:$0xff] %v4502_v53  ;;  %v3491_v32 = vpop.f32.mrb[200].mxu0  ;;  %v4164_v35 = vpop.f32.mrb[200].mxu1  ;;  %v11220_v7 = vld [vmem:[#allocation14 + $0xa0] sm:$0xff]  ;;  %v11224_v54 = vld [vmem:[#allocation14 + $0xb0] sm:$0xff] }
 0x4fb   :  { %13785 = vst [vmem:[#allocation84_spill] sm:$0xff] %v11212_v11  ;;  %13786 = vst [vmem:[#allocation85_spill] sm:$0xff] %v11214_v10  ;;  %v3493_v44 = vpop.f32.mrb[201].mxu0  ;;  %v4166_v15 = vpop.f32.mrb[201].mxu1  ;;  %v11226_v53 = vld [vmem:[#allocation14 + $0xb8] sm:$0xff]  ;;  %v3492_v10 = vadd.f32 %v3491_v32, %v10630_v17  ;;  %v4165_v11 = vadd.f32 %v4164_v35, %v10634_v18 }
 0x4fc   :  { %13787 = vst [vmem:[#allocation86_spill] sm:$0xff] %v11216_v43  ;;  %13788 = vst [vmem:[#allocation87_spill] sm:$0xff] %v11218_v8  ;;  %v3495_v27 = vpop.f32.mrb[202].mxu0  ;;  %v4168_v31 = vpop.f32.mrb[202].mxu1  ;;  %v4167_v4 = vadd.f32 %v4166_v15, %v10642_v42 }
 0x4fd   :  { %13789 = vst [vmem:[#allocation88_spill] sm:$0xff] %v11220_v7  ;;  %13791 = vst [vmem:[#allocation90_spill] sm:$0xff] %v11224_v54  ;;  %v3496_v43 = vadd.f32 %v3495_v27, %v10630_v17  ;;  %v4169_v8 = vadd.f32 %v4168_v31, %v10634_v18  ;;  %v3497_v36 = vpop.f32.mrb[203].mxu0  ;;  %v4170_v7 = vpop.f32.mrb[203].mxu1  ;;  %v11244_v54 = vld [vmem:[#allocation14 + $0xe0] sm:$0xff]  ;;  %v11246_v27 = vld [vmem:[#allocation14 + $0xe8] sm:$0xff] }
 0x4fe   :  { %13792 = vst [vmem:[#allocation91_spill] sm:$0xff] %v11226_v53  ;;  %v3494_v53 = vadd.f32 %v3493_v44, %v10638_v41  ;;  %v3498_v32 = vadd.f32 %v3497_v36, %v10638_v41  ;;  %v4171_v35 = vadd.f32 %v4170_v7, %v10642_v42  ;;  %13797 = vst [vmem:[#allocation96_spill] sm:$0xff] %v11244_v54  ;;  %v11248_v31 = vld [vmem:[#allocation14 + $0xf0] sm:$0xff] }
 0x4ff   :  { %13798 = vst [vmem:[#allocation97_spill] sm:$0xff] %v11246_v27  ;;  %13799 = vst [vmem:[#allocation98_spill] sm:$0xff] %v11248_v31  ;;  %v4503_v3 = vpack.c.bf16 %v3496_v43, %v3492_v10  ;;  %v4505_v2 = vpack.c.bf16 %v4169_v8, %v4165_v11 }
 0x500   :  { %v4504_v1 = vpack.c.bf16 %v3498_v32, %v3494_v53  ;;  %v4506_v5 = vpack.c.bf16 %v4171_v35, %v4167_v4 }
 0x501   :  { %4759 = vst [vmem:[#allocation3 + $0x640] sm:$0xff] %v4503_v3  ;;  %4761 = vst [vmem:[#allocation3 + $0x650] sm:$0xff] %v4505_v2 }
 0x502   :  { %4760 = vst [vmem:[#allocation3 + $0x648] sm:$0xff] %v4504_v1  ;;  %4762 = vst [vmem:[#allocation3 + $0x658] sm:$0xff] %v4506_v5  ;;  %v3501_v15 = vpop.f32.mrb[204].mxu0  ;;  %v4174_v36 = vpop.f32.mrb[204].mxu1 }
 0x503   :  { %v3503_v44 = vpop.f32.mrb[205].mxu0  ;;  %v4176_v7 = vpop.f32.mrb[205].mxu1  ;;  %v3502_v27 = vadd.f32 %v3501_v15, %v10630_v17  ;;  %v4175_v31 = vadd.f32 %v4174_v36, %v10634_v18 }
 0x504   :  { %v3505_v16 = vpop.f32.mrb[206].mxu0  ;;  %v4178_v54 = vpop.f32.mrb[206].mxu1  ;;  %v3504_v2 = vadd.f32 %v3503_v44, %v10638_v41  ;;  %v4177_v1 = vadd.f32 %v4176_v7, %v10642_v42 }
 0x505   :  { %v3506_v11 = vadd.f32 %v3505_v16, %v10630_v17  ;;  %v4179_v10 = vadd.f32 %v4178_v54, %v10634_v18  ;;  %v3507_v43 = vpop.f32.mrb[207].mxu0  ;;  %v4180_v4 = vpop.f32.mrb[207].mxu1 }
 0x506   :  { %v3508_v3 = vadd.f32 %v3507_v43, %v10638_v41  ;;  %v4181_v5 = vadd.f32 %v4180_v4, %v10642_v42 }
 0x507   :  { %v4507_v8 = vpack.c.bf16 %v3506_v11, %v3502_v27  ;;  %v4509_v53 = vpack.c.bf16 %v4179_v10, %v4175_v31 }
 0x508   :  { %v4508_v32 = vpack.c.bf16 %v3508_v3, %v3504_v2  ;;  %v4510_v35 = vpack.c.bf16 %v4181_v5, %v4177_v1 }
 0x509   :  { %4763 = vst [vmem:[#allocation3 + $0x660] sm:$0xff] %v4507_v8  ;;  %4765 = vst [vmem:[#allocation3 + $0x670] sm:$0xff] %v4509_v53 }
 0x50a   :  { %4764 = vst [vmem:[#allocation3 + $0x668] sm:$0xff] %v4508_v32  ;;  %4766 = vst [vmem:[#allocation3 + $0x678] sm:$0xff] %v4510_v35  ;;  %v3511_v16 = vpop.f32.mrb[208].mxu0  ;;  %v4184_v54 = vpop.f32.mrb[208].mxu1 }
 0x50b   :  { %v3513_v15 = vpop.f32.mrb[209].mxu0  ;;  %v4186_v36 = vpop.f32.mrb[209].mxu1  ;;  %v3512_v7 = vadd.f32 %v3511_v16, %v10630_v17  ;;  %v4185_v43 = vadd.f32 %v4184_v54, %v10634_v18 }
 0x50c   :  { %v3515_v0 = vpop.f32.mrb[210].mxu0  ;;  %v4188_v44 = vpop.f32.mrb[210].mxu1  ;;  %v3514_v10 = vadd.f32 %v3513_v15, %v10638_v41  ;;  %v4187_v2 = vadd.f32 %v4186_v36, %v10642_v42 }
 0x50d   :  { %v3516_v4 = vadd.f32 %v3515_v0, %v10630_v17  ;;  %v4189_v27 = vadd.f32 %v4188_v44, %v10634_v18  ;;  %v3517_v31 = vpop.f32.mrb[211].mxu0  ;;  %v4190_v11 = vpop.f32.mrb[211].mxu1 }
 0x50e   :  { %v3518_v1 = vadd.f32 %v3517_v31, %v10638_v41  ;;  %v4191_v3 = vadd.f32 %v4190_v11, %v10642_v42 }
 0x50f   :  { %v4511_v5 = vpack.c.bf16 %v3516_v4, %v3512_v7  ;;  %v4513_v8 = vpack.c.bf16 %v4189_v27, %v4185_v43 }
 0x510   :  { %v4512_v53 = vpack.c.bf16 %v3518_v1, %v3514_v10  ;;  %v4514_v32 = vpack.c.bf16 %v4191_v3, %v4187_v2 }
 0x511   :  { %4767 = vst [vmem:[#allocation3 + $0x680] sm:$0xff] %v4511_v5  ;;  %4769 = vst [vmem:[#allocation3 + $0x690] sm:$0xff] %v4513_v8 }
 0x512   :  { %4768 = vst [vmem:[#allocation3 + $0x688] sm:$0xff] %v4512_v53  ;;  %4770 = vst [vmem:[#allocation3 + $0x698] sm:$0xff] %v4514_v32  ;;  %v3521_v0 = vpop.f32.mrb[212].mxu0  ;;  %v4194_v35 = vpop.f32.mrb[212].mxu1 }
 0x513   :  { %v3523_v16 = vpop.f32.mrb[213].mxu0  ;;  %v4196_v54 = vpop.f32.mrb[213].mxu1  ;;  %v3522_v36 = vadd.f32 %v3521_v0, %v10630_v17  ;;  %v4195_v31 = vadd.f32 %v4194_v35, %v10634_v18 }
 0x514   :  { %v3525_v44 = vpop.f32.mrb[214].mxu0  ;;  %v4198_v15 = vpop.f32.mrb[214].mxu1  ;;  %v3524_v27 = vadd.f32 %v3523_v16, %v10638_v41  ;;  %v4197_v10 = vadd.f32 %v4196_v54, %v10642_v42 }
 0x515   :  { %v3526_v11 = vadd.f32 %v3525_v44, %v10630_v17  ;;  %v4199_v7 = vadd.f32 %v4198_v15, %v10634_v18  ;;  %v3527_v43 = vpop.f32.mrb[215].mxu0  ;;  %v4200_v4 = vpop.f32.mrb[215].mxu1 }
 0x516   :  { %v3528_v2 = vadd.f32 %v3527_v43, %v10638_v41  ;;  %v4201_v1 = vadd.f32 %v4200_v4, %v10642_v42 }
 0x517   :  { %v4515_v3 = vpack.c.bf16 %v3526_v11, %v3522_v36  ;;  %v4517_v5 = vpack.c.bf16 %v4199_v7, %v4195_v31 }
 0x518   :  { %v4516_v8 = vpack.c.bf16 %v3528_v2, %v3524_v27  ;;  %v4518_v53 = vpack.c.bf16 %v4201_v1, %v4197_v10 }
 0x519   :  { %4771 = vst [vmem:[#allocation3 + $0x6a0] sm:$0xff] %v4515_v3  ;;  %4773 = vst [vmem:[#allocation3 + $0x6b0] sm:$0xff] %v4517_v5 }
 0x51a   :  { %4772 = vst [vmem:[#allocation3 + $0x6a8] sm:$0xff] %v4516_v8  ;;  %4774 = vst [vmem:[#allocation3 + $0x6b8] sm:$0xff] %v4518_v53  ;;  %v3531_v32 = vpop.f32.mrb[216].mxu0  ;;  %v4204_v0 = vpop.f32.mrb[216].mxu1 }
 0x51b   :  { %v3533_v35 = vpop.f32.mrb[217].mxu0  ;;  %v4206_v44 = vpop.f32.mrb[217].mxu1  ;;  %v3532_v54 = vadd.f32 %v3531_v32, %v10630_v17  ;;  %v4205_v43 = vadd.f32 %v4204_v0, %v10634_v18 }
 0x51c   :  { %v3535_v15 = vpop.f32.mrb[218].mxu0  ;;  %v4208_v16 = vpop.f32.mrb[218].mxu1  ;;  %v3534_v7 = vadd.f32 %v3533_v35, %v10638_v41  ;;  %v4207_v27 = vadd.f32 %v4206_v44, %v10642_v42 }
 0x51d   :  { %v3536_v4 = vadd.f32 %v3535_v15, %v10630_v17  ;;  %v4209_v36 = vadd.f32 %v4208_v16, %v10634_v18  ;;  %v3537_v31 = vpop.f32.mrb[219].mxu0  ;;  %v4210_v11 = vpop.f32.mrb[219].mxu1 }
 0x51e   :  { %v3538_v10 = vadd.f32 %v3537_v31, %v10638_v41  ;;  %v4211_v2 = vadd.f32 %v4210_v11, %v10642_v42 }
 0x51f   :  { %v4519_v1 = vpack.c.bf16 %v3536_v4, %v3532_v54  ;;  %v4521_v3 = vpack.c.bf16 %v4209_v36, %v4205_v43 }
 0x520   :  { %v4520_v5 = vpack.c.bf16 %v3538_v10, %v3534_v7  ;;  %v4522_v8 = vpack.c.bf16 %v4211_v2, %v4207_v27 }
 0x521   :  { %4775 = vst [vmem:[#allocation3 + $0x6c0] sm:$0xff] %v4519_v1  ;;  %4777 = vst [vmem:[#allocation3 + $0x6d0] sm:$0xff] %v4521_v3 }
 0x522   :  { %4776 = vst [vmem:[#allocation3 + $0x6c8] sm:$0xff] %v4520_v5  ;;  %4778 = vst [vmem:[#allocation3 + $0x6d8] sm:$0xff] %v4522_v8  ;;  %v3541_v53 = vpop.f32.mrb[220].mxu0  ;;  %v4214_v32 = vpop.f32.mrb[220].mxu1 }
 0x523   :  { %v3543_v0 = vpop.f32.mrb[221].mxu0  ;;  %v4216_v15 = vpop.f32.mrb[221].mxu1  ;;  %v3542_v44 = vadd.f32 %v3541_v53, %v10630_v17  ;;  %v4215_v31 = vadd.f32 %v4214_v32, %v10634_v18 }
 0x524   :  { %v3545_v16 = vpop.f32.mrb[222].mxu0  ;;  %v4218_v35 = vpop.f32.mrb[222].mxu1  ;;  %v3544_v36 = vadd.f32 %v3543_v0, %v10638_v41  ;;  %v4217_v7 = vadd.f32 %v4216_v15, %v10642_v42 }
 0x525   :  { %v3546_v11 = vadd.f32 %v3545_v16, %v10630_v17  ;;  %v4219_v54 = vadd.f32 %v4218_v35, %v10634_v18  ;;  %v3547_v43 = vpop.f32.mrb[223].mxu0  ;;  %v4220_v4 = vpop.f32.mrb[223].mxu1 }
 0x526   :  { %v3548_v27 = vadd.f32 %v3547_v43, %v10638_v41  ;;  %v4221_v10 = vadd.f32 %v4220_v4, %v10642_v42 }
 0x527   :  { %v4523_v2 = vpack.c.bf16 %v3546_v11, %v3542_v44  ;;  %v4525_v1 = vpack.c.bf16 %v4219_v54, %v4215_v31 }
 0x528   :  { %v4524_v3 = vpack.c.bf16 %v3548_v27, %v3544_v36  ;;  %v4526_v5 = vpack.c.bf16 %v4221_v10, %v4217_v7 }
 0x529   :  { %4779 = vst [vmem:[#allocation3 + $0x6e0] sm:$0xff] %v4523_v2  ;;  %4781 = vst [vmem:[#allocation3 + $0x6f0] sm:$0xff] %v4525_v1 }
 0x52a   :  { %4780 = vst [vmem:[#allocation3 + $0x6e8] sm:$0xff] %v4524_v3  ;;  %4782 = vst [vmem:[#allocation3 + $0x6f8] sm:$0xff] %v4526_v5  ;;  %v3551_v8 = vpop.f32.mrb[224].mxu0  ;;  %v4224_v53 = vpop.f32.mrb[224].mxu1 }
 0x52b   :  { %v3553_v32 = vpop.f32.mrb[225].mxu0  ;;  %v4226_v16 = vpop.f32.mrb[225].mxu1  ;;  %v3552_v15 = vadd.f32 %v3551_v8, %v10630_v17  ;;  %v4225_v43 = vadd.f32 %v4224_v53, %v10634_v18 }
 0x52c   :  { %v3555_v35 = vpop.f32.mrb[226].mxu0  ;;  %v4228_v0 = vpop.f32.mrb[226].mxu1  ;;  %v3554_v54 = vadd.f32 %v3553_v32, %v10638_v41  ;;  %v4227_v36 = vadd.f32 %v4226_v16, %v10642_v42 }
 0x52d   :  { %v3556_v4 = vadd.f32 %v3555_v35, %v10630_v17  ;;  %v4229_v44 = vadd.f32 %v4228_v0, %v10634_v18  ;;  %v3557_v31 = vpop.f32.mrb[227].mxu0  ;;  %v4230_v11 = vpop.f32.mrb[227].mxu1 }
 0x52e   :  { %v3558_v7 = vadd.f32 %v3557_v31, %v10638_v41  ;;  %v4231_v27 = vadd.f32 %v4230_v11, %v10642_v42 }
 0x52f   :  { %v4527_v10 = vpack.c.bf16 %v3556_v4, %v3552_v15  ;;  %v4529_v2 = vpack.c.bf16 %v4229_v44, %v4225_v43 }
 0x530   :  { %v4528_v1 = vpack.c.bf16 %v3558_v7, %v3554_v54  ;;  %v4530_v3 = vpack.c.bf16 %v4231_v27, %v4227_v36 }
 0x531   :  { %4783 = vst [vmem:[#allocation3 + $0x700] sm:$0xff] %v4527_v10  ;;  %4785 = vst [vmem:[#allocation3 + $0x710] sm:$0xff] %v4529_v2 }
 0x532   :  { %4784 = vst [vmem:[#allocation3 + $0x708] sm:$0xff] %v4528_v1  ;;  %4786 = vst [vmem:[#allocation3 + $0x718] sm:$0xff] %v4530_v3  ;;  %v3561_v5 = vpop.f32.mrb[228].mxu0  ;;  %v4234_v8 = vpop.f32.mrb[228].mxu1 }
 0x533   :  { %v3563_v53 = vpop.f32.mrb[229].mxu0  ;;  %v4236_v35 = vpop.f32.mrb[229].mxu1  ;;  %v3562_v16 = vadd.f32 %v3561_v5, %v10630_v17  ;;  %v4235_v31 = vadd.f32 %v4234_v8, %v10634_v18 }
 0x534   :  { %v3565_v0 = vpop.f32.mrb[230].mxu0  ;;  %v4238_v32 = vpop.f32.mrb[230].mxu1  ;;  %v3564_v44 = vadd.f32 %v3563_v53, %v10638_v41  ;;  %v4237_v54 = vadd.f32 %v4236_v35, %v10642_v42 }
 0x535   :  { %v3566_v11 = vadd.f32 %v3565_v0, %v10630_v17  ;;  %v4239_v15 = vadd.f32 %v4238_v32, %v10634_v18  ;;  %v3567_v43 = vpop.f32.mrb[231].mxu0  ;;  %v4240_v4 = vpop.f32.mrb[231].mxu1 }
 0x536   :  { %v3568_v36 = vadd.f32 %v3567_v43, %v10638_v41  ;;  %v4241_v7 = vadd.f32 %v4240_v4, %v10642_v42 }
 0x537   :  { %v4531_v27 = vpack.c.bf16 %v3566_v11, %v3562_v16  ;;  %v4533_v10 = vpack.c.bf16 %v4239_v15, %v4235_v31 }
 0x538   :  { %v4532_v2 = vpack.c.bf16 %v3568_v36, %v3564_v44  ;;  %v4534_v1 = vpack.c.bf16 %v4241_v7, %v4237_v54 }
 0x539   :  { %4787 = vst [vmem:[#allocation3 + $0x720] sm:$0xff] %v4531_v27  ;;  %4789 = vst [vmem:[#allocation3 + $0x730] sm:$0xff] %v4533_v10 }
 0x53a   :  { %4788 = vst [vmem:[#allocation3 + $0x728] sm:$0xff] %v4532_v2  ;;  %4790 = vst [vmem:[#allocation3 + $0x738] sm:$0xff] %v4534_v1  ;;  %v3571_v3 = vpop.f32.mrb[232].mxu0  ;;  %v4244_v5 = vpop.f32.mrb[232].mxu1 }
 0x53b   :  { %v3573_v8 = vpop.f32.mrb[233].mxu0  ;;  %v4246_v0 = vpop.f32.mrb[233].mxu1  ;;  %v3572_v35 = vadd.f32 %v3571_v3, %v10630_v17  ;;  %v4245_v43 = vadd.f32 %v4244_v5, %v10634_v18 }
 0x53c   :  { %v3575_v32 = vpop.f32.mrb[234].mxu0  ;;  %v4248_v53 = vpop.f32.mrb[234].mxu1  ;;  %v3574_v15 = vadd.f32 %v3573_v8, %v10638_v41  ;;  %v4247_v44 = vadd.f32 %v4246_v0, %v10642_v42 }
 0x53d   :  { %v3576_v4 = vadd.f32 %v3575_v32, %v10630_v17  ;;  %v4249_v16 = vadd.f32 %v4248_v53, %v10634_v18  ;;  %v3577_v31 = vpop.f32.mrb[235].mxu0  ;;  %v4250_v11 = vpop.f32.mrb[235].mxu1 }
 0x53e   :  { %v3578_v54 = vadd.f32 %v3577_v31, %v10638_v41  ;;  %v4251_v36 = vadd.f32 %v4250_v11, %v10642_v42 }
 0x53f   :  { %v4535_v7 = vpack.c.bf16 %v3576_v4, %v3572_v35  ;;  %v4537_v27 = vpack.c.bf16 %v4249_v16, %v4245_v43 }
 0x540   :  { %v4536_v10 = vpack.c.bf16 %v3578_v54, %v3574_v15  ;;  %v4538_v2 = vpack.c.bf16 %v4251_v36, %v4247_v44 }
 0x541   :  { %4791 = vst [vmem:[#allocation3 + $0x740] sm:$0xff] %v4535_v7  ;;  %4793 = vst [vmem:[#allocation3 + $0x750] sm:$0xff] %v4537_v27 }
 0x542   :  { %4792 = vst [vmem:[#allocation3 + $0x748] sm:$0xff] %v4536_v10  ;;  %4794 = vst [vmem:[#allocation3 + $0x758] sm:$0xff] %v4538_v2  ;;  %v3581_v1 = vpop.f32.mrb[236].mxu0  ;;  %v4254_v3 = vpop.f32.mrb[236].mxu1 }
 0x543   :  { %v3583_v5 = vpop.f32.mrb[237].mxu0  ;;  %v4256_v32 = vpop.f32.mrb[237].mxu1  ;;  %v3582_v0 = vadd.f32 %v3581_v1, %v10630_v17  ;;  %v4255_v31 = vadd.f32 %v4254_v3, %v10634_v18 }
 0x544   :  { %v3585_v53 = vpop.f32.mrb[238].mxu0  ;;  %v4258_v8 = vpop.f32.mrb[238].mxu1  ;;  %v3584_v16 = vadd.f32 %v3583_v5, %v10638_v41  ;;  %v4257_v15 = vadd.f32 %v4256_v32, %v10642_v42 }
 0x545   :  { %v3586_v11 = vadd.f32 %v3585_v53, %v10630_v17  ;;  %v4259_v35 = vadd.f32 %v4258_v8, %v10634_v18  ;;  %v3587_v43 = vpop.f32.mrb[239].mxu0  ;;  %v4260_v4 = vpop.f32.mrb[239].mxu1 }
 0x546   :  { %v3588_v44 = vadd.f32 %v3587_v43, %v10638_v41  ;;  %v4261_v54 = vadd.f32 %v4260_v4, %v10642_v42 }
 0x547   :  { %v4539_v36 = vpack.c.bf16 %v3586_v11, %v3582_v0  ;;  %v4541_v7 = vpack.c.bf16 %v4259_v35, %v4255_v31 }
 0x548   :  { %v4540_v27 = vpack.c.bf16 %v3588_v44, %v3584_v16  ;;  %v4542_v10 = vpack.c.bf16 %v4261_v54, %v4257_v15 }
 0x549   :  { %4795 = vst [vmem:[#allocation3 + $0x760] sm:$0xff] %v4539_v36  ;;  %4797 = vst [vmem:[#allocation3 + $0x770] sm:$0xff] %v4541_v7 }
 0x54a   :  { %4796 = vst [vmem:[#allocation3 + $0x768] sm:$0xff] %v4540_v27  ;;  %4798 = vst [vmem:[#allocation3 + $0x778] sm:$0xff] %v4542_v10  ;;  %v3591_v2 = vpop.f32.mrb[240].mxu0  ;;  %v4264_v1 = vpop.f32.mrb[240].mxu1 }
 0x54b   :  { %v3593_v3 = vpop.f32.mrb[241].mxu0  ;;  %v4266_v53 = vpop.f32.mrb[241].mxu1  ;;  %v3592_v32 = vadd.f32 %v3591_v2, %v10630_v17  ;;  %v4265_v43 = vadd.f32 %v4264_v1, %v10634_v18 }
 0x54c   :  { %v3595_v8 = vpop.f32.mrb[242].mxu0  ;;  %v4268_v5 = vpop.f32.mrb[242].mxu1  ;;  %v3594_v35 = vadd.f32 %v3593_v3, %v10638_v41  ;;  %v4267_v16 = vadd.f32 %v4266_v53, %v10642_v42 }
 0x54d   :  { %v3596_v4 = vadd.f32 %v3595_v8, %v10630_v17  ;;  %v4269_v0 = vadd.f32 %v4268_v5, %v10634_v18  ;;  %v3597_v31 = vpop.f32.mrb[243].mxu0  ;;  %v4270_v11 = vpop.f32.mrb[243].mxu1 }
 0x54e   :  { %v3598_v15 = vadd.f32 %v3597_v31, %v10638_v41  ;;  %v4271_v44 = vadd.f32 %v4270_v11, %v10642_v42 }
 0x54f   :  { %v4543_v54 = vpack.c.bf16 %v3596_v4, %v3592_v32  ;;  %v4545_v36 = vpack.c.bf16 %v4269_v0, %v4265_v43 }
 0x550   :  { %v4544_v7 = vpack.c.bf16 %v3598_v15, %v3594_v35  ;;  %v4546_v27 = vpack.c.bf16 %v4271_v44, %v4267_v16 }
 0x551   :  { %4799 = vst [vmem:[#allocation3 + $0x780] sm:$0xff] %v4543_v54  ;;  %4801 = vst [vmem:[#allocation3 + $0x790] sm:$0xff] %v4545_v36 }
 0x552   :  { %4800 = vst [vmem:[#allocation3 + $0x788] sm:$0xff] %v4544_v7  ;;  %4802 = vst [vmem:[#allocation3 + $0x798] sm:$0xff] %v4546_v27  ;;  %v3601_v10 = vpop.f32.mrb[244].mxu0  ;;  %v4274_v2 = vpop.f32.mrb[244].mxu1 }
 0x553   :  { %v3603_v1 = vpop.f32.mrb[245].mxu0  ;;  %v4276_v8 = vpop.f32.mrb[245].mxu1  ;;  %v3602_v53 = vadd.f32 %v3601_v10, %v10630_v17  ;;  %v4275_v31 = vadd.f32 %v4274_v2, %v10634_v18 }
 0x554   :  { %v3605_v5 = vpop.f32.mrb[246].mxu0  ;;  %v4278_v3 = vpop.f32.mrb[246].mxu1  ;;  %v3604_v0 = vadd.f32 %v3603_v1, %v10638_v41  ;;  %v4277_v35 = vadd.f32 %v4276_v8, %v10642_v42 }
 0x555   :  { %v3606_v11 = vadd.f32 %v3605_v5, %v10630_v17  ;;  %v4279_v32 = vadd.f32 %v4278_v3, %v10634_v18  ;;  %v3607_v43 = vpop.f32.mrb[247].mxu0  ;;  %v4280_v4 = vpop.f32.mrb[247].mxu1 }
 0x556   :  { %v3608_v16 = vadd.f32 %v3607_v43, %v10638_v41  ;;  %v4281_v15 = vadd.f32 %v4280_v4, %v10642_v42 }
 0x557   :  { %v4547_v44 = vpack.c.bf16 %v3606_v11, %v3602_v53  ;;  %v4549_v54 = vpack.c.bf16 %v4279_v32, %v4275_v31 }
 0x558   :  { %v4548_v36 = vpack.c.bf16 %v3608_v16, %v3604_v0  ;;  %v4550_v7 = vpack.c.bf16 %v4281_v15, %v4277_v35 }
 0x559   :  { %4803 = vst [vmem:[#allocation3 + $0x7a0] sm:$0xff] %v4547_v44  ;;  %4805 = vst [vmem:[#allocation3 + $0x7b0] sm:$0xff] %v4549_v54 }
 0x55a   :  { %4804 = vst [vmem:[#allocation3 + $0x7a8] sm:$0xff] %v4548_v36  ;;  %4806 = vst [vmem:[#allocation3 + $0x7b8] sm:$0xff] %v4550_v7  ;;  %v3611_v27 = vpop.f32.mrb[248].mxu0  ;;  %v4284_v10 = vpop.f32.mrb[248].mxu1 }
 0x55b   :  { %v3613_v2 = vpop.f32.mrb[249].mxu0  ;;  %v4286_v5 = vpop.f32.mrb[249].mxu1  ;;  %v3612_v8 = vadd.f32 %v3611_v27, %v10630_v17  ;;  %v4285_v43 = vadd.f32 %v4284_v10, %v10634_v18 }
 0x55c   :  { %v3615_v3 = vpop.f32.mrb[250].mxu0  ;;  %v4288_v1 = vpop.f32.mrb[250].mxu1  ;;  %v3614_v32 = vadd.f32 %v3613_v2, %v10638_v41  ;;  %v4287_v0 = vadd.f32 %v4286_v5, %v10642_v42 }
 0x55d   :  { %v3616_v4 = vadd.f32 %v3615_v3, %v10630_v17  ;;  %v4289_v53 = vadd.f32 %v4288_v1, %v10634_v18  ;;  %v3617_v31 = vpop.f32.mrb[251].mxu0  ;;  %v4290_v11 = vpop.f32.mrb[251].mxu1 }
 0x55e   :  { %v3618_v35 = vadd.f32 %v3617_v31, %v10638_v41  ;;  %v4291_v16 = vadd.f32 %v4290_v11, %v10642_v42 }
 0x55f   :  { %v4551_v15 = vpack.c.bf16 %v3616_v4, %v3612_v8  ;;  %v4553_v44 = vpack.c.bf16 %v4289_v53, %v4285_v43 }
 0x560   :  { %v4552_v54 = vpack.c.bf16 %v3618_v35, %v3614_v32  ;;  %v4554_v36 = vpack.c.bf16 %v4291_v16, %v4287_v0 }
 0x561   :  { %4807 = vst [vmem:[#allocation3 + $0x7c0] sm:$0xff] %v4551_v15  ;;  %4809 = vst [vmem:[#allocation3 + $0x7d0] sm:$0xff] %v4553_v44 }
 0x562   :  { %4808 = vst [vmem:[#allocation3 + $0x7c8] sm:$0xff] %v4552_v54  ;;  %4810 = vst [vmem:[#allocation3 + $0x7d8] sm:$0xff] %v4554_v36  ;;  %v3621_v7 = vpop.f32.mrb[252].mxu0  ;;  %v4294_v27 = vpop.f32.mrb[252].mxu1 }
 0x563   :  { %v3623_v10 = vpop.f32.mrb[253].mxu0  ;;  %v4296_v3 = vpop.f32.mrb[253].mxu1  ;;  %v3622_v5 = vadd.f32 %v3621_v7, %v10630_v17  ;;  %v4295_v31 = vadd.f32 %v4294_v27, %v10634_v18 }
 0x564   :  { %v3625_v1 = vpop.f32.mrb[254].mxu0  ;;  %v4298_v2 = vpop.f32.mrb[254].mxu1  ;;  %v3624_v53 = vadd.f32 %v3623_v10, %v10638_v41  ;;  %v4297_v32 = vadd.f32 %v4296_v3, %v10642_v42  ;;  %7259 = sbr.rel (%p7520_p0) target bundleno = 1969 (0x7b1), region = 96 }
 0x565   :  { %v3626_v11 = vadd.f32 %v3625_v1, %v10630_v17  ;;  %v4299_v8 = vadd.f32 %v4298_v2, %v10634_v18  ;;  %v3627_v43 = vpop.f32.mrb[255].mxu0  ;;  %v4300_v4 = vpop.f32.mrb[255].mxu1 }
 0x566   :  { %v3628_v0 = vadd.f32 %v3627_v43, %v10638_v41  ;;  %v4301_v35 = vadd.f32 %v4300_v4, %v10642_v42 }
 0x567   :  { %v4555_v16 = vpack.c.bf16 %v3626_v11, %v3622_v5  ;;  %v4557_v15 = vpack.c.bf16 %v4299_v8, %v4295_v31 }
 0x568   :  { %v4556_v44 = vpack.c.bf16 %v3628_v0, %v3624_v53  ;;  %v4558_v54 = vpack.c.bf16 %v4301_v35, %v4297_v32 }
 0x569   :  { %4811 = vst [vmem:[#allocation3 + $0x7e0] sm:$0xff] %v4555_v16  ;;  %4813 = vst [vmem:[#allocation3 + $0x7f0] sm:$0xff] %v4557_v15 }
 0x56a   :  { %4812 = vst [vmem:[#allocation3 + $0x7e8] sm:$0xff] %v4556_v44  ;;  %4814 = vst [vmem:[#allocation3 + $0x7f8] sm:$0xff] %v4558_v54 }
 0x56b   :  { %v11359_v17 = vmov 0.0   ;;  %v11361_v18 = vmov 0.0   ;;  %v11363_v41 = vmov 0.0   ;;  %v11365_v42 = vmov 0.0   ;;  %s11487_s6 = smov 0  }
 0x56c   :  { %v11367_v36 = vmov 0.0   ;;  %v11369_v7 = vmov 0.0   ;;  %v11371_v27 = vmov 0.0   ;;  %v11373_v10 = vmov 0.0  }
 0x56d   :  { %v11375_v3 = vmov 0.0   ;;  %v11377_v1 = vmov 0.0   ;;  %v11379_v2 = vmov 0.0   ;;  %v11381_v5 = vmov 0.0  }
 0x56e   :  { %v11383_v31 = vmov 0.0   ;;  %v11385_v11 = vmov 0.0   ;;  %v11387_v8 = vmov 0.0   ;;  %v11389_v43 = vmov 0.0  }
 0x56f   :  { %v11391_v4 = vmov 0.0   ;;  %v11393_v53 = vmov 0.0   ;;  %v11395_v32 = vmov 0.0   ;;  %v11397_v0 = vmov 0.0  }
 0x570   :  { %v11399_v35 = vmov 0.0   ;;  %v11401_v16 = vmov 0.0   ;;  %v11403_v15 = vmov 0.0   ;;  %v11405_v44 = vmov 0.0  }
 0x571   :  { %13801 = vst [vmem:[#allocation100_spill] sm:$0xff] %v11401_v16  ;;  %v11407_v54 = vmov 0.0   ;;  %v11409_v6 = vmov 0.0   ;;  %v11411_v9 = vmov 0.0   ;;  %v11413_v20 = vmov 0.0  }
 0x572   :  { %v11415_v14 = vmov 0.0   ;;  %v11417_v12 = vmov 0.0   ;;  %v11419_v26 = vmov 0.0   ;;  %v11421_v13 = vmov 0.0  }
 0x573   :  { %v11423_v63 = vmov 0.0   ;;  %v11425_v25 = vmov 0.0   ;;  %v11427_v58 = vmov 0.0   ;;  %v11429_v24 = vmov 0.0  }
 0x574   :  { %v11431_v47 = vmov 0.0   ;;  %v11433_v55 = vmov 0.0   ;;  %v11435_v57 = vmov 0.0   ;;  %v11437_v59 = vmov 0.0  }
 0x575   :  { %v11439_v62 = vmov 0.0   ;;  %v11441_v40 = vmov 0.0   ;;  %v11443_v61 = vmov 0.0   ;;  %v11445_v39 = vmov 0.0  }
 0x576   :  { %v11447_v34 = vmov 0.0   ;;  %v11449_v38 = vmov 0.0   ;;  %v11451_v19 = vmov 0.0   ;;  %v11453_v37 = vmov 0.0  }
 0x577   :  { %v11455_v29 = vmov 0.0   ;;  %v11457_v33 = vmov 0.0   ;;  %v11459_v28 = vmov 0.0   ;;  %v11461_v30 = vmov 0.0  }
 0x578   :  { %13802 = vst [vmem:[#allocation101_spill] sm:$0xff] %v11459_v28  ;;  %13803 = vst [vmem:[#allocation102_spill] sm:$0xff] %v11461_v30  ;;  %v11463_v21 = vmov 0.0   ;;  %v11465_v23 = vmov 0.0   ;;  %v11467_v52 = vmov 0.0   ;;  %v11469_v22 = vmov 0.0  }
 0x579   :  { %13804 = vst [vmem:[#allocation103_spill] sm:$0xff] %v11463_v21  ;;  %13805 = vst [vmem:[#allocation104_spill] sm:$0xff] %v11465_v23  ;;  %v11471_v50 = vmov 0.0   ;;  %v11473_v51 = vmov 0.0   ;;  %v11475_v45 = vmov 0.0   ;;  %v11477_v48 = vmov 0.0  }
 0x57a   :  { %13806 = vst [vmem:[#allocation105_spill] sm:$0xff] %v11467_v52  ;;  %13807 = vst [vmem:[#allocation106_spill] sm:$0xff] %v11469_v22  ;;  %v11479_v49 = vmov 0.0   ;;  %v11481_v60 = vmov 0.0   ;;  %v11483_v56 = vmov 0.0   ;;  %v11485_v46 = vmov 0.0  }
 0x57b   :  { %13808 = vst [vmem:[#allocation107_spill] sm:$0xff] %v11471_v50  ;;  %13809 = vst [vmem:[#allocation108_spill] sm:$0xff] %v11473_v51 }
 0x57c   :  { %13810 = vst [vmem:[#allocation109_spill] sm:$0xff] %v11475_v45  ;;  %13811 = vst [vmem:[#allocation110_spill] sm:$0xff] %v11477_v48 }
 0x57d   :  { %13812 = vst [vmem:[#allocation111_spill] sm:$0xff] %v11479_v49  ;;  %13813 = vst [vmem:[#allocation112_spill] sm:$0xff] %v11481_v60 }
 0x57e   :  { %13814 = vst [vmem:[#allocation113_spill] sm:$0xff] %v11483_v56  ;;  %13815 = vst [vmem:[#allocation114_spill] sm:$0xff] %v11485_v46 }
 0x57f LB: > { %13831 = vst [vmem:[#allocation115_spill] sm:$0xff] %v9382_v17  ;;  %13832 = vst [vmem:[#allocation116_spill] sm:$0xff] %v9386_v18  ;;  %v13852_v16 = vld [vmem:[#allocation100_spill] sm:$0xff]  ;;  %v13872_v28 = vld [vmem:[#allocation101_spill] sm:$0xff]  ;;  %s7521_s28 = sadd.s32 4294967295, %s13497_s0  ;;  %s7689_s29 = sshll.u32 %s9638_s6, 8  ;;  %s9638_s6 = sphi %s11487_s6, %s14316_s6   ;;  %v9578_v33 = vphi %v11457_v33, %v12913_v33   ;;  %v9574_v29 = vphi %v11455_v29, %v14291_v29   ;;  %v9570_v37 = vphi %v11453_v37, %v14290_v37   ;;  %v9566_v19 = vphi %v11451_v19, %v14289_v19   ;;  %v9562_v38 = vphi %v11449_v38, %v14288_v38   ;;  %v9558_v34 = vphi %v11447_v34, %v14287_v34   ;;  %v9554_v39 = vphi %v11445_v39, %v14286_v39   ;;  %v9550_v61 = vphi %v11443_v61, %v14285_v61   ;;  %v9546_v40 = vphi %v11441_v40, %v14284_v40   ;;  %v9542_v62 = vphi %v11439_v62, %v14283_v62   ;;  %v9538_v59 = vphi %v11437_v59, %v14282_v59   ;;  %v9534_v57 = vphi %v11435_v57, %v14281_v57   ;;  %v9530_v55 = vphi %v11433_v55, %v14280_v55   ;;  %v9526_v47 = vphi %v11431_v47, %v14279_v47   ;;  %v9522_v24 = vphi %v11429_v24, %v14278_v24   ;;  %v9518_v58 = vphi %v11427_v58, %v14277_v58   ;;  %v9514_v25 = vphi %v11425_v25, %v14276_v25   ;;  %v9510_v63 = vphi %v11423_v63, %v14275_v63   ;;  %v9506_v13 = vphi %v11421_v13, %v14274_v13   ;;  %v9502_v26 = vphi %v11419_v26, %v12994_v26   ;;  %v9498_v12 = vphi %v11417_v12, %v14273_v12   ;;  %v9494_v14 = vphi %v11415_v14, %v13062_v14   ;;  %v9490_v20 = vphi %v11413_v20, %v13085_v20   ;;  %v9486_v9 = vphi %v11411_v9, %v14272_v9   ;;  %v9482_v6 = vphi %v11409_v6, %v13152_v6   ;;  %v9478_v54 = vphi %v11407_v54, %v13171_v54   ;;  %v9474_v44 = vphi %v11405_v44, %v14271_v44   ;;  %v9470_v15 = vphi %v11403_v15, %v14270_v15   ;;  %v9462_v35 = vphi %v11399_v35, %v14268_v35   ;;  %v9458_v0 = vphi %v11397_v0, %v7071_v0   ;;  %v9454_v32 = vphi %v11395_v32, %v7072_v32   ;;  %v9450_v53 = vphi %v11393_v53, %v14267_v53   ;;  %v9446_v4 = vphi %v11391_v4, %v14266_v4   ;;  %v9442_v43 = vphi %v11389_v43, %v14265_v43   ;;  %v9438_v8 = vphi %v11387_v8, %v14264_v8   ;;  %v9434_v11 = vphi %v11385_v11, %v14263_v11   ;;  %v9430_v31 = vphi %v11383_v31, %v14262_v31   ;;  %v9426_v5 = vphi %v11381_v5, %v14261_v5   ;;  %v9422_v2 = vphi %v11379_v2, %v13052_v2   ;;  %v9418_v1 = vphi %v11377_v1, %v14260_v1   ;;  %v9414_v3 = vphi %v11375_v3, %v14259_v3   ;;  %v9410_v10 = vphi %v11373_v10, %v14258_v10   ;;  %v9406_v27 = vphi %v11371_v27, %v14257_v27   ;;  %v9402_v7 = vphi %v11369_v7, %v13213_v7   ;;  %v9398_v36 = vphi %v11367_v36, %v14256_v36   ;;  %v9394_v42 = vphi %v11365_v42, %v13247_v42   ;;  %v9390_v41 = vphi %v11363_v41, %v7088_v41   ;;  %v9386_v18 = vphi %v11361_v18, %v14255_v18   ;;  %v9382_v17 = vphi %v11359_v17, %v7090_v17  }
 0x580   : > { %13833 = vst [vmem:[#allocation117_spill] sm:$0xff] %v9390_v41  ;;  %13834 = vst [vmem:[#allocation118_spill] sm:$0xff] %v9394_v42  ;;  %v13874_v30 = vld [vmem:[#allocation102_spill] sm:$0xff]  ;;  %v13876_v21 = vld [vmem:[#allocation103_spill] sm:$0xff]  ;;  %s11885_s4 = ssub.s32 %s7521_s28, %s9638_s6  ;;  %s11989_s30 = scalar_lea.vmem [#allocation2], %s7689_s29 }
 0x581   : > { %13835 = vst [vmem:[#allocation119_spill] sm:$0xff] %v9398_v36  ;;  %13836 = vst [vmem:[#allocation120_spill] sm:$0xff] %v9402_v7  ;;  %v13878_v23 = vld [vmem:[#allocation104_spill] sm:$0xff]  ;;  %v13880_v52 = vld [vmem:[#allocation105_spill] sm:$0xff]  ;;  %s12223_s11 = scalar_lea.vmem [#allocation15], %s7689_s29  ;;  %s7690_s13 = sshll.u32 %s11885_s4, 8 }
 0x582   : > { %13837 = vst [vmem:[#allocation121_spill] sm:$0xff] %v9406_v27  ;;  %13838 = vst [vmem:[#allocation122_spill] sm:$0xff] %v9410_v10  ;;  %v13882_v22 = vld [vmem:[#allocation106_spill] sm:$0xff]  ;;  %v13884_v50 = vld [vmem:[#allocation107_spill] sm:$0xff]  ;;  %s12536_s3 = scalar_lea.vmem [#allocation3], %s7690_s13  ;;  %s12985_s10 = scalar_lea.vmem [#allocation15], %s7690_s13 }
 0x583   : > { %13839 = vst [vmem:[#allocation123_spill] sm:$0xff] %v9414_v3  ;;  %13840 = vst [vmem:[#allocation124_spill] sm:$0xff] %v9418_v1  ;;  %v13886_v51 = vld [vmem:[#allocation108_spill] sm:$0xff]  ;;  %v13888_v45 = vld [vmem:[#allocation109_spill] sm:$0xff]  ;;  %s4882_s14 = sadd.s32 1, %s9638_s6  }
 0x584   : > { %13841 = vst [vmem:[#allocation125_spill] sm:$0xff] %v9422_v2  ;;  %13842 = vst [vmem:[#allocation126_spill] sm:$0xff] %v9426_v5  ;;  %v13890_v48 = vld [vmem:[#allocation110_spill] sm:$0xff]  ;;  %v13892_v49 = vld [vmem:[#allocation111_spill] sm:$0xff]  ;;  %p13287_p1 = scmp.ge.s32.totalorder %s4882_s14, %s13497_s0 }
 0x585   : > { %13843 = vst [vmem:[#allocation127_spill] sm:$0xff] %v9430_v31  ;;  %13844 = vst [vmem:[#allocation128_spill] sm:$0xff] %v9434_v11  ;;  %v13894_v60 = vld [vmem:[#allocation112_spill] sm:$0xff]  ;;  %v13896_v56 = vld [vmem:[#allocation113_spill] sm:$0xff] }
 0x586   : > { %13845 = vst [vmem:[#allocation129_spill] sm:$0xff] %v9438_v8  ;;  %13846 = vst [vmem:[#allocation130_spill] sm:$0xff] %v9442_v43  ;;  %v13898_v46 = vld [vmem:[#allocation114_spill] sm:$0xff]  ;;  %v13902_v18 = vld [vmem:[#allocation36_spill] sm:$0xff] }
 0x587   : > { %13847 = vst [vmem:[#allocation131_spill] sm:$0xff] %v9446_v4  ;;  %13848 = vst [vmem:[#allocation132_spill] sm:$0xff] %v9450_v53  ;;  %v13900_v17 = vld [vmem:[#allocation38_spill] sm:$0xff]  ;;  %v13906_v7 = vld [vmem:[#allocation40_spill] sm:$0xff] }
 0x588   : > { %13849 = vst [vmem:[#allocation133_spill] sm:$0xff] %v9454_v32  ;;  %13850 = vst [vmem:[#allocation134_spill] sm:$0xff] %v9458_v0  ;;  %v7525_v41 = vcombine.high %v13902_v18, %v13900_v17  ;;  %v13904_v36 = vld [vmem:[#allocation42_spill] sm:$0xff]  ;;  %v13908_v10 = vld [vmem:[#allocation39_spill] sm:$0xff] }
 0x589   : > { %13851 = vst [vmem:[#allocation135_spill] sm:$0xff] %v9462_v35  ;;  %13853 = vst [vmem:[#allocation100_spill] sm:$0xff] %v13852_v16  ;;  %v7529_v27 = vcombine.high %v13906_v7, %v13904_v36  ;;  %v13910_v3 = vld [vmem:[#allocation37_spill] sm:$0xff]  ;;  %v13912_v31 = vld [vmem:[#allocation43_spill] sm:$0xff] }
 0x58a   : > { %13854 = vst [vmem:[#allocation136_spill] sm:$0xff] %v9470_v15  ;;  %13855 = vst [vmem:[#allocation137_spill] sm:$0xff] %v9474_v44  ;;  %5218 = vmatprep.subr.bf16.mxu0 %v7525_v41  ;;  %v7527_v1 = vcombine.high %v13910_v3, %v13908_v10  ;;  %v13914_v11 = vld [vmem:[#allocation41_spill] sm:$0xff] }
 0x58b   : > { %13856 = vst [vmem:[#allocation138_spill] sm:$0xff] %v9478_v54  ;;  %13857 = vst [vmem:[#allocation139_spill] sm:$0xff] %v9482_v6 }
 0x58c   : > { %13858 = vst [vmem:[#allocation140_spill] sm:$0xff] %v9486_v9  ;;  %13859 = vst [vmem:[#allocation141_spill] sm:$0xff] %v9490_v20  ;;  %5331 = vmatprep.subr.bf16.mxu1 %v7527_v1  ;;  %v13925_v1 = vld [vmem:[#allocation48_spill] sm:$0xff] }
 0x58d   : > { %13860 = vst [vmem:[#allocation142_spill] sm:$0xff] %v9494_v14  ;;  %13861 = vst [vmem:[#allocation143_spill] sm:$0xff] %v9498_v12 }
 0x58e   : > { %13862 = vst [vmem:[#allocation144_spill] sm:$0xff] %v9502_v26  ;;  %13863 = vst [vmem:[#allocation145_spill] sm:$0xff] %v9506_v13 }
 0x58f   : > { %13864 = vst [vmem:[#allocation146_spill] sm:$0xff] %v9510_v63  ;;  %13865 = vst [vmem:[#allocation147_spill] sm:$0xff] %v9514_v25  ;;  %v14062_v25 = vld [vmem:[#allocation23_spill] sm:$0xff] }
 0x590   : > { %13866 = vst [vmem:[#allocation148_spill] sm:$0xff] %v9518_v58  ;;  %13867 = vst [vmem:[#allocation149_spill] sm:$0xff] %v9522_v24 }
 0x591   : > { %13868 = vst [vmem:[#allocation150_spill] sm:$0xff] %v9526_v47  ;;  %13869 = vst [vmem:[#allocation151_spill] sm:$0xff] %v9530_v55 }
 0x592   : > { %13870 = vst [vmem:[#allocation152_spill] sm:$0xff] %v9574_v29  ;;  %13871 = vst [vmem:[#allocation153_spill] sm:$0xff] %v9578_v33 }
 0x593   : > { %13873 = vst [vmem:[#allocation101_spill] sm:$0xff] %v13872_v28  ;;  %13875 = vst [vmem:[#allocation102_spill] sm:$0xff] %v13874_v30 }
 0x594   : > { %13877 = vst [vmem:[#allocation103_spill] sm:$0xff] %v13876_v21  ;;  %13879 = vst [vmem:[#allocation104_spill] sm:$0xff] %v13878_v23 }
 0x595   : > { %13881 = vst [vmem:[#allocation105_spill] sm:$0xff] %v13880_v52  ;;  %13883 = vst [vmem:[#allocation106_spill] sm:$0xff] %v13882_v22 }
 0x596   : > { %13885 = vst [vmem:[#allocation107_spill] sm:$0xff] %v13884_v50  ;;  %13887 = vst [vmem:[#allocation108_spill] sm:$0xff] %v13886_v51  ;;  %v13901_v51 = vmov %v13900_v17  ;;  %v13903_v50 = vmov %v13902_v18  ;;  %v7531_v17 = vcombine.high %v13914_v11, %v13912_v31  ;;  %v13916_v18 = vld [vmem:[#allocation46_spill] sm:$0xff] }
 0x597   : > { %13889 = vst [vmem:[#allocation109_spill] sm:$0xff] %v13888_v45  ;;  %13891 = vst [vmem:[#allocation110_spill] sm:$0xff] %v13890_v48  ;;  %v7524_v42 = vcombine.low %v13903_v50, %v13901_v51  ;;  %v13905_v48 = vmov %v13904_v36  ;;  %v13907_v45 = vmov %v13906_v7  ;;  %v13917_v22 = vmov %v13916_v18  ;;  %v13918_v50 = vld [vmem:[#allocation44_spill] sm:$0xff]  ;;  %v13919_v36 = vld [vmem:[#allocation47_spill] sm:$0xff] }
 0x598   : > { %13893 = vst [vmem:[#allocation111_spill] sm:$0xff] %v13892_v49  ;;  %13895 = vst [vmem:[#allocation112_spill] sm:$0xff] %v13894_v60  ;;  %v13909_v49 = vmov %v13908_v10  ;;  %v13911_v60 = vmov %v13910_v3  ;;  %v7528_v5 = vcombine.low %v13907_v45, %v13905_v48  ;;  %v7533_v51 = vcombine.high %v13918_v50, %v13916_v18  ;;  %v13921_v7 = vld [vmem:[#allocation45_spill] sm:$0xff] }
 0x599   : > { %13897 = vst [vmem:[#allocation113_spill] sm:$0xff] %v13896_v56  ;;  %13899 = vst [vmem:[#allocation114_spill] sm:$0xff] %v13898_v46  ;;  %v7526_v2 = vcombine.low %v13911_v60, %v13909_v49  ;;  %5219 = vmatpush1.bf16.msra.mxu0 %v7524_v42  ;;  %v13913_v46 = vmov %v13912_v31  ;;  %v13915_v56 = vmov %v13914_v11  ;;  %v13920_v52 = vmov %v13919_v36  ;;  %v13927_v11 = vld [vmem:[#allocation51_spill] sm:$0xff] }
 0x59a   : > { %5220 = vmatprep.subr.bf16.mxu0 %v7529_v27  ;;  %v7530_v41 = vcombine.low %v13915_v56, %v13913_v46  ;;  %v13922_v23 = vmov %v13921_v7  ;;  %v7535_v10 = vcombine.high %v13921_v7, %v13919_v36  ;;  %v13621_v42 = vmov 0   ;;  %v13923_v27 = vld [vmem:[#allocation50_spill] sm:$0xff]  ;;  %v13932_v36 = vld [vmem:[#allocation52_spill] sm:$0xff] }
 0x59b   : > { %5332 = vmatpush1.bf16.msra.mxu1 %v7526_v2  ;;  %5250 = vmatprep.mubr.bf16.mxu0 %v13621_v42  ;;  %v7532_v3 = vcombine.low %v13918_v50, %v13917_v22  ;;  %v13924_v45 = vmov %v13923_v27  ;;  %v13926_v48 = vmov %v13925_v1  ;;  %v7537_v2 = vcombine.high %v13925_v1, %v13923_v27  ;;  %v13934_v27 = vld [vmem:[#allocation55_spill] sm:$0xff]  ;;  %v13936_v1 = vld [vmem:[#allocation53_spill] sm:$0xff] }
 0x59c   : > { %5333 = vmatprep.subr.bf16.mxu1 %v7531_v17  ;;  %5363 = vmatprep.mubr.bf16.mxu1 %v13621_v42  ;;  %v7534_v31 = vcombine.low %v13922_v23, %v13920_v52  ;;  %v13928_v46 = vmov %v13927_v11  ;;  %v7536_v18 = vcombine.low %v13926_v48, %v13924_v45  ;;  %v13933_v22 = vmov %v13932_v36 }
 0x59d   : > { %5221 = vmatpush1.bf16.msra.mxu0 %v7528_v5  ;;  %8458 = vset.pattern.permute.xlu0 %v13621_v42  ;;  %v13929_v5 = vld [vmem:[#allocation49_spill] sm:$0xff]  ;;  %v13935_v23 = vmov %v13934_v27  ;;  %v13937_v50 = vmov %v13936_v1 }
 0x59e   : > { %5222 = vmatprep.subr.bf16.mxu0 %v7533_v51  ;;  %8459 = vset.pattern.permute.xlu1 %v13621_v42  ;;  %v13930_v49 = vmov %v13929_v5  ;;  %v7539_v17 = vcombine.high %v13929_v5, %v13927_v11  ;;  %v13931_v51 = vld [vmem:[#allocation54_spill] sm:$0xff]  ;;  %v7543_v42 = vcombine.high %v13936_v1, %v13934_v27  ;;  %v13940_v11 = vld [vmem:[#allocation56_spill] sm:$0xff] }
 0x59f   : > { %5334 = vmatpush1.bf16.msra.mxu1 %v7530_v41  ;;  %v7541_v7 = vcombine.high %v13932_v36, %v13931_v51  ;;  %v7538_v41 = vcombine.low %v13930_v49, %v13928_v46  ;;  %v13941_v56 = vmov %v13940_v11  ;;  %v13944_v36 = vld [vmem:[#allocation57_spill] sm:$0xff]  ;;  %v13948_v27 = vld [vmem:[#allocation60_spill] sm:$0xff] }
 0x5a0   : > { %5335 = vmatprep.subr.bf16.mxu1 %v7535_v10  ;;  %v7540_v10 = vcombine.low %v13933_v22, %v13931_v51  ;;  %v13945_v48 = vmov %v13944_v36  ;;  %v13949_v60 = vmov %v13948_v27 }
 0x5a1   : > { %5223 = vmatpush1.bf16.msra.mxu0 %v7532_v3  ;;  %v13938_v3 = vld [vmem:[#allocation58_spill] sm:$0xff] }
 0x5a2   : > { %5224 = vmatprep.subr.bf16.mxu0 %v7537_v2  ;;  %v13939_v52 = vmov %v13938_v3  ;;  %v7545_v5 = vcombine.high %v13940_v11, %v13938_v3  ;;  %v7542_v2 = vcombine.low %v13937_v50, %v13935_v23  ;;  %v13952_v3 = vld [vmem:[#allocation61_spill] sm:$0xff] }
 0x5a3   : > { %5336 = vmatpush1.bf16.msra.mxu1 %v7534_v31  ;;  %v13942_v31 = vld [vmem:[#allocation59_spill] sm:$0xff]  ;;  %v13953_v51 = vmov %v13952_v3 }
 0x5a4   : > { %5337 = vmatprep.subr.bf16.mxu1 %v7539_v17  ;;  %v13943_v45 = vmov %v13942_v31  ;;  %v7547_v46 = vcombine.high %v13944_v36, %v13942_v31  ;;  %v7544_v17 = vcombine.low %v13941_v56, %v13939_v52  ;;  %v13956_v31 = vld [vmem:[#allocation64_spill] sm:$0xff] }
 0x5a5   : > { %5225 = vmatpush1.bf16.msra.mxu0 %v7536_v18  ;;  %v13946_v18 = vld [vmem:[#allocation62_spill] sm:$0xff]  ;;  %v13957_v50 = vmov %v13956_v31 }
 0x5a6   : > { %5226 = vmatprep.subr.bf16.mxu0 %v7541_v7  ;;  %v13947_v49 = vmov %v13946_v18  ;;  %v7549_v1 = vcombine.high %v13948_v27, %v13946_v18  ;;  %v7546_v7 = vcombine.low %v13945_v48, %v13943_v45  ;;  %v13960_v18 = vld [vmem:[#allocation65_spill] sm:$0xff] }
 0x5a7   : > { %5338 = vmatpush1.bf16.msra.mxu1 %v7538_v41  ;;  %v13950_v41 = vld [vmem:[#allocation63_spill] sm:$0xff]  ;;  %v13961_v56 = vmov %v13960_v18 }
 0x5a8   : > { %5339 = vmatprep.subr.bf16.mxu1 %v7543_v42  ;;  %v13951_v22 = vmov %v13950_v41  ;;  %v7551_v11 = vcombine.high %v13952_v3, %v13950_v41  ;;  %v7548_v42 = vcombine.low %v13949_v60, %v13947_v49  ;;  %v13964_v41 = vld [vmem:[#allocation68_spill] sm:$0xff]  ;;  %v13966_v3 = vld [vmem:[#allocation114_spill] sm:$0xff]  ;;  %v13970_v49 = vld [vmem:[#allocation69_spill] sm:$0xff]  ;;  %v11767_v60 = vstv %s9638_s6  ;;  %s14316_s6 = smov %s4882_s14 }
 0x5a9   : > { %5227 = vmatpush1.bf16.msra.mxu0 %v7540_v10  ;;  %v13954_v10 = vld [vmem:[#allocation66_spill] sm:$0xff]  ;;  %v13965_v48 = vmov %v13964_v41  ;;  %v14015_v63 = vmov %v11767_v60 }
 0x5aa   : > { %5228 = vmatprep.subr.bf16.mxu0 %v7545_v5  ;;  %v13955_v23 = vmov %v13954_v10  ;;  %v7553_v36 = vcombine.high %v13956_v31, %v13954_v10  ;;  %v7550_v5 = vcombine.low %v13953_v51, %v13951_v22  ;;  %v13967_v10 = vld [vmem:[#allocation113_spill] sm:$0xff] }
 0x5ab   : > { %5340 = vmatpush1.bf16.msra.mxu1 %v7542_v2  ;;  %v13958_v2 = vld [vmem:[#allocation67_spill] sm:$0xff]  ;;  %v5050_v31 = vpack.c.bf16 %v13967_v10, %v13966_v3  ;;  %13979 = vst [vmem:[#allocation113_spill] sm:$0xff] %v11767_v60 }
 0x5ac   : > { %5341 = vmatprep.subr.bf16.mxu1 %v7547_v46  ;;  %v13959_v52 = vmov %v13958_v2  ;;  %v7555_v27 = vcombine.high %v13960_v18, %v13958_v2  ;;  %v7552_v46 = vcombine.low %v13957_v50, %v13955_v23  ;;  %v13973_v18 = vld [vmem:[#allocation72_spill] sm:$0xff] }
 0x5ad   : > { %5229 = vmatpush1.bf16.msra.mxu0 %v7544_v17  ;;  %v13962_v17 = vld [vmem:[#allocation70_spill] sm:$0xff]  ;;  %v13974_v50 = vmov %v13973_v18 }
 0x5ae   : > { %5230 = vmatprep.subr.bf16.mxu0 %v7549_v1  ;;  %v13963_v45 = vmov %v13962_v17  ;;  %v7559_v1 = vcombine.high %v13964_v41, %v13962_v17  ;;  %v13975_v17 = vld [vmem:[#allocation75_spill] sm:$0xff]  ;;  %v13977_v41 = vld [vmem:[#allocation73_spill] sm:$0xff] }
 0x5af   : > { %5342 = vmatpush1.bf16.msra.mxu1 %v7546_v7  ;;  %v7554_v7 = vcombine.low %v13961_v56, %v13959_v52  ;;  %v13976_v52 = vmov %v13975_v17  ;;  %v13978_v56 = vmov %v13977_v41 }
 0x5b0   : > { %5343 = vmatprep.subr.bf16.mxu1 %v7551_v11  ;;  %v13968_v11 = vld [vmem:[#allocation71_spill] sm:$0xff] }
 0x5b1   : > { %5231 = vmatpush1.bf16.msra.mxu0 %v7548_v42  ;;  %v13969_v22 = vmov %v13968_v11  ;;  %v7561_v2 = vcombine.high %v13970_v49, %v13968_v11  ;;  %v7558_v42 = vcombine.low %v13965_v48, %v13963_v45  ;;  %v13981_v11 = vld [vmem:[#allocation20_spill] sm:$0xff] }
 0x5b2   : > { %5232 = vmatprep.subr.bf16.mxu0 %v7553_v36  ;;  %v13971_v36 = vld [vmem:[#allocation74_spill] sm:$0xff]  ;;  %vm6066_vm0 = vcmp.lt.s32.totalorder %v11767_v60, %v13981_v11 }
 0x5b3   : > { %5344 = vmatpush1.bf16.msra.mxu1 %v7550_v5  ;;  %v13972_v23 = vmov %v13971_v36  ;;  %v7563_v51 = vcombine.high %v13973_v18, %v13971_v36  ;;  %v7560_v5 = vcombine.low %v13970_v49, %v13969_v22  ;;  %v13984_v36 = vld [vmem:[#allocation76_spill] sm:$0xff] }
 0x5b4   : > { %5345 = vmatprep.subr.bf16.mxu1 %v7555_v27  ;;  %v7565_v27 = vcombine.high %v13977_v41, %v13975_v17  ;;  %v13985_v22 = vmov %v13984_v36  ;;  %v13986_v17 = vld [vmem:[#allocation22_spill] sm:$0xff]  ;;  %v13987_v41 = vld [vmem:[#allocation112_spill] sm:$0xff] }
 0x5b5   : > { %5233 = vmatpush1.bf16.msra.mxu0 %v7552_v46  ;;  %v13980_v46 = vmov 0   ;;  %vm6068_vm1 = vcmp.lt.s32.totalorder %v11767_v60, %v13986_v17  ;;  %v13995_v17 = vld [vmem:[#allocation21_spill] sm:$0xff] }
 0x5b6   : > { %5775 = vmatprep.subr.bf16.mxu0 %v7559_v1  ;;  %v7562_v1 = vcombine.low %v13974_v50, %v13972_v23  ;;  %v13988_v23 = vld [vmem:[#allocation111_spill] sm:$0xff]  ;;  %vm6067_vm2 = vcmp.lt.s32.totalorder %v11767_v60, %v13995_v17  ;;  %v14004_v17 = vld [vmem:[#allocation84_spill] sm:$0xff] }
 0x5b7   : > { %5346 = vmatpush1.bf16.msra.mxu1 %v7554_v7  ;;  %v13982_v7 = vld [vmem:[#allocation78_spill] sm:$0xff]  ;;  %v5051_v50 = vpack.c.bf16 %v13988_v23, %v13987_v41 }
 0x5b8   : > { %5251 = vmatmul.mubr.bf16.vlgmr.msra.gmra.mrb[0].mxu0 %v5050_v31  ;;  %5888 = vmatprep.subr.bf16.mxu1 %v7561_v2  ;;  %v13983_v48 = vmov %v13982_v7  ;;  %v7567_v18 = vcombine.high %v13984_v36, %v13982_v7  ;;  %v6483_v2 = vsel %vm6066_vm0, 1, %v13980_v46  ;;  %v6485_v7 = vsel %vm6068_vm1, 1, %v13980_v46  ;;  %v13992_v36 = vld [vmem:[#allocation82_spill] sm:$0xff] }
 0x5b9   : > { %5776 = vmatpush1.bf16.msra.mxu0 %v7558_v42  ;;  %5260 = vmatprep.mubr.bf16.mxu0 %v13980_v46  ;;  %v7564_v42 = vcombine.low %v13978_v56, %v13976_v52  ;;  %v13993_v52 = vmov %v13992_v36  ;;  %v13994_v56 = vld [vmem:[#allocation80_spill] sm:$0xff] }
 0x5ba   : > { %5777 = vmatprep.subr.bf16.mxu0 %v7563_v51  ;;  %5364 = vmatmul.mubr.bf16.vlgmr.msra.gmra.mrb[0].mxu1 %v5050_v31  ;;  %v13989_v51 = vld [vmem:[#allocation79_spill] sm:$0xff]  ;;  %v13990_v31 = vld [vmem:[#allocation77_spill] sm:$0xff]  ;;  %v7571_v8 = vcombine.high %v13994_v56, %v13992_v36 }
 0x5bb   : > { %5889 = vmatpush1.bf16.msra.mxu1 %v7560_v5  ;;  %5373 = vmatprep.mubr.bf16.mxu1 %v13980_v46  ;;  %v13991_v45 = vmov %v13990_v31  ;;  %v7569_v11 = vcombine.high %v13990_v31, %v13989_v51  ;;  %v7566_v5 = vcombine.low %v13985_v22, %v13983_v48  ;;  %v13996_v31 = vld [vmem:[#allocation23_spill] sm:$0xff] }
 0x5bc   : > { %5890 = vmatprep.subr.bf16.mxu1 %v7565_v27  ;;  %6500 = vperm.xlu0 %8458, %v6483_v2   ;;  %v7568_v27 = vcombine.low %v13991_v45, %v13989_v51  ;;  %vm6069_vm3 = vcmp.lt.s32.totalorder %v11767_v60, %v13996_v31  ;;  %v13999_v2 = vld [vmem:[#allocation81_spill] sm:$0xff]  ;;  %v14005_v45 = vmov %v14004_v17 }
 0x5bd   : > { %5778 = vmatpush1.bf16.msra.mxu0 %v7562_v1  ;;  %6506 = vperm.xlu1 %8459, %v6485_v7   ;;  %v13997_v1 = vld [vmem:[#allocation83_spill] sm:$0xff]  ;;  %v14000_v21 = vmov %v13999_v2  ;;  %v14001_v7 = vmov 0  }
 0x5be   : > { %5779 = vmatprep.subr.bf16.mxu0 %v7567_v18  ;;  %v13998_v46 = vmov %v13997_v1  ;;  %v7573_v22 = vcombine.high %v13999_v2, %v13997_v1  ;;  %v7570_v18 = vcombine.low %v13994_v56, %v13993_v52  ;;  %v6484_v36 = vsel %vm6067_vm2, 1, %v14001_v7  ;;  %v14006_v1 = vld [vmem:[#allocation110_spill] sm:$0xff]  ;;  %v14008_v52 = vld [vmem:[#allocation87_spill] sm:$0xff]  ;;  %v14009_v56 = vld [vmem:[#allocation85_spill] sm:$0xff] }
 0x5bf   : > { %5891 = vmatpush1.bf16.msra.mxu1 %v7564_v42  ;;  %v14002_v42 = vld [vmem:[#allocation86_spill] sm:$0xff]  ;;  %v6486_v31 = vsel %vm6069_vm3, 1, %v14001_v7  ;;  %v7577_v43 = vcombine.high %v14009_v56, %v14008_v52 }
 0x5c0   : > { %5261 = vmatmul.mubr.bf16.gmra.mrb[4].mxu0 %v5051_v50  ;;  %5892 = vmatprep.subr.bf16.mxu1 %v7569_v11  ;;  %v14003_v48 = vmov %v14002_v42  ;;  %v7575_v51 = vcombine.high %v14004_v17, %v14002_v42  ;;  %v7572_v11 = vcombine.low %v14000_v21, %v13998_v46  ;;  %v14012_v42 = vld [vmem:[#allocation88_spill] sm:$0xff]  ;;  %v14016_v21 = vld [vmem:[#allocation25_spill] sm:$0xff] }
 0x5c1   : > { %5270 = vmatprep.mubr.bf16.mxu0 %v14001_v7  ;;  %5780 = vmatpush1.bf16.msra.mxu0 %v7566_v5  ;;  %v14007_v5 = vld [vmem:[#allocation109_spill] sm:$0xff]  ;;  %v14013_v49 = vmov %v14012_v42  ;;  %v14014_v17 = vld [vmem:[#allocation24_spill] sm:$0xff]  ;;  %vm6071_vm5 = vcmp.lt.s32.totalorder %v14015_v63, %v14016_v21 }
 0x5c2   : > { %5374 = vmatmul.mubr.bf16.gmra.mrb[4].mxu1 %v5051_v50  ;;  %5781 = vmatprep.subr.bf16.mxu0 %v7571_v8  ;;  %v5052_v2 = vpack.c.bf16 %v14007_v5, %v14006_v1  ;;  %v7574_v50 = vcombine.low %v14005_v45, %v14003_v48  ;;  %v14010_v8 = vld [vmem:[#allocation90_spill] sm:$0xff]  ;;  %vm6070_vm4 = vcmp.lt.s32.totalorder %v14015_v63, %v14014_v17  ;;  %v6488_v17 = vsel %vm6071_vm5, 1, %v14001_v7 }
 0x5c3   : > { %5383 = vmatprep.mubr.bf16.mxu1 %v14001_v7  ;;  %5893 = vmatpush1.bf16.msra.mxu1 %v7568_v27  ;;  %v14011_v23 = vmov %v14010_v8  ;;  %v7579_v27 = vcombine.high %v14012_v42, %v14010_v8  ;;  %v14023_v8 = vld [vmem:[#allocation92_spill] sm:$0xff] }
 0x5c4   : > { %5894 = vmatprep.subr.bf16.mxu1 %v7573_v22  ;;  %6503 = vperm.xlu0 %8458, %v6484_v36   ;;  %v7576_v22 = vcombine.low %v14009_v56, %v14008_v52  ;;  %v14019_v36 = vld [vmem:[#allocation89_spill] sm:$0xff]  ;;  %v14024_v52 = vmov %v14023_v8 }
 0x5c5   : > { %5782 = vmatpush1.bf16.msra.mxu0 %v7570_v18  ;;  %6509 = vperm.xlu1 %8459, %v6486_v31   ;;  %v14017_v18 = vld [vmem:[#allocation91_spill] sm:$0xff]  ;;  %v14020_v30 = vmov %v14019_v36  ;;  %v6487_v31 = vsel %vm6070_vm4, 1, %v14001_v7 }
 0x5c6   : > { %5783 = vmatprep.subr.bf16.mxu0 %v7575_v51  ;;  %v14018_v46 = vmov %v14017_v18  ;;  %v7581_v45 = vcombine.high %v14019_v36, %v14017_v18  ;;  %v7578_v51 = vcombine.low %v14013_v49, %v14011_v23  ;;  %v14025_v18 = vld [vmem:[#allocation108_spill] sm:$0xff]  ;;  %v14027_v23 = vld [vmem:[#allocation95_spill] sm:$0xff]  ;;  %v14028_v49 = vld [vmem:[#allocation93_spill] sm:$0xff] }
 0x5c7   : > { %5895 = vmatpush1.bf16.msra.mxu1 %v7572_v11  ;;  %v14021_v11 = vld [vmem:[#allocation94_spill] sm:$0xff]  ;;  %v7585_v56 = vcombine.high %v14028_v49, %v14027_v23 }
 0x5c8   : > { %5271 = vmatmul.mubr.bf16.gmra.mrb[8].mxu0 %v5052_v2  ;;  %5896 = vmatprep.subr.bf16.mxu1 %v7577_v43  ;;  %v14022_v48 = vmov %v14021_v11  ;;  %v7583_v42 = vcombine.high %v14023_v8, %v14021_v11  ;;  %v7580_v43 = vcombine.low %v14020_v30, %v14018_v46  ;;  %v14031_v11 = vld [vmem:[#allocation96_spill] sm:$0xff]  ;;  %v14033_v8 = vld [vmem:[#allocation26_spill] sm:$0xff]  ;;  %v14035_v30 = vld [vmem:[#allocation27_spill] sm:$0xff] }
 0x5c9   : > { %5280 = vmatprep.mubr.bf16.mxu0 %v14001_v7  ;;  %5784 = vmatpush1.bf16.msra.mxu0 %v7574_v50  ;;  %v14026_v50 = vld [vmem:[#allocation107_spill] sm:$0xff]  ;;  %v14032_v60 = vmov %v14031_v11  ;;  %v14034_v28 = vmov %v14033_v8  ;;  %vm6072_vm6 = vcmp.lt.s32.totalorder %v14015_v63, %v14033_v8  ;;  %vm6073_vm7 = vcmp.lt.s32.totalorder %v14015_v63, %v14035_v30  ;;  %v14044_v8 = vld [vmem:[#allocation105_spill] sm:$0xff] }
 0x5ca   : > { %5384 = vmatmul.mubr.bf16.gmra.mrb[8].mxu1 %v5052_v2  ;;  %5785 = vmatprep.subr.bf16.mxu0 %v7579_v27  ;;  %v5053_v36 = vpack.c.bf16 %v14026_v50, %v14025_v18  ;;  %v7582_v2 = vcombine.low %v14024_v52, %v14022_v48  ;;  %v14029_v27 = vld [vmem:[#allocation98_spill] sm:$0xff]  ;;  %v12161_v50 = vld [vmem:[%s11989_s30 + $0x78] sm:$0xff] }
 0x5cb   : > { %5393 = vmatprep.mubr.bf16.mxu1 %v14001_v7  ;;  %5897 = vmatpush1.bf16.msra.mxu1 %v7576_v22  ;;  %v14030_v21 = vmov %v14029_v27  ;;  %v7587_v22 = vcombine.high %v14031_v11, %v14029_v27  ;;  %v14039_v27 = vld [vmem:[#allocation28_spill] sm:$0xff]  ;;  %v14041_v11 = vld [vmem:[#allocation29_spill] sm:$0xff] }
 0x5cc   : > { %5898 = vmatprep.subr.bf16.mxu1 %v7581_v45  ;;  %6512 = vperm.xlu0 %8458, %v6487_v31   ;;  %v7584_v45 = vcombine.low %v14028_v49, %v14027_v23  ;;  %v14037_v31 = vld [vmem:[#allocation97_spill] sm:$0xff]  ;;  %v14040_v23 = vmov %v14039_v27  ;;  %vm6074_vm8 = vcmp.lt.s32.totalorder %v14015_v63, %v14039_v27  ;;  %v14042_v49 = vmov %v14041_v11  ;;  %v14045_v27 = vld [vmem:[#allocation30_spill] sm:$0xff] }
 0x5cd   : > { %5786 = vmatpush1.bf16.msra.mxu0 %v7578_v51  ;;  %6515 = vperm.xlu1 %8459, %v6488_v17   ;;  %v14036_v51 = vld [vmem:[#allocation99_spill] sm:$0xff]  ;;  %v14038_v46 = vmov %v14037_v31  ;;  %v6489_v17 = vsel %vm6072_vm6, 1, %v14001_v7  ;;  %vm6075_vm9 = vcmp.lt.s32.totalorder %v14015_v63, %v14041_v11  ;;  %vm6076_vm10 = vcmp.lt.s32.totalorder %v14015_v63, %v14045_v27  ;;  %v14052_v11 = vld [vmem:[#allocation104_spill] sm:$0xff] }
 0x5ce   : > { %5787 = vmatprep.subr.bf16.mxu0 %v7583_v42  ;;  %v7589_v48 = vcombine.high %v14037_v31, %v14036_v51  ;;  %v7586_v42 = vcombine.low %v14032_v60, %v14030_v21  ;;  %v14046_v21 = vmov %v14045_v27  ;;  %v11894_v60 = vstv %s11885_s4 }
 0x5cf   : > { %5899 = vmatpush1.bf16.msra.mxu1 %v7580_v43  ;;  %v6490_v43 = vsel %vm6073_vm7, 1, %v14001_v7  ;;  %vm6086_vm3 = vcmp.lt.s32.totalorder %v11894_v60, %v14062_v25  ;;  %v5057_v25 = vpack.c.bf16 %v9574_v29, %v9578_v33  ;;  %vm6089_vm6 = vcmp.lt.s32.totalorder %v11894_v60, %v14034_v28 }
 0x5d0   : > { %5281 = vmatmul.mubr.bf16.gmra.mrb[12].mxu0 %v5053_v36  ;;  %5900 = vmatprep.subr.bf16.mxu1 %v7585_v56  ;;  %v7588_v56 = vcombine.low %v14038_v46, %v14036_v51  ;;  %v14054_v51 = vld [vmem:[#allocation34_spill] sm:$0xff]  ;;  %vm6090_vm7 = vcmp.lt.s32.totalorder %v11894_v60, %v14035_v30 }
 0x5d1   : > { %5290 = vmatprep.mubr.bf16.mxu0 %v14001_v7  ;;  %5788 = vmatpush1.bf16.msra.mxu0 %v7582_v2  ;;  %v14043_v2 = vld [vmem:[#allocation106_spill] sm:$0xff]  ;;  %vm6080_vm14 = vcmp.lt.s32.totalorder %v14015_v63, %v14054_v51 }
 0x5d2   : > { %5394 = vmatmul.mubr.bf16.gmra.mrb[12].mxu1 %v5053_v36  ;;  %5789 = vmatprep.subr.bf16.mxu0 %v7587_v22  ;;  %v5054_v31 = vpack.c.bf16 %v14044_v8, %v14043_v2  ;;  %v6491_v36 = vsel %vm6074_vm8, 1, %v14001_v7  ;;  %v6492_v22 = vsel %vm6075_vm9, 1, %v14001_v7  ;;  %vm6091_vm8 = vcmp.lt.s32.totalorder %v11894_v60, %v14040_v23  ;;  %v4958_v23 = vld [vmem:[%s11989_s30 + $0x20] sm:$0xff] }
 0x5d3   : > { %5403 = vmatprep.mubr.bf16.mxu1 %v14001_v7  ;;  %5901 = vmatpush1.bf16.msra.mxu1 %v7584_v45  ;;  %v14047_v45 = vld [vmem:[#allocation31_spill] sm:$0xff]  ;;  %vm6092_vm9 = vcmp.lt.s32.totalorder %v11894_v60, %v14042_v49 }
 0x5d4   : > { %5902 = vmatprep.subr.bf16.mxu1 %v7589_v48  ;;  %6518 = vperm.xlu0 %8458, %v6489_v17   ;;  %vm6077_vm11 = vcmp.lt.s32.totalorder %v14015_v63, %v14047_v45  ;;  %v6493_v48 = vsel %vm6076_vm10, 1, %v14001_v7  ;;  %v14048_v17 = vld [vmem:[#allocation32_spill] sm:$0xff]  ;;  %vm6093_vm10 = vcmp.lt.s32.totalorder %v11894_v60, %v14046_v21 }
 0x5d5   : > { %5790 = vmatpush1.bf16.msra.mxu0 %v7586_v42  ;;  %6521 = vperm.xlu1 %8459, %v6490_v43   ;;  %v6494_v42 = vsel %vm6077_vm11, 1, %v14001_v7  ;;  %v14049_v46 = vmov %v14048_v17  ;;  %vm6078_vm12 = vcmp.lt.s32.totalorder %v14015_v63, %v14048_v17  ;;  %v14050_v43 = vld [vmem:[#allocation33_spill] sm:$0xff]  ;;  %v14055_v17 = vld [vmem:[#allocation35_spill] sm:$0xff]  ;;  %vm6094_vm11 = vcmp.lt.s32.totalorder %v11894_v60, %v14047_v45 }
 0x5d6   : > { %vm6079_vm13 = vcmp.lt.s32.totalorder %v14015_v63, %v14050_v43  ;;  %v14056_v52 = vmov %v14055_v17  ;;  %vm6081_vm15 = vcmp.lt.s32.totalorder %v14015_v63, %v14055_v17  ;;  %v14059_v63 = vld [vmem:[#allocation102_spill] sm:$0xff]  ;;  %v14060_v17 = vld [vmem:[#allocation101_spill] sm:$0xff] }
 0x5d7   : > { %5903 = vmatpush1.bf16.msra.mxu1 %v7588_v56  ;;  %v14051_v56 = vmov %v14050_v43  ;;  %v6496_v27 = vsel %vm6079_vm13, 1, %v14001_v7  ;;  %v14057_v43 = vld [vmem:[#allocation20_spill] sm:$0xff] }
 0x5d8   : > { %5291 = vmatmul.mubr.bf16.gmra.mrb[16].mxu0 %v5054_v31  ;;  %6524 = vperm.xlu0 %8458, %v6491_v36   ;;  %v14053_v36 = vld [vmem:[#allocation103_spill] sm:$0xff]  ;;  %vm6083_vm0 = vcmp.lt.s32.totalorder %v11894_v60, %v14057_v43  ;;  %v14064_v43 = vld [vmem:[#allocation25_spill] sm:$0xff]  ;;  %vm6096_vm13 = vcmp.lt.s32.totalorder %v11894_v60, %v14051_v56 }
 0x5d9   : > { %5300 = vmatprep.mubr.bf16.mxu0 %v14001_v7  ;;  %6527 = vperm.xlu1 %8459, %v6492_v22   ;;  %v5055_v22 = vpack.c.bf16 %v14053_v36, %v14052_v11  ;;  %v14058_v11 = vld [vmem:[#allocation21_spill] sm:$0xff]  ;;  %v5056_v36 = vpack.c.bf16 %v14060_v17, %v14059_v63  ;;  %vm6088_vm5 = vcmp.lt.s32.totalorder %v11894_v60, %v14064_v43  ;;  %v6989_v43 = vsel %vm6093_vm10, 1, %v14001_v7 }
 0x5da   : > { %5404 = vmatmul.mubr.bf16.gmra.mrb[16].mxu1 %v5054_v31  ;;  %v6495_v31 = vsel %vm6078_vm12, 1, %v14001_v7  ;;  %vm6084_vm1 = vcmp.lt.s32.totalorder %v11894_v60, %v14058_v11  ;;  %vm6095_vm12 = vcmp.lt.s32.totalorder %v11894_v60, %v14049_v46  ;;  %v4959_v46 = vld [vmem:[%s11989_s30 + $0x28] sm:$0xff] }
 0x5db   : > { %5413 = vmatprep.mubr.bf16.mxu1 %v14001_v7 }
 0x5dc   : > { %6530 = vperm.xlu0 %8458, %v6493_v48   ;;  %v6497_v48 = vsel %vm6080_vm14, 1, %v14001_v7  ;;  %vm6097_vm14 = vcmp.lt.s32.totalorder %v11894_v60, %v14054_v51 }
 0x5dd   : > { %6533 = vperm.xlu1 %8459, %v6494_v42   ;;  %v6498_v42 = vsel %vm6081_vm15, 1, %v14001_v7  ;;  %vm6098_vm15 = vcmp.lt.s32.totalorder %v11894_v60, %v14056_v52 }
 0x5e0   : > { %5301 = vmatmul.mubr.bf16.gmra.mrb[20].mxu0 %v5055_v22  ;;  %6536 = vperm.xlu0 %8458, %v6495_v31   ;;  %v6979_v31 = vsel %vm6083_vm0, 1, %v14001_v7 }
 0x5e1   : > { %5310 = vmatprep.mubr.bf16.mxu0 %v14001_v7  ;;  %6539 = vperm.xlu1 %8459, %v6496_v27   ;;  %v6980_v27 = vsel %vm6084_vm1, 1, %v14001_v7 }
 0x5e2   : > { %5414 = vmatmul.mubr.bf16.gmra.mrb[20].mxu1 %v5055_v22  ;;  %v14061_v22 = vld [vmem:[#allocation22_spill] sm:$0xff] }
 0x5e3   : > { %5423 = vmatprep.mubr.bf16.mxu1 %v14001_v7  ;;  %vm6085_vm2 = vcmp.lt.s32.totalorder %v11894_v60, %v14061_v22  ;;  %v6986_v22 = vsel %vm6090_vm7, 1, %v14001_v7 }
 0x5e4   : > { %6542 = vperm.xlu0 %8458, %v6497_v48   ;;  %v6981_v11 = vsel %vm6085_vm2, 1, %v14001_v7  ;;  %v6982_v48 = vsel %vm6086_vm3, 1, %v14001_v7 }
 0x5e5   : > { %6545 = vperm.xlu1 %8459, %v6498_v42   ;;  %v14063_v42 = vld [vmem:[#allocation24_spill] sm:$0xff] }
 0x5e6   : > { %vm6087_vm4 = vcmp.lt.s32.totalorder %v11894_v60, %v14063_v42  ;;  %v6988_v42 = vsel %vm6092_vm9, 1, %v14001_v7  ;;  %v5610_v60 = vpack.c.bf16 %v9478_v54, %v9482_v6  ;;  %v12049_v6 = vld [vmem:[%s11989_s30 + $0x58] sm:$0xff] }
 0x5e8   : > { %5311 = vmatmul.mubr.bf16.gmra.mrb[24].mxu0 %v5056_v36  ;;  %6996 = vperm.xlu0 %8458, %v6979_v31   ;;  %v6983_v31 = vsel %vm6087_vm4, 1, %v14001_v7 }
 0x5e9   : > { %5320 = vmatprep.mubr.bf16.mxu0 %v14001_v7  ;;  %6999 = vperm.xlu1 %8459, %v6980_v27   ;;  %v6984_v27 = vsel %vm6088_vm5, 1, %v14001_v7 }
 0x5ea   : > { %5424 = vmatmul.mubr.bf16.gmra.mrb[24].mxu1 %v5056_v36  ;;  %v6985_v36 = vsel %vm6089_vm6, 1, %v14001_v7 }
 0x5eb   : > { %5433 = vmatprep.mubr.bf16.mxu1 %v14001_v7 }
 0x5ec   : > { %7002 = vperm.xlu0 %8458, %v6981_v11   ;;  %v5607_v11 = vpack.c.bf16 %v9502_v26, %v9506_v13 }
 0x5ed   : > { %7005 = vperm.xlu1 %8459, %v6982_v48   ;;  %v6987_v48 = vsel %vm6091_vm8, 1, %v14001_v7 }
 0x5f0   : > { %5321 = vmatmul.mubr.bf16.gmra.mrb[28].mxu0 %v5057_v25  ;;  %7008 = vperm.xlu0 %8458, %v6983_v31   ;;  %v5608_v31 = vpack.c.bf16 %v9494_v14, %v9498_v12 }
 0x5f1   : > { %5807 = vmatprep.mubr.bf16.mxu0 %v14001_v7  ;;  %7011 = vperm.xlu1 %8459, %v6984_v27   ;;  %v6991_v27 = vsel %vm6095_vm12, 1, %v14001_v7 }
 0x5f2   : > { %5434 = vmatmul.mubr.bf16.gmra.mrb[28].mxu1 %v5057_v25  ;;  %v6990_v25 = vsel %vm6094_vm11, 1, %v14001_v7 }
 0x5f3   : > { %5920 = vmatprep.mubr.bf16.mxu1 %v14001_v7 }
 0x5f4   : > { %7014 = vperm.xlu0 %8458, %v6985_v36   ;;  %v6992_v36 = vsel %vm6096_vm13, 1, %v14001_v7 }
 0x5f5   : > { %7017 = vperm.xlu1 %8459, %v6986_v22   ;;  %v6993_v22 = vsel %vm6097_vm14, 1, %v14001_v7 }
 0x5f8   : > { %5808 = vmatmul.mubr.bf16.vlgmr.msra.gmra.mrb[32].mxu0 %v5607_v11  ;;  %7020 = vperm.xlu0 %8458, %v6987_v48   ;;  %v5609_v48 = vpack.c.bf16 %v9486_v9, %v9490_v20 }
 0x5f9   : > { %5817 = vmatprep.mubr.bf16.mxu0 %v14001_v7  ;;  %7023 = vperm.xlu1 %8459, %v6988_v42   ;;  %v5611_v42 = vpack.c.bf16 %v9470_v15, %v9474_v44 }
 0x5fa   : > { %5921 = vmatmul.mubr.bf16.vlgmr.msra.gmra.mrb[32].mxu1 %v5607_v11  ;;  %v6994_v11 = vsel %vm6098_vm15, 1, %v14001_v7 }
 0x5fb   : > { %5930 = vmatprep.mubr.bf16.mxu1 %v14001_v7 }
 0x5fc   : > { %7026 = vperm.xlu0 %8458, %v6989_v43   ;;  %v5612_v43 = vpack.c.bf16 %v9462_v35, %v13852_v16  ;;  %v4994_v35 = vunpack.c.l.bf16 %v4958_v23 }
 0x5fd   : > { %7029 = vperm.xlu1 %8459, %v6990_v25   ;;  %v5613_v25 = vpack.c.bf16 %v9454_v32, %v9458_v0 }
 0x600   : > { %5818 = vmatmul.mubr.bf16.gmra.mrb[36].mxu0 %v5608_v31  ;;  %7032 = vperm.xlu0 %8458, %v6991_v27   ;;  %v4954_v27 = vld [vmem:[%s11989_s30] sm:$0xff] }
 0x601   : > { %5827 = vmatprep.mubr.bf16.mxu0 %v14001_v7  ;;  %7035 = vperm.xlu1 %8459, %v6992_v36   ;;  %v4955_v36 = vld [vmem:[%s11989_s30 + $0x8] sm:$0xff] }
 0x602   : > { %5931 = vmatmul.mubr.bf16.gmra.mrb[36].mxu1 %v5608_v31  ;;  %v5614_v31 = vpack.c.bf16 %v9446_v4, %v9450_v53 }
 0x603   : > { %5940 = vmatprep.mubr.bf16.mxu1 %v14001_v7 }
 0x604   : > { %7038 = vperm.xlu0 %8458, %v6993_v22   ;;  %v4986_v22 = vunpack.c.l.bf16 %v4954_v27 }
 0x605   : > { %7041 = vperm.xlu1 %8459, %v6994_v11   ;;  %v4957_v11 = vld [vmem:[%s11989_s30 + $0x18] sm:$0xff] }
 0x606   : > { %v4993_v51 = vunpack.c.h.bf16 %v4957_v11 }
 0x608   : > { %5828 = vmatmul.mubr.bf16.gmra.mrb[40].mxu0 %v5609_v48 }
 0x609   : > { %5837 = vmatprep.mubr.bf16.mxu0 %v14001_v7 }
 0x60a   : > { %5941 = vmatmul.mubr.bf16.gmra.mrb[40].mxu1 %v5609_v48  ;;  %v4956_v48 = vld [vmem:[%s11989_s30 + $0x10] sm:$0xff] }
 0x60b   : > { %5950 = vmatprep.mubr.bf16.mxu1 %v14001_v7  ;;  %v4988_v28 = vunpack.c.l.bf16 %v4956_v48  ;;  %v4992_v32 = vunpack.c.h.bf16 %v4956_v48 }
 0x610   : > { %5838 = vmatmul.mubr.bf16.gmra.mrb[44].mxu0 %v5610_v60 }
 0x611   : > { %5847 = vmatprep.mubr.bf16.mxu0 %v14001_v7 }
 0x612   : > { %5951 = vmatmul.mubr.bf16.gmra.mrb[44].mxu1 %v5610_v60  ;;  %v4990_v60 = vunpack.c.h.bf16 %v4954_v27 }
 0x613   : > { %5960 = vmatprep.mubr.bf16.mxu1 %v14001_v7 }
 0x618   : > { %5848 = vmatmul.mubr.bf16.gmra.mrb[48].mxu0 %v5611_v42 }
 0x619   : > { %5857 = vmatprep.mubr.bf16.mxu0 %v14001_v7 }
 0x61a   : > { %5961 = vmatmul.mubr.bf16.gmra.mrb[48].mxu1 %v5611_v42 }
 0x61b   : > { %5970 = vmatprep.mubr.bf16.mxu1 %v14001_v7 }
 0x620   : > { %5858 = vmatmul.mubr.bf16.gmra.mrb[52].mxu0 %v5612_v43 }
 0x621   : > { %5867 = vmatprep.mubr.bf16.mxu0 %v14001_v7 }
 0x622   : > { %5971 = vmatmul.mubr.bf16.gmra.mrb[52].mxu1 %v5612_v43  ;;  %v4991_v43 = vunpack.c.h.bf16 %v4955_v36 }
 0x623   : > { %5980 = vmatprep.mubr.bf16.mxu1 %v14001_v7 }
 0x628   : > { %5868 = vmatmul.mubr.bf16.gmra.mrb[56].mxu0 %v5613_v25 }
 0x629   : > { %5877 = vmatprep.mubr.bf16.mxu0 %v14001_v7 }
 0x62a   : > { %5981 = vmatmul.mubr.bf16.gmra.mrb[56].mxu1 %v5613_v25  ;;  %v4989_v25 = vunpack.c.l.bf16 %v4957_v11 }
 0x62b   : > { %5990 = vmatprep.mubr.bf16.mxu1 %v14001_v7  ;;  %v4987_v7 = vunpack.c.l.bf16 %v4955_v36 }
 0x630   : > { %5878 = vmatmul.mubr.bf16.gmra.mrb[60].mxu0 %v5614_v31 }
 0x632   : > { %5991 = vmatmul.mubr.bf16.gmra.mrb[60].mxu1 %v5614_v31 }
 0x68b   : > { %v5252_v42 = vpop.f32.mrb[0].mxu0 }
 0x68c   : > { %v5444_v31 = vadd.f32 %v5252_v42, %v4986_v22  ;;  %v5254_v21 = vpop.f32.mrb[1].mxu0  ;;  %v4995_v42 = vunpack.c.l.bf16 %v4959_v46 }
 0x68d   : > { %v5445_v30 = vadd.f32 %v5254_v21, %v4987_v7  ;;  %v5256_v45 = vpop.f32.mrb[2].mxu0  ;;  %v5365_v49 = vpop.f32.mrb[0].mxu1 }
 0x68e   : > { %v7590_v52 = vmul.f32 -1.442695, %v5444_v31  ;;  %v5448_v56 = vadd.f32 %v5256_v45, %v4990_v60  ;;  %v5258_v4 = vpop.f32.mrb[3].mxu0  ;;  %v5367_v53 = vpop.f32.mrb[1].mxu1  ;;  %v5446_v15 = vadd.f32 %v5365_v49, %v4988_v28  ;;  %v11998_v45 = vld [vmem:[%s11989_s30 + $0x30] sm:$0xff]  ;;  %v4998_v60 = vunpack.c.h.bf16 %v4958_v23 }
 0x68f   : > { %v7606_v0 = vmul.f32 -1.442695, %v5445_v30  ;;  %v5449_v27 = vadd.f32 %v5258_v4, %v4991_v43  ;;  %v5447_v36 = vadd.f32 %v5367_v53, %v4989_v25  ;;  %v5369_v16 = vpop.f32.mrb[2].mxu1  ;;  %v4999_v4 = vunpack.c.h.bf16 %v4959_v46 }
 0x690   : > { %8460 = vpow2.f32 %v7590_v52  ;;  %v7591_v22 = vmul.f32 -1.442695, %v5448_v56  ;;  %v5371_v21 = vpop.f32.mrb[3].mxu1  ;;  %v5450_v48 = vadd.f32 %v5369_v16, %v4992_v32  ;;  %v4996_v49 = vunpack.c.l.bf16 %v11998_v45  ;;  %v12005_v32 = vld [vmem:[%s11989_s30 + $0x48] sm:$0xff] }
 0x691   : > { %8462 = vpow2.f32 %v7606_v0  ;;  %v7607_v7 = vmul.f32 -1.442695, %v5449_v27  ;;  %v7622_v44 = vmul.f32 -1.442695, %v5447_v36  ;;  %v5451_v11 = vadd.f32 %v5371_v21, %v4993_v51  ;;  %v12002_v51 = vld [vmem:[%s11989_s30 + $0x40] sm:$0xff] }
 0x692   : > { %8464 = vpow2.f32 %v7591_v22  ;;  %v5003_v21 = vunpack.c.l.bf16 %v12005_v32 }
 0x693   : > { %8466 = vpow2.f32 %v7607_v7  ;;  %v5262_v30 = vpop.f32.mrb[4].mxu0  ;;  %v7623_v53 = vmul.f32 -1.442695, %v5451_v11  ;;  %v12016_v11 = vld [vmem:[%s11989_s30 + $0x38] sm:$0xff] }
 0x694   : > { %v5452_v52 = vadd.f32 %v5262_v30, %v4994_v35  ;;  %v5264_v56 = vpop.f32.mrb[5].mxu0  ;;  %8468 = vtanh.f32 %v5446_v15 }
 0x695   : > { %v5453_v28 = vadd.f32 %v5264_v56, %v4995_v42  ;;  %v5266_v0 = vpop.f32.mrb[6].mxu0  ;;  %8470 = vpow2.f32 %v7622_v44  ;;  %v5375_v43 = vpop.f32.mrb[4].mxu1  ;;  %v5002_v44 = vunpack.c.l.bf16 %v12002_v51 }
 0x696   : > { %v7592_v25 = vmul.f32 -1.442695, %v5452_v52  ;;  %v5456_v31 = vadd.f32 %v5266_v0, %v4998_v60  ;;  %v5268_v23 = vpop.f32.mrb[7].mxu0  ;;  %8472 = vtanh.f32 %v5450_v48  ;;  %v12007_v16 = vpop.f32.mrb[5].mxu1  ;;  %v5454_v36 = vadd.f32 %v5375_v43, %v4996_v49 }
 0x697   : > { %v7608_v35 = vmul.f32 -1.442695, %v5453_v28  ;;  %v5457_v46 = vadd.f32 %v5268_v23, %v4999_v4  ;;  %8474 = vpow2.f32 %v7623_v53  ;;  %v12009_v15 = vpop.f32.mrb[6].mxu1  ;;  %v5006_v4 = vunpack.c.h.bf16 %v12002_v51 }
 0x698   : > { %8476 = vpow2.f32 %v7592_v25  ;;  %v7593_v27 = vmul.f32 -1.442695, %v5456_v31  ;;  %v12012_v22 = vpop.f32.mrb[7].mxu1  ;;  %v5007_v28 = vunpack.c.h.bf16 %v12005_v32  ;;  %v4997_v23 = vunpack.c.l.bf16 %v12016_v11 }
 0x699   : > { %8478 = vpow2.f32 %v7608_v35  ;;  %v7609_v42 = vmul.f32 -1.442695, %v5457_v46  ;;  %v12022_v35 = vld [vmem:[%s11989_s30 + $0x60] sm:$0xff]  ;;  %v12025_v46 = vld [vmem:[%s11989_s30 + $0x68] sm:$0xff] }
 0x69a   : > { %v8461_v7 = vpop.eup %8460  ;;  %8480 = vpow2.f32 %v7593_v27  ;;  %v5455_v12 = vadd.f32 %v12007_v16, %v4997_v23 }
 0x69b   : > { %v8463_v60 = vpop.eup %8462  ;;  %v6147_v48 = vadd.f32 1.0, %v8461_v7  ;;  %8482 = vpow2.f32 %v7609_v42  ;;  %v5272_v30 = vpop.f32.mrb[8].mxu0  ;;  %v5000_v42 = vunpack.c.h.bf16 %v11998_v45 }
 0x69c   : > { %v8465_v53 = vpop.eup %8464  ;;  %v6243_v52 = vadd.f32 1.0, %v8463_v60  ;;  %v5460_v56 = vadd.f32 %v5272_v30, %v5002_v44  ;;  %v5274_v49 = vpop.f32.mrb[9].mxu0  ;;  %8484 = vtanh.f32 %v5454_v36 }
 0x69d   : > { %v8467_v0 = vpop.eup %8466  ;;  %8486 = vrcp.f32 %v6147_v48  ;;  %v6148_v43 = vadd.f32 1.0, %v8465_v53  ;;  %v5461_v25 = vadd.f32 %v5274_v49, %v5003_v21  ;;  %v5276_v31 = vpop.f32.mrb[10].mxu0  ;;  %v5001_v48 = vunpack.c.h.bf16 %v12016_v11 }
 0x69e   : > { %v12027_v27 = vpop.f32.mrb[8].mxu1  ;;  %v12029_v51 = vpop.eup %8468  ;;  %8488 = vrcp.f32 %v6243_v52  ;;  %v6244_v44 = vadd.f32 1.0, %v8467_v0  ;;  %v7594_v32 = vmul.f32 -1.442695, %v5460_v56  ;;  %v5010_v49 = vunpack.c.l.bf16 %v12022_v35  ;;  %v12042_v0 = vld [vmem:[%s11989_s30 + $0x50] sm:$0xff] }
 0x69f   : > { %v5278_v36 = vpop.f32.mrb[11].mxu0  ;;  %v12032_v7 = vpop.f32.mrb[9].mxu1  ;;  %8490 = vrcp.f32 %v6148_v43  ;;  %v7610_v60 = vmul.f32 -1.442695, %v5461_v25  ;;  %v5011_v56 = vunpack.c.l.bf16 %v12025_v46  ;;  %v5464_v43 = vadd.f32 %v5276_v31, %v5006_v4 }
 0x6a0   : > { %v8471_v21 = vpop.eup %8470  ;;  %v12035_v30 = vpop.f32.mrb[10].mxu1  ;;  %8492 = vrcp.f32 %v6244_v44  ;;  %v5014_v25 = vunpack.c.h.bf16 %v12022_v35  ;;  %v5015_v11 = vunpack.c.h.bf16 %v12025_v46  ;;  %v5459_v13 = vadd.f32 %v12012_v22, %v5001_v48 }
 0x6a1   : > { %v12037_v53 = vpop.eup %8472  ;;  %v6355_v52 = vadd.f32 1.0, %v8471_v21  ;;  %v12044_v45 = vpop.f32.mrb[11].mxu1  ;;  %8494 = vpow2.f32 %v7594_v32  ;;  %v5465_v21 = vadd.f32 %v5278_v36, %v5007_v28  ;;  %v7595_v28 = vmul.f32 -1.442695, %v5464_v43 }
 0x6a2   : > { %v8475_v54 = vpop.eup %8474  ;;  %v12053_v32 = vpop.permute.xlu0 %6500  ;;  %v5458_v43 = vadd.f32 %v12009_v15, %v5000_v42  ;;  %v7625_v63 = vmul.f32 -1.442695, %v5459_v13 }
 0x6a3   : > { %v8477_v9 = vpop.eup %8476  ;;  %8496 = vrcp.f32 %v6355_v52  ;;  %v6356_v44 = vadd.f32 1.0, %v8475_v54  ;;  %v5282_v26 = vpop.f32.mrb[12].mxu0  ;;  %v7611_v52 = vmul.f32 -1.442695, %v5465_v21  ;;  %vm6547_vm0 = vcmp.eq.s32.totalorder %v12053_v32, 1 }
 0x6a4   : > { %v8479_v20 = vpop.eup %8478  ;;  %v6149_v14 = vadd.f32 1.0, %v8477_v9  ;;  %8498 = vpow2.f32 %v7610_v60  ;;  %v5284_v35 = vpop.f32.mrb[13].mxu0  ;;  %v5468_v36 = vadd.f32 %v5282_v26, %v5010_v49 }
 0x6a5   : > { %v8481_v4 = vpop.eup %8480  ;;  %v6245_v31 = vadd.f32 1.0, %v8479_v20  ;;  %8500 = vrcp.f32 %v6356_v44  ;;  %v5286_v9 = vpop.f32.mrb[14].mxu0 }
 0x6a6   : > { %v8483_v29 = vpop.eup %8482  ;;  %8502 = vrcp.f32 %v6149_v14  ;;  %v6150_v54 = vadd.f32 1.0, %v8481_v4  ;;  %v12056_v60 = vpop.f32.mrb[12].mxu1  ;;  %v7624_v14 = vmul.f32 -1.442695, %v5455_v12  ;;  %v7596_v48 = vmul.f32 -1.442695, %v5468_v36 }
 0x6a7   : > { %v12058_v16 = vpop.eup %8484  ;;  %8504 = vrcp.f32 %v6245_v31  ;;  %v6246_v23 = vadd.f32 1.0, %v8483_v29  ;;  %v5288_v20 = vpop.f32.mrb[15].mxu0  ;;  %v5469_v4 = vadd.f32 %v5284_v35, %v5011_v56 }
 0x6a8   : > { %v12061_v44 = vpop.f32.mrb[13].mxu1  ;;  %v8487_v46 = vpop.eup %8486  ;;  %8506 = vrcp.f32 %v6150_v54  ;;  %v12072_v54 = vld [vmem:[%s11989_s30 + $0x80] sm:$0xff] }
 0x6a9   : > { %v12064_v26 = vpop.f32.mrb[14].mxu1  ;;  %v8489_v49 = vpop.eup %8488  ;;  %8508 = vrcp.f32 %v6246_v23  ;;  %v6419_v29 = vmul.f32 %v8487_v46, %v12029_v51  ;;  %v5472_v23 = vadd.f32 %v5286_v9, %v5014_v25  ;;  %v5473_v51 = vadd.f32 %v5288_v20, %v5015_v11 }
 0x6aa   : > { %v12068_v21 = vpop.f32.mrb[15].mxu1  ;;  %v8491_v22 = vpop.eup %8490  ;;  %8510 = vpow2.f32 %v7595_v28  ;;  %v6403_v31 = vmul.f32 %v9570_v37, %v8489_v49  ;;  %v5018_v36 = vunpack.c.l.bf16 %v12072_v54  ;;  %v7612_v25 = vmul.f32 -1.442695, %v5469_v4 }
 0x6ab   : > { %v12074_v12 = vpop.permute.xlu0 %6503  ;;  %v8493_v33 = vpop.eup %8492  ;;  %8512 = vpow2.f32 %v7611_v52  ;;  %v6420_v15 = vmul.f32 %v8491_v22, %v12037_v53 }
 0x6ac   : > { %v8495_v42 = vpop.eup %8494  ;;  %8514 = vpow2.f32 %v7624_v14  ;;  %v6435_v46 = vadd.f32 %v6419_v29, %v6403_v31  ;;  %v5292_v17 = vpop.f32.mrb[16].mxu0  ;;  %v6404_v28 = vmul.f32 %v9566_v19, %v8493_v33  ;;  %vm6548_vm1 = vcmp.eq.s32.totalorder %v12074_v12, 1 }
 0x6ad   : > { %v12078_v56 = vpop.eup %8496  ;;  %v6151_v35 = vadd.f32 1.0, %v8495_v42  ;;  %8516 = vtanh.f32 %v5458_v43  ;;  %v12081_v49 = vpop.f32.mrb[17].mxu0  ;;  %v7597_v14 = vmul.f32 -1.442695, %v5472_v23  ;;  %v14068_v42 = vunpack.c.l.bf16 %v12049_v6 }
 0x6ae   : > { %v12084_v13 = vpop.permute.xlu1 %6506  ;;  %v8499_v53 = vpop.eup %8498  ;;  %8518 = vpow2.f32 %v7596_v48  ;;  %v12089_v37 = vsel %vm6547_vm0, %v6435_v46, %v9570_v37   ;;  %v12091_v33 = vadd.f32 %v6420_v15, %v6404_v28  ;;  %v7613_v48 = vmul.f32 -1.442695, %v5473_v51 }
 0x6af   : > { %14065 = vst [vmem:[#allocation112_spill] sm:$0xff] %v12089_v37  ;;  %v12093_v11 = vpop.f32.mrb[18].mxu0  ;;  %v12095_v9 = vpop.f32.mrb[16].mxu1  ;;  %8520 = vrcp.f32 %v6151_v35  ;;  %v6247_v20 = vadd.f32 1.0, %v8499_v53  ;;  %v14067_v15 = vunpack.c.l.bf16 %v12042_v0  ;;  %v5463_v28 = vadd.f32 %v12032_v7, %v14068_v42 }
 0x6b0   : > { %v12097_v52 = vpop.eup %8500  ;;  %v12099_v43 = vpop.f32.mrb[19].mxu0  ;;  %8522 = vpow2.f32 %v7625_v63  ;;  %v12107_v19 = vsel %vm6548_vm1, %v12091_v33, %v9566_v19   ;;  %v12118_v63 = vld [vmem:[%s11989_s30 + $0x88] sm:$0xff]  ;;  %vm6549_vm2 = vcmp.eq.s32.totalorder %v12084_v13, 1  ;;  %v5009_v7 = vunpack.c.h.bf16 %v12049_v6 }
 0x6b1   : > { %v12101_v29 = vpop.f32.mrb[17].mxu1  ;;  %v8503_v22 = vpop.eup %8502  ;;  %14066 = vst [vmem:[#allocation113_spill] sm:$0xff] %v12107_v19  ;;  %8524 = vrcp.f32 %v6247_v20  ;;  %v5462_v23 = vadd.f32 %v12027_v27, %v14067_v15  ;;  %v5008_v20 = vunpack.c.h.bf16 %v12042_v0  ;;  %v5019_v15 = vunpack.c.l.bf16 %v12118_v63 }
 0x6b2   : > { %v12109_v4 = vpop.f32.mrb[18].mxu1  ;;  %v8505_v31 = vpop.eup %8504  ;;  %v6421_v51 = vmul.f32 %v8503_v22, %v12058_v16  ;;  %8526 = vpow2.f32 %v7612_v25 }
 0x6b3   : > { %v12121_v35 = vpop.f32.mrb[19].mxu1  ;;  %v8507_v53 = vpop.eup %8506  ;;  %v6405_v37 = vmul.f32 %v9562_v38, %v8505_v31  ;;  %8528 = vpow2.f32 %v7597_v14  ;;  %v7626_v31 = vmul.f32 -1.442695, %v5463_v28  ;;  %v5476_v14 = vadd.f32 %v5292_v17, %v5018_v36 }
 0x6b4   : > { %v8509_v19 = vpop.eup %8508  ;;  %8530 = vpow2.f32 %v7613_v48  ;;  %v12130_v16 = vpop.f32.mrb[20].mxu0  ;;  %v5022_v28 = vunpack.c.h.bf16 %v12072_v54  ;;  %v5467_v54 = vadd.f32 %v12044_v45, %v5009_v7  ;;  %v5013_v7 = vunpack.c.l.bf16 %v12161_v50 }
 0x6b5   : > { %v8511_v27 = vpop.eup %8510  ;;  %v12128_v42 = vadd.f32 %v6421_v51, %v6405_v37  ;;  %8532 = vtanh.f32 %v5462_v23  ;;  %v12132_v2 = vpop.f32.mrb[21].mxu0  ;;  %v6406_v6 = vmul.f32 %v9558_v34, %v8509_v19  ;;  %v12150_v51 = vld [vmem:[%s11989_s30 + $0x70] sm:$0xff]  ;;  %v5466_v19 = vadd.f32 %v12035_v30, %v5008_v20 }
 0x6b6   : > { %v8513_v22 = vpop.eup %8512  ;;  %v6152_v25 = vadd.f32 1.0, %v8511_v27  ;;  %v12134_v0 = vpop.permute.xlu1 %6509  ;;  %8534 = vtanh.f32 %v6435_v46  ;;  %v5023_v46 = vunpack.c.h.bf16 %v12118_v63  ;;  %v7598_v47 = vmul.f32 -1.442695, %v5476_v14 }
 0x6b7   : > { %v8515_v8 = vpop.eup %8514  ;;  %v6248_v48 = vadd.f32 1.0, %v8513_v22  ;;  %v12140_v38 = vsel %vm6549_vm2, %v12128_v42, %v9562_v38   ;;  %v12143_v37 = vpop.f32.mrb[22].mxu0  ;;  %vm6550_vm3 = vcmp.eq.s32.totalorder %v12134_v0, 1 }
 0x6b8   : > { %14069 = vst [vmem:[#allocation114_spill] sm:$0xff] %v12140_v38  ;;  %v12145_v23 = vpop.f32.mrb[20].mxu1  ;;  %v8517_v17 = vpop.eup %8516  ;;  %8536 = vrcp.f32 %v6152_v25  ;;  %v6357_v36 = vadd.f32 1.0, %v8515_v8 }
 0x6b9   : > { %v12152_v27 = vpop.f32.mrb[23].mxu0  ;;  %v12154_v22 = vpop.f32.mrb[21].mxu1  ;;  %8538 = vrcp.f32 %v6248_v48  ;;  %v6422_v58 = vmul.f32 %v8517_v17, %v8507_v53  ;;  %v5012_v48 = vunpack.c.l.bf16 %v12150_v51  ;;  %v12181_v17 = vld [vmem:[%s11989_s30 + $0xa0] sm:$0xff] }
 0x6ba   : > { %v8519_v38 = vpop.eup %8518  ;;  %v12157_v24 = vpop.f32.mrb[22].mxu1  ;;  %8540 = vrcp.f32 %v6357_v36 }
 0x6bb   : > { %v8521_v25 = vpop.eup %8520  ;;  %v6153_v8 = vadd.f32 1.0, %v8519_v38  ;;  %v12164_v63 = vpop.f32.mrb[23].mxu1  ;;  %8542 = vpow2.f32 %v7626_v31  ;;  %v12167_v30 = vadd.f32 %v6422_v58, %v6406_v6  ;;  %v5477_v38 = vadd.f32 %v12081_v49, %v5019_v15 }
 0x6bc   : > { %v8523_v18 = vpop.eup %8522  ;;  %v12177_v31 = vpop.f32.mrb[24].mxu0  ;;  %v7627_v6 = vmul.f32 -1.442695, %v5467_v54 }
 0x6bd   : > { %v8525_v53 = vpop.eup %8524  ;;  %8544 = vrcp.f32 %v6153_v8  ;;  %v6358_v20 = vadd.f32 1.0, %v8523_v18  ;;  %v12175_v34 = vsel %vm6550_vm3, %v12167_v30, %v9558_v34   ;;  %v5480_v18 = vadd.f32 %v12093_v11, %v5022_v28  ;;  %v12183_v49 = vpop.permute.xlu0 %6512 }
 0x6be   : > { %v8527_v45 = vpop.eup %8526  ;;  %8546 = vtanh.f32 %v5466_v19  ;;  %14070 = vst [vmem:[#allocation154_spill] sm:$0xff] %v12175_v34  ;;  %v12185_v15 = vpop.f32.mrb[25].mxu0  ;;  %v5481_v8 = vadd.f32 %v12099_v43, %v5023_v46  ;;  %v6407_v34 = vmul.f32 %v9554_v39, %v8525_v53  ;;  %v7614_v28 = vmul.f32 -1.442695, %v5477_v38  ;;  %v12203_v38 = vld [vmem:[%s11989_s30 + $0xa8] sm:$0xff] }
 0x6bf   : > { %v8529_v14 = vpop.eup %8528  ;;  %8548 = vrcp.f32 %v6358_v20  ;;  %v6249_v58 = vadd.f32 1.0, %v8527_v45  ;;  %v12189_v55 = vpop.f32.mrb[26].mxu0  ;;  %v5017_v45 = vunpack.c.h.bf16 %v12161_v50  ;;  %v5026_v43 = vunpack.c.l.bf16 %v12181_v17 }
 0x6c0   : > { %v8531_v36 = vpop.eup %8530  ;;  %v6154_v19 = vadd.f32 1.0, %v8529_v14  ;;  %8550 = vpow2.f32 %v7598_v47  ;;  %v12191_v20 = vpop.f32.mrb[24].mxu1  ;;  %vm6551_vm4 = vcmp.eq.s32.totalorder %v12183_v49, 1  ;;  %v12539_v49 = vld [vmem:[%s12536_s3] sm:$0xff] }
 0x6c1   : > { %14071 = vst [vmem:[#allocation155_spill] sm:$0xff] %v12191_v20  ;;  %v8533_v54 = vpop.eup %8532  ;;  %8552 = vrcp.f32 %v6249_v58  ;;  %v6250_v11 = vadd.f32 1.0, %v8531_v36  ;;  %v12194_v5 = vpop.f32.mrb[27].mxu0  ;;  %v7599_v58 = vmul.f32 -1.442695, %v5480_v18  ;;  %v5016_v18 = vunpack.c.h.bf16 %v12150_v51 }
 0x6c2   : > { %v12196_v1 = vpop.f32.mrb[25].mxu1  ;;  %v8535_v47 = vpop.eup %8534  ;;  %8554 = vrcp.f32 %v6154_v19  ;;  %v6423_v46 = vmul.f32 %v8533_v54, %v8521_v25  ;;  %v7615_v19 = vmul.f32 -1.442695, %v5481_v8 }
 0x6c3   : > { %14072 = vst [vmem:[#allocation156_spill] sm:$0xff] %v12196_v1  ;;  %v12199_v53 = vpop.f32.mrb[26].mxu1  ;;  %v8537_v14 = vpop.eup %8536  ;;  %8556 = vrcp.f32 %v6250_v11  ;;  %v6467_v20 = vmul.f32 %v8535_v47, %v12078_v56  ;;  %v5471_v1 = vadd.f32 %v12061_v44, %v5013_v7  ;;  %v5027_v44 = vunpack.c.l.bf16 %v12203_v38 }
 0x6c4   : > { %v12206_v50 = vpop.f32.mrb[27].mxu1  ;;  %v8539_v36 = vpop.eup %8538  ;;  %8558 = vpow2.f32 %v7627_v6  ;;  %v12209_v25 = vadd.f32 %v6423_v46, %v6407_v34  ;;  %v5470_v34 = vadd.f32 %v12056_v60, %v5012_v48  ;;  %v5484_v7 = vadd.f32 %v12130_v16, %v5026_v43 }
 0x6c5   : > { %14073 = vst [vmem:[#allocation157_spill] sm:$0xff] %v12206_v50  ;;  %v12211_v54 = vpop.eup %8540  ;;  %v12216_v46 = vsel %vm6547_vm0, %v6467_v20, %v13966_v3   ;;  %v7091_v56 = vsel %vm6547_vm0, %v6467_v20, 0.0  ;;  %8560 = vpow2.f32 %v7614_v28  ;;  %v12235_v3 = vpop.f32.mrb[28].mxu0  ;;  %v6408_v60 = vmul.f32 %v9550_v61, %v8539_v36 }
 0x6c6   : > { %14074 = vst [vmem:[#allocation158_spill] sm:$0xff] %v12216_v46  ;;  %v8543_v11 = vpop.eup %8542  ;;  %7109 = vst [vmem:[%s12223_s11] sm:$0xff] %v7091_v56  ;;  %8562 = vtanh.f32 %v12091_v33  ;;  %v12233_v39 = vsel %vm6551_vm4, %v12209_v25, %v9554_v39   ;;  %v12240_v33 = vpop.permute.xlu1 %6515  ;;  %v7628_v8 = vmul.f32 -1.442695, %v5471_v1  ;;  %v5475_v20 = vadd.f32 %v12068_v21, %v5017_v45  ;;  %v12264_v46 = vld [vmem:[%s11989_s30 + $0x98] sm:$0xff] }
 0x6c7   : > { %14075 = vst [vmem:[#allocation159_spill] sm:$0xff] %v12233_v39  ;;  %v12237_v32 = vpop.eup %8544  ;;  %v6359_v51 = vadd.f32 1.0, %v8543_v11  ;;  %8564 = vpow2.f32 %v7599_v58  ;;  %v12243_v48 = vpop.f32.mrb[29].mxu0  ;;  %v5030_v16 = vunpack.c.h.bf16 %v12181_v17  ;;  %v5031_v43 = vunpack.c.h.bf16 %v12203_v38  ;;  %v12255_v58 = vld [vmem:[%s11989_s30 + $0x90] sm:$0xff] }
 0x6c8   : > { %v8547_v6 = vpop.eup %8546  ;;  %8566 = vpow2.f32 %v7615_v19  ;;  %v12246_v28 = vpop.f32.mrb[30].mxu0  ;;  %v5474_v45 = vadd.f32 %v12064_v26, %v5016_v18  ;;  %v5485_v11 = vadd.f32 %v12132_v2, %v5027_v44  ;;  %vm6552_vm5 = vcmp.eq.s32.totalorder %v12240_v33, 1  ;;  %v14124_v33 = vld [vmem:[#allocation150_spill] sm:$0xff] }
 0x6c9   : > { %v12248_v47 = vpop.f32.mrb[28].mxu1  ;;  %v12250_v56 = vpop.eup %8548  ;;  %8568 = vrcp.f32 %v6359_v51  ;;  %v6424_v36 = vmul.f32 %v8547_v6, %v8537_v14  ;;  %v7600_v14 = vmul.f32 -1.442695, %v5484_v7  ;;  %v12271_v6 = vld [vmem:[%s11989_s30 + $0xc0] sm:$0xff]  ;;  %v7629_v2 = vmul.f32 -1.442695, %v5475_v20 }
 0x6ca   : > { %14076 = vst [vmem:[#allocation160_spill] sm:$0xff] %v12248_v47  ;;  %v12257_v19 = vpop.f32.mrb[31].mxu0  ;;  %v12259_v1 = vpop.f32.mrb[29].mxu1  ;;  %8570 = vtanh.f32 %v5470_v34  ;;  %v5020_v18 = vunpack.c.l.bf16 %v12255_v58  ;;  %v12285_v7 = vld [vmem:[%s11989_s30 + $0xc8] sm:$0xff] }
 0x6cb   : > { %14077 = vst [vmem:[#allocation161_spill] sm:$0xff] %v12259_v1  ;;  %v8551_v21 = vpop.eup %8550  ;;  %v12267_v17 = vpop.f32.mrb[30].mxu1  ;;  %8572 = vtanh.f32 %v12128_v42  ;;  %v12273_v39 = vadd.f32 %v6424_v36, %v6408_v60 }
 0x6cc   : > { %14078 = vst [vmem:[#allocation162_spill] sm:$0xff] %v12267_v17  ;;  %v8553_v38 = vpop.eup %8552  ;;  %v6155_v51 = vadd.f32 1.0, %v8551_v21  ;;  %v12275_v34 = vpop.f32.mrb[31].mxu1  ;;  %8574 = vpow2.f32 %v7628_v8  ;;  %v5021_v21 = vunpack.c.l.bf16 %v12264_v46  ;;  %v5488_v8 = vadd.f32 %v12143_v37, %v5030_v16 }
 0x6cd   : > { %14079 = vst [vmem:[#allocation163_spill] sm:$0xff] %v12275_v34  ;;  %v12277_v26 = vpop.eup %8554  ;;  %v12291_v61 = vsel %vm6552_vm5, %v12273_v39, %v9550_v61   ;;  %v7616_v17 = vmul.f32 -1.442695, %v5485_v11  ;;  %v12304_v16 = vpop.f32.mrb[32].mxu1 }
 0x6ce   : > { %v12280_v44 = vpop.eup %8556  ;;  %8576 = vrcp.f32 %v6155_v51  ;;  %14080 = vst [vmem:[#allocation164_spill] sm:$0xff] %v12291_v61  ;;  %v12296_v51 = vpop.f32.mrb[32].mxu0  ;;  %v5489_v61 = vadd.f32 %v12152_v27, %v5031_v43  ;;  %14081 = vst [vmem:[#allocation165_spill] sm:$0xff] %v12304_v16  ;;  %v7601_v43 = vmul.f32 -1.442695, %v5488_v8 }
 0x6cf   : > { %v8559_v60 = vpop.eup %8558  ;;  %8578 = vtanh.f32 %v5474_v45  ;;  %v12298_v47 = vpop.f32.mrb[33].mxu0  ;;  %v6409_v45 = vmul.f32 %v9546_v40, %v8553_v38 }
 0x6d0   : > { %v8561_v34 = vpop.eup %8560  ;;  %v6360_v42 = vadd.f32 1.0, %v8559_v60  ;;  %8580 = vpow2.f32 %v7600_v14  ;;  %v12302_v37 = vpop.f32.mrb[34].mxu0  ;;  %v5479_v14 = vadd.f32 %v12101_v29, %v5021_v21  ;;  %v7617_v38 = vmul.f32 -1.442695, %v5489_v61 }
 0x6d1   : > { %v8563_v1 = vpop.eup %8562  ;;  %v6251_v50 = vadd.f32 1.0, %v8561_v34  ;;  %8582 = vpow2.f32 %v7629_v2  ;;  %v12308_v11 = vpop.f32.mrb[35].mxu0 }
 0x6d2   : > { %v8565_v36 = vpop.eup %8564  ;;  %8584 = vrcp.f32 %v6360_v42  ;;  %v6468_v20 = vmul.f32 %v8563_v1, %v12097_v52  ;;  %v12310_v60 = vpop.f32.mrb[33].mxu1  ;;  %v7630_v61 = vmul.f32 -1.442695, %v5479_v14 }
 0x6d3   : > { %v8567_v34 = vpop.eup %8566  ;;  %8586 = vrcp.f32 %v6251_v50  ;;  %v6156_v27 = vadd.f32 1.0, %v8565_v36  ;;  %v12312_v2 = vpop.permute.xlu0 %6518 }
 0x6d4   : > { %v12315_v16 = vpop.f32.mrb[34].mxu1  ;;  %v12317_v42 = vpop.eup %8568  ;;  %v12322_v52 = vsel %vm6548_vm1, %v6468_v20, %v13967_v10   ;;  %v7092_v29 = vsel %vm6548_vm1, %v6468_v20, 0.0  ;;  %v6252_v1 = vadd.f32 1.0, %v8567_v34  ;;  %8588 = vpow2.f32 %v7616_v17 }
 0x6d5   : > { %14082 = vst [vmem:[#allocation166_spill] sm:$0xff] %v12315_v16  ;;  %14083 = vst [vmem:[#allocation167_spill] sm:$0xff] %v12322_v52  ;;  %v12326_v50 = vpop.f32.mrb[35].mxu1  ;;  %v8571_v21 = vpop.eup %8570  ;;  %8590 = vrcp.f32 %v6156_v27  ;;  %vm6553_vm6 = vcmp.eq.s32.totalorder %v12312_v2, 1  ;;  %v5478_v34 = vadd.f32 %v12095_v9, %v5020_v18  ;;  %v14091_v52 = vunpack.c.l.bf16 %v12285_v7  ;;  %v12405_v16 = vld [vmem:[%s11989_s30 + $0xe8] sm:$0xff] }
 0x6d6   : > { %7110 = vst [vmem:[%s12223_s11 + $0x10] sm:$0xff] %v7092_v29  ;;  %v8573_v36 = vpop.eup %8572  ;;  %8592 = vrcp.f32 %v6252_v1  ;;  %v6425_v10 = vmul.f32 %v8571_v21, %v12237_v32  ;;  %v12333_v12 = vpop.permute.xlu1 %6521  ;;  %v6410_v21 = vmul.f32 %v9542_v62, %v12280_v44  ;;  %v14085_v44 = vunpack.c.l.bf16 %v12271_v6 }
 0x6d7   : > { %v8575_v20 = vpop.eup %8574  ;;  %v6469_v17 = vmul.f32 %v8573_v36, %v12211_v54  ;;  %8594 = vtanh.f32 %v12167_v30  ;;  %v12338_v27 = vpop.f32.mrb[36].mxu0  ;;  %vm6554_vm7 = vcmp.eq.s32.totalorder %v12333_v12, 1 }
 0x6d8   : > { %v12340_v29 = vpop.eup %8576  ;;  %v6361_v1 = vadd.f32 1.0, %v8575_v20  ;;  %8596 = vpow2.f32 %v7601_v43  ;;  %v12342_v32 = vadd.f32 %v6425_v10, %v6409_v45  ;;  %v12346_v54 = vpop.f32.mrb[37].mxu0  ;;  %v5492_v36 = vadd.f32 %v12177_v31, %v14085_v44  ;;  %v12365_v10 = vld [vmem:[%s11989_s30 + $0xb0] sm:$0xff] }
 0x6d9   : > { %v8579_v30 = vpop.eup %8578  ;;  %v12351_v9 = vsel %vm6549_vm2, %v6469_v17, %v13987_v41   ;;  %v7093_v18 = vsel %vm6549_vm2, %v6469_v17, 0.0  ;;  %8598 = vpow2.f32 %v7617_v38  ;;  %v12356_v14 = vpop.f32.mrb[38].mxu0  ;;  %v12368_v41 = vld [vmem:[%s11989_s30 + $0xb8] sm:$0xff]  ;;  %v14088_v31 = vunpack.c.h.bf16 %v12255_v58 }
 0x6da   : > { %14084 = vst [vmem:[#allocation168_spill] sm:$0xff] %v12351_v9  ;;  %v12358_v45 = vpop.f32.mrb[36].mxu1  ;;  %v8581_v43 = vpop.eup %8580  ;;  %7111 = vst [vmem:[%s12223_s11 + $0x20] sm:$0xff] %v7093_v18  ;;  %8600 = vrcp.f32 %v6361_v1  ;;  %v12374_v40 = vsel %vm6553_vm6, %v12342_v32, %v9546_v40   ;;  %v6426_v13 = vmul.f32 %v8579_v30, %v12277_v26  ;;  %v14089_v18 = vunpack.c.h.bf16 %v12264_v46 }
 0x6db   : > { %14086 = vst [vmem:[#allocation169_spill] sm:$0xff] %v12374_v40  ;;  %v12377_v38 = vpop.f32.mrb[39].mxu0  ;;  %v12379_v20 = vpop.f32.mrb[37].mxu1  ;;  %v6157_v1 = vadd.f32 1.0, %v8581_v43  ;;  %8602 = vtanh.f32 %v5478_v34  ;;  %v5482_v9 = vadd.f32 %v12109_v4, %v14088_v31  ;;  %v5493_v43 = vadd.f32 %v12185_v15, %v14091_v52  ;;  %v12401_v31 = vld [vmem:[%s11989_s30 + $0xe0] sm:$0xff] }
 0x6dc   : > { %14087 = vst [vmem:[#allocation170_spill] sm:$0xff] %v12379_v20  ;;  %v8583_v17 = vpop.eup %8582  ;;  %v5483_v44 = vadd.f32 %v12121_v35, %v14089_v18  ;;  %v12387_v8 = vpop.f32.mrb[38].mxu1  ;;  %8604 = vpow2.f32 %v7630_v61  ;;  %v12394_v34 = vadd.f32 %v6426_v13, %v6410_v21  ;;  %v5028_v46 = vunpack.c.l.bf16 %v12365_v10 }
 0x6dd   : > { %14090 = vst [vmem:[#allocation171_spill] sm:$0xff] %v12387_v8  ;;  %v12389_v26 = vpop.eup %8584  ;;  %v6362_v30 = vadd.f32 1.0, %v8583_v17  ;;  %v12396_v58 = vpop.f32.mrb[39].mxu1  ;;  %8606 = vrcp.f32 %v6157_v1  ;;  %v5029_v35 = vunpack.c.l.bf16 %v12368_v41  ;;  %v7602_v17 = vmul.f32 -1.442695, %v5492_v36 }
 0x6de   : > { %14092 = vst [vmem:[#allocation172_spill] sm:$0xff] %v12396_v58  ;;  %v8587_v4 = vpop.eup %8586  ;;  %v12411_v62 = vsel %vm6554_vm7, %v12394_v34, %v9542_v62   ;;  %v7631_v21 = vmul.f32 -1.442695, %v5483_v44  ;;  %v14094_v13 = vunpack.c.h.bf16 %v12271_v6  ;;  %v12418_v36 = vpop.f32.mrb[40].mxu0  ;;  %v7618_v61 = vmul.f32 -1.442695, %v5493_v43 }
 0x6df   : > { %v8589_v18 = vpop.eup %8588  ;;  %8608 = vrcp.f32 %v6362_v30  ;;  %14093 = vst [vmem:[#allocation173_spill] sm:$0xff] %v12411_v62  ;;  %v12422_v58 = vpop.f32.mrb[41].mxu0  ;;  %v5487_v40 = vadd.f32 %v12154_v22, %v5029_v35 }
 0x6e0   : > { %v12413_v15 = vpop.eup %8590  ;;  %v6253_v52 = vadd.f32 1.0, %v8589_v18  ;;  %8610 = vtanh.f32 %v5482_v9  ;;  %v5496_v1 = vadd.f32 %v12189_v55, %v14094_v13  ;;  %v12426_v6 = vpop.f32.mrb[42].mxu0 }
 0x6e1   : > { %v8593_v30 = vpop.eup %8592  ;;  %8612 = vtanh.f32 %v12209_v25  ;;  %v12428_v55 = vpop.f32.mrb[40].mxu1  ;;  %v14096_v25 = vunpack.c.h.bf16 %v12285_v7 }
 0x6e2   : > { %v8595_v62 = vpop.eup %8594  ;;  %8614 = vrcp.f32 %v6253_v52  ;;  %14095 = vst [vmem:[#allocation174_spill] sm:$0xff] %v12428_v55  ;;  %v12435_v52 = vpop.f32.mrb[43].mxu0  ;;  %v7603_v20 = vmul.f32 -1.442695, %v5496_v1  ;;  %v12440_v55 = vld [vmem:[%s11989_s30 + $0xd0] sm:$0xff] }
 0x6e3   : > { %v8597_v18 = vpop.eup %8596  ;;  %v6470_v13 = vmul.f32 %v8595_v62, %v12250_v56  ;;  %8616 = vpow2.f32 %v7602_v17  ;;  %v5497_v43 = vadd.f32 %v12194_v5, %v14096_v25  ;;  %v12437_v8 = vpop.f32.mrb[41].mxu1  ;;  %v6411_v62 = vmul.f32 %v9538_v59, %v8587_v4  ;;  %v14098_v5 = vld [vmem:[#allocation111_spill] sm:$0xff] }
 0x6e4   : > { %v8599_v44 = vpop.eup %8598  ;;  %v6158_v9 = vadd.f32 1.0, %v8597_v18  ;;  %8618 = vpow2.f32 %v7631_v21  ;;  %v12443_v56 = vpop.f32.mrb[42].mxu1 }
 0x6e5   : > { %14097 = vst [vmem:[#allocation175_spill] sm:$0xff] %v12443_v56  ;;  %v12445_v7 = vpop.eup %8600  ;;  %v12450_v22 = vsel %vm6550_vm3, %v6470_v13, %v14098_v5   ;;  %v7094_v35 = vsel %vm6550_vm3, %v6470_v13, 0.0  ;;  %v6254_v17 = vadd.f32 1.0, %v8599_v44  ;;  %8620 = vpow2.f32 %v7618_v61  ;;  %v12454_v21 = vpop.permute.xlu0 %6524  ;;  %v12463_v13 = vld [vmem:[%s11989_s30 + $0xd8] sm:$0xff] }
 0x6e6   : > { %14099 = vst [vmem:[#allocation111_spill] sm:$0xff] %v12450_v22  ;;  %v12456_v1 = vpop.f32.mrb[43].mxu1  ;;  %v8603_v4 = vpop.eup %8602  ;;  %7112 = vst [vmem:[%s12223_s11 + $0x30] sm:$0xff] %v7094_v35  ;;  %8622 = vrcp.f32 %v6158_v9  ;;  %v7619_v5 = vmul.f32 -1.442695, %v5497_v43  ;;  %v5486_v9 = vadd.f32 %v12145_v23, %v5028_v46  ;;  %vm6555_vm8 = vcmp.eq.s32.totalorder %v12454_v21, 1 }
 0x6e7   : > { %v8605_v56 = vpop.eup %8604  ;;  %8624 = vrcp.f32 %v6254_v17  ;;  %v6427_v61 = vmul.f32 %v8603_v4, %v12340_v29  ;;  %v12471_v35 = vpop.f32.mrb[44].mxu0  ;;  %v7632_v43 = vmul.f32 -1.442695, %v5487_v40  ;;  %v6412_v29 = vmul.f32 %v9534_v57, %v8593_v30 }
 0x6e8   : > { %v12466_v44 = vpop.eup %8606  ;;  %v6363_v22 = vadd.f32 1.0, %v8605_v56  ;;  %8626 = vtanh.f32 %v12273_v39  ;;  %v12476_v17 = vpop.permute.xlu1 %6527  ;;  %v14101_v23 = vunpack.c.h.bf16 %v12365_v10  ;;  %v14103_v30 = vunpack.c.l.bf16 %v12401_v31 }
 0x6e9   : > { %v12473_v25 = vpop.eup %8608  ;;  %8628 = vpow2.f32 %v7603_v20  ;;  %v12479_v4 = vadd.f32 %v6427_v61, %v6411_v62  ;;  %v12481_v56 = vpop.f32.mrb[45].mxu0  ;;  %vm6556_vm9 = vcmp.eq.s32.totalorder %v12476_v17, 1  ;;  %v14168_v17 = vld [vmem:[#allocation106_spill] sm:$0xff] }
 0x6ea   : > { %14100 = vst [vmem:[#allocation176_spill] sm:$0xff] %v12481_v56  ;;  %v8611_v39 = vpop.eup %8610  ;;  %8630 = vrcp.f32 %v6363_v22  ;;  %v5490_v46 = vadd.f32 %v12157_v24, %v14101_v23  ;;  %v12488_v20 = vpop.f32.mrb[46].mxu0  ;;  %v5500_v62 = vadd.f32 %v12235_v3, %v14103_v30  ;;  %v14106_v23 = vunpack.c.h.bf16 %v12368_v41 }
 0x6eb   : > { %v12490_v40 = vpop.f32.mrb[44].mxu1  ;;  %v8613_v18 = vpop.eup %8612  ;;  %8632 = vpow2.f32 %v7619_v5  ;;  %v6428_v22 = vmul.f32 %v8611_v39, %v12413_v15  ;;  %v12500_v59 = vsel %vm6555_vm8, %v12479_v4, %v9538_v59   ;;  %v14108_v30 = vunpack.c.l.bf16 %v12405_v16 }
 0x6ec   : > { %14102 = vst [vmem:[#allocation177_spill] sm:$0xff] %v12490_v40  ;;  %14104 = vst [vmem:[#allocation178_spill] sm:$0xff] %v12500_v59  ;;  %v12502_v24 = vpop.f32.mrb[47].mxu0  ;;  %v12504_v10 = vpop.f32.mrb[45].mxu1  ;;  %v6471_v5 = vmul.f32 %v8613_v18, %v12317_v42  ;;  %8634 = vtanh.f32 %v5486_v9  ;;  %v5491_v3 = vadd.f32 %v12164_v63, %v14106_v23  ;;  %v14110_v42 = vld [vmem:[#allocation110_spill] sm:$0xff] }
 0x6ed   : > { %14105 = vst [vmem:[#allocation179_spill] sm:$0xff] %v12504_v10  ;;  %v8615_v61 = vpop.eup %8614  ;;  %v12510_v15 = vpop.f32.mrb[46].mxu1  ;;  %8636 = vpow2.f32 %v7632_v43  ;;  %v5501_v0 = vadd.f32 %v12243_v48, %v14108_v30  ;;  %v12515_v59 = vadd.f32 %v6428_v22, %v6412_v29  ;;  %v7604_v43 = vmul.f32 -1.442695, %v5500_v62  ;;  %v12542_v29 = vld [vmem:[%s12536_s3 + $0x8] sm:$0xff] }
 0x6ee   : > { %14107 = vst [vmem:[#allocation180_spill] sm:$0xff] %v12510_v15  ;;  %v8617_v39 = vpop.eup %8616  ;;  %v12517_v40 = vpop.f32.mrb[47].mxu1  ;;  %v12522_v48 = vsel %vm6551_vm4, %v6471_v5, %v14110_v42   ;;  %v7095_v63 = vsel %vm6551_vm4, %v6471_v5, 0.0  ;;  %8638 = vtanh.f32 %v5490_v46  ;;  %v14113_v62 = vunpack.c.h.bf16 %v12401_v31 }
 0x6ef   : > { %14109 = vst [vmem:[#allocation181_spill] sm:$0xff] %v12517_v40  ;;  %v8619_v10 = vpop.eup %8618  ;;  %14111 = vst [vmem:[#allocation110_spill] sm:$0xff] %v12522_v48  ;;  %v6159_v41 = vadd.f32 1.0, %v8617_v39  ;;  %8640 = vtanh.f32 %v12342_v32  ;;  %v12532_v57 = vsel %vm6556_vm9, %v12515_v59, %v9534_v57   ;;  %v7633_v32 = vmul.f32 -1.442695, %v5491_v3  ;;  %v12547_v5 = vpop.f32.mrb[48].mxu0 }
 0x6f0   : > { %v8621_v18 = vpop.eup %8620  ;;  %7113 = vst [vmem:[%s12223_s11 + $0x40] sm:$0xff] %v7095_v63  ;;  %v6364_v9 = vadd.f32 1.0, %v8619_v10  ;;  %14112 = vst [vmem:[#allocation182_spill] sm:$0xff] %v12532_v57  ;;  %v5504_v10 = vadd.f32 %v12246_v28, %v14113_v62  ;;  %v7620_v39 = vmul.f32 -1.442695, %v5501_v0  ;;  %v5040_v30 = vunpack.c.h.bf16 %v12440_v55  ;;  %v12551_v63 = vpop.f32.mrb[49].mxu0 }
 0x6f1   : > { %v8623_v46 = vpop.eup %8622  ;;  %8642 = vrcp.f32 %v6159_v41  ;;  %v6255_v22 = vadd.f32 1.0, %v8621_v18  ;;  %v12555_v31 = vpop.f32.mrb[50].mxu0  ;;  %v14115_v0 = vunpack.c.h.bf16 %v12405_v16  ;;  %v14118_v40 = vld [vmem:[#allocation156_spill] sm:$0xff] }
 0x6f2   : > { %v8625_v23 = vpop.eup %8624  ;;  %8644 = vrcp.f32 %v6364_v9  ;;  %v12557_v28 = vpop.f32.mrb[48].mxu1  ;;  %v7605_v57 = vmul.f32 -1.442695, %v5504_v10  ;;  %v14120_v16 = vld [vmem:[#allocation109_spill] sm:$0xff] }
 0x6f3   : > { %v8627_v48 = vpop.eup %8626  ;;  %8646 = vrcp.f32 %v6255_v22  ;;  %14114 = vst [vmem:[#allocation183_spill] sm:$0xff] %v12557_v28  ;;  %v5505_v62 = vadd.f32 %v12257_v19, %v14115_v0  ;;  %v12563_v42 = vpop.f32.mrb[51].mxu0  ;;  %v14117_v28 = vunpack.c.l.bf16 %v12463_v13  ;;  %v14122_v0 = vld [vmem:[#allocation151_spill] sm:$0xff] }
 0x6f4   : > { %v8629_v18 = vpop.eup %8628  ;;  %v6472_v9 = vmul.f32 %v8627_v48, %v12389_v26  ;;  %8648 = vpow2.f32 %v7604_v43  ;;  %v12565_v22 = vpop.f32.mrb[49].mxu1 }
 0x6f5   : > { %14116 = vst [vmem:[#allocation184_spill] sm:$0xff] %v12565_v22  ;;  %v12567_v41 = vpop.eup %8630  ;;  %v6160_v3 = vadd.f32 1.0, %v8629_v18  ;;  %8650 = vpow2.f32 %v7633_v32  ;;  %v5495_v15 = vadd.f32 %v14118_v40, %v14117_v28  ;;  %v12572_v48 = vpop.f32.mrb[50].mxu1  ;;  %v6413_v18 = vmul.f32 %v14122_v0, %v8615_v61 }
 0x6f6   : > { %14119 = vst [vmem:[#allocation156_spill] sm:$0xff] %v12572_v48  ;;  %v8633_v26 = vpop.eup %8632  ;;  %v12577_v19 = vsel %vm6552_vm5, %v6472_v9, %v14120_v16   ;;  %v7096_v43 = vsel %vm6552_vm5, %v6472_v9, 0.0  ;;  %8652 = vpow2.f32 %v7620_v39  ;;  %v12582_v32 = vpop.f32.mrb[51].mxu1  ;;  %v7621_v16 = vmul.f32 -1.442695, %v5505_v62  ;;  %v12597_v48 = vld [vmem:[%s11989_s30 + $0xf0] sm:$0xff] }
 0x6f7   : > { %14121 = vst [vmem:[#allocation109_spill] sm:$0xff] %v12577_v19  ;;  %14123 = vst [vmem:[#allocation151_spill] sm:$0xff] %v12582_v32  ;;  %v8635_v10 = vpop.eup %8634  ;;  %8654 = vrcp.f32 %v6160_v3  ;;  %v6256_v40 = vadd.f32 1.0, %v8633_v26  ;;  %v6414_v9 = vmul.f32 %v14124_v33, %v8625_v23  ;;  %v12589_v39 = vpop.permute.xlu0 %6530  ;;  %v14125_v3 = vunpack.c.l.bf16 %v12440_v55  ;;  %v14126_v26 = vld [vmem:[#allocation155_spill] sm:$0xff] }
 0x6f8   : > { %7114 = vst [vmem:[%s12223_s11 + $0x50] sm:$0xff] %v7096_v43  ;;  %v8637_v22 = vpop.eup %8636  ;;  %8656 = vtanh.f32 %v12394_v34  ;;  %v6429_v61 = vmul.f32 %v8635_v10, %v12466_v44  ;;  %vm6557_vm10 = vcmp.eq.s32.totalorder %v12589_v39, 1  ;;  %v12599_v34 = vpop.f32.mrb[52].mxu0  ;;  %v7634_v23 = vmul.f32 -1.442695, %v5495_v15 }
 0x6f9   : > { %v8639_v19 = vpop.eup %8638  ;;  %8658 = vrcp.f32 %v6256_v40  ;;  %v6365_v43 = vadd.f32 1.0, %v8637_v22  ;;  %v5494_v56 = vadd.f32 %v14126_v26, %v14125_v3  ;;  %v12601_v28 = vpop.permute.xlu1 %6533  ;;  %v5498_v3 = vadd.f32 %v12199_v53, %v5040_v30  ;;  %v12613_v26 = vld [vmem:[%s11989_s30 + $0xf8] sm:$0xff] }
 0x6fa   : > { %v8641_v62 = vpop.eup %8640  ;;  %8660 = vpow2.f32 %v7605_v57  ;;  %v6430_v44 = vmul.f32 %v8639_v19, %v8623_v46  ;;  %v12603_v10 = vadd.f32 %v6429_v61, %v6413_v18  ;;  %v12605_v22 = vpop.f32.mrb[53].mxu0  ;;  %vm6558_vm11 = vcmp.eq.s32.totalorder %v12601_v28, 1 }
 0x6fb   : > { %14127 = vst [vmem:[#allocation150_spill] sm:$0xff] %v12605_v22  ;;  %v12607_v55 = vpop.eup %8642  ;;  %8662 = vrcp.f32 %v6365_v43  ;;  %v6473_v40 = vmul.f32 %v8641_v62, %v12445_v7  ;;  %v12615_v57 = vpop.f32.mrb[54].mxu0  ;;  %v14132_v62 = vld [vmem:[#allocation108_spill] sm:$0xff]  ;;  %v14166_v22 = vunpack.c.h.bf16 %v12613_v26 }
 0x6fc   : > { %v12617_v15 = vpop.f32.mrb[52].mxu1  ;;  %v12619_v46 = vpop.eup %8644  ;;  %8664 = vpow2.f32 %v7621_v16  ;;  %v12621_v18 = vadd.f32 %v6430_v44, %v6414_v9  ;;  %v12627_v7 = vsel %vm6557_vm10, %v12603_v10, %v14122_v0   ;;  %v14134_v0 = vunpack.c.h.bf16 %v12463_v13  ;;  %v14135_v44 = vld [vmem:[#allocation157_spill] sm:$0xff] }
 0x6fd   : > { %14128 = vst [vmem:[#allocation155_spill] sm:$0xff] %v12617_v15  ;;  %14129 = vst [vmem:[#allocation185_spill] sm:$0xff] %v12627_v7  ;;  %v12630_v61 = vpop.f32.mrb[55].mxu0  ;;  %v12632_v19 = vpop.f32.mrb[53].mxu1  ;;  %v12637_v15 = vsel %vm6553_vm6, %v6473_v40, %v14132_v62   ;;  %v7097_v9 = vsel %vm6553_vm6, %v6473_v40, 0.0  ;;  %8666 = vtanh.f32 %v5494_v56  ;;  %v5045_v56 = vunpack.c.l.bf16 %v12613_v26 }
 0x6fe   : > { %14130 = vst [vmem:[#allocation186_spill] sm:$0xff] %v12630_v61  ;;  %14131 = vst [vmem:[#allocation187_spill] sm:$0xff] %v12632_v19  ;;  %v8647_v43 = vpop.eup %8646  ;;  %v5499_v7 = vadd.f32 %v14135_v44, %v14134_v0  ;;  %v12644_v53 = vpop.f32.mrb[54].mxu1  ;;  %8668 = vpow2.f32 %v7634_v23  ;;  %v14137_v19 = vunpack.c.l.bf16 %v12539_v49  ;;  %v12654_v2 = vsel %vm6558_vm11, %v12621_v18, %v14124_v33   ;;  %v12661_v23 = vld [vmem:[%s12536_s3 + $0x20] sm:$0xff] }
 0x6ff   : > { %14133 = vst [vmem:[#allocation108_spill] sm:$0xff] %v12637_v15  ;;  %14136 = vst [vmem:[#allocation157_spill] sm:$0xff] %v12644_v53  ;;  %v8649_v30 = vpop.eup %8648  ;;  %v12657_v13 = vpop.f32.mrb[55].mxu1  ;;  %8670 = vtanh.f32 %v5498_v3  ;;  %v12740_v61 = vld [vmem:[%s12536_s3 + $0x40] sm:$0xff] }
 0x700   : > { %7115 = vst [vmem:[%s12223_s11 + $0x60] sm:$0xff] %v7097_v9  ;;  %v6001_v32 = vadd.f32 %v12296_v51, %v14137_v19  ;;  %14138 = vst [vmem:[#allocation188_spill] sm:$0xff] %v12654_v2  ;;  %v8651_v15 = vpop.eup %8650  ;;  %v6161_v62 = vadd.f32 1.0, %v8649_v30  ;;  %8672 = vtanh.f32 %v12515_v59  ;;  %v14140_v51 = vunpack.c.l.bf16 %v12542_v29  ;;  %v12668_v3 = vpop.f32.mrb[56].mxu0 }
 0x701   : > { %14139 = vst [vmem:[#allocation189_spill] sm:$0xff] %v12657_v13  ;;  %v8653_v0 = vpop.eup %8652  ;;  %v6366_v44 = vadd.f32 1.0, %v8651_v15  ;;  %v7635_v16 = vmul.f32 -1.442695, %v5499_v7  ;;  %14141 = vst [vmem:[#allocation190_spill] sm:$0xff] %v12668_v3  ;;  %v14142_v15 = vunpack.c.h.bf16 %v12539_v49  ;;  %v12673_v13 = vpop.permute.xlu0 %6536 }
 0x702   : > { %v6002_v33 = vadd.f32 %v12298_v47, %v14140_v51  ;;  %v8655_v19 = vpop.eup %8654  ;;  %8674 = vrcp.f32 %v6161_v62  ;;  %v6257_v2 = vadd.f32 1.0, %v8653_v0  ;;  %v7638_v40 = vmul.f32 -1.442695, %v6001_v32  ;;  %v12676_v51 = vpop.f32.mrb[57].mxu0  ;;  %v12680_v0 = vld [vmem:[%s12536_s3 + $0x28] sm:$0xff]  ;;  %v14149_v47 = vld [vmem:[#allocation107_spill] sm:$0xff] }
 0x703   : > { %v8657_v9 = vpop.eup %8656  ;;  %8676 = vrcp.f32 %v6366_v44  ;;  %v6005_v59 = vadd.f32 %v12302_v37, %v14142_v15  ;;  %14143 = vst [vmem:[#allocation191_spill] sm:$0xff] %v12676_v51  ;;  %v12682_v30 = vpop.f32.mrb[58].mxu0  ;;  %v14146_v44 = vunpack.c.h.bf16 %v12542_v29  ;;  %vm6559_vm12 = vcmp.eq.s32.totalorder %v12673_v13, 1 }
 0x704   : > { %v8659_v62 = vpop.eup %8658  ;;  %8678 = vrcp.f32 %v6257_v2  ;;  %v6474_v7 = vmul.f32 %v8657_v9, %v12473_v25  ;;  %14144 = vst [vmem:[#allocation192_spill] sm:$0xff] %v12682_v30  ;;  %v12684_v32 = vpop.f32.mrb[56].mxu1  ;;  %v7654_v37 = vmul.f32 -1.442695, %v6002_v33 }
 0x705   : > { %14145 = vst [vmem:[#allocation193_spill] sm:$0xff] %v12684_v32  ;;  %v8661_v49 = vpop.eup %8660  ;;  %8680 = vtanh.f32 %v12479_v4  ;;  %v6006_v15 = vadd.f32 %v12308_v11, %v14146_v44  ;;  %v12691_v2 = vpop.f32.mrb[59].mxu0  ;;  %v7639_v44 = vmul.f32 -1.442695, %v6005_v59 }
 0x706   : > { %14147 = vst [vmem:[#allocation194_spill] sm:$0xff] %v12691_v2  ;;  %v12693_v25 = vpop.f32.mrb[57].mxu1  ;;  %v12695_v9 = vpop.eup %8662  ;;  %v12700_v32 = vsel %vm6554_vm7, %v6474_v7, %v14149_v47   ;;  %v7098_v4 = vsel %vm6554_vm7, %v6474_v7, 0.0  ;;  %v6162_v29 = vadd.f32 1.0, %v8661_v49  ;;  %8682 = vpow2.f32 %v7635_v16  ;;  %v14154_v7 = vld [vmem:[#allocation161_spill] sm:$0xff]  ;;  %v12714_v49 = vld [vmem:[%s12536_s3 + $0x10] sm:$0xff] }
 0x707   : > { %14148 = vst [vmem:[#allocation195_spill] sm:$0xff] %v12693_v25  ;;  %14150 = vst [vmem:[#allocation107_spill] sm:$0xff] %v12700_v32  ;;  %v12704_v11 = vpop.f32.mrb[58].mxu1  ;;  %v8665_v33 = vpop.eup %8664  ;;  %8684 = vpow2.f32 %v7638_v40  ;;  %v14152_v25 = vld [vmem:[#allocation149_spill] sm:$0xff]  ;;  %v5503_v32 = vadd.f32 %v14154_v7, %v5045_v56  ;;  %v7655_v40 = vmul.f32 -1.442695, %v6006_v15  ;;  %v5556_v56 = vunpack.c.h.bf16 %v12680_v0 }
 0x708   : > { %14151 = vst [vmem:[#allocation196_spill] sm:$0xff] %v12704_v11  ;;  %7116 = vst [vmem:[%s12223_s11 + $0x70] sm:$0xff] %v7098_v4  ;;  %v6415_v53 = vmul.f32 %v14152_v25, %v8647_v43  ;;  %v12709_v51 = vpop.f32.mrb[59].mxu1  ;;  %v8667_v47 = vpop.eup %8666  ;;  %8686 = vrcp.f32 %v6162_v29  ;;  %v6258_v12 = vadd.f32 1.0, %v8665_v33  ;;  %v14155_v4 = vld [vmem:[#allocation148_spill] sm:$0xff]  ;;  %v12721_v11 = vld [vmem:[%s12536_s3 + $0x18] sm:$0xff] }
 0x709   : > { %14153 = vst [vmem:[#allocation149_spill] sm:$0xff] %v12709_v51  ;;  %v8669_v30 = vpop.eup %8668  ;;  %8688 = vpow2.f32 %v7654_v37  ;;  %v12716_v59 = vpop.permute.xlu1 %6539  ;;  %v6416_v43 = vmul.f32 %v14155_v4, %v8659_v62  ;;  %v6431_v2 = vmul.f32 %v8667_v47, %v12607_v55  ;;  %v14158_v16 = vld [vmem:[#allocation160_spill] sm:$0xff] }
 0x70a   : > { %v8671_v51 = vpop.eup %8670  ;;  %8690 = vrcp.f32 %v6258_v12  ;;  %v6367_v29 = vadd.f32 1.0, %v8669_v30  ;;  %vm6560_vm13 = vcmp.eq.s32.totalorder %v12716_v59, 1  ;;  %v12725_v33 = vpop.f32.mrb[60].mxu0  ;;  %v14157_v12 = vunpack.c.l.bf16 %v12597_v48 }
 0x70b   : > { %14156 = vst [vmem:[#allocation161_spill] sm:$0xff] %v12725_v33  ;;  %v8673_v37 = vpop.eup %8672  ;;  %8692 = vpow2.f32 %v7639_v44  ;;  %v6432_v15 = vmul.f32 %v8671_v51, %v8655_v19  ;;  %v12727_v7 = vadd.f32 %v6431_v2, %v6415_v53  ;;  %v12730_v55 = vpop.f32.mrb[61].mxu0  ;;  %v5546_v33 = vunpack.c.l.bf16 %v12721_v11 }
 0x70c   : > { %v12732_v47 = vpop.eup %8674  ;;  %8694 = vrcp.f32 %v6367_v29  ;;  %v6476_v30 = vmul.f32 %v8673_v37, %v12619_v46  ;;  %v5502_v3 = vadd.f32 %v14158_v16, %v14157_v12  ;;  %v12742_v19 = vpop.f32.mrb[62].mxu0  ;;  %v7636_v2 = vmul.f32 -1.442695, %v5503_v32  ;;  %v14160_v12 = vld [vmem:[#allocation105_spill] sm:$0xff] }
 0x70d   : > { %v12744_v53 = vpop.f32.mrb[60].mxu1  ;;  %v12746_v51 = vpop.eup %8676  ;;  %8696 = vpow2.f32 %v7655_v40  ;;  %v6448_v44 = vadd.f32 %v6432_v15, %v6416_v43  ;;  %v12752_v46 = vsel %vm6559_vm12, %v12727_v7, %v14152_v25   ;;  %v14162_v40 = vunpack.c.h.bf16 %v12597_v48  ;;  %v14163_v43 = vld [vmem:[#allocation162_spill] sm:$0xff] }
 0x70e   : > { %14159 = vst [vmem:[#allocation197_spill] sm:$0xff] %v12752_v46  ;;  %v12754_v16 = vpop.f32.mrb[63].mxu0  ;;  %v12756_v29 = vpop.f32.mrb[61].mxu1  ;;  %v12761_v62 = vsel %vm6556_vm9, %v6476_v30, %v14160_v12   ;;  %v7100_v32 = vsel %vm6556_vm9, %v6476_v30, 0.0  ;;  %8698 = vtanh.f32 %v12621_v18  ;;  %v5559_v30 = vunpack.c.l.bf16 %v12740_v61 }
 0x70f   : > { %v8679_v37 = vpop.eup %8678  ;;  %14161 = vst [vmem:[#allocation105_spill] sm:$0xff] %v12761_v62  ;;  %v5506_v25 = vadd.f32 %v14163_v43, %v14162_v40  ;;  %v12769_v15 = vpop.f32.mrb[62].mxu1  ;;  %7118 = vst [vmem:[%s12223_s11 + $0x90] sm:$0xff] %v7100_v32  ;;  %8700 = vtanh.f32 %v12603_v10  ;;  %v12776_v12 = vsel %vm6560_vm13, %v6448_v44, %v14155_v4   ;;  %v14167_v4 = vld [vmem:[#allocation163_spill] sm:$0xff]  ;;  %v14172_v32 = vunpack.c.h.bf16 %v12661_v23 }
 0x710   : > { %14164 = vst [vmem:[#allocation148_spill] sm:$0xff] %v12769_v15  ;;  %v8681_v46 = vpop.eup %8680  ;;  %14165 = vst [vmem:[#allocation198_spill] sm:$0xff] %v12776_v12  ;;  %v12780_v18 = vpop.f32.mrb[63].mxu1  ;;  %8702 = vtanh.f32 %v5502_v3  ;;  %v5507_v12 = vadd.f32 %v14167_v4, %v14166_v22  ;;  %v14171_v4 = vunpack.c.l.bf16 %v12680_v0 }
 0x711   : > { %v8683_v48 = vpop.eup %8682  ;;  %v6475_v40 = vmul.f32 %v8681_v46, %v12567_v41  ;;  %8704 = vpow2.f32 %v7636_v2  ;;  %v14170_v2 = vunpack.c.l.bf16 %v12661_v23  ;;  %v6013_v21 = vadd.f32 %v12356_v14, %v14172_v32  ;;  %v12810_v0 = vpop.permute.xlu0 %6542 }
 0x712   : > { %v8685_v43 = vpop.eup %8684  ;;  %v6368_v10 = vadd.f32 1.0, %v8683_v48  ;;  %8706 = vtanh.f32 %v5506_v25  ;;  %v7637_v25 = vmul.f32 -1.442695, %v5507_v12  ;;  %vm6561_vm15 = vcmp.eq.s32.totalorder %v12810_v0, 1 }
 0x713   : > { %v8687_v62 = vpop.eup %8686  ;;  %v12790_v22 = vsel %vm6555_vm8, %v6475_v40, %v14168_v17   ;;  %v7099_v15 = vsel %vm6555_vm8, %v6475_v40, 0.0  ;;  %v6643_v41 = vadd.f32 1.0, %v8685_v43  ;;  %v6009_v26 = vadd.f32 %v12338_v27, %v14170_v2  ;;  %v12805_v43 = vpop.permute.xlu1 %6545  ;;  %v14173_v2 = vld [vmem:[#allocation147_spill] sm:$0xff] }
 0x714   : > { %14169 = vst [vmem:[#allocation106_spill] sm:$0xff] %v12790_v22  ;;  %v8689_v3 = vpop.eup %8688  ;;  %7117 = vst [vmem:[%s12223_s11 + $0x80] sm:$0xff] %v7099_v15  ;;  %8708 = vrcp.f32 %v6368_v10  ;;  %v6010_v17 = vadd.f32 %v12346_v54, %v14171_v4  ;;  %v6014_v15 = vadd.f32 %v12377_v38, %v5556_v56  ;;  %vm6562_vm14 = vcmp.eq.s32.totalorder %v12805_v43, 1  ;;  %v14228_v22 = vld [vmem:[#allocation121_spill] sm:$0xff] }
 0x715   : > { %v8691_v46 = vpop.eup %8690  ;;  %8710 = vrcp.f32 %v6643_v41  ;;  %v6739_v48 = vadd.f32 1.0, %v8689_v3  ;;  %v7640_v23 = vmul.f32 -1.442695, %v6009_v26  ;;  %v6004_v14 = vadd.f32 %v12310_v60, %v5546_v33  ;;  %v14174_v26 = vld [vmem:[#allocation146_spill] sm:$0xff] }
 0x716   : > { %v8693_v40 = vpop.eup %8692  ;;  %8712 = vtanh.f32 %v6448_v44  ;;  %v7656_v56 = vmul.f32 -1.442695, %v6010_v17  ;;  %v7641_v32 = vmul.f32 -1.442695, %v6013_v21  ;;  %v7657_v3 = vmul.f32 -1.442695, %v6014_v15 }
 0x717   : > { %v12807_v10 = vpop.eup %8694  ;;  %8714 = vrcp.f32 %v6739_v48  ;;  %v6644_v27 = vadd.f32 1.0, %v8693_v40  ;;  %v6417_v48 = vmul.f32 %v14173_v2, %v8679_v37  ;;  %v6418_v60 = vmul.f32 %v14174_v26, %v8691_v46  ;;  %v14175_v21 = vld [vmem:[#allocation103_spill] sm:$0xff]  ;;  %v5520_v46 = vld [vmem:[%s12536_s3 + $0x48] sm:$0xff]  ;;  %v12889_v13 = vpop.permute.xlu1 %6999 }
 0x718   : > { %v8697_v54 = vpop.eup %8696  ;;  %8716 = vtanh.f32 %v12727_v7  ;;  %v6017_v33 = vadd.f32 %v12418_v36, %v5559_v30  ;;  %vm7044_vm0 = vcmp.eq.s32.totalorder %v12889_v13, 1 }
 0x719   : > { %v8699_v44 = vpop.eup %8698  ;;  %8718 = vrcp.f32 %v6644_v27  ;;  %v6740_v38 = vadd.f32 1.0, %v8697_v54  ;;  %v14178_v54 = vld [vmem:[#allocation165_spill] sm:$0xff] }
 0x71a   : > { %v8701_v12 = vpop.eup %8700  ;;  %v6478_v41 = vmul.f32 %v8699_v44, %v12746_v51  ;;  %8720 = vpow2.f32 %v7637_v25 }
 0x71b   : > { %v8703_v4 = vpop.eup %8702  ;;  %8722 = vrcp.f32 %v6740_v38  ;;  %v6477_v7 = vmul.f32 %v8701_v12, %v12695_v9  ;;  %v14176_v9 = vld [vmem:[#allocation104_spill] sm:$0xff]  ;;  %v7670_v38 = vmul.f32 -1.442695, %v6004_v14  ;;  %v14179_v12 = vunpack.c.h.bf16 %v12721_v11 }
 0x71c   : > { %v8705_v17 = vpop.eup %8704  ;;  %v12823_v21 = vsel %vm6558_vm11, %v6478_v41, %v14175_v21   ;;  %v7102_v51 = vsel %vm6558_vm11, %v6478_v41, 0.0  ;;  %8724 = vpow2.f32 %v7640_v23  ;;  %v6433_v37 = vmul.f32 %v8703_v4, %v12732_v47  ;;  %v14181_v11 = vld [vmem:[#allocation166_spill] sm:$0xff] }
 0x71d   : > { %v8707_v40 = vpop.eup %8706  ;;  %7120 = vst [vmem:[%s12223_s11 + $0xb0] sm:$0xff] %v7102_v51  ;;  %v12832_v23 = vsel %vm6557_vm10, %v6477_v7, %v14176_v9   ;;  %v7101_v36 = vsel %vm6557_vm10, %v6477_v7, 0.0  ;;  %v6369_v30 = vadd.f32 1.0, %v8705_v17  ;;  %8726 = vpow2.f32 %v7656_v56  ;;  %v5517_v9 = vld [vmem:[%s12536_s3 + $0x30] sm:$0xff]  ;;  %14294 = vst [vmem:[#allocation103_spill] sm:$0xff] %v12823_v21 }
 0x71e   : > { %v8709_v25 = vpop.eup %8708  ;;  %7119 = vst [vmem:[%s12223_s11 + $0xa0] sm:$0xff] %v7101_v36  ;;  %8728 = vpow2.f32 %v7641_v32  ;;  %v6434_v28 = vmul.f32 %v8707_v40, %v8687_v62  ;;  %v6449_v15 = vadd.f32 %v6433_v37, %v6417_v48  ;;  %v14177_v47 = vunpack.c.l.bf16 %v12714_v49  ;;  %v14183_v40 = vld [vmem:[#allocation101_spill] sm:$0xff]  ;;  %14295 = vst [vmem:[#allocation104_spill] sm:$0xff] %v12832_v23 }
 0x71f   : > { %v12838_v27 = vpop.eup %8710  ;;  %8730 = vrcp.f32 %v6369_v30  ;;  %v6008_v39 = vadd.f32 %v12326_v50, %v14179_v12  ;;  %v5560_v32 = vunpack.c.l.bf16 %v5520_v46  ;;  %v14180_v14 = vunpack.c.h.bf16 %v12714_v49  ;;  %v12876_v30 = vld [vmem:[%s12536_s3 + $0x38] sm:$0xff] }
 0x720   : > { %v6003_v44 = vadd.f32 %v14178_v54, %v14177_v47  ;;  %v8713_v41 = vpop.eup %8712  ;;  %8732 = vpow2.f32 %v7657_v3  ;;  %v6450_v56 = vadd.f32 %v6434_v28, %v6418_v60  ;;  %v12849_v62 = vsel %vm6561_vm15, %v6449_v15, %v14173_v2  }
 0x721   : > { %v12851_v48 = vpop.eup %8714  ;;  %v6480_v4 = vmul.f32 %v8713_v41, %v8709_v25  ;;  %8734 = vtanh.f32 %v6449_v15  ;;  %v6007_v7 = vadd.f32 %v14181_v11, %v14180_v14  ;;  %v7642_v50 = vmul.f32 -1.442695, %v6017_v33  ;;  %v14184_v25 = vld [vmem:[#allocation102_spill] sm:$0xff]  ;;  %v12894_v11 = vld [vmem:[%s12536_s3 + $0x60] sm:$0xff] }
 0x722   : > { %v8717_v17 = vpop.eup %8716  ;;  %8736 = vtanh.f32 %v6450_v56  ;;  %v12859_v3 = vsel %vm6562_vm14, %v6450_v56, %v14174_v26   ;;  %v5563_v2 = vunpack.c.h.bf16 %v12740_v61  ;;  %v5564_v51 = vunpack.c.h.bf16 %v5520_v46 }
 0x723   : > { %v14182_v60 = vmov %v12859_v3  ;;  %v12862_v37 = vpop.eup %8718  ;;  %v12867_v28 = vsel %vm6560_vm13, %v6480_v4, %v14183_v40   ;;  %v7104_v49 = vsel %vm6560_vm13, %v6480_v4, 0.0  ;;  %v6479_v33 = vmul.f32 %v8717_v17, %v12807_v10  ;;  %v12891_v4 = vpop.permute.xlu0 %6996 }
 0x724   : > { %8738 = vtanh.f32 %v6003_v44  ;;  %v8721_v26 = vpop.eup %8720  ;;  %7122 = vst [vmem:[%s12223_s11 + $0xd0] sm:$0xff] %v7104_v49  ;;  %v7671_v61 = vmul.f32 -1.442695, %v6008_v39  ;;  %v6018_v36 = vadd.f32 %v12422_v58, %v5560_v32  ;;  %v6021_v54 = vadd.f32 %v12426_v6, %v5563_v2  ;;  %14292 = vst [vmem:[#allocation101_spill] sm:$0xff] %v12867_v28 }
 0x725   : > { %8740 = vpow2.f32 %v7670_v38  ;;  %v8723_v46 = vpop.eup %8722  ;;  %v12881_v15 = vsel %vm6559_vm12, %v6479_v33, %v14184_v25   ;;  %v7103_v59 = vsel %vm6559_vm12, %v6479_v33, 0.0  ;;  %v6370_v10 = vadd.f32 1.0, %v8721_v26  ;;  %v14186_v33 = vld [vmem:[#allocation170_spill] sm:$0xff] }
 0x726   : > { %v14185_v56 = vmov %v12881_v15  ;;  %8742 = vtanh.f32 %v6007_v7  ;;  %v8725_v47 = vpop.eup %8724  ;;  %7121 = vst [vmem:[%s12223_s11 + $0xc0] sm:$0xff] %v7103_v59  ;;  %v6022_v58 = vadd.f32 %v12435_v52, %v5564_v51  ;;  %v5553_v44 = vunpack.c.l.bf16 %v5517_v9  ;;  %v12900_v51 = vld [vmem:[%s12536_s3 + $0x68] sm:$0xff] }
 0x727   : > { %8744 = vpow2.f32 %v7642_v50  ;;  %v8727_v38 = vpop.eup %8726  ;;  %v6645_v12 = vadd.f32 1.0, %v8725_v47  ;;  %v5554_v39 = vunpack.c.l.bf16 %v12876_v30  ;;  %v7658_v14 = vmul.f32 -1.442695, %v6018_v36  ;;  %14293 = vst [vmem:[#allocation102_spill] sm:$0xff] %v14185_v56  ;;  %v14312_v56 = vld [vmem:[#allocation167_spill] sm:$0xff] }
 0x728   : > { %8746 = vrcp.f32 %v6370_v10  ;;  %v8729_v41 = vpop.eup %8728  ;;  %v6741_v32 = vadd.f32 1.0, %v8727_v38  ;;  %vm7043_vm1 = vcmp.eq.s32.totalorder %v12891_v4, 1  ;;  %v5557_v7 = vunpack.c.h.bf16 %v5517_v9  ;;  %v14187_v9 = vld [vmem:[#allocation130_spill] sm:$0xff] }
 0x729   : > { %8748 = vpow2.f32 %v7671_v61  ;;  %v8731_v6 = vpop.eup %8730  ;;  %v6646_v52 = vadd.f32 1.0, %v8729_v41  ;;  %v7643_v17 = vmul.f32 -1.442695, %v6021_v54  ;;  %v7659_v3 = vmul.f32 -1.442695, %v6022_v58  ;;  %v14189_v54 = vld [vmem:[#allocation171_spill] sm:$0xff] }
 0x72a   : > { %8750 = vrcp.f32 %v6645_v12  ;;  %v8733_v50 = vpop.eup %8732  ;;  %v6011_v2 = vadd.f32 %v12358_v45, %v5553_v44  ;;  %v6012_v26 = vadd.f32 %v14186_v33, %v5554_v39  ;;  %v5567_v61 = vunpack.c.l.bf16 %v12894_v11  ;;  %v14188_v45 = vld [vmem:[#allocation129_spill] sm:$0xff] }
 0x72b   : > { %8752 = vrcp.f32 %v6741_v32  ;;  %v8735_v40 = vpop.eup %8734  ;;  %v6742_v49 = vadd.f32 1.0, %v8733_v50  ;;  %v6899_v15 = vmul.f32 %v14187_v9, %v12851_v48  ;;  %v5558_v59 = vunpack.c.h.bf16 %v12876_v30  ;;  %v14190_v12 = vld [vmem:[#allocation153_spill] sm:$0xff] }
 0x72c   : > { %8754 = vrcp.f32 %v6646_v52  ;;  %v8737_v36 = vpop.eup %8736  ;;  %v6481_v25 = vmul.f32 %v8735_v40, %v8731_v6  ;;  %v6900_v47 = vmul.f32 %v14188_v45, %v8723_v46  ;;  %v6015_v58 = vadd.f32 %v14189_v54, %v5557_v7  ;;  %v14191_v7 = vld [vmem:[#allocation172_spill] sm:$0xff] }
 0x72d   : > { %8756 = vpow2.f32 %v7658_v14  ;;  %v5568_v44 = vunpack.c.l.bf16 %v12900_v51  ;;  %v7672_v46 = vmul.f32 -1.442695, %v6012_v26  ;;  %v6025_v32 = vadd.f32 %v12471_v35, %v5567_v61 }
 0x72e   : > { %v8739_v10 = vpop.eup %8738  ;;  %8758 = vrcp.f32 %v6742_v49  ;;  %v12913_v33 = vsel %vm6561_vm15, %v6481_v25, %v14190_v12   ;;  %v7105_v48 = vsel %vm6561_vm15, %v6481_v25, 0.0  ;;  %v6016_v50 = vadd.f32 %v14191_v7, %v5558_v59  ;;  %v12931_v59 = vld [vmem:[%s12536_s3 + $0x58] sm:$0xff] }
 0x72f   : > { %v8741_v38 = vpop.eup %8740  ;;  %v6915_v39 = vmul.f32 %v8739_v10, %v12838_v27  ;;  %8760 = vpow2.f32 %v7643_v17  ;;  %7123 = vst [vmem:[%s12223_s11 + $0xe0] sm:$0xff] %v7105_v48  ;;  %v14192_v27 = vld [vmem:[#allocation176_spill] sm:$0xff]  ;;  %v5571_v49 = vunpack.c.h.bf16 %v12894_v11  ;;  %v7644_v61 = vmul.f32 -1.442695, %v6025_v32 }
 0x730   : > { %v8743_v30 = vpop.eup %8742  ;;  %v6851_v41 = vadd.f32 1.0, %v8741_v38  ;;  %8762 = vpow2.f32 %v7659_v3  ;;  %v6026_v17 = vadd.f32 %v14192_v27, %v5568_v44  ;;  %v14193_v10 = vld [vmem:[#allocation152_spill] sm:$0xff]  ;;  %v7673_v12 = vmul.f32 -1.442695, %v6016_v50  ;;  %v12956_v27 = vpop.permute.xlu1 %7005 }
 0x731   : > { %v8745_v14 = vpop.eup %8744  ;;  %v6916_v6 = vmul.f32 %v8743_v30, %v12862_v37  ;;  %v6931_v52 = vadd.f32 %v6915_v39, %v6899_v15  ;;  %8764 = vtanh.f32 %v6011_v2  ;;  %v5572_v15 = vunpack.c.h.bf16 %v12900_v51  ;;  %v5521_v44 = vld [vmem:[%s12536_s3 + $0x50] sm:$0xff] }
 0x732   : > { %v8747_v0 = vpop.eup %8746  ;;  %8766 = vrcp.f32 %v6851_v41  ;;  %v6647_v40 = vadd.f32 1.0, %v8745_v14  ;;  %v6029_v51 = vadd.f32 %v12488_v20, %v5571_v49  ;;  %v5562_v43 = vunpack.c.l.bf16 %v12931_v59 }
 0x733   : > { %v8749_v25 = vpop.eup %8748  ;;  %v6482_v3 = vmul.f32 %v8747_v0, %v8737_v36  ;;  %v6932_v26 = vadd.f32 %v6916_v6, %v6900_v47  ;;  %8768 = vtanh.f32 %v6931_v52  ;;  %v12927_v35 = vsel %vm7043_vm1, %v6931_v52, %v14187_v9   ;;  %v14195_v52 = vld [vmem:[#allocation128_spill] sm:$0xff]  ;;  %v12954_v0 = vld [vmem:[%s12536_s3 + $0x80] sm:$0xff] }
 0x734   : > { %v8751_v37 = vpop.eup %8750  ;;  %8770 = vrcp.f32 %v6647_v40  ;;  %v6852_v2 = vadd.f32 1.0, %v8749_v25  ;;  %v6030_v32 = vadd.f32 %v12502_v24, %v5572_v15  ;;  %v5561_v14 = vunpack.c.l.bf16 %v5521_v44 }
 0x735   : > { %v8753_v11 = vpop.eup %8752  ;;  %v12936_v36 = vsel %vm6562_vm14, %v6482_v3, %v14193_v10   ;;  %v7106_v47 = vsel %vm6562_vm14, %v6482_v3, 0.0  ;;  %8772 = vtanh.f32 %v6932_v26  ;;  %v12943_v9 = vsel %vm7044_vm0, %v6932_v26, %v14188_v45   ;;  %v5528_v3 = vld [vmem:[%s12536_s3 + $0x88] sm:$0xff] }
 0x736   : > { %v14194_v48 = vmov %v12936_v36  ;;  %v12945_v54 = vpop.eup %8754  ;;  %7124 = vst [vmem:[%s12223_s11 + $0xf0] sm:$0xff] %v7106_v47  ;;  %8774 = vrcp.f32 %v6852_v2  ;;  %v7660_v45 = vmul.f32 -1.442695, %v6026_v17  ;;  %v6901_v7 = vmul.f32 %v14195_v52, %v8753_v11 }
 0x737   : > { %v8757_v38 = vpop.eup %8756  ;;  %8776 = vpow2.f32 %v7672_v46  ;;  %v7645_v46 = vmul.f32 -1.442695, %v6029_v51  ;;  %v6020_v17 = vadd.f32 %v12437_v8, %v5562_v43  ;;  %v5565_v24 = vunpack.c.h.bf16 %v5521_v44 }
 0x738   : > { %v8759_v39 = vpop.eup %8758  ;;  %v6743_v30 = vadd.f32 1.0, %v8757_v38  ;;  %8778 = vtanh.f32 %v6015_v58  ;;  %v12958_v58 = vpop.permute.xlu0 %7002  ;;  %vm7046_vm2 = vcmp.eq.s32.totalorder %v12956_v27, 1  ;;  %v7661_v2 = vmul.f32 -1.442695, %v6030_v32 }
 0x739   : > { %v8761_v41 = vpop.eup %8760  ;;  %8780 = vpow2.f32 %v7644_v61  ;;  %vm7045_vm3 = vcmp.eq.s32.totalorder %v12958_v58, 1  ;;  %v14196_v61 = vld [vmem:[#allocation174_spill] sm:$0xff]  ;;  %v5575_v11 = vunpack.c.l.bf16 %v12954_v0  ;;  %v5566_v47 = vunpack.c.h.bf16 %v12931_v59 }
 0x73a   : > { %v8763_v6 = vpop.eup %8762  ;;  %8782 = vrcp.f32 %v6743_v30  ;;  %v6648_v20 = vadd.f32 1.0, %v8761_v41  ;;  %v6019_v15 = vadd.f32 %v14196_v61, %v5561_v14  ;;  %v7674_v44 = vmul.f32 -1.442695, %v6020_v17  ;;  %v14198_v30 = vld [vmem:[#allocation145_spill] sm:$0xff]  ;;  %v14200_v14 = vld [vmem:[#allocation127_spill] sm:$0xff] }
 0x73b   : > { %v8765_v50 = vpop.eup %8764  ;;  %v6744_v40 = vadd.f32 1.0, %v8763_v6  ;;  %8784 = vpow2.f32 %v7673_v12  ;;  %v5576_v12 = vunpack.c.l.bf16 %v5528_v3  ;;  %v6902_v6 = vmul.f32 %v14200_v14, %v8759_v39  ;;  %v14201_v39 = vld [vmem:[#allocation144_spill] sm:$0xff] }
 0x73c   : > { %v8767_v49 = vpop.eup %8766  ;;  %8786 = vrcp.f32 %v6648_v20  ;;  %v6917_v25 = vmul.f32 %v8765_v50, %v8751_v37  ;;  %v14197_v37 = vld [vmem:[#allocation175_spill] sm:$0xff]  ;;  %v6033_v4 = vadd.f32 %v12547_v5, %v5575_v11  ;;  %v13002_v11 = vld [vmem:[%s12536_s3 + $0x78] sm:$0xff] }
 0x73d   : > { %v8769_v26 = vpop.eup %8768  ;;  %8788 = vrcp.f32 %v6744_v40  ;;  %v6023_v38 = vadd.f32 %v14197_v37, %v5565_v24  ;;  %v6024_v40 = vadd.f32 %v12456_v1, %v5566_v47 }
 0x73e   : > { %v12966_v10 = vpop.eup %8770  ;;  %v6963_v36 = vmul.f32 %v8769_v26, %v8767_v49  ;;  %v6933_v8 = vadd.f32 %v6917_v25, %v6901_v7  ;;  %8790 = vpow2.f32 %v7660_v45  ;;  %v5580_v25 = vunpack.c.h.bf16 %v5528_v3 }
 0x73f   : > { %v8773_v51 = vpop.eup %8772  ;;  %8792 = vpow2.f32 %v7645_v46 }
 0x740   : > { %v8775_v43 = vpop.eup %8774  ;;  %v12973_v41 = vsel %vm7043_vm1, %v6963_v36, %v14198_v30   ;;  %v7125_v32 = vsel %vm7043_vm1, %v6963_v36, 0.0  ;;  %8794 = vtanh.f32 %v6933_v8  ;;  %v12980_v59 = vsel %vm7045_vm3, %v6933_v8, %v14195_v52   ;;  %v5525_v8 = vld [vmem:[%s12536_s3 + $0x70] sm:$0xff]  ;;  %v13016_v30 = vpop.permute.xlu0 %7008 }
 0x741   : > { %v14199_v50 = vmov %v12973_v41  ;;  %v8777_v45 = vpop.eup %8776  ;;  %7143 = vst [vmem:[%s12985_s10 + $0x8] sm:$0xff] %v7125_v32  ;;  %v6964_v7 = vmul.f32 %v8775_v43, %v8773_v51  ;;  %8796 = vpow2.f32 %v7661_v2  ;;  %v5579_v52 = vunpack.c.h.bf16 %v12954_v0 }
 0x742   : > { %v8779_v20 = vpop.eup %8778  ;;  %v6853_v46 = vadd.f32 1.0, %v8777_v45  ;;  %8798 = vtanh.f32 %v6019_v15  ;;  %v6034_v0 = vadd.f32 %v12551_v63, %v5576_v12  ;;  %v7646_v15 = vmul.f32 -1.442695, %v6033_v4  ;;  %v13014_v12 = vld [vmem:[%s12536_s3 + $0xa0] sm:$0xff] }
 0x743   : > { %v8781_v17 = vpop.eup %8780  ;;  %v12994_v26 = vsel %vm7044_vm0, %v6964_v7, %v14201_v39   ;;  %v7126_v24 = vsel %vm7044_vm0, %v6964_v7, 0.0  ;;  %v6918_v49 = vmul.f32 %v8779_v20, %v12945_v54  ;;  %8800 = vpow2.f32 %v7674_v44  ;;  %v14203_v39 = vld [vmem:[#allocation179_spill] sm:$0xff] }
 0x744   : > { %v8783_v5 = vpop.eup %8782  ;;  %7144 = vst [vmem:[%s12985_s10 + $0x18] sm:$0xff] %v7126_v24  ;;  %8802 = vrcp.f32 %v6853_v46  ;;  %v6649_v1 = vadd.f32 1.0, %v8781_v17  ;;  %v7675_v54 = vmul.f32 -1.442695, %v6024_v40  ;;  %v6037_v63 = vadd.f32 %v12555_v31, %v5579_v52 }
 0x745   : > { %v8785_v2 = vpop.eup %8784  ;;  %v6934_v61 = vadd.f32 %v6918_v49, %v6902_v6  ;;  %8804 = vtanh.f32 %v6023_v38  ;;  %v7662_v44 = vmul.f32 -1.442695, %v6034_v0  ;;  %v6038_v37 = vadd.f32 %v12563_v42, %v5580_v25  ;;  %v13018_v6 = vpop.permute.xlu1 %7011  ;;  %v14202_v42 = vld [vmem:[#allocation126_spill] sm:$0xff]  ;;  %v14204_v0 = vld [vmem:[#allocation177_spill] sm:$0xff] }
 0x746   : > { %v8787_v13 = vpop.eup %8786  ;;  %8806 = vrcp.f32 %v6649_v1  ;;  %v6854_v36 = vadd.f32 1.0, %v8785_v2  ;;  %v5570_v38 = vunpack.c.l.bf16 %v13002_v11  ;;  %v5569_v32 = vunpack.c.l.bf16 %v5525_v8  ;;  %v14205_v2 = vld [vmem:[#allocation180_spill] sm:$0xff] }
 0x747   : > { %v8789_v47 = vpop.eup %8788  ;;  %8808 = vtanh.f32 %v6934_v61  ;;  %v13008_v51 = vsel %vm7046_vm2, %v6934_v61, %v14200_v14   ;;  %v5573_v45 = vunpack.c.h.bf16 %v5525_v8  ;;  %vm7047_vm4 = vcmp.eq.s32.totalorder %v13016_v30, 1  ;;  %v5532_v61 = vld [vmem:[%s12536_s3 + $0xa8] sm:$0xff] }
 0x748   : > { %v8791_v3 = vpop.eup %8790  ;;  %8810 = vrcp.f32 %v6854_v36  ;;  %v6903_v4 = vmul.f32 %v14202_v42, %v8783_v5  ;;  %vm7048_vm5 = vcmp.eq.s32.totalorder %v13018_v6, 1  ;;  %v7647_v20 = vmul.f32 -1.442695, %v6037_v63  ;;  %v14206_v36 = vld [vmem:[#allocation125_spill] sm:$0xff]  ;;  %v14217_v30 = vld [vmem:[#allocation123_spill] sm:$0xff] }
 0x749   : > { %v8793_v43 = vpop.eup %8792  ;;  %v6745_v41 = vadd.f32 1.0, %v8791_v3  ;;  %8812 = vpow2.f32 %v7646_v15  ;;  %v5583_v46 = vunpack.c.l.bf16 %v13014_v12  ;;  %v7663_v17 = vmul.f32 -1.442695, %v6038_v37  ;;  %v14221_v6 = vld [vmem:[#allocation191_spill] sm:$0xff] }
 0x74a   : > { %v8795_v14 = vpop.eup %8794  ;;  %v6650_v31 = vadd.f32 1.0, %v8793_v43  ;;  %8814 = vpow2.f32 %v7675_v54  ;;  %v6028_v24 = vadd.f32 %v14203_v39, %v5570_v38  ;;  %v6027_v25 = vadd.f32 %v14204_v0, %v5569_v32  ;;  %v14210_v0 = vld [vmem:[#allocation142_spill] sm:$0xff] }
 0x74b   : > { %v8797_v7 = vpop.eup %8796  ;;  %8816 = vrcp.f32 %v6745_v41  ;;  %v6031_v5 = vadd.f32 %v14205_v2, %v5573_v45  ;;  %v6904_v54 = vmul.f32 %v14206_v36, %v8789_v47  ;;  %v5574_v63 = vunpack.c.h.bf16 %v13002_v11 }
 0x74c   : > { %v8799_v40 = vpop.eup %8798  ;;  %8818 = vrcp.f32 %v6650_v31  ;;  %v6746_v52 = vadd.f32 1.0, %v8797_v7  ;;  %v7676_v41 = vmul.f32 -1.442695, %v6028_v24  ;;  %v5584_v32 = vunpack.c.l.bf16 %v5532_v61  ;;  %v14207_v31 = vld [vmem:[#allocation143_spill] sm:$0xff]  ;;  %v14208_v7 = vld [vmem:[#allocation181_spill] sm:$0xff]  ;;  %v14209_v24 = vld [vmem:[#allocation150_spill] sm:$0xff] }
 0x74d   : > { %v8801_v49 = vpop.eup %8800  ;;  %v6919_v1 = vmul.f32 %v8799_v40, %v12966_v10  ;;  %8820 = vpow2.f32 %v7662_v44  ;;  %v6041_v10 = vadd.f32 %v12599_v34, %v5583_v46 }
 0x74e   : > { %v8803_v15 = vpop.eup %8802  ;;  %8822 = vrcp.f32 %v6746_v52  ;;  %v6855_v8 = vadd.f32 1.0, %v8801_v49  ;;  %v5588_v52 = vunpack.c.h.bf16 %v5532_v61  ;;  %v5529_v49 = vld [vmem:[%s12536_s3 + $0x90] sm:$0xff] }
 0x74f   : > { %v8805_v3 = vpop.eup %8804  ;;  %v6965_v37 = vmul.f32 %v8803_v15, %v8795_v14  ;;  %v6935_v38 = vadd.f32 %v6919_v1, %v6903_v4  ;;  %8824 = vpow2.f32 %v7647_v20  ;;  %v6032_v4 = vadd.f32 %v14208_v7, %v5574_v63  ;;  %v13057_v1 = vld [vmem:[%s12536_s3 + $0x98] sm:$0xff]  ;;  %v14211_v63 = vld [vmem:[#allocation186_spill] sm:$0xff] }
 0x750   : > { %v13032_v44 = vpop.eup %8806  ;;  %8826 = vrcp.f32 %v6855_v8  ;;  %v6920_v43 = vmul.f32 %v8805_v3, %v8787_v13  ;;  %v5587_v20 = vunpack.c.h.bf16 %v13014_v12  ;;  %v7648_v58 = vmul.f32 -1.442695, %v6041_v10  ;;  %v14212_v7 = vld [vmem:[#allocation183_spill] sm:$0xff] }
 0x751   : > { %v8809_v45 = vpop.eup %8808  ;;  %v13037_v47 = vsel %vm7045_vm3, %v6965_v37, %v14207_v31   ;;  %v7127_v11 = vsel %vm7045_vm3, %v6965_v37, 0.0  ;;  %8828 = vtanh.f32 %v6935_v38  ;;  %v13044_v34 = vsel %vm7047_vm4, %v6935_v38, %v14202_v42  }
 0x752   : > { %v8811_v14 = vpop.eup %8810  ;;  %7145 = vst [vmem:[%s12985_s10 + $0x28] sm:$0xff] %v7127_v11  ;;  %v6936_v13 = vadd.f32 %v6920_v43, %v6904_v54  ;;  %8830 = vpow2.f32 %v7663_v17  ;;  %v6042_v17 = vadd.f32 %v14209_v24, %v5584_v32  ;;  %v6045_v54 = vadd.f32 %v12615_v57, %v5587_v20  ;;  %v13073_v11 = vld [vmem:[%s12536_s3 + $0xc0] sm:$0xff] }
 0x753   : > { %v8813_v46 = vpop.eup %8812  ;;  %v6966_v40 = vmul.f32 %v8811_v14, %v8809_v45  ;;  %8832 = vtanh.f32 %v6027_v25  ;;  %v6046_v3 = vadd.f32 %v14211_v63, %v5588_v52  ;;  %v5577_v37 = vunpack.c.l.bf16 %v5529_v49  ;;  %v14213_v20 = vld [vmem:[#allocation184_spill] sm:$0xff]  ;;  %v14214_v52 = vld [vmem:[#allocation124_spill] sm:$0xff] }
 0x754   : > { %v8815_v39 = vpop.eup %8814  ;;  %8834 = vtanh.f32 %v6936_v13  ;;  %v13052_v2 = vsel %vm7048_vm5, %v6936_v13, %v14206_v36   ;;  %v6651_v42 = vadd.f32 1.0, %v8813_v46  ;;  %v7677_v36 = vmul.f32 -1.442695, %v6032_v4 }
 0x755   : > { %v8817_v12 = vpop.eup %8816  ;;  %v13062_v14 = vsel %vm7046_vm2, %v6966_v40, %v14210_v0   ;;  %v7128_v25 = vsel %vm7046_vm2, %v6966_v40, 0.0  ;;  %v6856_v61 = vadd.f32 1.0, %v8815_v39  ;;  %8836 = vpow2.f32 %v7676_v41 }
 0x756   : > { %v13066_v15 = vpop.eup %8818  ;;  %7146 = vst [vmem:[%s12985_s10 + $0x38] sm:$0xff] %v7128_v25  ;;  %8838 = vrcp.f32 %v6651_v42  ;;  %v5578_v38 = vunpack.c.l.bf16 %v13057_v1  ;;  %v7664_v41 = vmul.f32 -1.442695, %v6042_v17  ;;  %v7649_v31 = vmul.f32 -1.442695, %v6045_v54 }
 0x757   : > { %v8821_v8 = vpop.eup %8820  ;;  %8840 = vrcp.f32 %v6856_v61  ;;  %v7665_v13 = vmul.f32 -1.442695, %v6046_v3  ;;  %v6035_v4 = vadd.f32 %v14212_v7, %v5577_v37  ;;  %v6905_v39 = vmul.f32 %v14214_v52, %v8817_v12  ;;  %v13080_v61 = vpop.permute.xlu0 %7014 }
 0x758   : > { %v8823_v10 = vpop.eup %8822  ;;  %v6747_v27 = vadd.f32 1.0, %v8821_v8  ;;  %8842 = vtanh.f32 %v6031_v5  ;;  %v6036_v46 = vadd.f32 %v14213_v20, %v5578_v38  ;;  %v5591_v17 = vunpack.c.l.bf16 %v13073_v11  ;;  %v5536_v8 = vld [vmem:[%s12536_s3 + $0xc8] sm:$0xff] }
 0x759   : > { %v8825_v43 = vpop.eup %8824  ;;  %8844 = vpow2.f32 %v7648_v58  ;;  %v5581_v58 = vunpack.c.h.bf16 %v5529_v49  ;;  %v5582_v0 = vunpack.c.h.bf16 %v13057_v1  ;;  %vm7049_vm6 = vcmp.eq.s32.totalorder %v13080_v61, 1  ;;  %v14216_v38 = vld [vmem:[#allocation156_spill] sm:$0xff] }
 0x75a   : > { %v8827_v32 = vpop.eup %8826  ;;  %8846 = vrcp.f32 %v6747_v27  ;;  %v6652_v45 = vadd.f32 1.0, %v8825_v43  ;;  %v7678_v1 = vmul.f32 -1.442695, %v6036_v46 }
 0x75b   : > { %v8829_v57 = vpop.eup %8828  ;;  %8848 = vpow2.f32 %v7677_v36  ;;  %v14215_v36 = vld [vmem:[#allocation141_spill] sm:$0xff]  ;;  %v6039_v27 = vadd.f32 %v14216_v38, %v5581_v58  ;;  %v13106_v58 = vpop.permute.xlu1 %7017 }
 0x75c   : > { %v8831_v40 = vpop.eup %8830  ;;  %v6967_v5 = vmul.f32 %v8829_v57, %v8827_v32  ;;  %8850 = vrcp.f32 %v6652_v45  ;;  %v14219_v45 = vld [vmem:[#allocation151_spill] sm:$0xff]  ;;  %vm7050_vm7 = vcmp.eq.s32.totalorder %v13106_v58, 1 }
 0x75d   : > { %v8833_v42 = vpop.eup %8832  ;;  %v6748_v24 = vadd.f32 1.0, %v8831_v40  ;;  %8852 = vpow2.f32 %v7664_v41  ;;  %v6906_v41 = vmul.f32 %v14217_v30, %v8823_v10 }
 0x75e   : > { %v8835_v25 = vpop.eup %8834  ;;  %v13085_v20 = vsel %vm7047_vm4, %v6967_v5, %v14215_v36   ;;  %v7129_v12 = vsel %vm7047_vm4, %v6967_v5, 0.0  ;;  %v6921_v49 = vmul.f32 %v8833_v42, %v13032_v44  ;;  %8854 = vpow2.f32 %v7649_v31  ;;  %v14218_v44 = vld [vmem:[#allocation190_spill] sm:$0xff]  ;;  %v14220_v42 = vld [vmem:[#allocation140_spill] sm:$0xff] }
 0x75f   : > { %v8837_v54 = vpop.eup %8836  ;;  %7147 = vst [vmem:[%s12985_s10 + $0x48] sm:$0xff] %v7129_v12  ;;  %8856 = vrcp.f32 %v6748_v24  ;;  %v6049_v32 = vadd.f32 %v14218_v44, %v5591_v17  ;;  %v6040_v31 = vadd.f32 %v14219_v45, %v5582_v0  ;;  %v13116_v0 = vld [vmem:[%s12536_s3 + $0xb8] sm:$0xff]  ;;  %v13120_v12 = vpop.permute.xlu0 %7020  ;;  %v14223_v45 = vld [vmem:[#allocation194_spill] sm:$0xff] }
 0x760   : > { %v13093_v63 = vpop.eup %8838  ;;  %v6937_v3 = vadd.f32 %v6921_v49, %v6905_v39  ;;  %v6857_v37 = vadd.f32 1.0, %v8837_v54  ;;  %8858 = vpow2.f32 %v7665_v13  ;;  %v5592_v13 = vunpack.c.l.bf16 %v5536_v8 }
 0x761   : > { %v8841_v43 = vpop.eup %8840  ;;  %8860 = vtanh.f32 %v6035_v4  ;;  %v5595_v4 = vunpack.c.h.bf16 %v13073_v11  ;;  %v5596_v39 = vunpack.c.h.bf16 %v5536_v8  ;;  %v5533_v8 = vld [vmem:[%s12536_s3 + $0xb0] sm:$0xff]  ;;  %vm7051_vm8 = vcmp.eq.s32.totalorder %v13120_v12, 1  ;;  %v14239_v12 = vld [vmem:[#allocation119_spill] sm:$0xff] }
 0x762   : > { %v8843_v57 = vpop.eup %8842  ;;  %v6968_v7 = vmul.f32 %v8841_v43, %v8835_v25  ;;  %8862 = vtanh.f32 %v6937_v3  ;;  %v13102_v46 = vsel %vm7049_vm6, %v6937_v3, %v14214_v52   ;;  %v7650_v25 = vmul.f32 -1.442695, %v6049_v32  ;;  %v13133_v43 = vld [vmem:[%s12536_s3 + $0xe0] sm:$0xff] }
 0x763   : > { %v8845_v40 = vpop.eup %8844  ;;  %8864 = vrcp.f32 %v6857_v37  ;;  %v6922_v10 = vmul.f32 %v8843_v57, %v13066_v15  ;;  %v6050_v54 = vadd.f32 %v14221_v6, %v5592_v13  ;;  %v14222_v37 = vld [vmem:[#allocation192_spill] sm:$0xff]  ;;  %v7679_v32 = vmul.f32 -1.442695, %v6040_v31 }
 0x764   : > { %v8847_v5 = vpop.eup %8846  ;;  %v13111_v24 = vsel %vm7048_vm5, %v6968_v7, %v14220_v42   ;;  %v7130_v52 = vsel %vm7048_vm5, %v6968_v7, 0.0  ;;  %v6653_v17 = vadd.f32 1.0, %v8845_v40  ;;  %8866 = vpow2.f32 %v7678_v1  ;;  %v14224_v42 = vld [vmem:[#allocation122_spill] sm:$0xff] }
 0x765   : > { %v8849_v15 = vpop.eup %8848  ;;  %7148 = vst [vmem:[%s12985_s10 + $0x58] sm:$0xff] %v7130_v52  ;;  %v6938_v11 = vadd.f32 %v6922_v10, %v6906_v41  ;;  %8868 = vtanh.f32 %v6039_v27  ;;  %v6053_v38 = vadd.f32 %v14222_v37, %v5595_v4  ;;  %v5586_v27 = vunpack.c.l.bf16 %v13116_v0  ;;  %v14226_v37 = vld [vmem:[#allocation155_spill] sm:$0xff] }
 0x766   : > { %v8851_v36 = vpop.eup %8850  ;;  %8870 = vrcp.f32 %v6653_v17  ;;  %v6858_v49 = vadd.f32 1.0, %v8849_v15  ;;  %v6054_v57 = vadd.f32 %v14223_v45, %v5596_v39  ;;  %v5585_v40 = vunpack.c.l.bf16 %v5533_v8 }
 0x767   : > { %v8853_v3 = vpop.eup %8852  ;;  %8872 = vtanh.f32 %v6938_v11  ;;  %v13128_v1 = vsel %vm7050_vm7, %v6938_v11, %v14217_v30   ;;  %v6907_v30 = vmul.f32 %v14224_v42, %v8847_v5  ;;  %v7666_v52 = vmul.f32 -1.442695, %v6050_v54 }
 0x768   : > { %v8855_v41 = vpop.eup %8854  ;;  %8874 = vrcp.f32 %v6858_v49  ;;  %v6749_v44 = vadd.f32 1.0, %v8853_v3  ;;  %v5599_v4 = vunpack.c.l.bf16 %v13133_v43  ;;  %v7651_v11 = vmul.f32 -1.442695, %v6053_v38  ;;  %v14225_v49 = vld [vmem:[#allocation187_spill] sm:$0xff]  ;;  %v14227_v38 = vld [vmem:[#allocation161_spill] sm:$0xff] }
 0x769   : > { %v8857_v7 = vpop.eup %8856  ;;  %v6654_v13 = vadd.f32 1.0, %v8855_v41  ;;  %8876 = vpow2.f32 %v7650_v25  ;;  %v6044_v31 = vadd.f32 %v14225_v49, %v5586_v27  ;;  %v7667_v25 = vmul.f32 -1.442695, %v6054_v57  ;;  %v5540_v27 = vld [vmem:[%s12536_s3 + $0xe8] sm:$0xff] }
 0x76a   : > { %v8859_v10 = vpop.eup %8858  ;;  %8878 = vrcp.f32 %v6749_v44  ;;  %v6043_v5 = vadd.f32 %v14226_v37, %v5585_v40  ;;  %v5589_v41 = vunpack.c.h.bf16 %v5533_v8  ;;  %v5590_v54 = vunpack.c.h.bf16 %v13116_v0  ;;  %v13147_v40 = vpop.permute.xlu1 %7023  ;;  %v14229_v8 = vld [vmem:[#allocation139_spill] sm:$0xff] }
 0x76b   : > { %v8861_v17 = vpop.eup %8860  ;;  %8880 = vrcp.f32 %v6654_v13  ;;  %v6750_v15 = vadd.f32 1.0, %v8859_v10  ;;  %v6057_v10 = vadd.f32 %v14227_v38, %v5599_v4  ;;  %v7680_v57 = vmul.f32 -1.442695, %v6044_v31  ;;  %v14231_v31 = vld [vmem:[#allocation157_spill] sm:$0xff] }
 0x76c   : > { %v8863_v6 = vpop.eup %8862  ;;  %v6923_v39 = vmul.f32 %v8861_v17, %v13093_v63  ;;  %8882 = vpow2.f32 %v7679_v32  ;;  %v6908_v63 = vmul.f32 %v14228_v22, %v8857_v7  ;;  %vm7052_vm9 = vcmp.eq.s32.totalorder %v13147_v40, 1 }
 0x76d   : > { %v8865_v3 = vpop.eup %8864  ;;  %8884 = vrcp.f32 %v6750_v15  ;;  %v5600_v15 = vunpack.c.l.bf16 %v5540_v27  ;;  %v5603_v37 = vunpack.c.h.bf16 %v13133_v43 }
 0x76e   : > { %v8867_v44 = vpop.eup %8866  ;;  %v6969_v45 = vmul.f32 %v8865_v3, %v8863_v6  ;;  %v6939_v13 = vadd.f32 %v6923_v39, %v6907_v30  ;;  %8886 = vpow2.f32 %v7666_v52  ;;  %v6047_v39 = vadd.f32 %v14231_v31, %v5589_v41  ;;  %v14232_v3 = vld [vmem:[#allocation189_spill] sm:$0xff] }
 0x76f   : > { %v8869_v49 = vpop.eup %8868  ;;  %v6859_v32 = vadd.f32 1.0, %v8867_v44  ;;  %8888 = vpow2.f32 %v7651_v11  ;;  %v6048_v61 = vadd.f32 %v14232_v3, %v5590_v54  ;;  %v6058_v41 = vadd.f32 %v12730_v55, %v5600_v15  ;;  %v5537_v55 = vld [vmem:[%s12536_s3 + $0xd0] sm:$0xff] }
 0x770   : > { %v13145_v17 = vpop.eup %8870  ;;  %v13152_v6 = vsel %vm7049_vm6, %v6969_v45, %v14229_v8   ;;  %v7131_v0 = vsel %vm7049_vm6, %v6969_v45, 0.0  ;;  %8890 = vtanh.f32 %v6939_v13  ;;  %v13159_v7 = vsel %vm7051_vm8, %v6939_v13, %v14224_v42  }
 0x771   : > { %v14230_v30 = vmov %v13159_v7  ;;  %v8873_v52 = vpop.eup %8872  ;;  %7149 = vst [vmem:[%s12985_s10 + $0x68] sm:$0xff] %v7131_v0  ;;  %8892 = vrcp.f32 %v6859_v32  ;;  %v6924_v4 = vmul.f32 %v8869_v49, %v8851_v36  ;;  %v5604_v13 = vunpack.c.h.bf16 %v5540_v27 }
 0x772   : > { %v8875_v11 = vpop.eup %8874  ;;  %8894 = vpow2.f32 %v7667_v25  ;;  %v7652_v36 = vmul.f32 -1.442695, %v6057_v10  ;;  %v14233_v25 = vld [vmem:[#allocation138_spill] sm:$0xff]  ;;  %v6061_v32 = vadd.f32 %v12742_v19, %v5603_v37  ;;  %v5593_v37 = vunpack.c.l.bf16 %v5537_v55 }
 0x773   : > { %v8877_v44 = vpop.eup %8876  ;;  %v6970_v42 = vmul.f32 %v8875_v11, %v8873_v52  ;;  %v6940_v45 = vadd.f32 %v6924_v4, %v6908_v63  ;;  %8896 = vtanh.f32 %v6043_v5  ;;  %v5538_v5 = vld [vmem:[%s12536_s3 + $0xd8] sm:$0xff]  ;;  %v7681_v63 = vmul.f32 -1.442695, %v6048_v61 }
 0x774   : > { %v8879_v38 = vpop.eup %8878  ;;  %v6655_v8 = vadd.f32 1.0, %v8877_v44  ;;  %8898 = vpow2.f32 %v7680_v57  ;;  %v6062_v58 = vadd.f32 %v12754_v16, %v5604_v13  ;;  %v5594_v52 = vunpack.c.l.bf16 %v5538_v5  ;;  %v14234_v44 = vld [vmem:[#allocation120_spill] sm:$0xff] }
 0x775   : > { %v13166_v49 = vpop.eup %8880  ;;  %v13171_v54 = vsel %vm7050_vm7, %v6970_v42, %v14233_v25   ;;  %v7132_v43 = vsel %vm7050_vm7, %v6970_v42, 0.0  ;;  %8900 = vtanh.f32 %v6940_v45  ;;  %v13181_v10 = vsel %vm7052_vm9, %v6940_v45, %v14228_v22   ;;  %v14235_v45 = vld [vmem:[#allocation195_spill] sm:$0xff] }
 0x776   : > { %v8883_v27 = vpop.eup %8882  ;;  %7150 = vst [vmem:[%s12985_s10 + $0x78] sm:$0xff] %v7132_v43  ;;  %8902 = vrcp.f32 %v6655_v8  ;;  %v7668_v11 = vmul.f32 -1.442695, %v6058_v41  ;;  %v7653_v3 = vmul.f32 -1.442695, %v6061_v32  ;;  %v6909_v16 = vmul.f32 %v14234_v44, %v8879_v38  ;;  %v14236_v41 = vld [vmem:[#allocation137_spill] sm:$0xff] }
 0x777   : > { %v8885_v57 = vpop.eup %8884  ;;  %v6860_v0 = vadd.f32 1.0, %v8883_v27  ;;  %8904 = vtanh.f32 %v6047_v39  ;;  %v7669_v19 = vmul.f32 -1.442695, %v6062_v58  ;;  %v6052_v13 = vadd.f32 %v14235_v45, %v5594_v52 }
 0x778   : > { %v8887_v7 = vpop.eup %8886  ;;  %8906 = vpow2.f32 %v7652_v36  ;;  %v5598_v25 = vunpack.c.h.bf16 %v5538_v5  ;;  %v5597_v5 = vunpack.c.h.bf16 %v5537_v55  ;;  %v14240_v55 = vld [vmem:[#allocation149_spill] sm:$0xff] }
 0x779   : > { %v8889_v4 = vpop.eup %8888  ;;  %8908 = vrcp.f32 %v6860_v0  ;;  %v6751_v15 = vadd.f32 1.0, %v8887_v7  ;;  %v14238_v7 = vld [vmem:[#allocation193_spill] sm:$0xff] }
 0x77a   : > { %v8891_v31 = vpop.eup %8890  ;;  %v6656_v22 = vadd.f32 1.0, %v8889_v4  ;;  %8910 = vpow2.f32 %v7681_v63  ;;  %v6051_v52 = vadd.f32 %v14238_v7, %v5593_v37  ;;  %v5542_v4 = vld [vmem:[%s12536_s3 + $0xf8] sm:$0xff]  ;;  %v6056_v37 = vadd.f32 %v14240_v55, %v5598_v25 }
 0x77b   : > { %v8893_v61 = vpop.eup %8892  ;;  %8912 = vrcp.f32 %v6751_v15 }
 0x77c   : > { %v8895_v39 = vpop.eup %8894  ;;  %v6971_v42 = vmul.f32 %v8893_v61, %v8891_v31  ;;  %8914 = vrcp.f32 %v6656_v22  ;;  %v13203_v31 = vpop.permute.xlu0 %7026  ;;  %v6910_v22 = vmul.f32 %v14239_v12, %v8885_v57 }
 0x77d   : > { %v8897_v8 = vpop.eup %8896  ;;  %v6752_v36 = vadd.f32 1.0, %v8895_v39  ;;  %8916 = vpow2.f32 %v7668_v11  ;;  %v13201_v11 = vpop.permute.xlu1 %7029  ;;  %vm7053_vm11 = vcmp.eq.s32.totalorder %v13203_v31, 1 }
 0x77e   : > { %v8899_v43 = vpop.eup %8898  ;;  %v13191_v27 = vsel %vm7051_vm8, %v6971_v42, %v14236_v41   ;;  %v7133_v32 = vsel %vm7051_vm8, %v6971_v42, 0.0  ;;  %v6925_v38 = vmul.f32 %v8897_v8, %v13145_v17  ;;  %8918 = vpow2.f32 %v7653_v3  ;;  %v5541_v3 = vld [vmem:[%s12536_s3 + $0xf0] sm:$0xff] }
 0x77f   : > { %v14237_v63 = vmov %v13191_v27  ;;  %v8901_v0 = vpop.eup %8900  ;;  %7151 = vst [vmem:[%s12985_s10 + $0x88] sm:$0xff] %v7133_v32  ;;  %8920 = vrcp.f32 %v6752_v36  ;;  %v6861_v58 = vadd.f32 1.0, %v8899_v43  ;;  %v7682_v17 = vmul.f32 -1.442695, %v6052_v13  ;;  %v14241_v13 = vld [vmem:[#allocation196_spill] sm:$0xff] }
 0x780   : > { %v13199_v15 = vpop.eup %8902  ;;  %v6941_v61 = vadd.f32 %v6925_v38, %v6909_v16  ;;  %8922 = vpow2.f32 %v7669_v19  ;;  %vm7054_vm10 = vcmp.eq.s32.totalorder %v13201_v11, 1  ;;  %v5602_v19 = vunpack.c.l.bf16 %v5542_v4 }
 0x781   : > { %v8905_v39 = vpop.eup %8904  ;;  %8924 = vrcp.f32 %v6861_v58  ;;  %v6055_v8 = vadd.f32 %v14241_v13, %v5597_v5  ;;  %v5601_v36 = vunpack.c.l.bf16 %v5541_v3  ;;  %v5606_v27 = vunpack.c.h.bf16 %v5542_v4 }
 0x782   : > { %v8907_v42 = vpop.eup %8906  ;;  %8926 = vtanh.f32 %v6941_v61  ;;  %v13213_v7 = vsel %vm7053_vm11, %v6941_v61, %v14234_v44   ;;  %v6926_v57 = vmul.f32 %v8905_v39, %v13166_v49  ;;  %v7683_v44 = vmul.f32 -1.442695, %v6056_v37  ;;  %v14242_v61 = vld [vmem:[#allocation136_spill] sm:$0xff] }
 0x783   : > { %v8909_v16 = vpop.eup %8908  ;;  %v6657_v45 = vadd.f32 1.0, %v8907_v42  ;;  %8928 = vtanh.f32 %v6051_v52  ;;  %v6060_v5 = vadd.f32 %v12756_v29, %v5602_v19  ;;  %v6059_v55 = vadd.f32 %v12744_v53, %v5601_v36 }
 0x784   : > { %v8911_v43 = vpop.eup %8910  ;;  %v6972_v41 = vmul.f32 %v8909_v16, %v8901_v0  ;;  %v6942_v25 = vadd.f32 %v6926_v57, %v6910_v22  ;;  %8930 = vpow2.f32 %v7682_v17  ;;  %v5605_v22 = vunpack.c.h.bf16 %v5541_v3  ;;  %v14244_v3 = vld [vmem:[#allocation118_spill] sm:$0xff] }
 0x785   : > { %v8913_v32 = vpop.eup %8912  ;;  %8932 = vrcp.f32 %v6657_v45  ;;  %v6862_v38 = vadd.f32 1.0, %v8911_v43  ;;  %v6064_v40 = vadd.f32 %v12780_v18, %v5606_v27  ;;  %v7684_v57 = vmul.f32 -1.442695, %v6060_v5  ;;  %v14245_v27 = vld [vmem:[#allocation100_spill] sm:$0xff] }
 0x786   : > { %v8915_v58 = vpop.eup %8914  ;;  %v13220_v49 = vsel %vm7052_vm9, %v6972_v41, %v14242_v61   ;;  %v7134_v52 = vsel %vm7052_vm9, %v6972_v41, 0.0  ;;  %8934 = vtanh.f32 %v6942_v25  ;;  %v13229_v4 = vsel %vm7054_vm10, %v6942_v25, %v14239_v12   ;;  %v14243_v12 = vld [vmem:[#allocation148_spill] sm:$0xff]  ;;  %v7033_v61 = vpop.permute.xlu0 %7032 }
 0x787   : > { %v8917_v0 = vpop.eup %8916  ;;  %7152 = vst [vmem:[%s12985_s10 + $0x98] sm:$0xff] %v7134_v52  ;;  %8936 = vrcp.f32 %v6862_v38  ;;  %v6063_v45 = vadd.f32 %v14243_v12, %v5605_v22  ;;  %v6911_v43 = vmul.f32 %v14244_v3, %v8913_v32  ;;  %vm7055_vm12 = vcmp.eq.s32.totalorder %v7033_v61, 1 }
 0x788   : > { %v8919_v17 = vpop.eup %8918  ;;  %v6753_v39 = vadd.f32 1.0, %v8917_v0  ;;  %8938 = vtanh.f32 %v6055_v8  ;;  %v7685_v8 = vmul.f32 -1.442695, %v6064_v40  ;;  %v7036_v40 = vpop.permute.xlu1 %7035 }
 0x789   : > { %v8921_v37 = vpop.eup %8920  ;;  %v6658_v42 = vadd.f32 1.0, %v8919_v17  ;;  %8940 = vpow2.f32 %v7683_v44  ;;  %vm7056_vm13 = vcmp.eq.s32.totalorder %v7036_v40, 1  ;;  %v14284_v40 = vld [vmem:[#allocation169_spill] sm:$0xff] }
 0x78a   : > { %v8923_v29 = vpop.eup %8922  ;;  %8942 = vrcp.f32 %v6753_v39 }
 0x78b   : > { %v8925_v19 = vpop.eup %8924  ;;  %8944 = vrcp.f32 %v6658_v42  ;;  %v6754_v16 = vadd.f32 1.0, %v8923_v29  ;;  %v14247_v29 = vld [vmem:[#allocation135_spill] sm:$0xff] }
 0x78c   : > { %v8927_v13 = vpop.eup %8926  ;;  %8946 = vtanh.f32 %v6059_v55 }
 0x78d   : > { %v8929_v53 = vpop.eup %8928  ;;  %v6973_v36 = vmul.f32 %v8927_v13, %v8925_v19  ;;  %8948 = vrcp.f32 %v6754_v16 }
 0x78e   : > { %v8931_v18 = vpop.eup %8930  ;;  %v6927_v41 = vmul.f32 %v8929_v53, %v13199_v15  ;;  %8950 = vpow2.f32 %v7684_v57  ;;  %v14246_v15 = vld [vmem:[#allocation117_spill] sm:$0xff] }
 0x78f   : > { %v8933_v25 = vpop.eup %8932  ;;  %v13239_v16 = vsel %vm7053_vm11, %v6973_v36, %v14245_v27   ;;  %v7135_v38 = vsel %vm7053_vm11, %v6973_v36, 0.0  ;;  %v6863_v32 = vadd.f32 1.0, %v8931_v18  ;;  %8952 = vtanh.f32 %v6063_v45  ;;  %v14248_v45 = vld [vmem:[#allocation116_spill] sm:$0xff]  ;;  %v14249_v18 = vld [vmem:[#allocation115_spill] sm:$0xff] }
 0x790   : > { %v8935_v44 = vpop.eup %8934  ;;  %7153 = vst [vmem:[%s12985_s10 + $0xa8] sm:$0xff] %v7135_v38  ;;  %v6943_v52 = vadd.f32 %v6927_v41, %v6911_v43  ;;  %8954 = vpow2.f32 %v7685_v8  ;;  %v6912_v0 = vmul.f32 %v14246_v15, %v8921_v37  ;;  %v7039_v8 = vpop.permute.xlu0 %7038  ;;  %14269 = vst [vmem:[#allocation100_spill] sm:$0xff] %v13239_v16 }
 0x791   : > { %v8937_v5 = vpop.eup %8936  ;;  %8956 = vrcp.f32 %v6863_v32  ;;  %vm7057_vm14 = vcmp.eq.s32.totalorder %v7039_v8, 1  ;;  %v14264_v8 = vmov %v12943_v9  ;;  %v14272_v9 = vmov %v13111_v24  ;;  %v14278_v24 = vld [vmem:[#allocation197_spill] sm:$0xff] }
 0x792   : > { %v8939_v22 = vpop.eup %8938  ;;  %v6974_v17 = vmul.f32 %v8937_v5, %v8935_v44  ;;  %8958 = vtanh.f32 %v6943_v52  ;;  %v13247_v42 = vsel %vm7055_vm12, %v6943_v52, %v14244_v3   ;;  %v7042_v52 = vpop.permute.xlu1 %7041 }
 0x793   : > { %v8941_v31 = vpop.eup %8940  ;;  %v6928_v39 = vmul.f32 %v8939_v22, %v8915_v58  ;;  %vm7058_vm15 = vcmp.eq.s32.totalorder %v7042_v52, 1  ;;  %v14296_v52 = vld [vmem:[#allocation105_spill] sm:$0xff] }
 0x794   : > { %v8943_v55 = vpop.eup %8942  ;;  %v13252_v57 = vsel %vm7054_vm10, %v6974_v17, %v14247_v29   ;;  %v7136_v37 = vsel %vm7054_vm10, %v6974_v17, 0.0  ;;  %v6864_v19 = vadd.f32 1.0, %v8941_v31  ;;  %14297 = vst [vmem:[#allocation105_spill] sm:$0xff] %v14296_v52 }
 0x795   : > { %v8945_v12 = vpop.eup %8944  ;;  %7154 = vst [vmem:[%s12985_s10 + $0xb8] sm:$0xff] %v7136_v37  ;;  %v6913_v13 = vmul.f32 %v14248_v45, %v8943_v55  ;;  %v6944_v43 = vadd.f32 %v6928_v39, %v6912_v0  ;;  %v14250_v39 = vld [vmem:[#allocation134_spill] sm:$0xff] }
 0x796   : > { %v8947_v3 = vpop.eup %8946  ;;  %8960 = vrcp.f32 %v6864_v19 }
 0x797   : > { %v8949_v58 = vpop.eup %8948  ;;  %8962 = vtanh.f32 %v6944_v43  ;;  %v7088_v41 = vsel %vm7056_vm13, %v6944_v43, %v14246_v15   ;;  %v6929_v53 = vmul.f32 %v8947_v3, %v8933_v25 }
 0x798   : > { %v8951_v36 = vpop.eup %8950  ;;  %v6914_v11 = vmul.f32 %v14249_v18, %v8949_v58 }
 0x799   : > { %v8953_v27 = vpop.eup %8952  ;;  %v6945_v38 = vadd.f32 %v6929_v53, %v6913_v13  ;;  %v6865_v32 = vadd.f32 1.0, %v8951_v36  ;;  %v14252_v36 = vld [vmem:[#allocation132_spill] sm:$0xff] }
 0x79a   : > { %v8955_v44 = vpop.eup %8954  ;;  %v6930_v5 = vmul.f32 %v8953_v27, %v8945_v12  ;;  %v14251_v12 = vld [vmem:[#allocation133_spill] sm:$0xff]  ;;  %v14253_v27 = vld [vmem:[#allocation131_spill] sm:$0xff] }
 0x79b   : > { %v8957_v0 = vpop.eup %8956  ;;  %8964 = vtanh.f32 %v6945_v38  ;;  %v7089_v22 = vsel %vm7057_vm14, %v6945_v38, %v14248_v45   ;;  %v6866_v17 = vadd.f32 1.0, %v8955_v44 }
 0x79c   : > { %v8959_v31 = vpop.eup %8958  ;;  %8966 = vrcp.f32 %v6865_v32  ;;  %v6946_v25 = vadd.f32 %v6930_v5, %v6914_v11  ;;  %v14261_v5 = vmov %v13044_v34  ;;  %v14287_v34 = vld [vmem:[#allocation154_spill] sm:$0xff] }
 0x79d   : > { %v6975_v15 = vmul.f32 %v8959_v31, %v8957_v0  ;;  %8968 = vrcp.f32 %v6866_v17  ;;  %v14262_v31 = vmov %v13008_v51  ;;  %v14302_v51 = vld [vmem:[#allocation108_spill] sm:$0xff] }
 0x79e   : > { %8970 = vtanh.f32 %v6946_v25  ;;  %v7090_v17 = vsel %vm7058_vm15, %v6946_v25, %v14249_v18   ;;  %v14276_v25 = vmov %v12849_v62  ;;  %v14283_v62 = vld [vmem:[#allocation173_spill] sm:$0xff]  ;;  %14303 = vst [vmem:[#allocation108_spill] sm:$0xff] %v14302_v51 }
 0x79f   : > { %v7071_v0 = vsel %vm7055_vm12, %v6975_v15, %v14250_v39   ;;  %v7137_v55 = vsel %vm7055_vm12, %v6975_v15, 0.0  ;;  %v14270_v15 = vmov %v13220_v49  ;;  %v14286_v39 = vld [vmem:[#allocation159_spill] sm:$0xff]  ;;  %v14308_v49 = vld [vmem:[#allocation111_spill] sm:$0xff] }
 0x7a0   : > { %v8961_v29 = vpop.eup %8960  ;;  %7155 = vst [vmem:[%s12985_s10 + $0xc8] sm:$0xff] %v7137_v55  ;;  %v14280_v55 = vld [vmem:[#allocation185_spill] sm:$0xff]  ;;  %14309 = vst [vmem:[#allocation111_spill] sm:$0xff] %v14308_v49 }
 0x7a1   : > { %v8963_v37 = vpop.eup %8962 }
 0x7a2   : > { %v6976_v19 = vmul.f32 %v8963_v37, %v8961_v29  ;;  %v14290_v37 = vld [vmem:[#allocation112_spill] sm:$0xff]  ;;  %v14291_v29 = vmov %v14194_v48  ;;  %v14306_v48 = vld [vmem:[#allocation110_spill] sm:$0xff] }
 0x7a3   : > { %14307 = vst [vmem:[#allocation110_spill] sm:$0xff] %v14306_v48 }
 0x7a4   : > { %v7072_v32 = vsel %vm7056_vm13, %v6976_v19, %v14251_v12   ;;  %v7138_v45 = vsel %vm7056_vm13, %v6976_v19, 0.0  ;;  %v14273_v12 = vmov %v13037_v47  ;;  %v14279_v47 = vld [vmem:[#allocation188_spill] sm:$0xff]  ;;  %v14289_v19 = vld [vmem:[#allocation113_spill] sm:$0xff] }
 0x7a5   : > { %v8965_v13 = vpop.eup %8964  ;;  %7156 = vst [vmem:[%s12985_s10 + $0xd8] sm:$0xff] %v7138_v45  ;;  %v14304_v45 = vld [vmem:[#allocation109_spill] sm:$0xff]  ;;  %14313 = vst [vmem:[#allocation113_spill] sm:$0xff] %v14312_v56 }
 0x7a6   : > { %v8967_v43 = vpop.eup %8966  ;;  %14305 = vst [vmem:[#allocation109_spill] sm:$0xff] %v14304_v45 }
 0x7a7   : > { %v8969_v3 = vpop.eup %8968  ;;  %v6977_v58 = vmul.f32 %v8967_v43, %v8965_v13  ;;  %v14265_v43 = vmov %v12927_v35  ;;  %v14268_v35 = vmov %v13252_v57  ;;  %v14274_v13 = vmov %v14199_v50  ;;  %v14281_v57 = vld [vmem:[#allocation182_spill] sm:$0xff]  ;;  %v14300_v50 = vld [vmem:[#allocation107_spill] sm:$0xff] }
 0x7a8   : > { %v8971_v53 = vpop.eup %8970  ;;  %14301 = vst [vmem:[#allocation107_spill] sm:$0xff] %v14300_v50 }
 0x7a9   : > { %v7073_v61 = vsel %vm7057_vm14, %v6977_v58, %v14252_v36   ;;  %v7139_v18 = vsel %vm7057_vm14, %v6977_v58, 0.0  ;;  %v6978_v11 = vmul.f32 %v8971_v53, %v8969_v3  ;;  %v14256_v36 = vmov %v13229_v4  ;;  %v14277_v58 = vld [vmem:[#allocation198_spill] sm:$0xff] }
 0x7aa   : > { %7157 = vst [vmem:[%s12985_s10 + $0xe8] sm:$0xff] %v7139_v18  ;;  %v14255_v18 = vmov %v7089_v22  ;;  %v14259_v3 = vmov %v13128_v1  ;;  %v14260_v1 = vmov %v13102_v46  ;;  %v14267_v53 = vmov %v7073_v61  ;;  %v14285_v61 = vld [vmem:[#allocation164_spill] sm:$0xff]  ;;  %v14314_v46 = vld [vmem:[#allocation158_spill] sm:$0xff]  ;;  %4884 = sbr.rel (!%p13287_p1) target bundleno = 1407 (0x57f), region = 102 }
 0x7ab   : > { %v7074_v38 = vsel %vm7058_vm15, %v6978_v11, %v14253_v27   ;;  %v7140_v44 = vsel %vm7058_vm15, %v6978_v11, 0.0  ;;  %v14257_v27 = vmov %v13181_v10  ;;  %v14258_v10 = vmov %v14230_v30  ;;  %v14298_v22 = vld [vmem:[#allocation106_spill] sm:$0xff] }
 0x7ac   : > { %7158 = vst [vmem:[%s12985_s10 + $0xf8] sm:$0xff] %v7140_v44  ;;  %v14263_v11 = vmov %v12980_v59  ;;  %v14266_v4 = vmov %v7074_v38  ;;  %v14271_v44 = vmov %v14237_v63  ;;  %v14275_v63 = vmov %v14182_v60  ;;  %v14282_v59 = vld [vmem:[#allocation178_spill] sm:$0xff]  ;;  %v14288_v38 = vld [vmem:[#allocation114_spill] sm:$0xff]  ;;  %14299 = vst [vmem:[#allocation106_spill] sm:$0xff] %v14298_v22 }
 0x7ad   : > { %v14310_v60 = vld [vmem:[#allocation168_spill] sm:$0xff]  ;;  %14315 = vst [vmem:[#allocation114_spill] sm:$0xff] %v14314_v46 }
 0x7ae   : > { %14311 = vst [vmem:[#allocation112_spill] sm:$0xff] %v14310_v60 }
 0x7b1 PF:  { %s9652_s16 = smov [#allocation15]  }
 0x7b2   :  { %s7164_s17 = sshll.u32 %s9652_s16, 4  ;;  %s7165_s17 = int_to_ptr.vmem [resolvable:$true] %s7164_s17 }
 0x7b3   :  { %s9082_s2 = scalar_lea.vmem %s7165_s17, 32768  ;;  %p9087_p3 = scmp.lt.s32.totalorder %s7165_s17, %s7165_s17 }
 0x7b4   :  { %p9083_p2 = scmp.ne.s32.totalorder %s7165_s17, %s9082_s2  ;;  %p9088_p4 = scmp.lt.s32.totalorder %s9082_s2, %s9082_s2 }
 0x7b6   :  { %p9089_p5 = por %p9088_p4, %p9087_p3 }
 0x7b8   :  { %p9090_p6 = pnand %p9089_p5, %p9083_p2 }
 0x7ba   :  { %9093 = shalt.err (!%p9090_p6)
}
 0x7bb   :  { %s9094_s21 = scalar_lea.hbm %s13506_s9, 32768 }
 0x7bc   :  { %p9095_p7 = scmp.ne.s32.totalorder %s13506_s9, %s9094_s21  ;;  %p9098_p8 = scmp.lt.u32.totalorder %s9094_s21, %s13506_s9 }
 0x7be   :  { %p9100_p9 = pnand %p9098_p8, %p9095_p7 }
 0x7c0   :  { %9103 = shalt.err (!%p9100_p9)
}
 0x7c1   :  { %7170 = dma.vmem_to_hbm [thread:$0]  %s7165_s17, 32768, %s13506_s9, [#allocation8], %s9641_s19, %s9641_s19, %s9642_s20  }
 0x7c2   :  { %9374 = dma.done.wait [#allocation8], 32768  }
 0x7c3   :  { %9375 = vsyncadd [#allocation8], 4294934528 }
 0x7c4   :  { %7174 = vsyncpa [#allocation7], 1 }
 0x7c5   :  { %7175 = vsyncpa [#allocation10], 1 }
 0x7c6   :  { %7176 = vsyncpa [#allocation13], 1 }
 0x7c7   :  { %7177 = vsyncpa [#allocation8], 1 }

</bundles_post_ra>
